<compile_context>
chip_gen: v6e
topology: v6e:2x2x1
jax: 0.10.0
libtpu: 0.0.40
codegen_flags: <defaults>
</compile_context>

<pallas_src>
import functools

import jax
import jax.numpy as jnp
from jax.experimental import pallas as pl
from jax.experimental.pallas import tpu as pltpu

CHANNELS = 32
IN_CHANNELS = 32
K = 16
LEVELS = 3
N_BLOCKS = 5
N_CLASSES = 13
BN_EPS = 1e-5
BIFPN_EPS = 1e-4
OUT_PAD = 128          # final logits padded to a lane-dense width; sliced back to 13 outside
NEG_BIG = -1e30
POS_BIG = 1e30

_PARALLEL = pltpu.CompilerParams(dimension_semantics=("parallel",))


def _round_up(v, m):
    return (v + m - 1) // m * m


def _rows(n):
    """Padded node count + row tile: whole graph in one block when small, 256-row tiles else."""
    if n <= 512:
        npad = _round_up(n, 8)
        return npad, npad
    tm = 256
    return _round_up(n, tm), tm


# ----------------------------- Pallas kernels -----------------------------

def _proj_kernel(x_ref, w_ref, o_ref):
    """o = x @ Wcat (bf16 MXU, f32 accumulate); Wcat = [W1 - W2 | W2] packed lane-dense."""
    o_ref[...] = jnp.dot(x_ref[...].astype(jnp.bfloat16), w_ref[...],
                         preferred_element_type=jnp.float32)


def _head_fuse_kernel(ab_ref, bmax_ref, b_ref, s_ref, t_ref, o_ref):
    """Head GraphConv epilogue: out = BN(ReLU((A-B)_i + max_j B_j + bias)) (no residual)."""
    c = o_ref.shape[1]
    amb = ab_ref[...][:, :c]
    y = amb + bmax_ref[...] + b_ref[...]
    y = jnp.maximum(y, 0.0)
    o_ref[...] = y * s_ref[...] + t_ref[...]


def _pdist_kernel(xf_ref, xt_ref, o_ref, *, n_real):
    """Row tile of pairwise squared distances; padded columns pushed to +BIG (kept f32)."""
    xf = xf_ref[...]
    xt = xt_ref[...]
    g = jax.lax.dot_general(xt, xf, (((1,), (1,)), ((), ())),
                            preferred_element_type=jnp.float32)
    sq_t = jnp.sum(xt * xt, axis=-1, keepdims=True)
    sq_f = jnp.sum(xf * xf, axis=-1, keepdims=True)
    d = sq_t + sq_f.T - 2.0 * g
    if n_real < xf.shape[0]:
        col = jax.lax.broadcasted_iota(jnp.int32, d.shape, 1)
        d = jnp.where(col < n_real, d, POS_BIG)
    o_ref[...] = d


def _edge_kernel(xf_ref, xt_ref, d_ref, thr_ref, w_ref, b_ref, s_ref, t_ref, o_ref):
    """Fused dynamic-EdgeConv block:
         B      = X_all  @ W2            (full graph, VMEM resident — no (N,K,C) gather)
         A - B  = X_tile @ (W1 - W2)
         maxB_i = max_{j : d_ij <= kth_dist_i} B_j     (kNN neighbour max via distance mask)
         out    = BN(ReLU(A - B + maxB + bias)) + X_tile   (residual, res_scale = 1)
    """
    c = o_ref.shape[1]
    xt = xt_ref[...]
    w = w_ref[...]
    b_all = jnp.dot(xf_ref[...].astype(jnp.bfloat16), w[:, c:],
                    preferred_element_type=jnp.float32)                 # (NP, C)
    amb = jnp.dot(xt.astype(jnp.bfloat16), w[:, :c],
                  preferred_element_type=jnp.float32)                   # (TM, C)
    mask_add = jnp.where(d_ref[...] <= thr_ref[...], 0.0, NEG_BIG)      # (TM, NP)
    # TODO(synk): chunk this (TM, NP, C) masked max over the node axis for very large graphs.
    bmax = jnp.max(mask_add[:, :, None] + b_all[None, :, :], axis=1)    # (TM, C)
    y = amb + bmax + b_ref[...]
    y = jnp.maximum(y, 0.0)
    o_ref[...] = y * s_ref[...] + t_ref[...] + xt


def _tail_kernel(f0_ref, f1_ref, f2_ref, sw_ref,
                 wb_ref, bb_ref,
                 wf_ref, bf_ref, sf_ref, tf_ref,
                 w0_ref, b0_ref, s0_ref, t0_ref,
                 w1_ref, b1_ref, s1_ref, t1_ref,
                 w2_ref, b2_ref, o_ref):
    """Fused BiFPN(levels=3) + fusion MLP(96->512) + prediction (512->256->64->13).
    All weights resident in VMEM; logits written lane-dense (padded to 128 cols)."""
    c = f0_ref.shape[1]
    wb = wb_ref[...]        # (32, 128) bf16 : [conv0 | conv1 | conv2 | conv3]
    bb = bb_ref[...]        # (1, 128)  f32

    def conv(x, k):
        return (jnp.dot(x.astype(jnp.bfloat16), wb[:, k * c:(k + 1) * c],
                        preferred_element_type=jnp.float32)
                + bb[:, k * c:(k + 1) * c])

    def lin_relu_bn(x, wr, br, sr, tr):
        y = jnp.dot(x.astype(jnp.bfloat16), wr[...],
                    preferred_element_type=jnp.float32) + br[...]
        y = jnp.maximum(y, 0.0)
        return y * sr[...] + tr[...]

    p0, p1, p2 = f0_ref[...], f1_ref[...], f2_ref[...]
    in1 = p1                                                          # inputs_clone[level 1]
    p1 = conv(sw_ref[0] * p1 + sw_ref[1] * p2, 0)                     # top-down  -> level 1
    p0 = conv(sw_ref[2] * p0 + sw_ref[3] * p1, 1)                     # top-down  -> level 0
    p1 = conv(sw_ref[4] * p1 + sw_ref[5] * p0 + sw_ref[6] * in1, 2)   # bottom-up -> level 1
    p2 = conv(sw_ref[7] * p2 + sw_ref[8] * p1, 3)                     # final     -> level 2

    h = jnp.concatenate([p0, p1, p2], axis=1)                         # (TM, 96)
    h = lin_relu_bn(h, wf_ref, bf_ref, sf_ref, tf_ref)                # MLP([96, 512])
    h = lin_relu_bn(h, w0_ref, b0_ref, s0_ref, t0_ref)                # MLP([512, 256])
    h = lin_relu_bn(h, w1_ref, b1_ref, s1_ref, t1_ref)                # MLP([256, 64])
    # Dropout(p=0.8): identity at inference.
    o_ref[...] = jnp.dot(h.astype(jnp.bfloat16), w2_ref[...],
                         preferred_element_type=jnp.float32) + b2_ref[...]   # (TM, 128)


# ----------------------------- kernel wrappers -----------------------------

def proj(x_pad, wcat, npad, tm):
    cin, cout2 = wcat.shape
    return pl.pallas_call(
        _proj_kernel,
        out_shape=jax.ShapeDtypeStruct((npad, cout2), jnp.float32),
        grid=(npad // tm,),
        in_specs=[pl.BlockSpec((tm, cin), lambda i: (i, 0)),
                  pl.BlockSpec((cin, cout2), lambda i: (0, 0))],
        out_specs=pl.BlockSpec((tm, cout2), lambda i: (i, 0)),
        compiler_params=_PARALLEL,
    )(x_pad, wcat)


def head_fuse(ab, bmax, bias, scale, shift, npad, tm):
    c = bmax.shape[1]
    return pl.pallas_call(
        _head_fuse_kernel,
        out_shape=jax.ShapeDtypeStruct((npad, c), jnp.float32),
        grid=(npad // tm,),
        in_specs=[pl.BlockSpec((tm, 2 * c), lambda i: (i, 0)),
                  pl.BlockSpec((tm, c), lambda i: (i, 0)),
                  pl.BlockSpec((1, c), lambda i: (0, 0)),
                  pl.BlockSpec((1, c), lambda i: (0, 0)),
                  pl.BlockSpec((1, c), lambda i: (0, 0))],
        out_specs=pl.BlockSpec((tm, c), lambda i: (i, 0)),
        compiler_params=_PARALLEL,
    )(ab, bmax, bias.reshape(1, c), scale.reshape(1, c), shift.reshape(1, c))


def pairwise_sqdist(x_pad, n_real, npad, tm):
    c = x_pad.shape[1]
    kern = functools.partial(_pdist_kernel, n_real=n_real)
    return pl.pallas_call(
        kern,
        out_shape=jax.ShapeDtypeStruct((npad, npad), jnp.float32),
        grid=(npad // tm,),
        in_specs=[pl.BlockSpec((npad, c), lambda i: (0, 0)),     # full x (kNN columns)
                  pl.BlockSpec((tm, c), lambda i: (i, 0))],      # this tile's rows
        out_specs=pl.BlockSpec((tm, npad), lambda i: (i, 0)),
        compiler_params=_PARALLEL,
    )(x_pad, x_pad)


def edge_block(x_pad, d, thr, wcat, bias, scale, shift, npad, tm):
    c = x_pad.shape[1]
    return pl.pallas_call(
        _edge_kernel,
        out_shape=jax.ShapeDtypeStruct((npad, c), jnp.float32),
        grid=(npad // tm,),
        in_specs=[pl.BlockSpec((npad, c), lambda i: (0, 0)),     # full x (B for all nodes)
                  pl.BlockSpec((tm, c), lambda i: (i, 0)),       # this tile's x rows
                  pl.BlockSpec((tm, npad), lambda i: (i, 0)),    # distance rows
                  pl.BlockSpec((tm, 1), lambda i: (i, 0)),       # kth-NN distance threshold
                  pl.BlockSpec((c, 2 * c), lambda i: (0, 0)),    # packed [W1-W2 | W2] bf16
                  pl.BlockSpec((1, c), lambda i: (0, 0)),
                  pl.BlockSpec((1, c), lambda i: (0, 0)),
                  pl.BlockSpec((1, c), lambda i: (0, 0))],
        out_specs=pl.BlockSpec((tm, c), lambda i: (i, 0)),
        compiler_params=_PARALLEL,
    )(x_pad, x_pad, d, thr, wcat,
      bias.reshape(1, c), scale.reshape(1, c), shift.reshape(1, c))


# ----------------------------- module pieces ------------------------------

def _pack_edge_weight(w):
    """EdgeConv MLP weight (2*Cin, Cout) -> bf16 packed [W1 - W2 | W2] of shape (Cin, 2*Cout)."""
    cin = w.shape[0] // 2
    w1, w2 = w[:cin], w[cin:]
    return jnp.concatenate([w1 - w2, w2], axis=1).astype(jnp.bfloat16)


def graph_conv_head(x_pad, edge_index, p, npad, tm):
    c = p["w"].shape[1]
    ab = proj(x_pad, _pack_edge_weight(p["w"]), npad, tm)        # (NP, 2C): [A-B | B]
    b_vals = ab[:, c:]
    src, tgt = edge_index[0], edge_index[1]
    # arbitrary-graph scatter/segment max kept in plain JAX glue
    bmax = jax.ops.segment_max(b_vals[src], tgt, num_segments=npad)
    bmax = jnp.where(jnp.isfinite(bmax), bmax, 0.0)              # isolated nodes -> 0
    return head_fuse(ab, bmax, p["b"], p["scale"], p["shift"], npad, tm)


def res_dyn_block(x_pad, p, n_real, npad, tm):
    d = pairwise_sqdist(x_pad, n_real, npad, tm)
    # kNN threshold = k-th smallest distance per row (self included); exact top-k in glue
    thr = -jax.lax.top_k(-d, K)[0][:, K - 1:K]                   # (NP, 1)
    return edge_block(x_pad, d, thr, _pack_edge_weight(p["w"]),
                      p["b"], p["scale"], p["shift"], npad, tm)


def tail(f0, f1, f2, pb, pf, ppred, npad, tm):
    c = CHANNELS
    eps = BIFPN_EPS
    # BiFPN fusion weights (mmdet-style double normalization, exactly as the reference)
    w1 = jax.nn.relu(pb["w1"]); w1 = w1 / (jnp.sum(w1, axis=0) + eps)
    w2 = jax.nn.relu(pb["w2"]); w2 = w2 / (jnp.sum(w2, axis=0) + eps)
    d_td1 = w1[0, 1] + w1[1, 1] + eps
    d_td0 = w1[0, 0] + w1[1, 0] + eps
    d_bu1 = w2[0, 0] + w2[1, 0] + w2[2, 0] + eps
    d_fin = w1[0, 2] + w1[1, 2] + eps
    sw = jnp.stack([w1[0, 1] / d_td1, w1[1, 1] / d_td1,
                    w1[0, 0] / d_td0, w1[1, 0] / d_td0,
                    w2[0, 0] / d_bu1, w2[1, 0] / d_bu1, w2[2, 0] / d_bu1,
                    w1[0, 2] / d_fin, w1[1, 2] / d_fin]).astype(jnp.float32)

    # pack the four 32x32 BiFPN conv weights/biases lane-dense into (32, 128)/(1, 128)
    wb = jnp.concatenate([pb["convs"][k]["w"] for k in range(4)], axis=1).astype(jnp.bfloat16)
    bb = jnp.concatenate([pb["convs"][k]["b"] for k in range(4)]).reshape(1, 4 * c)

    wf = pf["w"].astype(jnp.bfloat16)
    bf_ = pf["b"].reshape(1, -1)
    sf = pf["scale"].reshape(1, -1)
    tf = pf["shift"].reshape(1, -1)
    pr0, pr1, pr2 = ppred
    w0 = pr0["w"].astype(jnp.bfloat16)
    b0, s0, t0 = pr0["b"].reshape(1, -1), pr0["scale"].reshape(1, -1), pr0["shift"].reshape(1, -1)
    w1p = pr1["w"].astype(jnp.bfloat16)
    b1, s1, t1 = pr1["b"].reshape(1, -1), pr1["scale"].reshape(1, -1), pr1["shift"].reshape(1, -1)
    # pad the 13-class head to 128 output lanes (dense store); sliced back in the caller
    w2p = jnp.zeros((pr2["w"].shape[0], OUT_PAD), jnp.float32).at[:, :N_CLASSES].set(pr2["w"])
    w2p = w2p.astype(jnp.bfloat16)
    b2p = jnp.zeros((1, OUT_PAD), jnp.float32).at[:, :N_CLASSES].set(pr2["b"].reshape(1, -1))

    row = lambda i: (i, 0)
    const = lambda i: (0, 0)
    full = lambda a: pl.BlockSpec(a.shape, const)

    return pl.pallas_call(
        _tail_kernel,
        out_shape=jax.ShapeDtypeStruct((npad, OUT_PAD), jnp.float32),
        grid=(npad // tm,),
        in_specs=[pl.BlockSpec((tm, c), row), pl.BlockSpec((tm, c), row),
                  pl.BlockSpec((tm, c), row),
                  pl.BlockSpec(memory_space=pltpu.MemorySpace.SMEM),
                  full(wb), full(bb),
                  full(wf), full(bf_), full(sf), full(tf),
                  full(w0), full(b0), full(s0), full(t0),
                  full(w1p), full(b1), full(s1), full(t1),
                  full(w2p), full(b2p)],
        out_specs=pl.BlockSpec((tm, OUT_PAD), row),
        compiler_params=_PARALLEL,
    )(f0, f1, f2, sw, wb, bb, wf, bf_, sf, tf,
      w0, b0, s0, t0, w1p, b1, s1, t1, w2p, b2p)


def sparse_deep_gcn(params, x, edge_index, edge_attr):
    del edge_attr                             # unused by the reference forward
    n = x.shape[0]
    npad, tm = _rows(n)
    x_pad = jnp.pad(x, ((0, npad - n), (0, 0))) if npad != n else x

    feats = [graph_conv_head(x_pad, edge_index, params["head"], npad, tm)]
    for i in range(N_BLOCKS - 1):
        feats.append(res_dyn_block(feats[-1], params["backbone"][i], n, npad, tm))

    f0, f1, f2 = feats[N_BLOCKS - LEVELS:]
    logits = tail(f0, f1, f2, params["bifpn"], params["fusion"], params["pred"], npad, tm)
    return logits[:n, :N_CLASSES]


# ----------------------------- parameter init -----------------------------

def make_lin(key, cin, cout, norm=True):
    # torch kaiming_normal_ on weight (out, in): std = sqrt(2 / fan_in), bias = 0
    w = jax.random.normal(key, (cin, cout), jnp.float32) * jnp.sqrt(2.0 / cin)
    b = jnp.zeros((cout,), jnp.float32)
    if norm:  # eval-mode BatchNorm1d (running mean 0, var 1, gamma 1, beta 0)
        scale = jnp.full((cout,), 1.0 / jnp.sqrt(1.0 + BN_EPS), jnp.float32)
    else:
        scale = jnp.ones((cout,), jnp.float32)
    shift = jnp.zeros((cout,), jnp.float32)
    return {"w": w, "b": b, "scale": scale, "shift": shift}


def init_params(key):
    keys = jax.random.split(key, 16)
    params = {
        "head": make_lin(keys[0], 2 * IN_CHANNELS, CHANNELS, norm=True),
        "backbone": [make_lin(keys[1 + i], 2 * CHANNELS, CHANNELS, norm=True)
                     for i in range(N_BLOCKS - 1)],
        "bifpn": {
            "w1": jnp.full((2, LEVELS), 0.5, jnp.float32),
            "w2": jnp.full((3, LEVELS - 2), 0.5, jnp.float32),
            "convs": [make_lin(keys[5 + i], CHANNELS, CHANNELS, norm=False)
                      for i in range(2 * (LEVELS - 1))],
        },
        "fusion": make_lin(keys[9], CHANNELS * LEVELS, 512, norm=True),
        "pred": [
            make_lin(keys[10], 512, 256, norm=True),
            make_lin(keys[11], 256, 64, norm=True),
            make_lin(keys[12], 64, N_CLASSES, norm=False),
        ],
    }
    return params


# --------------------------------- main ------------------------------------

if __name__ == "__main__":
    key = jax.random.PRNGKey(0)
    pkey, xkey = jax.random.split(key)
    params = init_params(pkey)

    N = 64  # number of point-cloud nodes (single graph)
    x = jax.random.normal(xkey, (N, IN_CHANNELS), jnp.float32)

    # deterministic ring graph: each node receives edges from its 8 ring neighbours
    offs = jnp.array([-4, -3, -2, -1, 1, 2, 3, 4], jnp.int32)
    tgt = jnp.repeat(jnp.arange(N, dtype=jnp.int32), offs.shape[0])
    src = (tgt + jnp.tile(offs, N)) % N
    edge_index = jnp.stack([src, tgt]).astype(jnp.int32)      # (2, 512) [source; target]
    edge_attr = jnp.zeros((edge_index.shape[1], 4), jnp.float32)

    fwd = jax.jit(sparse_deep_gcn)
    out = fwd(params, x, edge_index, edge_attr)
    out = jax.block_until_ready(out)
    assert out.shape == (N, N_CLASSES) and out.dtype == jnp.float32
    assert bool(jnp.all(jnp.isfinite(out)))
    print("KERNEL_OK")
</pallas_src>

<mosaic_0001>
module attributes {stable_mosaic.version = 11 : i64} {
  func.func @_proj_kernel(%arg0: i32, %arg1: memref<64x32xf32, #tpu.memory_space<vmem>>, %arg2: memref<32x64xbf16, #tpu.memory_space<vmem>>, %arg3: memref<64x64xf32, #tpu.memory_space<vmem>>) attributes {dimension_semantics = [#tpu.dimension_semantics<parallel>], iteration_bounds = array<i64: 1>, scalar_prefetch = 0 : i64, scratch_operands = 0 : i64, tpu.core_type = #tpu.core_type<tc>, window_params = [{transform_indices = @transform_0, window_bounds = array<i64: 64, 32>}, {pipeline_mode = #tpu.pipeline_mode<synchronous>, transform_indices = @transform_1, window_bounds = array<i64: 32, 64>}, {transform_indices = @transform_2, window_bounds = array<i64: 64, 64>}]} {
    %c0 = arith.constant 0 : index
    %c0_0 = arith.constant 0 : index
    %0 = vector.load %arg1[%c0, %c0_0] : memref<64x32xf32, #tpu.memory_space<vmem>>, vector<64x32xf32>
    %1 = arith.truncf %0 : vector<64x32xf32> to vector<64x32xbf16>
    %c0_1 = arith.constant 0 : index
    %c0_2 = arith.constant 0 : index
    %2 = vector.load %arg2[%c0_1, %c0_2] : memref<32x64xbf16, #tpu.memory_space<vmem>>, vector<32x64xbf16>
    %cst = arith.constant dense<0.000000e+00> : vector<64x64xf32>
    %3 = tpu.matmul %1, %2, %cst {dimension_numbers = #tpu.dot_dimension_numbers<[1], [0], [0], [1], [0, 0, 1, 1], [], []>} : vector<64x32xbf16>, vector<32x64xbf16>, vector<64x64xf32> -> vector<64x64xf32>
    %c0_3 = arith.constant 0 : index
    %c0_4 = arith.constant 0 : index
    %4 = vector.load %arg3[%c0_3, %c0_4] : memref<64x64xf32, #tpu.memory_space<vmem>>, vector<64x64xf32>
    tpu.vector_store %arg3[%c0_3, %c0_4], %3 {strides = array<i32>} : memref<64x64xf32, #tpu.memory_space<vmem>>, vector<64x64xf32>,
    return
  }
  func.func @transform_0(%arg0: i32) -> (i32, i32) {
    %c0_i32 = arith.constant 0 : i32
    %c0_i32_0 = arith.constant 0 : i32
    return %arg0, %c0_i32 : i32, i32
  }
  func.func @transform_1(%arg0: i32) -> (i32, i32) {
    %c0_i32 = arith.constant 0 : i32
    %c0_i32_0 = arith.constant 0 : i32
    %c0_i32_1 = arith.constant 0 : i32
    return %c0_i32, %c0_i32_0 : i32, i32
  }
  func.func @transform_2(%arg0: i32) -> (i32, i32) {
    %c0_i32 = arith.constant 0 : i32
    %c0_i32_0 = arith.constant 0 : i32
    return %arg0, %c0_i32 : i32, i32
  }
}

module attributes {stable_mosaic.version = 11 : i64} {
  func.func @_pdist_kernel(%arg0: i32, %arg1: memref<64x32xf32, #tpu.memory_space<vmem>>, %arg2: memref<64x32xf32, #tpu.memory_space<vmem>>, %arg3: memref<64x64xf32, #tpu.memory_space<vmem>>) attributes {dimension_semantics = [#tpu.dimension_semantics<parallel>], iteration_bounds = array<i64: 1>, scalar_prefetch = 0 : i64, scratch_operands = 0 : i64, tpu.core_type = #tpu.core_type<tc>, window_params = [{pipeline_mode = #tpu.pipeline_mode<synchronous>, transform_indices = @transform_0, window_bounds = array<i64: 64, 32>}, {transform_indices = @transform_1, window_bounds = array<i64: 64, 32>}, {transform_indices = @transform_2, window_bounds = array<i64: 64, 64>}]} {
    %c0 = arith.constant 0 : index
    %c0_0 = arith.constant 0 : index
    %0 = vector.load %arg1[%c0, %c0_0] : memref<64x32xf32, #tpu.memory_space<vmem>>, vector<64x32xf32>
    %c0_1 = arith.constant 0 : index
    %c0_2 = arith.constant 0 : index
    %1 = vector.load %arg2[%c0_1, %c0_2] : memref<64x32xf32, #tpu.memory_space<vmem>>, vector<64x32xf32>
    %cst = arith.constant dense<0.000000e+00> : vector<64x64xf32>
    %2 = tpu.matmul %1, %0, %cst {dimension_numbers = #tpu.dot_dimension_numbers<[1], [1], [0], [0], [0, 0, 1, 0], [], []>} : vector<64x32xf32>, vector<64x32xf32>, vector<64x64xf32> -> vector<64x64xf32>
    %3 = arith.mulf %1, %1 : vector<64x32xf32>
    %cst_3 = arith.constant dense<0.000000e+00> : vector<64xf32>
    %4 = vector.multi_reduction <add>, %3, %cst_3 [1] : vector<64x32xf32> to vector<64xf32>
    %5 = vector.shape_cast %4 : vector<64xf32> to vector<64x1xf32>
    %6 = arith.mulf %0, %0 : vector<64x32xf32>
    %cst_4 = arith.constant dense<0.000000e+00> : vector<64xf32>
    %7 = vector.multi_reduction <add>, %6, %cst_4 [1] : vector<64x32xf32> to vector<64xf32>
    %8 = vector.shape_cast %7 : vector<64xf32> to vector<64x1xf32>
    %9 = tpu.transpose %8, [1, 0] : vector<64x1xf32> -> vector<1x64xf32>
    %10 = vector.broadcast %5 : vector<64x1xf32> to vector<64x64xf32>
    %11 = vector.broadcast %9 : vector<1x64xf32> to vector<64x64xf32>
    %12 = arith.addf %10, %11 : vector<64x64xf32>
    %cst_5 = arith.constant 2.000000e+00 : f32
    %13 = vector.broadcast %cst_5 : f32 to vector<64x64xf32>
    %14 = arith.mulf %13, %2 : vector<64x64xf32>
    %15 = arith.subf %12, %14 : vector<64x64xf32>
    %c0_6 = arith.constant 0 : index
    %c0_7 = arith.constant 0 : index
    %16 = vector.load %arg3[%c0_6, %c0_7] : memref<64x64xf32, #tpu.memory_space<vmem>>, vector<64x64xf32>
    tpu.vector_store %arg3[%c0_6, %c0_7], %15 {strides = array<i32>} : memref<64x64xf32, #tpu.memory_space<vmem>>, vector<64x64xf32>,
    return
  }
  func.func @transform_0(%arg0: i32) -> (i32, i32) {
    %c0_i32 = arith.constant 0 : i32
    %c0_i32_0 = arith.constant 0 : i32
    %c0_i32_1 = arith.constant 0 : i32
    return %c0_i32, %c0_i32_0 : i32, i32
  }
  func.func @transform_1(%arg0: i32) -> (i32, i32) {
    %c0_i32 = arith.constant 0 : i32
    %c0_i32_0 = arith.constant 0 : i32
    return %arg0, %c0_i32 : i32, i32
  }
  func.func @transform_2(%arg0: i32) -> (i32, i32) {
    %c0_i32 = arith.constant 0 : i32
    %c0_i32_0 = arith.constant 0 : i32
    return %arg0, %c0_i32 : i32, i32
  }
}

module attributes {stable_mosaic.version = 11 : i64} {
  func.func @_head_fuse_kernel(%arg0: i32, %arg1: memref<64x64xf32, #tpu.memory_space<vmem>>, %arg2: memref<64x32xf32, #tpu.memory_space<vmem>>, %arg3: memref<1x32xf32, #tpu.memory_space<vmem>>, %arg4: memref<1x32xf32, #tpu.memory_space<vmem>>, %arg5: memref<1x32xf32, #tpu.memory_space<vmem>>, %arg6: memref<64x32xf32, #tpu.memory_space<vmem>>) attributes {dimension_semantics = [#tpu.dimension_semantics<parallel>], iteration_bounds = array<i64: 1>, scalar_prefetch = 0 : i64, scratch_operands = 0 : i64, tpu.core_type = #tpu.core_type<tc>, window_params = [{transform_indices = @transform_0, window_bounds = array<i64: 64, 64>}, {transform_indices = @transform_1, window_bounds = array<i64: 64, 32>}, {pipeline_mode = #tpu.pipeline_mode<synchronous>, transform_indices = @transform_2, window_bounds = array<i64: 1, 32>}, {pipeline_mode = #tpu.pipeline_mode<synchronous>, transform_indices = @transform_3, window_bounds = array<i64: 1, 32>}, {pipeline_mode = #tpu.pipeline_mode<synchronous>, transform_indices = @transform_4, window_bounds = array<i64: 1, 32>}, {transform_indices = @transform_5, window_bounds = array<i64: 64, 32>}]} {
    %c0 = arith.constant 0 : index
    %c0_0 = arith.constant 0 : index
    %0 = vector.load %arg1[%c0, %c0_0] : memref<64x64xf32, #tpu.memory_space<vmem>>, vector<64x64xf32>
    %1 = vector.extract_strided_slice %0 {offsets = [0, 0], sizes = [64, 32], strides = [1, 1]} : vector<64x64xf32> to vector<64x32xf32>
    %c0_1 = arith.constant 0 : index
    %c0_2 = arith.constant 0 : index
    %2 = vector.load %arg2[%c0_1, %c0_2] : memref<64x32xf32, #tpu.memory_space<vmem>>, vector<64x32xf32>
    %3 = arith.addf %1, %2 : vector<64x32xf32>
    %c0_3 = arith.constant 0 : index
    %c0_4 = arith.constant 0 : index
    %4 = vector.load %arg3[%c0_3, %c0_4] : memref<1x32xf32, #tpu.memory_space<vmem>>, vector<1x32xf32>
    %5 = vector.broadcast %4 : vector<1x32xf32> to vector<64x32xf32>
    %6 = arith.addf %3, %5 : vector<64x32xf32>
    %cst = arith.constant 0.000000e+00 : f32
    %7 = vector.broadcast %cst : f32 to vector<64x32xf32>
    %8 = arith.maximumf %6, %7 : vector<64x32xf32>
    %c0_5 = arith.constant 0 : index
    %c0_6 = arith.constant 0 : index
    %9 = vector.load %arg4[%c0_5, %c0_6] : memref<1x32xf32, #tpu.memory_space<vmem>>, vector<1x32xf32>
    %10 = vector.broadcast %9 : vector<1x32xf32> to vector<64x32xf32>
    %11 = arith.mulf %8, %10 : vector<64x32xf32>
    %c0_7 = arith.constant 0 : index
    %c0_8 = arith.constant 0 : index
    %12 = vector.load %arg5[%c0_7, %c0_8] : memref<1x32xf32, #tpu.memory_space<vmem>>, vector<1x32xf32>
    %13 = vector.broadcast %12 : vector<1x32xf32> to vector<64x32xf32>
    %14 = arith.addf %11, %13 : vector<64x32xf32>
    %c0_9 = arith.constant 0 : index
    %c0_10 = arith.constant 0 : index
    %15 = vector.load %arg6[%c0_9, %c0_10] : memref<64x32xf32, #tpu.memory_space<vmem>>, vector<64x32xf32>
    tpu.vector_store %arg6[%c0_9, %c0_10], %14 {strides = array<i32>} : memref<64x32xf32, #tpu.memory_space<vmem>>, vector<64x32xf32>,
    return
  }
  func.func @transform_0(%arg0: i32) -> (i32, i32) {
    %c0_i32 = arith.constant 0 : i32
    %c0_i32_0 = arith.constant 0 : i32
    return %arg0, %c0_i32 : i32, i32
  }
  func.func @transform_1(%arg0: i32) -> (i32, i32) {
    %c0_i32 = arith.constant 0 : i32
    %c0_i32_0 = arith.constant 0 : i32
    return %arg0, %c0_i32 : i32, i32
  }
  func.func @transform_2(%arg0: i32) -> (i32, i32) {
    %c0_i32 = arith.constant 0 : i32
    %c0_i32_0 = arith.constant 0 : i32
    %c0_i32_1 = arith.constant 0 : i32
    return %c0_i32, %c0_i32_0 : i32, i32
  }
  func.func @transform_3(%arg0: i32) -> (i32, i32) {
    %c0_i32 = arith.constant 0 : i32
    %c0_i32_0 = arith.constant 0 : i32
    %c0_i32_1 = arith.constant 0 : i32
    return %c0_i32, %c0_i32_0 : i32, i32
  }
  func.func @transform_4(%arg0: i32) -> (i32, i32) {
    %c0_i32 = arith.constant 0 : i32
    %c0_i32_0 = arith.constant 0 : i32
    %c0_i32_1 = arith.constant 0 : i32
    return %c0_i32, %c0_i32_0 : i32, i32
  }
  func.func @transform_5(%arg0: i32) -> (i32, i32) {
    %c0_i32 = arith.constant 0 : i32
    %c0_i32_0 = arith.constant 0 : i32
    return %arg0, %c0_i32 : i32, i32
  }
}

module attributes {stable_mosaic.version = 11 : i64} {
  func.func @_edge_kernel(%arg0: i32, %arg1: memref<64x32xf32, #tpu.memory_space<vmem>>, %arg2: memref<64x32xf32, #tpu.memory_space<vmem>>, %arg3: memref<64x64xf32, #tpu.memory_space<vmem>>, %arg4: memref<64x1xf32, #tpu.memory_space<vmem>>, %arg5: memref<32x64xbf16, #tpu.memory_space<vmem>>, %arg6: memref<1x32xf32, #tpu.memory_space<vmem>>, %arg7: memref<1x32xf32, #tpu.memory_space<vmem>>, %arg8: memref<1x32xf32, #tpu.memory_space<vmem>>, %arg9: memref<64x32xf32, #tpu.memory_space<vmem>>) attributes {dimension_semantics = [#tpu.dimension_semantics<parallel>], iteration_bounds = array<i64: 1>, scalar_prefetch = 0 : i64, scratch_operands = 0 : i64, tpu.core_type = #tpu.core_type<tc>, window_params = [{pipeline_mode = #tpu.pipeline_mode<synchronous>, transform_indices = @transform_0, window_bounds = array<i64: 64, 32>}, {transform_indices = @transform_1, window_bounds = array<i64: 64, 32>}, {transform_indices = @transform_2, window_bounds = array<i64: 64, 64>}, {transform_indices = @transform_3, window_bounds = array<i64: 64, 1>}, {pipeline_mode = #tpu.pipeline_mode<synchronous>, transform_indices = @transform_4, window_bounds = array<i64: 32, 64>}, {pipeline_mode = #tpu.pipeline_mode<synchronous>, transform_indices = @transform_5, window_bounds = array<i64: 1, 32>}, {pipeline_mode = #tpu.pipeline_mode<synchronous>, transform_indices = @transform_6, window_bounds = array<i64: 1, 32>}, {pipeline_mode = #tpu.pipeline_mode<synchronous>, transform_indices = @transform_7, window_bounds = array<i64: 1, 32>}, {transform_indices = @transform_8, window_bounds = array<i64: 64, 32>}]} {
    %c0 = arith.constant 0 : index
    %c0_0 = arith.constant 0 : index
    %0 = vector.load %arg2[%c0, %c0_0] : memref<64x32xf32, #tpu.memory_space<vmem>>, vector<64x32xf32>
    %c0_1 = arith.constant 0 : index
    %c0_2 = arith.constant 0 : index
    %1 = vector.load %arg5[%c0_1, %c0_2] : memref<32x64xbf16, #tpu.memory_space<vmem>>, vector<32x64xbf16>
    %c0_3 = arith.constant 0 : index
    %c0_4 = arith.constant 0 : index
    %2 = vector.load %arg1[%c0_3, %c0_4] : memref<64x32xf32, #tpu.memory_space<vmem>>, vector<64x32xf32>
    %3 = arith.truncf %2 : vector<64x32xf32> to vector<64x32xbf16>
    %4 = vector.extract_strided_slice %1 {offsets = [0, 32], sizes = [32, 32], strides = [1, 1]} : vector<32x64xbf16> to vector<32x32xbf16>
    %cst = arith.constant dense<0.000000e+00> : vector<64x32xf32>
    %5 = tpu.matmul %3, %4, %cst {dimension_numbers = #tpu.dot_dimension_numbers<[1], [0], [0], [1], [0, 0, 1, 1], [], []>} : vector<64x32xbf16>, vector<32x32xbf16>, vector<64x32xf32> -> vector<64x32xf32>
    %6 = arith.truncf %0 : vector<64x32xf32> to vector<64x32xbf16>
    %7 = vector.extract_strided_slice %1 {offsets = [0, 0], sizes = [32, 32], strides = [1, 1]} : vector<32x64xbf16> to vector<32x32xbf16>
    %cst_5 = arith.constant dense<0.000000e+00> : vector<64x32xf32>
    %8 = tpu.matmul %6, %7, %cst_5 {dimension_numbers = #tpu.dot_dimension_numbers<[1], [0], [0], [1], [0, 0, 1, 1], [], []>} : vector<64x32xbf16>, vector<32x32xbf16>, vector<64x32xf32> -> vector<64x32xf32>
    %c0_6 = arith.constant 0 : index
    %c0_7 = arith.constant 0 : index
    %9 = vector.load %arg3[%c0_6, %c0_7] : memref<64x64xf32, #tpu.memory_space<vmem>>, vector<64x64xf32>
    %c0_8 = arith.constant 0 : index
    %c0_9 = arith.constant 0 : index
    %10 = vector.load %arg4[%c0_8, %c0_9] : memref<64x1xf32, #tpu.memory_space<vmem>>, vector<64x1xf32>
    %11 = vector.broadcast %10 : vector<64x1xf32> to vector<64x64xf32>
    %12 = arith.cmpf ole, %9, %11 : vector<64x64xf32>
    %cst_10 = arith.constant 0.000000e+00 : f32
    %cst_11 = arith.constant -1.000000e+30 : f32
    %13 = vector.broadcast %cst_10 : f32 to vector<64x64xf32>
    %14 = vector.broadcast %cst_11 : f32 to vector<64x64xf32>
    %15 = arith.select %12, %13, %14 : vector<64x64xi1>, vector<64x64xf32>
    %16 = vector.shape_cast %15 : vector<64x64xf32> to vector<64x64x1xf32>
    %17 = vector.shape_cast %5 : vector<64x32xf32> to vector<1x64x32xf32>
    %18 = vector.broadcast %16 : vector<64x64x1xf32> to vector<64x64x32xf32>
    %19 = vector.broadcast %17 : vector<1x64x32xf32> to vector<64x64x32xf32>
    %20 = arith.addf %18, %19 : vector<64x64x32xf32>
    %cst_12 = arith.constant dense<0xFF800000> : vector<64x32xf32>
    %21 = vector.multi_reduction <maximumf>, %20, %cst_12 [1] : vector<64x64x32xf32> to vector<64x32xf32>
    %22 = arith.addf %8, %21 : vector<64x32xf32>
    %c0_13 = arith.constant 0 : index
    %c0_14 = arith.constant 0 : index
    %23 = vector.load %arg6[%c0_13, %c0_14] : memref<1x32xf32, #tpu.memory_space<vmem>>, vector<1x32xf32>
    %24 = vector.broadcast %23 : vector<1x32xf32> to vector<64x32xf32>
    %25 = arith.addf %22, %24 : vector<64x32xf32>
    %cst_15 = arith.constant 0.000000e+00 : f32
    %26 = vector.broadcast %cst_15 : f32 to vector<64x32xf32>
    %27 = arith.maximumf %25, %26 : vector<64x32xf32>
    %c0_16 = arith.constant 0 : index
    %c0_17 = arith.constant 0 : index
    %28 = vector.load %arg7[%c0_16, %c0_17] : memref<1x32xf32, #tpu.memory_space<vmem>>, vector<1x32xf32>
    %29 = vector.broadcast %28 : vector<1x32xf32> to vector<64x32xf32>
    %30 = arith.mulf %27, %29 : vector<64x32xf32>
    %c0_18 = arith.constant 0 : index
    %c0_19 = arith.constant 0 : index
    %31 = vector.load %arg8[%c0_18, %c0_19] : memref<1x32xf32, #tpu.memory_space<vmem>>, vector<1x32xf32>
    %32 = vector.broadcast %31 : vector<1x32xf32> to vector<64x32xf32>
    %33 = arith.addf %30, %32 : vector<64x32xf32>
    %34 = arith.addf %33, %0 : vector<64x32xf32>
    %c0_20 = arith.constant 0 : index
    %c0_21 = arith.constant 0 : index
    %35 = vector.load %arg9[%c0_20, %c0_21] : memref<64x32xf32, #tpu.memory_space<vmem>>, vector<64x32xf32>
    tpu.vector_store %arg9[%c0_20, %c0_21], %34 {strides = array<i32>} : memref<64x32xf32, #tpu.memory_space<vmem>>, vector<64x32xf32>,
    return
  }
  func.func @transform_0(%arg0: i32) -> (i32, i32) {
    %c0_i32 = arith.constant 0 : i32
    %c0_i32_0 = arith.constant 0 : i32
    %c0_i32_1 = arith.constant 0 : i32
    return %c0_i32, %c0_i32_0 : i32, i32
  }
  func.func @transform_1(%arg0: i32) -> (i32, i32) {
    %c0_i32 = arith.constant 0 : i32
    %c0_i32_0 = arith.constant 0 : i32
    return %arg0, %c0_i32 : i32, i32
  }
  func.func @transform_2(%arg0: i32) -> (i32, i32) {
    %c0_i32 = arith.constant 0 : i32
    %c0_i32_0 = arith.constant 0 : i32
    return %arg0, %c0_i32 : i32, i32
  }
  func.func @transform_3(%arg0: i32) -> (i32, i32) {
    %c0_i32 = arith.constant 0 : i32
    %c0_i32_0 = arith.constant 0 : i32
    return %arg0, %c0_i32 : i32, i32
  }
  func.func @transform_4(%arg0: i32) -> (i32, i32) {
    %c0_i32 = arith.constant 0 : i32
    %c0_i32_0 = arith.constant 0 : i32
    %c0_i32_1 = arith.constant 0 : i32
    return %c0_i32, %c0_i32_0 : i32, i32
  }
  func.func @transform_5(%arg0: i32) -> (i32, i32) {
    %c0_i32 = arith.constant 0 : i32
    %c0_i32_0 = arith.constant 0 : i32
    %c0_i32_1 = arith.constant 0 : i32
    return %c0_i32, %c0_i32_0 : i32, i32
  }
  func.func @transform_6(%arg0: i32) -> (i32, i32) {
    %c0_i32 = arith.constant 0 : i32
    %c0_i32_0 = arith.constant 0 : i32
    %c0_i32_1 = arith.constant 0 : i32
    return %c0_i32, %c0_i32_0 : i32, i32
  }
  func.func @transform_7(%arg0: i32) -> (i32, i32) {
    %c0_i32 = arith.constant 0 : i32
    %c0_i32_0 = arith.constant 0 : i32
    %c0_i32_1 = arith.constant 0 : i32
    return %c0_i32, %c0_i32_0 : i32, i32
  }
  func.func @transform_8(%arg0: i32) -> (i32, i32) {
    %c0_i32 = arith.constant 0 : i32
    %c0_i32_0 = arith.constant 0 : i32
    return %arg0, %c0_i32 : i32, i32
  }
}

module attributes {stable_mosaic.version = 11 : i64} {
  func.func @_tail_kernel(%arg0: i32, %arg1: memref<64x32xf32, #tpu.memory_space<vmem>>, %arg2: memref<64x32xf32, #tpu.memory_space<vmem>>, %arg3: memref<64x32xf32, #tpu.memory_space<vmem>>, %arg4: memref<9xf32, #tpu.memory_space<smem>>, %arg5: memref<32x128xbf16, #tpu.memory_space<vmem>>, %arg6: memref<1x128xf32, #tpu.memory_space<vmem>>, %arg7: memref<96x512xbf16, #tpu.memory_space<vmem>>, %arg8: memref<1x512xf32, #tpu.memory_space<vmem>>, %arg9: memref<1x512xf32, #tpu.memory_space<vmem>>, %arg10: memref<1x512xf32, #tpu.memory_space<vmem>>, %arg11: memref<512x256xbf16, #tpu.memory_space<vmem>>, %arg12: memref<1x256xf32, #tpu.memory_space<vmem>>, %arg13: memref<1x256xf32, #tpu.memory_space<vmem>>, %arg14: memref<1x256xf32, #tpu.memory_space<vmem>>, %arg15: memref<256x64xbf16, #tpu.memory_space<vmem>>, %arg16: memref<1x64xf32, #tpu.memory_space<vmem>>, %arg17: memref<1x64xf32, #tpu.memory_space<vmem>>, %arg18: memref<1x64xf32, #tpu.memory_space<vmem>>, %arg19: memref<64x128xbf16, #tpu.memory_space<vmem>>, %arg20: memref<1x128xf32, #tpu.memory_space<vmem>>, %arg21: memref<64x128xf32, #tpu.memory_space<vmem>>) attributes {dimension_semantics = [#tpu.dimension_semantics<parallel>], iteration_bounds = array<i64: 1>, scalar_prefetch = 0 : i64, scratch_operands = 0 : i64, tpu.core_type = #tpu.core_type<tc>, window_params = [{transform_indices = @transform_0, window_bounds = array<i64: 64, 32>}, {transform_indices = @transform_1, window_bounds = array<i64: 64, 32>}, {transform_indices = @transform_2, window_bounds = array<i64: 64, 32>}, {transform_indices = @transform_3, window_bounds = array<i64: 9>}, {pipeline_mode = #tpu.pipeline_mode<synchronous>, transform_indices = @transform_4, window_bounds = array<i64: 32, 128>}, {pipeline_mode = #tpu.pipeline_mode<synchronous>, transform_indices = @transform_5, window_bounds = array<i64: 1, 128>}, {pipeline_mode = #tpu.pipeline_mode<synchronous>, transform_indices = @transform_6, window_bounds = array<i64: 96, 512>}, {pipeline_mode = #tpu.pipeline_mode<synchronous>, transform_indices = @transform_7, window_bounds = array<i64: 1, 512>}, {pipeline_mode = #tpu.pipeline_mode<synchronous>, transform_indices = @transform_8, window_bounds = array<i64: 1, 512>}, {pipeline_mode = #tpu.pipeline_mode<synchronous>, transform_indices = @transform_9, window_bounds = array<i64: 1, 512>}, {pipeline_mode = #tpu.pipeline_mode<synchronous>, transform_indices = @transform_10, window_bounds = array<i64: 512, 256>}, {pipeline_mode = #tpu.pipeline_mode<synchronous>, transform_indices = @transform_11, window_bounds = array<i64: 1, 256>}, {pipeline_mode = #tpu.pipeline_mode<synchronous>, transform_indices = @transform_12, window_bounds = array<i64: 1, 256>}, {pipeline_mode = #tpu.pipeline_mode<synchronous>, transform_indices = @transform_13, window_bounds = array<i64: 1, 256>}, {pipeline_mode = #tpu.pipeline_mode<synchronous>, transform_indices = @transform_14, window_bounds = array<i64: 256, 64>}, {pipeline_mode = #tpu.pipeline_mode<synchronous>, transform_indices = @transform_15, window_bounds = array<i64: 1, 64>}, {pipeline_mode = #tpu.pipeline_mode<synchronous>, transform_indices = @transform_16, window_bounds = array<i64: 1, 64>}, {pipeline_mode = #tpu.pipeline_mode<synchronous>, transform_indices = @transform_17, window_bounds = array<i64: 1, 64>}, {pipeline_mode = #tpu.pipeline_mode<synchronous>, transform_indices = @transform_18, window_bounds = array<i64: 64, 128>}, {pipeline_mode = #tpu.pipeline_mode<synchronous>, transform_indices = @transform_19, window_bounds = array<i64: 1, 128>}, {transform_indices = @transform_20, window_bounds = array<i64: 64, 128>}]} {
    %c0 = arith.constant 0 : index
    %c0_0 = arith.constant 0 : index
    %0 = vector.load %arg5[%c0, %c0_0] : memref<32x128xbf16, #tpu.memory_space<vmem>>, vector<32x128xbf16>
    %c0_1 = arith.constant 0 : index
    %c0_2 = arith.constant 0 : index
    %1 = vector.load %arg6[%c0_1, %c0_2] : memref<1x128xf32, #tpu.memory_space<vmem>>, vector<1x128xf32>
    %c0_3 = arith.constant 0 : index
    %c0_4 = arith.constant 0 : index
    %2 = vector.load %arg1[%c0_3, %c0_4] : memref<64x32xf32, #tpu.memory_space<vmem>>, vector<64x32xf32>
    %c0_5 = arith.constant 0 : index
    %c0_6 = arith.constant 0 : index
    %3 = vector.load %arg2[%c0_5, %c0_6] : memref<64x32xf32, #tpu.memory_space<vmem>>, vector<64x32xf32>
    %c0_7 = arith.constant 0 : index
    %c0_8 = arith.constant 0 : index
    %4 = vector.load %arg3[%c0_7, %c0_8] : memref<64x32xf32, #tpu.memory_space<vmem>>, vector<64x32xf32>
    %c0_9 = arith.constant 0 : index
    %5 = memref.load %arg4[%c0_9] : memref<9xf32, #tpu.memory_space<smem>>
    %6 = vector.broadcast %5 : f32 to vector<64x32xf32>
    %7 = arith.mulf %6, %3 : vector<64x32xf32>
    %c1 = arith.constant 1 : index
    %8 = memref.load %arg4[%c1] : memref<9xf32, #tpu.memory_space<smem>>
    %9 = vector.broadcast %8 : f32 to vector<64x32xf32>
    %10 = arith.mulf %9, %4 : vector<64x32xf32>
    %11 = arith.addf %7, %10 : vector<64x32xf32>
    %12 = arith.truncf %11 : vector<64x32xf32> to vector<64x32xbf16>
    %13 = vector.extract_strided_slice %0 {offsets = [0, 0], sizes = [32, 32], strides = [1, 1]} : vector<32x128xbf16> to vector<32x32xbf16>
    %cst = arith.constant dense<0.000000e+00> : vector<64x32xf32>
    %14 = tpu.matmul %12, %13, %cst {dimension_numbers = #tpu.dot_dimension_numbers<[1], [0], [0], [1], [0, 0, 1, 1], [], []>} : vector<64x32xbf16>, vector<32x32xbf16>, vector<64x32xf32> -> vector<64x32xf32>
    %15 = vector.extract_strided_slice %1 {offsets = [0, 0], sizes = [1, 32], strides = [1, 1]} : vector<1x128xf32> to vector<1x32xf32>
    %16 = vector.broadcast %15 : vector<1x32xf32> to vector<64x32xf32>
    %17 = arith.addf %14, %16 : vector<64x32xf32>
    %c2 = arith.constant 2 : index
    %18 = memref.load %arg4[%c2] : memref<9xf32, #tpu.memory_space<smem>>
    %19 = vector.broadcast %18 : f32 to vector<64x32xf32>
    %20 = arith.mulf %19, %2 : vector<64x32xf32>
    %c3 = arith.constant 3 : index
    %21 = memref.load %arg4[%c3] : memref<9xf32, #tpu.memory_space<smem>>
    %22 = vector.broadcast %21 : f32 to vector<64x32xf32>
    %23 = arith.mulf %22, %17 : vector<64x32xf32>
    %24 = arith.addf %20, %23 : vector<64x32xf32>
    %25 = arith.truncf %24 : vector<64x32xf32> to vector<64x32xbf16>
    %26 = vector.extract_strided_slice %0 {offsets = [0, 32], sizes = [32, 32], strides = [1, 1]} : vector<32x128xbf16> to vector<32x32xbf16>
    %cst_10 = arith.constant dense<0.000000e+00> : vector<64x32xf32>
    %27 = tpu.matmul %25, %26, %cst_10 {dimension_numbers = #tpu.dot_dimension_numbers<[1], [0], [0], [1], [0, 0, 1, 1], [], []>} : vector<64x32xbf16>, vector<32x32xbf16>, vector<64x32xf32> -> vector<64x32xf32>
    %28 = vector.extract_strided_slice %1 {offsets = [0, 32], sizes = [1, 32], strides = [1, 1]} : vector<1x128xf32> to vector<1x32xf32>
    %29 = vector.broadcast %28 : vector<1x32xf32> to vector<64x32xf32>
    %30 = arith.addf %27, %29 : vector<64x32xf32>
    %c4 = arith.constant 4 : index
    %31 = memref.load %arg4[%c4] : memref<9xf32, #tpu.memory_space<smem>>
    %32 = vector.broadcast %31 : f32 to vector<64x32xf32>
    %33 = arith.mulf %32, %17 : vector<64x32xf32>
    %c5 = arith.constant 5 : index
    %34 = memref.load %arg4[%c5] : memref<9xf32, #tpu.memory_space<smem>>
    %35 = vector.broadcast %34 : f32 to vector<64x32xf32>
    %36 = arith.mulf %35, %30 : vector<64x32xf32>
    %37 = arith.addf %33, %36 : vector<64x32xf32>
    %c6 = arith.constant 6 : index
    %38 = memref.load %arg4[%c6] : memref<9xf32, #tpu.memory_space<smem>>
    %39 = vector.broadcast %38 : f32 to vector<64x32xf32>
    %40 = arith.mulf %39, %3 : vector<64x32xf32>
    %41 = arith.addf %37, %40 : vector<64x32xf32>
    %42 = arith.truncf %41 : vector<64x32xf32> to vector<64x32xbf16>
    %43 = vector.extract_strided_slice %0 {offsets = [0, 64], sizes = [32, 32], strides = [1, 1]} : vector<32x128xbf16> to vector<32x32xbf16>
    %cst_11 = arith.constant dense<0.000000e+00> : vector<64x32xf32>
    %44 = tpu.matmul %42, %43, %cst_11 {dimension_numbers = #tpu.dot_dimension_numbers<[1], [0], [0], [1], [0, 0, 1, 1], [], []>} : vector<64x32xbf16>, vector<32x32xbf16>, vector<64x32xf32> -> vector<64x32xf32>
    %45 = vector.extract_strided_slice %1 {offsets = [0, 64], sizes = [1, 32], strides = [1, 1]} : vector<1x128xf32> to vector<1x32xf32>
    %46 = vector.broadcast %45 : vector<1x32xf32> to vector<64x32xf32>
    %47 = arith.addf %44, %46 : vector<64x32xf32>
    %c7 = arith.constant 7 : index
    %48 = memref.load %arg4[%c7] : memref<9xf32, #tpu.memory_space<smem>>
    %49 = vector.broadcast %48 : f32 to vector<64x32xf32>
    %50 = arith.mulf %49, %4 : vector<64x32xf32>
    %c8 = arith.constant 8 : index
    %51 = memref.load %arg4[%c8] : memref<9xf32, #tpu.memory_space<smem>>
    %52 = vector.broadcast %51 : f32 to vector<64x32xf32>
    %53 = arith.mulf %52, %47 : vector<64x32xf32>
    %54 = arith.addf %50, %53 : vector<64x32xf32>
    %55 = arith.truncf %54 : vector<64x32xf32> to vector<64x32xbf16>
    %56 = vector.extract_strided_slice %0 {offsets = [0, 96], sizes = [32, 32], strides = [1, 1]} : vector<32x128xbf16> to vector<32x32xbf16>
    %cst_12 = arith.constant dense<0.000000e+00> : vector<64x32xf32>
    %57 = tpu.matmul %55, %56, %cst_12 {dimension_numbers = #tpu.dot_dimension_numbers<[1], [0], [0], [1], [0, 0, 1, 1], [], []>} : vector<64x32xbf16>, vector<32x32xbf16>, vector<64x32xf32> -> vector<64x32xf32>
    %58 = vector.extract_strided_slice %1 {offsets = [0, 96], sizes = [1, 32], strides = [1, 1]} : vector<1x128xf32> to vector<1x32xf32>
    %59 = vector.broadcast %58 : vector<1x32xf32> to vector<64x32xf32>
    %60 = arith.addf %57, %59 : vector<64x32xf32>
    %61 = tpu.concatenate %30, %47, %60 in 1 : vector<64x32xf32>, vector<64x32xf32>, vector<64x32xf32> -> vector<64x96xf32>
    %62 = arith.truncf %61 : vector<64x96xf32> to vector<64x96xbf16>
    %c0_13 = arith.constant 0 : index
    %c0_14 = arith.constant 0 : index
    %63 = vector.load %arg7[%c0_13, %c0_14] : memref<96x512xbf16, #tpu.memory_space<vmem>>, vector<96x512xbf16>
    %cst_15 = arith.constant dense<0.000000e+00> : vector<64x512xf32>
    %64 = tpu.matmul %62, %63, %cst_15 {dimension_numbers = #tpu.dot_dimension_numbers<[1], [0], [0], [1], [0, 0, 1, 1], [], []>} : vector<64x96xbf16>, vector<96x512xbf16>, vector<64x512xf32> -> vector<64x512xf32>
    %c0_16 = arith.constant 0 : index
    %c0_17 = arith.constant 0 : index
    %65 = vector.load %arg8[%c0_16, %c0_17] : memref<1x512xf32, #tpu.memory_space<vmem>>, vector<1x512xf32>
    %66 = vector.broadcast %65 : vector<1x512xf32> to vector<64x512xf32>
    %67 = arith.addf %64, %66 : vector<64x512xf32>
    %cst_18 = arith.constant 0.000000e+00 : f32
    %68 = vector.broadcast %cst_18 : f32 to vector<64x512xf32>
    %69 = arith.maximumf %67, %68 : vector<64x512xf32>
    %c0_19 = arith.constant 0 : index
    %c0_20 = arith.constant 0 : index
    %70 = vector.load %arg9[%c0_19, %c0_20] : memref<1x512xf32, #tpu.memory_space<vmem>>, vector<1x512xf32>
    %71 = vector.broadcast %70 : vector<1x512xf32> to vector<64x512xf32>
    %72 = arith.mulf %69, %71 : vector<64x512xf32>
    %c0_21 = arith.constant 0 : index
    %c0_22 = arith.constant 0 : index
    %73 = vector.load %arg10[%c0_21, %c0_22] : memref<1x512xf32, #tpu.memory_space<vmem>>, vector<1x512xf32>
    %74 = vector.broadcast %73 : vector<1x512xf32> to vector<64x512xf32>
    %75 = arith.addf %72, %74 : vector<64x512xf32>
    %76 = arith.truncf %75 : vector<64x512xf32> to vector<64x512xbf16>
    %c0_23 = arith.constant 0 : index
    %c0_24 = arith.constant 0 : index
    %77 = vector.load %arg11[%c0_23, %c0_24] : memref<512x256xbf16, #tpu.memory_space<vmem>>, vector<512x256xbf16>
    %cst_25 = arith.constant dense<0.000000e+00> : vector<64x256xf32>
    %78 = tpu.matmul %76, %77, %cst_25 {dimension_numbers = #tpu.dot_dimension_numbers<[1], [0], [0], [1], [0, 0, 1, 1], [], []>} : vector<64x512xbf16>, vector<512x256xbf16>, vector<64x256xf32> -> vector<64x256xf32>
    %c0_26 = arith.constant 0 : index
    %c0_27 = arith.constant 0 : index
    %79 = vector.load %arg12[%c0_26, %c0_27] : memref<1x256xf32, #tpu.memory_space<vmem>>, vector<1x256xf32>
    %80 = vector.broadcast %79 : vector<1x256xf32> to vector<64x256xf32>
    %81 = arith.addf %78, %80 : vector<64x256xf32>
    %cst_28 = arith.constant 0.000000e+00 : f32
    %82 = vector.broadcast %cst_28 : f32 to vector<64x256xf32>
    %83 = arith.maximumf %81, %82 : vector<64x256xf32>
    %c0_29 = arith.constant 0 : index
    %c0_30 = arith.constant 0 : index
    %84 = vector.load %arg13[%c0_29, %c0_30] : memref<1x256xf32, #tpu.memory_space<vmem>>, vector<1x256xf32>
    %85 = vector.broadcast %84 : vector<1x256xf32> to vector<64x256xf32>
    %86 = arith.mulf %83, %85 : vector<64x256xf32>
    %c0_31 = arith.constant 0 : index
    %c0_32 = arith.constant 0 : index
    %87 = vector.load %arg14[%c0_31, %c0_32] : memref<1x256xf32, #tpu.memory_space<vmem>>, vector<1x256xf32>
    %88 = vector.broadcast %87 : vector<1x256xf32> to vector<64x256xf32>
    %89 = arith.addf %86, %88 : vector<64x256xf32>
    %90 = arith.truncf %89 : vector<64x256xf32> to vector<64x256xbf16>
    %c0_33 = arith.constant 0 : index
    %c0_34 = arith.constant 0 : index
    %91 = vector.load %arg15[%c0_33, %c0_34] : memref<256x64xbf16, #tpu.memory_space<vmem>>, vector<256x64xbf16>
    %cst_35 = arith.constant dense<0.000000e+00> : vector<64x64xf32>
    %92 = tpu.matmul %90, %91, %cst_35 {dimension_numbers = #tpu.dot_dimension_numbers<[1], [0], [0], [1], [0, 0, 1, 1], [], []>} : vector<64x256xbf16>, vector<256x64xbf16>, vector<64x64xf32> -> vector<64x64xf32>
    %c0_36 = arith.constant 0 : index
    %c0_37 = arith.constant 0 : index
    %93 = vector.load %arg16[%c0_36, %c0_37] : memref<1x64xf32, #tpu.memory_space<vmem>>, vector<1x64xf32>
    %94 = vector.broadcast %93 : vector<1x64xf32> to vector<64x64xf32>
    %95 = arith.addf %92, %94 : vector<64x64xf32>
    %cst_38 = arith.constant 0.000000e+00 : f32
    %96 = vector.broadcast %cst_38 : f32 to vector<64x64xf32>
    %97 = arith.maximumf %95, %96 : vector<64x64xf32>
    %c0_39 = arith.constant 0 : index
    %c0_40 = arith.constant 0 : index
    %98 = vector.load %arg17[%c0_39, %c0_40] : memref<1x64xf32, #tpu.memory_space<vmem>>, vector<1x64xf32>
    %99 = vector.broadcast %98 : vector<1x64xf32> to vector<64x64xf32>
    %100 = arith.mulf %97, %99 : vector<64x64xf32>
    %c0_41 = arith.constant 0 : index
    %c0_42 = arith.constant 0 : index
    %101 = vector.load %arg18[%c0_41, %c0_42] : memref<1x64xf32, #tpu.memory_space<vmem>>, vector<1x64xf32>
    %102 = vector.broadcast %101 : vector<1x64xf32> to vector<64x64xf32>
    %103 = arith.addf %100, %102 : vector<64x64xf32>
    %104 = arith.truncf %103 : vector<64x64xf32> to vector<64x64xbf16>
    %c0_43 = arith.constant 0 : index
    %c0_44 = arith.constant 0 : index
    %105 = vector.load %arg19[%c0_43, %c0_44] : memref<64x128xbf16, #tpu.memory_space<vmem>>, vector<64x128xbf16>
    %cst_45 = arith.constant dense<0.000000e+00> : vector<64x128xf32>
    %106 = tpu.matmul %104, %105, %cst_45 {dimension_numbers = #tpu.dot_dimension_numbers<[1], [0], [0], [1], [0, 0, 1, 1], [], []>} : vector<64x64xbf16>, vector<64x128xbf16>, vector<64x128xf32> -> vector<64x128xf32>
    %c0_46 = arith.constant 0 : index
    %c0_47 = arith.constant 0 : index
    %107 = vector.load %arg20[%c0_46, %c0_47] : memref<1x128xf32, #tpu.memory_space<vmem>>, vector<1x128xf32>
    %108 = vector.broadcast %107 : vector<1x128xf32> to vector<64x128xf32>
    %109 = arith.addf %106, %108 : vector<64x128xf32>
    %c0_48 = arith.constant 0 : index
    %c0_49 = arith.constant 0 : index
    %110 = vector.load %arg21[%c0_48, %c0_49] : memref<64x128xf32, #tpu.memory_space<vmem>>, vector<64x128xf32>
    tpu.vector_store %arg21[%c0_48, %c0_49], %109 {strides = array<i32>} : memref<64x128xf32, #tpu.memory_space<vmem>>, vector<64x128xf32>,
    return
  }
  func.func @transform_0(%arg0: i32) -> (i32, i32) {
    %c0_i32 = arith.constant 0 : i32
    %c0_i32_0 = arith.constant 0 : i32
    return %arg0, %c0_i32 : i32, i32
  }
  func.func @transform_1(%arg0: i32) -> (i32, i32) {
    %c0_i32 = arith.constant 0 : i32
    %c0_i32_0 = arith.constant 0 : i32
    return %arg0, %c0_i32 : i32, i32
  }
  func.func @transform_2(%arg0: i32) -> (i32, i32) {
    %c0_i32 = arith.constant 0 : i32
    %c0_i32_0 = arith.constant 0 : i32
    return %arg0, %c0_i32 : i32, i32
  }
  func.func @transform_3(%arg0: i32) -> i32 {
    %c0_i32 = arith.constant 0 : i32
    %c0_i32_0 = arith.constant 0 : i32
    return %c0_i32 : i32
  }
  func.func @transform_4(%arg0: i32) -> (i32, i32) {
    %c0_i32 = arith.constant 0 : i32
    %c0_i32_0 = arith.constant 0 : i32
    %c0_i32_1 = arith.constant 0 : i32
    return %c0_i32, %c0_i32_0 : i32, i32
  }
  func.func @transform_5(%arg0: i32) -> (i32, i32) {
    %c0_i32 = arith.constant 0 : i32
    %c0_i32_0 = arith.constant 0 : i32
    %c0_i32_1 = arith.constant 0 : i32
    return %c0_i32, %c0_i32_0 : i32, i32
  }
  func.func @transform_6(%arg0: i32) -> (i32, i32) {
    %c0_i32 = arith.constant 0 : i32
    %c0_i32_0 = arith.constant 0 : i32
    %c0_i32_1 = arith.constant 0 : i32
    return %c0_i32, %c0_i32_0 : i32, i32
  }
  func.func @transform_7(%arg0: i32) -> (i32, i32) {
    %c0_i32 = arith.constant 0 : i32
    %c0_i32_0 = arith.constant 0 : i32
    %c0_i32_1 = arith.constant 0 : i32
    return %c0_i32, %c0_i32_0 : i32, i32
  }
  func.func @transform_8(%arg0: i32) -> (i32, i32) {
    %c0_i32 = arith.constant 0 : i32
    %c0_i32_0 = arith.constant 0 : i32
    %c0_i32_1 = arith.constant 0 : i32
    return %c0_i32, %c0_i32_0 : i32, i32
  }
  func.func @transform_9(%arg0: i32) -> (i32, i32) {
    %c0_i32 = arith.constant 0 : i32
    %c0_i32_0 = arith.constant 0 : i32
    %c0_i32_1 = arith.constant 0 : i32
    return %c0_i32, %c0_i32_0 : i32, i32
  }
  func.func @transform_10(%arg0: i32) -> (i32, i32) {
    %c0_i32 = arith.constant 0 : i32
    %c0_i32_0 = arith.constant 0 : i32
    %c0_i32_1 = arith.constant 0 : i32
    return %c0_i32, %c0_i32_0 : i32, i32
  }
  func.func @transform_11(%arg0: i32) -> (i32, i32) {
    %c0_i32 = arith.constant 0 : i32
    %c0_i32_0 = arith.constant 0 : i32
    %c0_i32_1 = arith.constant 0 : i32
    return %c0_i32, %c0_i32_0 : i32, i32
  }
  func.func @transform_12(%arg0: i32) -> (i32, i32) {
    %c0_i32 = arith.constant 0 : i32
    %c0_i32_0 = arith.constant 0 : i32
    %c0_i32_1 = arith.constant 0 : i32
    return %c0_i32, %c0_i32_0 : i32, i32
  }
  func.func @transform_13(%arg0: i32) -> (i32, i32) {
    %c0_i32 = arith.constant 0 : i32
    %c0_i32_0 = arith.constant 0 : i32
    %c0_i32_1 = arith.constant 0 : i32
    return %c0_i32, %c0_i32_0 : i32, i32
  }
  func.func @transform_14(%arg0: i32) -> (i32, i32) {
    %c0_i32 = arith.constant 0 : i32
    %c0_i32_0 = arith.constant 0 : i32
    %c0_i32_1 = arith.constant 0 : i32
    return %c0_i32, %c0_i32_0 : i32, i32
  }
  func.func @transform_15(%arg0: i32) -> (i32, i32) {
    %c0_i32 = arith.constant 0 : i32
    %c0_i32_0 = arith.constant 0 : i32
    %c0_i32_1 = arith.constant 0 : i32
    return %c0_i32, %c0_i32_0 : i32, i32
  }
  func.func @transform_16(%arg0: i32) -> (i32, i32) {
    %c0_i32 = arith.constant 0 : i32
    %c0_i32_0 = arith.constant 0 : i32
    %c0_i32_1 = arith.constant 0 : i32
    return %c0_i32, %c0_i32_0 : i32, i32
  }
  func.func @transform_17(%arg0: i32) -> (i32, i32) {
    %c0_i32 = arith.constant 0 : i32
    %c0_i32_0 = arith.constant 0 : i32
    %c0_i32_1 = arith.constant 0 : i32
    return %c0_i32, %c0_i32_0 : i32, i32
  }
  func.func @transform_18(%arg0: i32) -> (i32, i32) {
    %c0_i32 = arith.constant 0 : i32
    %c0_i32_0 = arith.constant 0 : i32
    %c0_i32_1 = arith.constant 0 : i32
    return %c0_i32, %c0_i32_0 : i32, i32
  }
  func.func @transform_19(%arg0: i32) -> (i32, i32) {
    %c0_i32 = arith.constant 0 : i32
    %c0_i32_0 = arith.constant 0 : i32
    %c0_i32_1 = arith.constant 0 : i32
    return %c0_i32, %c0_i32_0 : i32, i32
  }
  func.func @transform_20(%arg0: i32) -> (i32, i32) {
    %c0_i32 = arith.constant 0 : i32
    %c0_i32_0 = arith.constant 0 : i32
    return %arg0, %c0_i32 : i32, i32
  }
}

</mosaic_0001>

<bundles_post_ra>
// kernel: sparse_deep_gcn.11
= control target key start
LH: loop header
LB: loop body
LE: loop exit
PB: predicated region body
PF: predicated region fallthrough
CT: control target
= control target key end

     0   :  { %vm40_vm0 = vcmask 261120   ;;  %vm118_vm1 = vcmask 523264   ;;  %s242_s1 = inlined_call_operand.vmem [shape: bf16[32,64], index: 1, kind: input, shape index: {}]   ;;  %s243_s0 = inlined_call_operand.vmem [shape: f32[64,32], index: 0, kind: input, shape index: {}]   ;;  %s244_s2 = inlined_call_operand.vmem [shape: f32[64,64], index: 2, kind: output, shape index: {}]  }
   0x1   :  { %v159_v0 = vld [vmem:[%s242_s1 + $0x8] sm:$0xff]   ;;  %v160_v1 = vld [vmem:[%s242_s1] sm:$0xff]   ;;  %v14_v7 = vld [vmem:[%s243_s0 + $0x10] sm:$0xff] }
   0x2   :  { %143 = vmatprep.subr.bf16.mxu0 %v159_v0  ;;  %155 = vmatprep.subr.bf16.mxu1 %v159_v0  ;;  %v12_v2 = vld [vmem:[%s243_s0] sm:$0xff]  ;;  %v13_v3 = vld [vmem:[%s243_s0 + $0x8] sm:$0xff]  ;;  %v15_v8 = vld [vmem:[%s243_s0 + $0x18] sm:$0xff] }
   0x3   :  { %v16_v4 = vld [vmem:[%s243_s0 + $0x20] sm:$0xff]  ;;  %144 = vmatpush3.bf16.msra.mxu0 %v159_v0  ;;  %157 = vmatpush3.bf16.msra.mxu1 %v159_v0  ;;  %v20_v5 = vpack.c.bf16 %v13_v3, %v12_v2  ;;  %v17_v6 = vld [vmem:[%s243_s0 + $0x28] sm:$0xff]  ;;  %v18_v10 = vld [vmem:[%s243_s0 + $0x30] sm:$0xff]  ;;  %v21_v12 = vpack.c.bf16 %v15_v8, %v14_v7 }
   0x4   :  { %145 = vmatprep.subr.bf16.mxu0 %v160_v1  ;;  %156 = vmatprep.subr.bf16.mxu1 %v160_v1  ;;  %v22_v9 = vpack.c.bf16 %v17_v6, %v16_v4  ;;  %v19_v11 = vld [vmem:[%s243_s0 + $0x38] sm:$0xff] }
   0x5   :  { %147 = vmatprep.mubr.msk.bf16.mxu0 %vm40_vm0, %v20_v5  ;;  %v23_v13 = vpack.c.bf16 %v19_v11, %v18_v10 }
   0x6   :  { %151 = vmatprep.mubr.msk.bf16.mxu1 %vm40_vm0, %v22_v9 }
   0x7   :  { %146 = vmatpush3.bf16.msra.mxu0 %v160_v1  ;;  %158 = vmatpush3.bf16.msra.mxu1 %v160_v1 }
   0xa   :  { %148 = vmatmul.mubr.msk.bf16.vlgmr.msra.gmra.mxu0 %vm40_vm0, %v21_v12  ;;  %152 = vmatmul.mubr.msk.bf16.vlgmr.msra.gmra.mxu1 %vm40_vm0, %v23_v13 }
  0xca   :  { %v149_v14 = vpop.f32.mrf.mxu0  ;;  %v153_v15 = vpop.f32.mrf.mxu1 }
  0xcb   :  { %121 = vst.msk [vmem:[%s244_s2 + $0x10] sm:$0xff] %vm118_vm1, %v149_v14  ;;  %125 = vst.msk [vmem:[%s244_s2 + $0x30] sm:$0xff] %vm118_vm1, %v153_v15 }
  0xcc   :  { %v87_v16 = vpop.f32.mrf.mxu0  ;;  %v103_v17 = vpop.f32.mrf.mxu1 }
  0xcd   :  { %119 = vst.msk [vmem:[%s244_s2] sm:$0xff] %vm118_vm1, %v87_v16  ;;  %123 = vst.msk [vmem:[%s244_s2 + $0x20] sm:$0xff] %vm118_vm1, %v103_v17 }
  0xce   :  { %v150_v18 = vpop.f32.mrf.mxu0  ;;  %v154_v19 = vpop.f32.mrf.mxu1 }
  0xcf   :  { %122 = vst.msk [vmem:[%s244_s2 + $0x18] sm:$0xff] %vm118_vm1, %v150_v18  ;;  %126 = vst.msk [vmem:[%s244_s2 + $0x38] sm:$0xff] %vm118_vm1, %v154_v19 }
  0xd0   :  { %v90_v20 = vpop.f32.mrf.mxu0  ;;  %v106_v21 = vpop.f32.mrf.mxu1 }
  0xd1   :  { %120 = vst.msk [vmem:[%s244_s2 + $0x8] sm:$0xff] %vm118_vm1, %v90_v20  ;;  %124 = vst.msk [vmem:[%s244_s2 + $0x28] sm:$0xff] %vm118_vm1, %v106_v21 }

// kernel: neg.8
= control target key start
LH: loop header
LB: loop body
LE: loop exit
PB: predicated region body
PF: predicated region fallthrough
CT: control target
= control target key end

     0   :  { %s136_s0 = inlined_call_operand.vmem [shape: f32[64,64], index: 0, kind: input, shape index: {}]   ;;  %s137_s1 = inlined_call_operand.vmem [shape: f32[64,64], index: 1, kind: output, shape index: {}]  }
   0x1   :  { %v2_v0 = vld [vmem:[%s136_s0] sm:$0xff]  ;;  %v64_v1 = vld [vmem:[%s136_s0 + $0x8] sm:$0xff]  ;;  %v66_v2 = vld [vmem:[%s136_s0 + $0x10] sm:$0xff] }
   0x2   :  { %v5_v3 = vxor.u32 2147483648, %v2_v0  ;;  %v12_v4 = vxor.u32 2147483648, %v64_v1  ;;  %v20_v5 = vxor.u32 2147483648, %v66_v2  ;;  %v68_v6 = vld [vmem:[%s136_s0 + $0x18] sm:$0xff]  ;;  %v70_v7 = vld [vmem:[%s136_s0 + $0x20] sm:$0xff]  ;;  %v72_v8 = vld [vmem:[%s136_s0 + $0x28] sm:$0xff] }
   0x3   :  { %v28_v9 = vxor.u32 2147483648, %v68_v6  ;;  %v36_v10 = vxor.u32 2147483648, %v70_v7  ;;  %v44_v11 = vxor.u32 2147483648, %v72_v8  ;;  %v74_v12 = vld [vmem:[%s136_s0 + $0x30] sm:$0xff]  ;;  %v76_v13 = vld [vmem:[%s136_s0 + $0x38] sm:$0xff] }
   0x4   :  { %7 = vst [vmem:[%s137_s1] sm:$0xff] %v5_v3  ;;  %65 = vst [vmem:[%s137_s1 + $0x8] sm:$0xff] %v12_v4  ;;  %v52_v14 = vxor.u32 2147483648, %v74_v12  ;;  %v60_v15 = vxor.u32 2147483648, %v76_v13 }
   0x5   :  { %67 = vst [vmem:[%s137_s1 + $0x10] sm:$0xff] %v20_v5  ;;  %69 = vst [vmem:[%s137_s1 + $0x18] sm:$0xff] %v28_v9 }
   0x6   :  { %71 = vst [vmem:[%s137_s1 + $0x20] sm:$0xff] %v36_v10  ;;  %73 = vst [vmem:[%s137_s1 + $0x28] sm:$0xff] %v44_v11 }
   0x7   :  { %75 = vst [vmem:[%s137_s1 + $0x30] sm:$0xff] %v52_v14  ;;  %77 = vst [vmem:[%s137_s1 + $0x38] sm:$0xff] %v60_v15 }

// kernel: sparse_deep_gcn.12
= control target key start
LH: loop header
LB: loop body
LE: loop exit
PB: predicated region body
PF: predicated region fallthrough
CT: control target
= control target key end

     0   :  { %vm97_vm0 = vcmask 261120   ;;  %s232_s0 = inlined_call_operand.vmem [shape: f32[64,64], index: 0, kind: input, shape index: {}]   ;;  %s233_s1 = inlined_call_operand.vmem [shape: f32[64,32], index: 1, kind: input, shape index: {}]   ;;  %s234_s2 = inlined_call_operand.vmem [shape: f32[1,32], index: 2, kind: input, shape index: {}]   ;;  %s235_s3 = inlined_call_operand.vmem [shape: f32[1,32], index: 3, kind: input, shape index: {}]   ;;  %s236_s4 = inlined_call_operand.vmem [shape: f32[1,32], index: 4, kind: input, shape index: {}]   ;;  %s237_s5 = inlined_call_operand.vmem [shape: f32[64,32], index: 5, kind: output, shape index: {}]  }
   0x1   :  { %v20_v0 = vld [vmem:[%s232_s0] sm:$0xff]  ;;  %v21_v4 = vld [vmem:[%s232_s0 + $0x8] sm:$0xff]  ;;  %v22_v7 = vld [vmem:[%s232_s0 + $0x10] sm:$0xff] }
   0x2   :  { %v28_v1 = vld [vmem:[%s233_s1] sm:$0xff]  ;;  %v29_v6 = vld [vmem:[%s233_s1 + $0x8] sm:$0xff]  ;;  %v30_v8 = vld [vmem:[%s233_s1 + $0x10] sm:$0xff] }
   0x3   :  { %v110_v2 = vld [vmem:[%s234_s2] ss:$0 sm:$0xff]  ;;  %v36_v3 = vadd.f32 %v28_v1, %v20_v0  ;;  %v37_v10 = vadd.f32 %v29_v6, %v21_v4  ;;  %v38_v11 = vadd.f32 %v30_v8, %v22_v7  ;;  %v23_v12 = vld [vmem:[%s232_s0 + $0x18] sm:$0xff]  ;;  %v25_v17 = vld [vmem:[%s232_s0 + $0x28] sm:$0xff] }
   0x4   :  { %v111_v5 = vld [vmem:[%s235_s3] ss:$0 sm:$0xff]  ;;  %v31_v13 = vld [vmem:[%s233_s1 + $0x18] sm:$0xff]  ;;  %v33_v18 = vld [vmem:[%s233_s1 + $0x28] sm:$0xff] }
   0x5   :  { %v51_v9 = vadd.f32 %v110_v2, %v36_v3  ;;  %v24_v14 = vld [vmem:[%s232_s0 + $0x20] sm:$0xff]  ;;  %v39_v15 = vadd.f32 %v31_v13, %v23_v12  ;;  %v52_v20 = vadd.f32 %v110_v2, %v37_v10  ;;  %v53_v21 = vadd.f32 %v110_v2, %v38_v11  ;;  %v26_v23 = vld [vmem:[%s232_s0 + $0x30] sm:$0xff]  ;;  %v27_v25 = vld [vmem:[%s232_s0 + $0x38] sm:$0xff] }
   0x6   :  { %v32_v16 = vld [vmem:[%s233_s1 + $0x20] sm:$0xff]  ;;  %v34_v24 = vld [vmem:[%s233_s1 + $0x30] sm:$0xff]  ;;  %v41_v28 = vadd.f32 %v33_v18, %v25_v17  ;;  %v35_v30 = vld [vmem:[%s233_s1 + $0x38] sm:$0xff] }
   0x7   :  { %v59_v19 = vmax.f32 %v51_v9, 0.0  ;;  %v40_v22 = vadd.f32 %v32_v16, %v24_v14  ;;  %v112_v26 = vld [vmem:[%s236_s4] ss:$0 sm:$0xff]  ;;  %v54_v27 = vadd.f32 %v110_v2, %v39_v15  ;;  %v42_v29 = vadd.f32 %v34_v24, %v26_v23 }
   0x8   :  { %v60_v32 = vmax.f32 %v52_v20, 0.0  ;;  %v61_v33 = vmax.f32 %v53_v21, 0.0  ;;  %v56_v36 = vadd.f32 %v110_v2, %v41_v28  ;;  %v43_v38 = vadd.f32 %v35_v30, %v27_v25 }
   0x9   :  { %v74_v31 = vmul.f32 %v111_v5, %v59_v19  ;;  %v55_v34 = vadd.f32 %v110_v2, %v40_v22  ;;  %v62_v35 = vmax.f32 %v54_v27, 0.0  ;;  %v57_v37 = vadd.f32 %v110_v2, %v42_v29 }
   0xa   :  { %v75_v40 = vmul.f32 %v111_v5, %v60_v32  ;;  %v76_v41 = vmul.f32 %v111_v5, %v61_v33  ;;  %v64_v44 = vmax.f32 %v56_v36, 0.0  ;;  %v58_v46 = vadd.f32 %v110_v2, %v43_v38 }
   0xb   :  { %v89_v39 = vadd.f32 %v112_v26, %v74_v31  ;;  %v63_v42 = vmax.f32 %v55_v34, 0.0  ;;  %v77_v43 = vmul.f32 %v111_v5, %v62_v35  ;;  %v65_v45 = vmax.f32 %v57_v37, 0.0 }
   0xc   :  { %v90_v47 = vadd.f32 %v112_v26, %v75_v40  ;;  %v91_v48 = vadd.f32 %v112_v26, %v76_v41  ;;  %v79_v51 = vmul.f32 %v111_v5, %v64_v44  ;;  %v66_v53 = vmax.f32 %v58_v46, 0.0 }
   0xd   :  { %98 = vst.msk [vmem:[%s237_s5] sm:$0xff] %vm97_vm0, %v89_v39  ;;  %v78_v49 = vmul.f32 %v111_v5, %v63_v42  ;;  %v92_v50 = vadd.f32 %v112_v26, %v77_v43  ;;  %v80_v52 = vmul.f32 %v111_v5, %v65_v45 }
   0xe   :  { %99 = vst.msk [vmem:[%s237_s5 + $0x8] sm:$0xff] %vm97_vm0, %v90_v47  ;;  %100 = vst.msk [vmem:[%s237_s5 + $0x10] sm:$0xff] %vm97_vm0, %v91_v48  ;;  %v94_v55 = vadd.f32 %v112_v26, %v79_v51  ;;  %v81_v57 = vmul.f32 %v111_v5, %v66_v53 }
   0xf   :  { %v93_v54 = vadd.f32 %v112_v26, %v78_v49  ;;  %101 = vst.msk [vmem:[%s237_s5 + $0x18] sm:$0xff] %vm97_vm0, %v92_v50  ;;  %v95_v56 = vadd.f32 %v112_v26, %v80_v52 }
  0x10   :  { %103 = vst.msk [vmem:[%s237_s5 + $0x28] sm:$0xff] %vm97_vm0, %v94_v55  ;;  %v96_v58 = vadd.f32 %v112_v26, %v81_v57 }
  0x11   :  { %102 = vst.msk [vmem:[%s237_s5 + $0x20] sm:$0xff] %vm97_vm0, %v93_v54  ;;  %104 = vst.msk [vmem:[%s237_s5 + $0x30] sm:$0xff] %vm97_vm0, %v95_v56 }
  0x12   :  { %105 = vst.msk [vmem:[%s237_s5 + $0x38] sm:$0xff] %vm97_vm0, %v96_v58 }

// kernel: sparse_deep_gcn.13
= control target key start
LH: loop header
LB: loop body
LE: loop exit
PB: predicated region body
PF: predicated region fallthrough
CT: control target
= control target key end

     0   :  { %vm27_vm0 = vcmask 261120   ;;  %v277_v62 = vlaneseq  ;;  %vm305_vm1 = vcmask 523264   ;;  %s570_s0 = inlined_call_operand.vmem [shape: f32[64,32], index: 0, kind: input, shape index: {}, may-alias: {0,1}]   ;;  %s571_s1 = inlined_call_operand.vmem [shape: f32[64,32], index: 1, kind: input, shape index: {}, may-alias: {0,1}]   ;;  %s572_s2 = inlined_call_operand.vmem [shape: f32[64,64], index: 2, kind: output, shape index: {}]  }
   0x1   :  { %v413_v0 = vld [vmem:[%s570_s0] sm:$0xff]  ;;  %v418_v1 = vld [vmem:[%s570_s0 + $0x8] sm:$0xff]  ;;  %v423_v2 = vld [vmem:[%s570_s0 + $0x10] sm:$0xff] }
   0x2   :  { %v213_v3 = vmul.f32 %v413_v0, %v413_v0  ;;  %v214_v4 = vmul.f32 %v418_v1, %v418_v1  ;;  %v215_v5 = vmul.f32 %v423_v2, %v423_v2  ;;  %v14_v6 = vld [vmem:[%s570_s0 + $0x18] sm:$0xff]  ;;  %v15_v8 = vld [vmem:[%s570_s0 + $0x20] sm:$0xff]  ;;  %v16_v9 = vld [vmem:[%s570_s0 + $0x28] sm:$0xff] }
   0x3   :  { %v216_v7 = vmul.f32 %v14_v6, %v14_v6  ;;  %v18_v10 = vld [vmem:[%s570_s0 + $0x38] sm:$0xff]  ;;  %v19_v13 = vld [vmem:[%s571_s1] sm:$0xff]  ;;  %v217_v17 = vmul.f32 %v15_v8, %v15_v8  ;;  %v218_v18 = vmul.f32 %v16_v9, %v16_v9  ;;  %v17_v19 = vld [vmem:[%s570_s0 + $0x30] sm:$0xff] }
   0x4   :  { %v221_v11 = vsel %vm27_vm0, %v213_v3, 0.0  ;;  %v227_v12 = vsel %vm27_vm0, %v215_v5, 0.0  ;;  %350 = vmatprep.subr.msk.mxu0 %vm27_vm0, %v18_v10  ;;  %378 = vmatprep.subr.msk.mxu1 %vm27_vm0, %v18_v10  ;;  %v23_v14 = vld [vmem:[%s571_s1 + $0x20] sm:$0xff]  ;;  %v224_v15 = vsel %vm27_vm0, %v214_v4, 0.0  ;;  %v219_v22 = vmul.f32 %v17_v19, %v17_v19  ;;  %v20_v24 = vld [vmem:[%s571_s1 + $0x8] sm:$0xff]  ;;  %v21_v29 = vld [vmem:[%s571_s1 + $0x10] sm:$0xff] }
   0x5   :  { %222 = vadd.xlane.f32.xlu0 %v221_v11  ;;  %228 = vadd.xlane.f32.xlu1 %v227_v12  ;;  %v230_v16 = vsel %vm27_vm0, %v216_v7, 0.0  ;;  %v233_v20 = vsel %vm27_vm0, %v217_v17, 0.0  ;;  %v236_v21 = vsel %vm27_vm0, %v218_v18, 0.0  ;;  %v220_v23 = vmul.f32 %v18_v10, %v18_v10  ;;  %v22_v30 = vld [vmem:[%s571_s1 + $0x18] sm:$0xff]  ;;  %v24_v35 = vld [vmem:[%s571_s1 + $0x28] sm:$0xff]  ;;  %v25_v40 = vld [vmem:[%s571_s1 + $0x30] sm:$0xff] }
   0x6   :  { %351 = vmatpush3.xpose.msk.msra.mxu0 %vm27_vm0, %v18_v10  ;;  %386 = vmatpush3.xpose.msk.msra.mxu1 %vm27_vm0, %v18_v10  ;;  %v239_v25 = vsel %vm27_vm0, %v219_v22, 0.0  ;;  %v181_v27 = vmul.f32 %v19_v13, %v19_v13  ;;  %v182_v28 = vmul.f32 %v20_v24, %v20_v24  ;;  %v183_v32 = vmul.f32 %v21_v29, %v21_v29  ;;  %v26_v41 = vld [vmem:[%s571_s1 + $0x38] sm:$0xff] }
   0x7   :  { %352 = vmatprep.subr.msk.mxu0 %vm27_vm0, %v17_v19  ;;  %379 = vmatprep.subr.msk.mxu1 %vm27_vm0, %v17_v19  ;;  %v242_v26 = vsel %vm27_vm0, %v220_v23, 0.0  ;;  %v184_v34 = vmul.f32 %v22_v30, %v22_v30  ;;  %v185_v36 = vmul.f32 %v23_v14, %v23_v14  ;;  %v186_v39 = vmul.f32 %v24_v35, %v24_v35 }
   0x8   :  { %366 = vmatprep.mubr.msk.f32.mxu0 %vm27_vm0, %v19_v13  ;;  %372 = vmatprep.mubr.msk.f32.mxu1 %vm27_vm0, %v23_v14  ;;  %v189_v31 = vsel %vm27_vm0, %v181_v27, 0.0  ;;  %v192_v33 = vsel %vm27_vm0, %v182_v28, 0.0  ;;  %v195_v37 = vsel %vm27_vm0, %v183_v32, 0.0  ;;  %v187_v43 = vmul.f32 %v25_v40, %v25_v40 }
   0x9   :  { %225 = vadd.xlane.f32.xlu0 %v224_v15  ;;  %231 = vadd.xlane.f32.xlu1 %v230_v16  ;;  %v198_v38 = vsel %vm27_vm0, %v184_v34, 0.0  ;;  %v201_v42 = vsel %vm27_vm0, %v185_v36, 0.0  ;;  %v204_v44 = vsel %vm27_vm0, %v186_v39, 0.0  ;;  %v188_v45 = vmul.f32 %v26_v41, %v26_v41 }
   0xa   :  { %353 = vmatpush3.xpose.msk.msra.mxu0 %vm27_vm0, %v17_v19  ;;  %387 = vmatpush3.xpose.msk.msra.mxu1 %vm27_vm0, %v17_v19  ;;  %v207_v46 = vsel %vm27_vm0, %v187_v43, 0.0 }
   0xb   :  { %354 = vmatprep.subr.msk.mxu0 %vm27_vm0, %v16_v9  ;;  %380 = vmatprep.subr.msk.mxu1 %vm27_vm0, %v16_v9  ;;  %v210_v47 = vsel %vm27_vm0, %v188_v45, 0.0 }
   0xd   :  { %234 = vadd.xlane.f32.xlu0 %v233_v20  ;;  %237 = vadd.xlane.f32.xlu1 %v236_v21 }
   0xe   :  { %355 = vmatpush3.xpose.msk.msra.mxu0 %vm27_vm0, %v16_v9  ;;  %388 = vmatpush3.xpose.msk.msra.mxu1 %vm27_vm0, %v16_v9 }
   0xf   :  { %356 = vmatprep.subr.msk.mxu0 %vm27_vm0, %v15_v8  ;;  %381 = vmatprep.subr.msk.mxu1 %vm27_vm0, %v15_v8 }
  0x11   :  { %240 = vadd.xlane.f32.xlu0 %v239_v25  ;;  %243 = vadd.xlane.f32.xlu1 %v242_v26 }
  0x12   :  { %357 = vmatpush3.xpose.msk.msra.mxu0 %vm27_vm0, %v15_v8  ;;  %389 = vmatpush3.xpose.msk.msra.mxu1 %vm27_vm0, %v15_v8 }
  0x13   :  { %358 = vmatprep.subr.msk.mxu0 %vm27_vm0, %v14_v6  ;;  %382 = vmatprep.subr.msk.mxu1 %vm27_vm0, %v14_v6 }
  0x15   :  { %190 = vadd.xlane.f32.xlu0 %v189_v31  ;;  %193 = vadd.xlane.f32.xlu1 %v192_v33 }
  0x16   :  { %359 = vmatpush3.xpose.msk.msra.mxu0 %vm27_vm0, %v14_v6  ;;  %390 = vmatpush3.xpose.msk.msra.mxu1 %vm27_vm0, %v14_v6 }
  0x17   :  { %360 = vmatprep.subr.msk.mxu0 %vm27_vm0, %v423_v2  ;;  %383 = vmatprep.subr.msk.mxu1 %vm27_vm0, %v423_v2 }
  0x19   :  { %196 = vadd.xlane.f32.xlu0 %v195_v37  ;;  %199 = vadd.xlane.f32.xlu1 %v198_v38 }
  0x1a   :  { %361 = vmatpush3.xpose.msk.msra.mxu0 %vm27_vm0, %v423_v2  ;;  %391 = vmatpush3.xpose.msk.msra.mxu1 %vm27_vm0, %v423_v2  ;;  %v278_v2 = vshrl.u32 %v277_v62, 7 }
  0x1b   :  { %362 = vmatprep.subr.msk.mxu0 %vm27_vm0, %v418_v1  ;;  %384 = vmatprep.subr.msk.mxu1 %vm27_vm0, %v418_v1 }
  0x1c   :  { %v279_v7 = vsub.s32 0, %v278_v2 }
  0x1d   :  { %202 = vadd.xlane.f32.xlu0 %v201_v42  ;;  %205 = vadd.xlane.f32.xlu1 %v204_v44 }
  0x1e   :  { %363 = vmatpush3.xpose.msk.msra.mxu0 %vm27_vm0, %v418_v1  ;;  %392 = vmatpush3.xpose.msk.msra.mxu1 %vm27_vm0, %v418_v1 }
  0x1f   :  { %364 = vmatprep.subr.msk.mxu0 %vm27_vm0, %v413_v0  ;;  %385 = vmatprep.subr.msk.mxu1 %vm27_vm0, %v413_v0 }
  0x21   :  { %208 = vadd.xlane.f32.xlu0 %v207_v46  ;;  %211 = vadd.xlane.f32.xlu1 %v210_v47 }
  0x22   :  { %365 = vmatpush3.xpose.msk.msra.mxu0 %vm27_vm0, %v413_v0  ;;  %393 = vmatpush3.xpose.msk.msra.mxu1 %vm27_vm0, %v413_v0 }
  0x25   :  { %367 = vmatmul.mubr.msk.f32.vlgmr.msra.gmra.mxu0 %vm27_vm0, %v20_v24  ;;  %373 = vmatmul.mubr.msk.f32.vlgmr.msra.gmra.mxu1 %vm27_vm0, %v24_v35 }
  0x26   :  { %369 = vmatprep.mubr.msk.f32.mxu0 %vm27_vm0, %v21_v29  ;;  %375 = vmatprep.mubr.msk.f32.mxu1 %vm27_vm0, %v25_v40 }
  0x29   :  { %370 = vmatmul.mubr.msk.f32.gmra.mxu0 %vm27_vm0, %v22_v30  ;;  %376 = vmatmul.mubr.msk.f32.gmra.mxu1 %vm27_vm0, %v26_v41 }
  0x8e   :  { %v223_v48 = vpop.xlane.xlu0 %222  ;;  %v229_v50 = vpop.xlane.xlu1 %228 }
  0x8f   :  { %245 = vxpose.xlu0.b32.start [1/8] (short) (narrow) %v223_v48, 8 }
  0x92   :  { %v226_v49 = vpop.xlane.xlu0 %225  ;;  %v232_v51 = vpop.xlane.xlu1 %231 }
  0x93   :  { %246 = vxpose.xlu0.b32.cont [2/8] (short) (narrow) %v226_v49, 8 }
  0x96   :  { %v235_v52 = vpop.xlane.xlu0 %234  ;;  %v238_v53 = vpop.xlane.xlu1 %237 }
  0x97   :  { %247 = vxpose.xlu0.b32.cont [3/8] (short) (narrow) %v229_v50, 8 }
  0x9a   :  { %v241_v54 = vpop.xlane.xlu0 %240  ;;  %v244_v55 = vpop.xlane.xlu1 %243 }
  0x9b   :  { %248 = vxpose.xlu0.b32.cont [4/8] (short) (narrow) %v232_v51, 8 }
  0x9e   :  { %v191_v56 = vpop.xlane.xlu0 %190  ;;  %v194_v57 = vpop.xlane.xlu1 %193 }
  0x9f   :  { %249 = vxpose.xlu0.b32.cont [5/8] (short) (narrow) %v235_v52, 8 }
  0xa2   :  { %v197_v58 = vpop.xlane.xlu0 %196  ;;  %v200_v61 = vpop.xlane.xlu1 %199 }
  0xa3   :  { %250 = vxpose.xlu0.b32.cont [6/8] (short) (narrow) %v238_v53, 8 }
  0xa6   :  { %v203_v63 = vpop.xlane.xlu0 %202  ;;  %v206_v3 = vpop.xlane.xlu1 %205 }
  0xa7   :  { %251 = vxpose.xlu0.b32.cont [7/8] (short) (narrow) %v241_v54, 8 }
  0xaa   :  { %v209_v6 = vpop.xlane.xlu0 %208  ;;  %v212_v16 = vpop.xlane.xlu1 %211 }
  0xab   :  { %252 = vxpose.xlu0.b32.end [8/8] (short) (narrow) %v244_v55, 8 }
  0xe5   :  { %v368_v59 = vpop.f32.mrf.mxu0  ;;  %v374_v60 = vpop.f32.mrf.mxu1 }
  0xe6   :  { %v290_v10 = vmul.f32 2.0, %v368_v59  ;;  %v294_v12 = vmul.f32 2.0, %v374_v60 }
  0xe7   :  { %v142_v0 = vpop.f32.mrf.mxu0  ;;  %v162_v1 = vpop.f32.mrf.mxu1 }
  0xe8   :  { %v289_v13 = vmul.f32 2.0, %v142_v0  ;;  %v293_v14 = vmul.f32 2.0, %v162_v1 }
  0xe9   :  { %v371_v4 = vpop.f32.mrf.mxu0  ;;  %v377_v5 = vpop.f32.mrf.mxu1 }
  0xea   :  { %v292_v17 = vmul.f32 2.0, %v371_v4  ;;  %v296_v18 = vmul.f32 2.0, %v377_v5 }
  0xeb   :  { %v152_v8 = vpop.f32.mrf.mxu0  ;;  %v172_v9 = vpop.f32.mrf.mxu1 }
  0xec   :  { %v291_v19 = vmul.f32 2.0, %v152_v8  ;;  %v295_v20 = vmul.f32 2.0, %v172_v9 }
 0x10b   :  { %v261_v11 = vpop.trf.xlu0 }
 0x10c   :  { %v280_v15 = vrot.slane %v261_v11, %v279_v7 }
 0x10e   :  { %v281_v21 = vadd.f32 %v280_v15, %v191_v56  ;;  %v282_v22 = vadd.f32 %v280_v15, %v194_v57  ;;  %v284_v23 = vadd.f32 %v280_v15, %v200_v61  ;;  %v285_v24 = vadd.f32 %v280_v15, %v203_v63 }
 0x10f   :  { %v286_v25 = vadd.f32 %v280_v15, %v206_v3  ;;  %v283_v26 = vadd.f32 %v280_v15, %v197_v58  ;;  %v287_v27 = vadd.f32 %v280_v15, %v209_v6  ;;  %v288_v28 = vadd.f32 %v280_v15, %v212_v16 }
 0x110   :  { %v297_v29 = vsub.f32 %v281_v21, %v289_v13  ;;  %v298_v30 = vsub.f32 %v282_v22, %v290_v10  ;;  %v300_v31 = vsub.f32 %v284_v23, %v292_v17  ;;  %v301_v32 = vsub.f32 %v285_v24, %v293_v14 }
 0x111   :  { %v302_v33 = vsub.f32 %v286_v25, %v294_v12  ;;  %v299_v34 = vsub.f32 %v283_v26, %v291_v19  ;;  %v303_v35 = vsub.f32 %v287_v27, %v295_v20  ;;  %v304_v36 = vsub.f32 %v288_v28, %v296_v18 }
 0x112   :  { %306 = vst.msk [vmem:[%s572_s2] sm:$0xff] %vm305_vm1, %v297_v29  ;;  %307 = vst.msk [vmem:[%s572_s2 + $0x8] sm:$0xff] %vm305_vm1, %v298_v30 }
 0x113   :  { %309 = vst.msk [vmem:[%s572_s2 + $0x18] sm:$0xff] %vm305_vm1, %v300_v31  ;;  %310 = vst.msk [vmem:[%s572_s2 + $0x20] sm:$0xff] %vm305_vm1, %v301_v32 }
 0x114   :  { %308 = vst.msk [vmem:[%s572_s2 + $0x10] sm:$0xff] %vm305_vm1, %v299_v34  ;;  %311 = vst.msk [vmem:[%s572_s2 + $0x28] sm:$0xff] %vm305_vm1, %v302_v33 }
 0x115   :  { %312 = vst.msk [vmem:[%s572_s2 + $0x30] sm:$0xff] %vm305_vm1, %v303_v35  ;;  %313 = vst.msk [vmem:[%s572_s2 + $0x38] sm:$0xff] %vm305_vm1, %v304_v36 }

// kernel: sparse_deep_gcn.21
= control target key start
LH: loop header
LB: loop body
LE: loop exit
PB: predicated region body
PF: predicated region fallthrough
CT: control target
= control target key end

     0   :  { %s3673_s0 = inlined_call_operand.vmem [shape: f32[64,32], index: 0, kind: input, shape index: {}]   ;;  %s3674_s1 = inlined_call_operand.vmem [shape: f32[64,32], index: 1, kind: input, shape index: {}]   ;;  %s3675_s2 = inlined_call_operand.vmem [shape: f32[64,32], index: 2, kind: input, shape index: {}]   ;;  %s3676_s3 = inlined_call_operand.vmem [shape: f32[9], index: 3, kind: input, shape index: {}]   ;;  %s3677_s4 = inlined_call_operand.vmem [shape: bf16[32,128], index: 4, kind: input, shape index: {}]   ;;  %s3678_s5 = inlined_call_operand.vmem [shape: f32[1,128], index: 5, kind: input, shape index: {}]   ;;  %s3679_s6 = inlined_call_operand.vmem [shape: bf16[96,512], index: 6, kind: input, shape index: {}]   ;;  %s3680_s7 = inlined_call_operand.vmem [shape: f32[1,512], index: 7, kind: input, shape index: {}]   ;;  %s3681_s8 = inlined_call_operand.vmem [shape: f32[1,512], index: 8, kind: input, shape index: {}]   ;;  %s3682_s9 = inlined_call_operand.vmem [shape: f32[1,512], index: 9, kind: input, shape index: {}]   ;;  %s3683_s10 = inlined_call_operand.vmem [shape: bf16[512,256], index: 10, kind: input, shape index: {}]   ;;  %s3684_s11 = inlined_call_operand.vmem [shape: f32[1,256], index: 11, kind: input, shape index: {}]   ;;  %s3685_s12 = inlined_call_operand.vmem [shape: f32[1,256], index: 12, kind: input, shape index: {}]   ;;  %s3686_s13 = inlined_call_operand.vmem [shape: f32[1,256], index: 13, kind: input, shape index: {}]   ;;  %s3687_s14 = inlined_call_operand.vmem [shape: bf16[256,64], index: 14, kind: input, shape index: {}]   ;;  %s3688_s15 = inlined_call_operand.vmem [shape: f32[1,64], index: 15, kind: input, shape index: {}]   ;;  %s3689_s16 = inlined_call_operand.vmem [shape: f32[1,64], index: 16, kind: input, shape index: {}]   ;;  %s3690_s17 = inlined_call_operand.vmem [shape: f32[1,64], index: 17, kind: input, shape index: {}]   ;;  %s3691_s18 = inlined_call_operand.vmem [shape: bf16[64,128], index: 18, kind: input, shape index: {}]   ;;  %s3692_s19 = inlined_call_operand.vmem [shape: f32[1,128], index: 19, kind: input, shape index: {}]   ;;  %s3693_s20 = inlined_call_operand.vmem [shape: f32[64,128], index: 20, kind: output, shape index: {}]  }
   0x1   :  { %3698 = sst [smem:[#allocation5_spill]] %s3673_s0 }
   0x2   :  { %3699 = sst [smem:[#allocation6_spill]] %s3674_s1 }
   0x3   :  { %3700 = sst [smem:[#allocation7_spill]] %s3675_s2 }
   0x4   :  { %3701 = sst [smem:[#allocation8_spill]] %s3676_s3 }
   0x5   :  { %3702 = sst [smem:[#allocation9_spill]] %s3677_s4 }
   0x6   :  { %25 = vsyncpa [#allocation3], 0  ;;  %s3703_s23 = sld [smem:[#allocation8_spill]] }
   0xc   :  { %s38_s24 = sshll.u32 %s3703_s23, 4  ;;  %s39_s24 = int_to_ptr.vmem [resolvable:$true] %s38_s24 }
   0xd   :  { %s2657_s2 = scalar_lea.vmem %s39_s24, 16  ;;  %p2662_p1 = scmp.lt.s32.totalorder %s39_s24, %s39_s24 }
   0xe   :  { %p2658_p0 = scmp.ne.s32.totalorder %s39_s24, %s2657_s2  ;;  %p2663_p2 = scmp.lt.s32.totalorder %s2657_s2, %s2657_s2 }
  0x10   :  { %p2664_p3 = por %p2663_p2, %p2662_p1 }
  0x12   :  { %p2665_p4 = pnand %p2664_p3, %p2658_p0 }
  0x14   :  { %2668 = shalt.err (!%p2665_p4)
}
  0x15   :  { %s2671_s25 = smov [#allocation2]  }
  0x16   :  { %41 = dma.vmem_to_smem %s39_s24, 16, %s2671_s25, [#allocation3]  }
  0x17   :  { %2669 = dma.done.wait [#allocation3], 16  }
  0x18   :  { %2670 = vsyncadd [#allocation3], 4294967280 }
  0x19   :  { %77 = sfence }
  0x1a   :  { %s3704_s27 = sld [smem:[#allocation9_spill]]  ;;  %s2672_s4 = smov 96   ;;  %vm158_vm0 = vcmask 261120   ;;  %v2909_v48 = vld [vmem:[%s3678_s5] ss:$0 sm:$0xff]  ;;  %vm680_vm1 = vcmask 523264  }
  0x1b   :  { %s108_s29 = sld [smem:[#allocation2]]  ;;  %274 = vrot.lane.b32.xlu1 %v2909_v48, %s2672_s4  ;;  %s2673_s0 = smov 64   ;;  %vm859_vm2 = vcmask 785408  }
  0x1c   :  { %s2167_s30 = sld [smem:[#allocation2 + $0x1]] }
  0x1d   :  { %s3705_s1 = sld [smem:[#allocation6_spill]] }
  0x1e   :  { %s3706_s25 = sld [smem:[#allocation7_spill]] }
  0x1f   :  { %s2175_s5 = sld [smem:[#allocation2 + $0x2]] }
  0x20   :  { %v2787_v0 = vld [vmem:[%s3704_s27 + $0x8] sm:$0xff]   ;;  %v2792_v1 = vld [vmem:[%s3704_s27] sm:$0xff]   ;;  %s2176_s21 = sld [smem:[#allocation2 + $0x3]] }
  0x21   :  { %2390 = vmatprep.subr.bf16.mxu0 %v2787_v0  ;;  %2454 = vmatprep.subr.bf16.mxu1 %v2787_v0  ;;  %v109_v12 = vstv %s108_s29  ;;  %s3707_s23 = sld [smem:[#allocation5_spill]] }
  0x22   :  { %2391 = vmatpush3.bf16.msra.mxu0 %v2787_v0  ;;  %2456 = vmatpush3.bf16.msra.mxu1 %v2787_v0  ;;  %v119_v17 = vstv %s2167_s30  ;;  %s2182_s24 = sld [smem:[#allocation2 + $0x5]] }
  0x23   :  { %2392 = vmatprep.subr.bf16.mxu0 %v2792_v1  ;;  %v2802_v2 = vld [vmem:[%s3705_s1] sm:$0xff]  ;;  %v2807_v3 = vld [vmem:[%s3705_s1 + $0x8] sm:$0xff]  ;;  %2455 = vmatprep.subr.bf16.mxu1 %v2792_v1  ;;  %v2823_v6 = vld [vmem:[%s3705_s1 + $0x10] sm:$0xff]  ;;  %s2181_s2 = sld [smem:[#allocation2 + $0x4]] }
  0x24   :  { %v2813_v4 = vld [vmem:[%s3706_s25] sm:$0xff]  ;;  %v2818_v5 = vld [vmem:[%s3706_s25 + $0x8] sm:$0xff]  ;;  %270 = vrot.lane.b32.xlu0 %v2787_v0, %s2672_s4  ;;  %v2830_v7 = vld [vmem:[%s3705_s1 + $0x18] sm:$0xff]  ;;  %v110_v15 = vmul.f32 %v109_v12, %v2802_v2  ;;  %v111_v16 = vmul.f32 %v109_v12, %v2807_v3  ;;  %v112_v18 = vmul.f32 %v109_v12, %v2823_v6  ;;  %s2183_s29 = sld [smem:[#allocation2 + $0x6]] }
  0x25   :  { %v2835_v8 = vld [vmem:[%s3706_s25 + $0x10] sm:$0xff]  ;;  %v2840_v9 = vld [vmem:[%s3706_s25 + $0x18] sm:$0xff]  ;;  %v2847_v10 = vld [vmem:[%s3705_s1 + $0x20] sm:$0xff]  ;;  %v120_v20 = vmul.f32 %v119_v17, %v2813_v4  ;;  %v121_v21 = vmul.f32 %v119_v17, %v2818_v5  ;;  %v113_v22 = vmul.f32 %v109_v12, %v2830_v7  ;;  %406 = vrot.lane.b32.xlu1 %v2787_v0, %s2673_s0  ;;  %s2188_s3 = sld [smem:[#allocation2 + $0x7]] }
  0x26   :  { %2393 = vmatpush3.bf16.msra.mxu0 %v2792_v1  ;;  %2457 = vmatpush3.bf16.msra.mxu1 %v2792_v1  ;;  %v2852_v11 = vld [vmem:[%s3705_s1 + $0x28] sm:$0xff]  ;;  %v2857_v13 = vld [vmem:[%s3706_s25 + $0x20] sm:$0xff]  ;;  %v2870_v19 = vld [vmem:[%s3705_s1 + $0x30] sm:$0xff]  ;;  %v122_v24 = vmul.f32 %v119_v17, %v2835_v8  ;;  %v123_v25 = vmul.f32 %v119_v17, %v2840_v9  ;;  %v114_v30 = vmul.f32 %v109_v12, %v2847_v10  ;;  %v237_v60 = vstv %s2175_s5  ;;  %s2189_s30 = sld [smem:[#allocation2 + $0x8]] }
  0x27   :  { %v2862_v14 = vld [vmem:[%s3706_s25 + $0x28] sm:$0xff]  ;;  %v2880_v23 = vld [vmem:[%s3705_s1 + $0x38] sm:$0xff]  ;;  %v2887_v26 = vld [vmem:[%s3706_s25 + $0x30] sm:$0xff]  ;;  %v128_v28 = vadd.f32 %v120_v20, %v110_v15  ;;  %v129_v29 = vadd.f32 %v121_v21, %v111_v16  ;;  %v115_v31 = vmul.f32 %v109_v12, %v2852_v11  ;;  %v124_v34 = vmul.f32 %v119_v17, %v2857_v13 }
  0x28   :  { %268 = vrot.lane.b32.xlu0 %v2792_v1, %s2672_s4  ;;  %v2892_v27 = vld [vmem:[%s3706_s25 + $0x38] sm:$0xff]  ;;  %v130_v32 = vadd.f32 %v122_v24, %v112_v18  ;;  %v131_v33 = vadd.f32 %v123_v25, %v113_v22  ;;  %v125_v35 = vmul.f32 %v119_v17, %v2862_v14  ;;  %v116_v37 = vmul.f32 %v109_v12, %v2870_v19  ;;  %v84_v53 = vld [vmem:[%s3707_s23] sm:$0xff]  ;;  %v85_v58 = vld [vmem:[%s3707_s23 + $0x8] sm:$0xff] }
  0x29   :  { %v136_v36 = vpack.c.bf16 %v129_v29, %v128_v28  ;;  %v132_v39 = vadd.f32 %v124_v34, %v114_v30  ;;  %v117_v41 = vmul.f32 %v109_v12, %v2880_v23  ;;  %v126_v42 = vmul.f32 %v119_v17, %v2887_v26  ;;  %410 = vrot.lane.b32.xlu1 %v2909_v48, %s2673_s0  ;;  %v87_v55 = vld [vmem:[%s3707_s23 + $0x18] sm:$0xff]  ;;  %v86_v59 = vld [vmem:[%s3707_s23 + $0x10] sm:$0xff]  ;;  %v88_v24 = vld [vmem:[%s3707_s23 + $0x20] sm:$0xff] }
  0x2a   :  { %v137_v38 = vpack.c.bf16 %v131_v33, %v130_v32  ;;  %v133_v40 = vadd.f32 %v125_v35, %v115_v31  ;;  %v127_v43 = vmul.f32 %v119_v17, %v2892_v27  ;;  %v247_v61 = vstv %s2176_s21  ;;  %v90_v17 = vld [vmem:[%s3707_s23 + $0x30] sm:$0xff]  ;;  %v91_v32 = vld [vmem:[%s3707_s23 + $0x38] sm:$0xff]  ;;  %v89_v33 = vld [vmem:[%s3707_s23 + $0x28] sm:$0xff]  ;;  %s2674_s23 = smov 32  }
  0x2b   :  { %2394 = vmatprep.mubr.msk.bf16.mxu0 %vm158_vm0, %v136_v36  ;;  %v134_v45 = vadd.f32 %v126_v42, %v116_v37  ;;  %v238_v12 = vmul.f32 %v237_v60, %v84_v53  ;;  %v241_v15 = vmul.f32 %v237_v60, %v87_v55  ;;  %v239_v22 = vmul.f32 %v237_v60, %v85_v58 }
  0x2c   :  { %2395 = vmatmul.mubr.msk.bf16.vlgmr.msra.gmra.mxu0 %vm158_vm0, %v137_v38  ;;  %v138_v44 = vpack.c.bf16 %v133_v40, %v132_v39  ;;  %v135_v46 = vadd.f32 %v127_v43, %v117_v41  ;;  %404 = vrot.lane.b32.xlu0 %v2792_v1, %s2673_s0  ;;  %v240_v28 = vmul.f32 %v237_v60, %v86_v59 }
  0x2d   :  { %v244_v35 = vmul.f32 %v237_v60, %v90_v17  ;;  %v242_v38 = vmul.f32 %v237_v60, %v88_v24  ;;  %v245_v43 = vmul.f32 %v237_v60, %v91_v32  ;;  %522 = vrot.lane.b32.xlu1 %v2792_v1, %s2674_s23  ;;  %v365_v17 = vstv %s2182_s24 }
  0x2e   :  { %2398 = vmatprep.mubr.msk.bf16.mxu1 %vm158_vm0, %v138_v44  ;;  %v139_v47 = vpack.c.bf16 %v135_v46, %v134_v45  ;;  %v243_v45 = vmul.f32 %v237_v60, %v89_v33  ;;  %v383_v24 = vstv %s2183_s29 }
  0x30   :  { %2399 = vmatmul.mubr.msk.bf16.vlgmr.msra.gmra.mxu1 %vm158_vm0, %v139_v47  ;;  %524 = vrot.lane.b32.xlu0 %v2787_v0, %s2674_s23  ;;  %v384_v0 = vmul.f32 %v383_v24, %v2802_v2 }
  0x34   :  { %528 = vrot.lane.b32.xlu0 %v2909_v48, %s2674_s23 }
  0x96   :  { %v271_v49 = vpop.permute.xlu0 %270 }
  0x97   :  { %2402 = vmatprep.subr.bf16.mxu1 %v271_v49 }
  0x98   :  { %2403 = vmatpush3.bf16.msra.mxu1 %v271_v49 }
  0x9a   :  { %v269_v50 = vpop.permute.xlu0 %268 }
  0x9b   :  { %2404 = vmatprep.subr.bf16.mxu1 %v269_v50 }
  0x9c   :  { %2405 = vmatpush3.bf16.msra.mxu1 %v269_v50 }
  0xec   :  { %v2396_v51 = vpop.f32.mrf.mxu0 }
  0xed   :  { %v2929_v56 = vadd.f32 %v2396_v51, %v2909_v48 }
  0xee   :  { %v205_v52 = vpop.f32.mrf.mxu0 }
  0xef   :  { %v2923_v54 = vadd.f32 %v2909_v48, %v205_v52  ;;  %v250_v29 = vmul.f32 %v247_v61, %v2929_v56 }
  0xf0   :  { %v2397_v57 = vpop.f32.mrf.mxu0  ;;  %v2400_v63 = vpop.f32.mrf.mxu1 }
  0xf1   :  { %v2938_v62 = vadd.f32 %v2397_v57, %v2909_v48  ;;  %v248_v18 = vmul.f32 %v247_v61, %v2923_v54  ;;  %v2953_v30 = vadd.f32 %v2400_v63, %v2909_v48  ;;  %v258_v46 = vadd.f32 %v250_v29, %v240_v28 }
  0xf2   :  { %v208_v16 = vpop.f32.mrf.mxu0  ;;  %v221_v25 = vpop.f32.mrf.mxu1 }
  0xf3   :  { %v251_v20 = vmul.f32 %v247_v61, %v2938_v62  ;;  %v2946_v21 = vadd.f32 %v2909_v48, %v208_v16  ;;  %v2956_v31 = vadd.f32 %v2909_v48, %v221_v25  ;;  %v256_v41 = vadd.f32 %v248_v18, %v238_v12  ;;  %v275_v12 = vpop.permute.xlu1 %274  ;;  %v405_v16 = vpop.permute.xlu0 %404 }
  0xf4   :  { %v2401_v36 = vpop.f32.mrf.mxu1  ;;  %v254_v47 = vmul.f32 %v247_v61, %v2953_v30 }
  0xf5   :  { %v249_v34 = vmul.f32 %v247_v61, %v2946_v21  ;;  %v259_v37 = vadd.f32 %v251_v20, %v241_v15  ;;  %v252_v39 = vmul.f32 %v247_v61, %v2956_v31  ;;  %v2967_v40 = vadd.f32 %v2401_v36, %v2909_v48 }
  0xf6   :  { %v224_v44 = vpop.f32.mrf.mxu1  ;;  %v262_v57 = vadd.f32 %v254_v47, %v244_v35  ;;  %v355_v20 = vstv %s2181_s2  ;;  %v386_v35 = vmul.f32 %v383_v24, %v2823_v6  ;;  %v387_v36 = vmul.f32 %v383_v24, %v2830_v7 }
  0xf7   :  { %v257_v42 = vadd.f32 %v249_v34, %v239_v22  ;;  %v255_v49 = vmul.f32 %v247_v61, %v2967_v40  ;;  %v2972_v50 = vadd.f32 %v2909_v48, %v224_v44  ;;  %v265_v52 = vpack.c.bf16 %v259_v37, %v258_v46  ;;  %v407_v15 = vpop.permute.xlu1 %406 }
  0xf8   :  { %v260_v53 = vadd.f32 %v252_v39, %v242_v38  ;;  %2414 = vmatprep.subr.bf16.mxu0 %v407_v15  ;;  %v358_v29 = vmul.f32 %v355_v20, %v2929_v56  ;;  %v356_v48 = vmul.f32 %v355_v20, %v2923_v54  ;;  %v359_v34 = vmul.f32 %v355_v20, %v2938_v62 }
  0xf9   :  { %v264_v51 = vpack.c.bf16 %v257_v42, %v256_v41  ;;  %v253_v55 = vmul.f32 %v247_v61, %v2972_v50  ;;  %v263_v58 = vadd.f32 %v255_v49, %v245_v43  ;;  %2415 = vmatpush3.bf16.msra.mxu0 %v407_v15  ;;  %v385_v56 = vmul.f32 %v383_v24, %v2807_v3 }
  0xfa   :  { %2416 = vmatprep.subr.bf16.mxu0 %v405_v16  ;;  %v357_v54 = vmul.f32 %v355_v20, %v2946_v21  ;;  %v360_v21 = vmul.f32 %v355_v20, %v2956_v31  ;;  %v363_v15 = vmul.f32 %v355_v20, %v2967_v40  ;;  %v390_v31 = vmul.f32 %v383_v24, %v2870_v19 }
  0xfb   :  { %2406 = vmatprep.mubr.msk.bf16.mxu1 %vm158_vm0, %v264_v51  ;;  %v261_v59 = vadd.f32 %v253_v55, %v243_v45  ;;  %v267_v63 = vpack.c.bf16 %v263_v58, %v262_v57  ;;  %v388_v51 = vmul.f32 %v383_v24, %v2847_v10  ;;  %v525_v58 = vpop.permute.xlu0 %524 }
  0xfc   :  { %2407 = vmatmul.mubr.msk.bf16.vlgmr.msra.gmra.mxu1 %vm158_vm0, %v265_v52  ;;  %2426 = vmatprep.subr.bf16.mxu1 %v525_v58 }
  0xfd   :  { %v266_v60 = vpack.c.bf16 %v261_v59, %v260_v53  ;;  %2417 = vmatpush3.bf16.msra.mxu0 %v405_v16  ;;  %v362_v59 = vmul.f32 %v355_v20, %v2953_v30  ;;  %2427 = vmatpush3.bf16.msra.mxu1 %v525_v58  ;;  %v389_v30 = vmul.f32 %v383_v24, %v2852_v11  ;;  %v411_v11 = vpop.permute.xlu1 %410 }
  0xff   :  { %2410 = vmatprep.mubr.msk.bf16.mxu1 %vm158_vm0, %v266_v60 }
 0x104   :  { %2411 = vmatmul.mubr.msk.bf16.gmra.mxu1 %vm158_vm0, %v267_v63 }
 0x1bc   :  { %v2408_v61 = vpop.f32.mrf.mxu1 }
 0x1bd   :  { %v2985_v18 = vadd.f32 %v2408_v61, %v275_v12 }
 0x1be   :  { %v323_v22 = vpop.f32.mrf.mxu1 }
 0x1bf   :  { %v368_v25 = vmul.f32 %v365_v17, %v2985_v18  ;;  %v2988_v28 = vadd.f32 %v323_v22, %v275_v12 }
 0x1c0   :  { %v2409_v1 = vpop.f32.mrf.mxu1 }
 0x1c1   :  { %v366_v32 = vmul.f32 %v365_v17, %v2988_v28  ;;  %v2994_v33 = vadd.f32 %v2409_v1, %v275_v12  ;;  %v376_v38 = vadd.f32 %v368_v25, %v358_v29  ;;  %v361_v1 = vmul.f32 %v355_v20, %v2972_v50 }
 0x1c2   :  { %v326_v37 = vpop.f32.mrf.mxu1 }
 0x1c3   :  { %v374_v39 = vadd.f32 %v366_v32, %v356_v48  ;;  %v369_v2 = vmul.f32 %v365_v17, %v2994_v33  ;;  %v3000_v41 = vadd.f32 %v326_v37, %v275_v12  ;;  %v394_v7 = vadd.f32 %v386_v35, %v376_v38 }
 0x1c4   :  { %v2412_v42 = vpop.f32.mrf.mxu1  ;;  %v491_v38 = vstv %s2188_s3 }
 0x1c5   :  { %v392_v43 = vadd.f32 %v384_v0, %v374_v39  ;;  %v377_v44 = vadd.f32 %v369_v2, %v359_v34  ;;  %v367_v62 = vmul.f32 %v365_v17, %v3000_v41  ;;  %v3005_v45 = vadd.f32 %v2412_v42, %v275_v12 }
 0x1c6   :  { %v339_v6 = vpop.f32.mrf.mxu1  ;;  %v391_v0 = vmul.f32 %v383_v24, %v2880_v23  ;;  %v523_v23 = vpop.permute.xlu1 %522  ;;  %v501_v39 = vstv %s2189_s30 }
 0x1c7   :  { %v395_v46 = vadd.f32 %v387_v36, %v377_v44  ;;  %v375_v47 = vadd.f32 %v367_v62, %v357_v54  ;;  %v3007_v49 = vadd.f32 %v339_v6, %v275_v12  ;;  %v372_v52 = vmul.f32 %v365_v17, %v3005_v45  ;;  %2428 = vmatprep.subr.bf16.mxu1 %v523_v23 }
 0x1c8   :  { %v2413_v3 = vpop.f32.mrf.mxu1  ;;  %2429 = vmatpush3.bf16.msra.mxu1 %v523_v23  ;;  %v495_v54 = vmul.f32 %v491_v38, %v2840_v9  ;;  %v493_v6 = vmul.f32 %v491_v38, %v2818_v5  ;;  %v496_v5 = vmul.f32 %v491_v38, %v2857_v13  ;;  %v2516_v23 = vld [vmem:[%s3679_s6 + $0x8c] ss:$16 sps:$4 sm:$0xff]  }
 0x1c9   :  { %v401_v53 = vpack.c.bf16 %v395_v46, %v394_v7  ;;  %v393_v55 = vadd.f32 %v385_v56, %v375_v47  ;;  %v370_v57 = vmul.f32 %v365_v17, %v3007_v49  ;;  %v3014_v60 = vadd.f32 %v2413_v3, %v275_v12 }
 0x1ca   :  { %v342_v63 = vpop.f32.mrf.mxu1  ;;  %v380_v22 = vadd.f32 %v372_v52, %v362_v59  ;;  %v492_v56 = vmul.f32 %v491_v38, %v2813_v4  ;;  %v494_v7 = vmul.f32 %v491_v38, %v2835_v8  ;;  %v499_v8 = vmul.f32 %v491_v38, %v2892_v27 }
 0x1cb   :  { %v378_v16 = vadd.f32 %v370_v57, %v360_v21  ;;  %v3017_v10 = vadd.f32 %v342_v63, %v275_v12  ;;  %v400_v61 = vpack.c.bf16 %v393_v55, %v392_v43  ;;  %v373_v25 = vmul.f32 %v365_v17, %v3014_v60 }
 0x1cc   :  { %v398_v32 = vadd.f32 %v390_v31, %v380_v22 }
 0x1cd   :  { %v396_v29 = vadd.f32 %v388_v51, %v378_v16  ;;  %v371_v48 = vmul.f32 %v365_v17, %v3017_v10  ;;  %2418 = vmatprep.mubr.msk.bf16.mxu0 %vm158_vm0, %v400_v61  ;;  %v381_v40 = vadd.f32 %v373_v25, %v363_v15  ;;  %v497_v61 = vmul.f32 %v491_v38, %v2862_v14 }
 0x1ce   :  { %2419 = vmatmul.mubr.msk.bf16.vlgmr.msra.gmra.mxu0 %vm158_vm0, %v401_v53 }
 0x1cf   :  { %v379_v12 = vadd.f32 %v371_v48, %v361_v1  ;;  %v399_v34 = vadd.f32 %v391_v0, %v381_v40 }
 0x1d1   :  { %v397_v19 = vadd.f32 %v389_v30, %v379_v12  ;;  %v403_v35 = vpack.c.bf16 %v399_v34, %v398_v32  ;;  %v498_v30 = vmul.f32 %v491_v38, %v2887_v26  ;;  %v2505_v26 = vld [vmem:[%s3679_s6 + $0xa0] ss:$16 sps:$4 sm:$0xff]   ;;  %v2520_v38 = vld [vmem:[%s3679_s6 + $0x68] ss:$16 sps:$4 sm:$0xff]  }
 0x1d3   :  { %v402_v36 = vpack.c.bf16 %v397_v19, %v396_v29  ;;  %v2507_v19 = vld [vmem:[%s3679_s6 + $0xa4] ss:$16 sps:$4 sm:$0xff]  }
 0x1d4   :  { %876 = vmatprep.subr.bf16.mxu0 %v2507_v19 }
 0x1d5   :  { %2422 = vmatprep.mubr.msk.bf16.mxu0 %vm158_vm0, %v402_v36  ;;  %v2510_v36 = vld [vmem:[%s3679_s6 + $0xac] ss:$16 sps:$4 sm:$0xff]   ;;  %877 = vmatpush1.bf16.msra.mxu0 %v2505_v26 }
 0x1d6   :  { %2423 = vmatmul.mubr.msk.bf16.gmra.mxu0 %vm158_vm0, %v403_v35  ;;  %v2508_v35 = vld [vmem:[%s3679_s6 + $0xa8] ss:$16 sps:$4 sm:$0xff]   ;;  %949 = vmatprep.subr.bf16.mxu1 %v2510_v36 }
 0x28e   :  { %v2420_v50 = vpop.f32.mrf.mxu0 }
 0x28f   :  { %v468_v24 = vadd.f32 %v2420_v50, %v411_v11  ;;  %v2511_v50 = vld [vmem:[%s3679_s6 + $0x80] ss:$16 sps:$4 sm:$0xff]  }
 0x290   :  { %v459_v17 = vpop.f32.mrf.mxu0 }
 0x291   :  { %v460_v20 = vadd.f32 %v459_v17, %v411_v11  ;;  %v504_v46 = vmul.f32 %v501_v39, %v468_v24  ;;  %v2514_v17 = vld [vmem:[%s3679_s6 + $0x88] ss:$16 sps:$4 sm:$0xff]  }
 0x292   :  { %v2421_v37 = vpop.f32.mrf.mxu0 }
 0x293   :  { %v471_v2 = vadd.f32 %v2421_v37, %v411_v11  ;;  %v502_v43 = vmul.f32 %v501_v39, %v460_v20  ;;  %v512_v4 = vadd.f32 %v504_v46, %v494_v7  ;;  %v2517_v37 = vld [vmem:[%s3679_s6 + $0x60] ss:$16 sps:$4 sm:$0xff]   ;;  %v2540_v7 = vld [vmem:[%s3679_s6 + $0xc] ss:$16 sps:$4 sm:$0xff]  }
 0x294   :  { %v462_v42 = vpop.f32.mrf.mxu0  ;;  %v2535_v46 = vld [vmem:[%s3679_s6] ss:$16 sps:$4 sm:$0xff]  }
 0x295   :  { %v505_v44 = vmul.f32 %v501_v39, %v471_v2  ;;  %v463_v62 = vadd.f32 %v462_v42, %v411_v11  ;;  %v510_v21 = vadd.f32 %v502_v43, %v492_v56  ;;  %v2473_v58 = vpack.i.bf16 %v471_v2, %v468_v24  ;;  %v2522_v24 = vld [vmem:[%s3679_s6 + $0x6c] ss:$16 sps:$4 sm:$0xff]   ;;  %v2523_v56 = vld [vmem:[%s3679_s6 + $0x40] ss:$16 sps:$4 sm:$0xff]   ;;  %v2531_v42 = vld [vmem:[%s3679_s6 + $0x24] ss:$16 sps:$4 sm:$0xff]  }
 0x296   :  { %v2424_v47 = vpop.f32.mrf.mxu0  ;;  %v2528_v2 = vld [vmem:[%s3679_s6 + $0x4c] ss:$16 sps:$4 sm:$0xff]  }
 0x297   :  { %v503_v51 = vmul.f32 %v501_v39, %v463_v62  ;;  %v2463_v52 = vpack.i.bf16 %v463_v62, %v460_v20  ;;  %v513_v53 = vadd.f32 %v505_v44, %v495_v54  ;;  %v484_v63 = vadd.f32 %v2424_v47, %v411_v11  ;;  %v2519_v20 = vld [vmem:[%s3679_s6 + $0x64] ss:$16 sps:$4 sm:$0xff]   ;;  %v2526_v54 = vld [vmem:[%s3679_s6 + $0x48] ss:$16 sps:$4 sm:$0xff]   ;;  %v2534_v43 = vld [vmem:[%s3679_s6 + $0x2c] ss:$16 sps:$4 sm:$0xff]  }
 0x298   :  { %v475_v3 = vpop.f32.mrf.mxu0  ;;  %v2529_v44 = vld [vmem:[%s3679_s6 + $0x20] ss:$16 sps:$4 sm:$0xff]   ;;  %v2532_v62 = vld [vmem:[%s3679_s6 + $0x28] ss:$16 sps:$4 sm:$0xff]  }
 0x299   :  { %v511_v55 = vadd.f32 %v503_v51, %v493_v6  ;;  %v476_v57 = vadd.f32 %v475_v3, %v411_v11  ;;  %2464 = vrot.lane.b32.xlu1 %v2463_v52, %s2674_s23  ;;  %v519_v22 = vpack.c.bf16 %v513_v53, %v512_v4  ;;  %v508_v1 = vmul.f32 %v501_v39, %v484_v63  ;;  %v2537_v6 = vld [vmem:[%s3679_s6 + $0x4] ss:$16 sps:$4 sm:$0xff]   ;;  %v2538_v47 = vld [vmem:[%s3679_s6 + $0x8] ss:$16 sps:$4 sm:$0xff]   ;;  %v529_v53 = vpop.permute.xlu0 %528 }
 0x29a   :  { %v2425_v9 = vpop.f32.mrf.mxu0  ;;  %v2675_v3 = vmov 0  }
 0x29b   :  { %v518_v59 = vpack.c.bf16 %v511_v55, %v510_v21  ;;  %v487_v15 = vadd.f32 %v2425_v9, %v411_v11  ;;  %v506_v31 = vmul.f32 %v501_v39, %v476_v57  ;;  %v516_v14 = vadd.f32 %v508_v1, %v498_v30  ;;  %904 = vmatprep.mubr.bf16.mxu0 %v2675_v3  ;;  %v2543_v1 = vld [vmem:[%s3683_s10 + $0x74] ss:$8 sps:$4 sm:$0xff]  }
 0x29c   :  { %v478_v16 = vpop.f32.mrf.mxu0 }
 0x29d   :  { %v509_v25 = vmul.f32 %v501_v39, %v487_v15  ;;  %v479_v0 = vadd.f32 %v478_v16, %v411_v11  ;;  %2474 = vrot.lane.b32.xlu1 %v2473_v58, %s2674_s23  ;;  %2430 = vmatprep.mubr.msk.bf16.mxu1 %vm158_vm0, %v518_v59  ;;  %v514_v13 = vadd.f32 %v506_v31, %v496_v5  ;;  %v2513_v11 = vld [vmem:[%s3679_s6 + $0x84] ss:$16 sps:$4 sm:$0xff]  }
 0x29e   :  { %2431 = vmatmul.mubr.msk.bf16.vlgmr.msra.gmra.mxu1 %vm158_vm0, %v519_v22  ;;  %v2493_v12 = vpack.i.bf16 %v487_v15, %v484_v63  ;;  %878 = vmatprep.subr.bf16.mxu0 %v2513_v11 }
 0x29f   :  { %v507_v29 = vmul.f32 %v501_v39, %v479_v0  ;;  %v2483_v48 = vpack.i.bf16 %v479_v0, %v476_v57  ;;  %v517_v27 = vadd.f32 %v509_v25, %v499_v8  ;;  %950 = vmatpush1.bf16.msra.mxu1 %v2508_v35  ;;  %879 = vmatpush1.bf16.msra.mxu0 %v2511_v50  ;;  %v2525_v39 = vld [vmem:[%s3679_s6 + $0x44] ss:$16 sps:$4 sm:$0xff]  }
 0x2a0   :  { %951 = vmatprep.subr.bf16.mxu1 %v2516_v23  ;;  %880 = vmatprep.subr.bf16.mxu0 %v2519_v20 }
 0x2a1   :  { %v515_v40 = vadd.f32 %v507_v29, %v497_v61  ;;  %2484 = vrot.lane.b32.xlu1 %v2483_v48, %s2674_s23  ;;  %v521_v34 = vpack.c.bf16 %v517_v27, %v516_v14  ;;  %v2546_v29 = vld [vmem:[%s3683_s10 + $0x174] ss:$8 sps:$4 sm:$0xff]  }
 0x2a3   :  { %v520_v32 = vpack.c.bf16 %v515_v40, %v514_v13  ;;  %952 = vmatpush1.bf16.msra.mxu1 %v2514_v17  ;;  %881 = vmatpush1.bf16.msra.mxu0 %v2517_v37  ;;  %v2541_v17 = vld [vmem:[%s3683_s10 + $0x70] ss:$8 sps:$4 sm:$0xff]   ;;  %v2552_v37 = vld [vmem:[%s3683_s10 + $0x164] ss:$8 sps:$4 sm:$0xff]  }
 0x2a4   :  { %953 = vmatprep.subr.bf16.mxu1 %v2522_v24  ;;  %882 = vmatprep.subr.bf16.mxu0 %v2525_v39 }
 0x2a5   :  { %2494 = vrot.lane.b32.xlu1 %v2493_v12, %s2674_s23  ;;  %2434 = vmatprep.mubr.msk.bf16.mxu1 %vm158_vm0, %v520_v32 }
 0x2a6   :  { %2435 = vmatmul.mubr.msk.bf16.gmra.mxu1 %vm158_vm0, %v521_v34 }
 0x2a7   :  { %954 = vmatpush1.bf16.msra.mxu1 %v2520_v38  ;;  %883 = vmatpush1.bf16.msra.mxu0 %v2523_v56  ;;  %v2550_v56 = vld [vmem:[%s3683_s10 + $0x160] ss:$8 sps:$4 sm:$0xff]  }
 0x2a8   :  { %955 = vmatprep.subr.bf16.mxu1 %v2528_v2  ;;  %884 = vmatprep.subr.bf16.mxu0 %v2531_v42  ;;  %v2547_v2 = vld [vmem:[%s3683_s10 + $0x60] ss:$8 sps:$4 sm:$0xff]  }
 0x2a9   :  { %977 = vmatprep.mubr.bf16.mxu1 %v2675_v3 }
 0x2ab   :  { %956 = vmatpush1.bf16.msra.mxu1 %v2526_v54  ;;  %885 = vmatpush1.bf16.msra.mxu0 %v2529_v44 }
 0x2ac   :  { %957 = vmatprep.subr.bf16.mxu1 %v2534_v43  ;;  %886 = vmatprep.subr.bf16.mxu0 %v2537_v6 }
 0x2af   :  { %958 = vmatpush1.bf16.msra.mxu1 %v2532_v62  ;;  %887 = vmatpush1.bf16.msra.mxu0 %v2535_v46  ;;  %v2553_v46 = vld [vmem:[%s3683_s10 + $0x50] ss:$8 sps:$4 sm:$0xff]  }
 0x2b0   :  { %959 = vmatprep.subr.bf16.mxu1 %v2540_v7  ;;  %1570 = vmatprep.subr.bf16.mxu0 %v2543_v1 }
 0x2b3   :  { %960 = vmatpush1.bf16.msra.mxu1 %v2538_v47  ;;  %v2556_v47 = vld [vmem:[%s3683_s10 + $0x150] ss:$8 sps:$4 sm:$0xff]  }
 0x2b4   :  { %1643 = vmatprep.subr.bf16.mxu1 %v2546_v29 }
 0x30b   :  { %v2465_v48 = vpop.permute.xlu1 %2464 }
 0x30c   :  { %v2467_v13 = vunpack.i.h.bf16 %v2465_v48  ;;  %v2466_v27 = vunpack.i.l.bf16 %v2465_v48  ;;  %v2571_v48 = vld [vmem:[%s3683_s10 + $0x20] ss:$8 sps:$4 sm:$0xff]  }
 0x30e   :  { %v673_v34 = vsel %vm158_vm0, %v3000_v41, %v2467_v13  ;;  %v672_v26 = vsel %vm158_vm0, %v2988_v28, %v2466_v27  ;;  %v2544_v41 = vld [vmem:[%s3683_s10 + $0x170] ss:$8 sps:$4 sm:$0xff]   ;;  %v2549_v28 = vld [vmem:[%s3683_s10 + $0x64] ss:$8 sps:$4 sm:$0xff]   ;;  %v2574_v13 = vld [vmem:[%s3683_s10 + $0x120] ss:$8 sps:$4 sm:$0xff]  }
 0x30f   :  { %v2475_v14 = vpop.permute.xlu1 %2474 }
 0x310   :  { %v2477_v36 = vunpack.i.h.bf16 %v2475_v14  ;;  %v2476_v11 = vunpack.i.l.bf16 %v2475_v14  ;;  %v2577_v14 = vld [vmem:[%s3683_s10 + $0x10] ss:$8 sps:$4 sm:$0xff]  }
 0x312   :  { %v675_v38 = vsel %vm158_vm0, %v2994_v33, %v2477_v36  ;;  %v674_v39 = vsel %vm158_vm0, %v2985_v18, %v2476_v11  ;;  %v2555_v18 = vld [vmem:[%s3683_s10 + $0x54] ss:$8 sps:$4 sm:$0xff]   ;;  %v2589_v11 = vld [vmem:[%s3683_s10 + $0xf0] ss:$8 sps:$4 sm:$0xff]  }
 0x313   :  { %v2485_v54 = vpop.permute.xlu1 %2484  ;;  %v2558_v33 = vld [vmem:[%s3683_s10 + $0x154] ss:$8 sps:$4 sm:$0xff]  }
 0x314   :  { %v2487_v62 = vunpack.i.h.bf16 %v2485_v54  ;;  %v2486_v6 = vunpack.i.l.bf16 %v2485_v54  ;;  %v2594_v36 = vld [vmem:[%s3683_s10 + $0x1f4] ss:$8 sps:$4 sm:$0xff]   ;;  %v2610_v54 = vld [vmem:[%s3683_s10 + $0x1c0] ss:$8 sps:$4 sm:$0xff]  }
 0x35e   :  { %v2432_v51 = vpop.f32.mrf.mxu1 }
 0x35f   :  { %v586_v15 = vadd.f32 %v2432_v51, %v529_v53 }
 0x360   :  { %v577_v52 = vpop.f32.mrf.mxu1 }
 0x361   :  { %v578_v57 = vadd.f32 %v577_v52, %v529_v53 }
 0x362   :  { %v2433_v21 = vpop.f32.mrf.mxu1 }
 0x363   :  { %v589_v58 = vadd.f32 %v2433_v21, %v529_v53  ;;  %v2561_v21 = vld [vmem:[%s3683_s10 + $0x44] ss:$8 sps:$4 sm:$0xff]  }
 0x364   :  { %v580_v55 = vpop.f32.mrf.mxu1 }
 0x365   :  { %v581_v4 = vadd.f32 %v580_v55, %v529_v53  ;;  %v2478_v8 = vpack.i.bf16 %v589_v58, %v586_v15  ;;  %v677_v55 = vsel %vm158_vm0, %v3017_v10, %v2487_v62  ;;  %v2495_v58 = vpop.permute.xlu1 %2494  ;;  %v2570_v10 = vld [vmem:[%s3683_s10 + $0x134] ss:$8 sps:$4 sm:$0xff]   ;;  %v2624_v62 = vld [vmem:[%s3683_s10 + $0x1a4] ss:$8 sps:$4 sm:$0xff]  }
 0x366   :  { %v2436_v9 = vpop.f32.mrf.mxu1 }
 0x367   :  { %v2468_v59 = vpack.i.bf16 %v581_v4, %v578_v57  ;;  %v602_v0 = vadd.f32 %v2436_v9, %v529_v53  ;;  %v676_v57 = vsel %vm158_vm0, %v3007_v49, %v2486_v6  ;;  %v2559_v4 = vld [vmem:[%s3683_s10 + $0x40] ss:$8 sps:$4 sm:$0xff]   ;;  %v2567_v49 = vld [vmem:[%s3683_s10 + $0x34] ss:$8 sps:$4 sm:$0xff]  }
 0x368   :  { %v593_v63 = vpop.f32.mrf.mxu1  ;;  %v2562_v9 = vld [vmem:[%s3683_s10 + $0x140] ss:$8 sps:$4 sm:$0xff]  }
 0x369   :  { %2469 = vrot.lane.b32.xlu0 %v2468_v59, %s2673_s0  ;;  %v594_v61 = vadd.f32 %v593_v63, %v529_v53  ;;  %v2619_v6 = vld [vmem:[%s3683_s10 + $0xa0] ss:$8 sps:$4 sm:$0xff]  }
 0x36a   :  { %v2437_v5 = vpop.f32.mrf.mxu1 }
 0x36b   :  { %v605_v31 = vadd.f32 %v2437_v5, %v529_v53  ;;  %v2497_v5 = vunpack.i.h.bf16 %v2495_v58 }
 0x36c   :  { %v596_v16 = vpop.f32.mrf.mxu1 }
 0x36d   :  { %v597_v22 = vadd.f32 %v596_v16, %v529_v53  ;;  %2479 = vrot.lane.b32.xlu0 %v2478_v8, %s2673_s0  ;;  %v2498_v30 = vpack.i.bf16 %v605_v31, %v602_v0  ;;  %v2564_v53 = vld [vmem:[%s3683_s10 + $0x144] ss:$8 sps:$4 sm:$0xff]   ;;  %v2496_v8 = vunpack.i.l.bf16 %v2495_v58  ;;  %v679_v1 = vsel %vm158_vm0, %v3014_v60, %v2497_v5  ;;  %v2582_v60 = vld [vmem:[%s3683_s10 + $0x114] ss:$8 sps:$4 sm:$0xff]  }
 0x36e   :  { %v2573_v0 = vld [vmem:[%s3683_s10 + $0x24] ss:$8 sps:$4 sm:$0xff]  }
 0x36f   :  { %v2488_v25 = vpack.i.bf16 %v597_v22, %v594_v61  ;;  %v2565_v61 = vld [vmem:[%s3683_s10 + $0x30] ss:$8 sps:$4 sm:$0xff]   ;;  %v678_v29 = vsel %vm158_vm0, %v3005_v45, %v2496_v8  ;;  %v2579_v45 = vld [vmem:[%s3683_s10 + $0x14] ss:$8 sps:$4 sm:$0xff]  }
 0x370   :  { %v2568_v22 = vld [vmem:[%s3683_s10 + $0x130] ss:$8 sps:$4 sm:$0xff]  }
 0x371   :  { %2489 = vrot.lane.b32.xlu0 %v2488_v25, %s2673_s0 }
 0x375   :  { %2499 = vrot.lane.b32.xlu0 %v2498_v30, %s2673_s0  ;;  %v2576_v30 = vld [vmem:[%s3683_s10 + $0x124] ss:$8 sps:$4 sm:$0xff]  }
 0x3db   :  { %v2470_v40 = vpop.permute.xlu0 %2469 }
 0x3dc   :  { %v2472_v12 = vunpack.i.h.bf16 %v2470_v40  ;;  %v2471_v32 = vunpack.i.l.bf16 %v2470_v40 }
 0x3de   :  { %v682_v19 = vsel %vm680_vm1, %v673_v34, %v2472_v12  ;;  %v681_v35 = vsel %vm680_vm1, %v672_v26, %v2471_v32  ;;  %v2580_v12 = vld [vmem:[%s3683_s10 + $0x110] ss:$8 sps:$4 sm:$0xff]   ;;  %v2585_v32 = vld [vmem:[%s3683_s10 + $0x4] ss:$8 sps:$4 sm:$0xff]   ;;  %v2583_v26 = vld [vmem:[%s3683_s10] ss:$8 sps:$4 sm:$0xff]  }
 0x3df   :  { %v689_v23 = vpack.c.bf16 %v682_v19, %v681_v35  ;;  %v2480_v50 = vpop.permute.xlu0 %2479  ;;  %v2588_v34 = vld [vmem:[%s3683_s10 + $0x104] ss:$8 sps:$4 sm:$0xff]   ;;  %v2586_v19 = vld [vmem:[%s3683_s10 + $0x100] ss:$8 sps:$4 sm:$0xff]   ;;  %v2591_v35 = vld [vmem:[%s3683_s10 + $0xf4] ss:$8 sps:$4 sm:$0xff]  }
 0x3e0   :  { %v2482_v20 = vunpack.i.h.bf16 %v2480_v50  ;;  %v2481_v24 = vunpack.i.l.bf16 %v2480_v50  ;;  %v2597_v50 = vld [vmem:[%s3683_s10 + $0xe4] ss:$8 sps:$4 sm:$0xff]  }
 0x3e1   :  { %2218 = vmatmul.mubr.msk.bf16.vlgmr.msra.gmra.mxu0 %vm859_vm2, %v689_v23  ;;  %2222 = vmatmul.mubr.msk.bf16.vlgmr.msra.gmra.mxu1 %vm859_vm2, %v689_v23  ;;  %v2592_v23 = vld [vmem:[%s3683_s10 + $0x1f0] ss:$8 sps:$4 sm:$0xff]  }
 0x3e2   :  { %914 = vmatprep.mubr.bf16.mxu0 %v2675_v3  ;;  %987 = vmatprep.mubr.bf16.mxu1 %v2675_v3  ;;  %v684_v42 = vsel %vm680_vm1, %v675_v38, %v2482_v20  ;;  %v683_v43 = vsel %vm680_vm1, %v674_v39, %v2481_v24  ;;  %v2598_v20 = vld [vmem:[%s3683_s10 + $0x1e0] ss:$8 sps:$4 sm:$0xff]   ;;  %v2603_v24 = vld [vmem:[%s3683_s10 + $0xd4] ss:$8 sps:$4 sm:$0xff]   ;;  %v2604_v38 = vld [vmem:[%s3683_s10 + $0x1d0] ss:$8 sps:$4 sm:$0xff]  }
 0x3e3   :  { %1571 = vmatpush1.bf16.msra.mxu0 %v2541_v17  ;;  %1644 = vmatpush1.bf16.msra.mxu1 %v2544_v41  ;;  %v2490_v44 = vpop.permute.xlu0 %2489  ;;  %v690_v7 = vpack.c.bf16 %v684_v42, %v683_v43  ;;  %v2600_v17 = vld [vmem:[%s3683_s10 + $0x1e4] ss:$8 sps:$4 sm:$0xff]   ;;  %v2595_v41 = vld [vmem:[%s3683_s10 + $0xe0] ss:$8 sps:$4 sm:$0xff]   ;;  %v2615_v42 = vld [vmem:[%s3683_s10 + $0xb4] ss:$8 sps:$4 sm:$0xff]  }
 0x3e4   :  { %1572 = vmatprep.subr.bf16.mxu0 %v2549_v28  ;;  %1645 = vmatprep.subr.bf16.mxu1 %v2552_v37  ;;  %v2492_v51 = vunpack.i.h.bf16 %v2490_v44  ;;  %v2491_v52 = vunpack.i.l.bf16 %v2490_v44  ;;  %v2606_v28 = vld [vmem:[%s3683_s10 + $0x1d4] ss:$8 sps:$4 sm:$0xff]   ;;  %v2601_v37 = vld [vmem:[%s3683_s10 + $0xd0] ss:$8 sps:$4 sm:$0xff]   ;;  %v2609_v39 = vld [vmem:[%s3683_s10 + $0xc4] ss:$8 sps:$4 sm:$0xff]  }
 0x3e5   :  { %v2618_v43 = vld [vmem:[%s3683_s10 + $0x1b4] ss:$8 sps:$4 sm:$0xff]   ;;  %v2621_v44 = vld [vmem:[%s3683_s10 + $0xa4] ss:$8 sps:$4 sm:$0xff]  }
 0x3e6   :  { %v686_v59 = vsel %vm680_vm1, %v677_v55, %v2492_v51  ;;  %v685_v63 = vsel %vm680_vm1, %v676_v57, %v2491_v52  ;;  %v2625_v51 = vld [vmem:[%s3683_s10 + $0x90] ss:$8 sps:$4 sm:$0xff]   ;;  %v2631_v55 = vld [vmem:[%s3683_s10 + $0x80] ss:$8 sps:$4 sm:$0xff]  }
 0x3e7   :  { %1573 = vmatpush1.bf16.msra.mxu0 %v2547_v2  ;;  %1646 = vmatpush1.bf16.msra.mxu1 %v2550_v56  ;;  %v2500_v15 = vpop.permute.xlu0 %2499  ;;  %v691_v16 = vpack.c.bf16 %v686_v59, %v685_v63  ;;  %v2612_v2 = vld [vmem:[%s3683_s10 + $0x1c4] ss:$8 sps:$4 sm:$0xff]   ;;  %v2607_v56 = vld [vmem:[%s3683_s10 + $0xc0] ss:$8 sps:$4 sm:$0xff]   ;;  %v2628_v52 = vld [vmem:[%s3683_s10 + $0x190] ss:$8 sps:$4 sm:$0xff]  }
 0x3e8   :  { %1574 = vmatprep.subr.bf16.mxu0 %v2555_v18  ;;  %1647 = vmatprep.subr.bf16.mxu1 %v2558_v33  ;;  %v2502_v31 = vunpack.i.h.bf16 %v2500_v15  ;;  %v2501_v25 = vunpack.i.l.bf16 %v2500_v15  ;;  %v2613_v18 = vld [vmem:[%s3683_s10 + $0xb0] ss:$8 sps:$4 sm:$0xff]   ;;  %v2634_v57 = vld [vmem:[%s3683_s10 + $0x180] ss:$8 sps:$4 sm:$0xff]  }
 0x3e9   :  { %2219 = vmatmul.mubr.msk.bf16.gmra.mxu0 %vm859_vm2, %v690_v7  ;;  %2223 = vmatmul.mubr.msk.bf16.gmra.mxu1 %vm859_vm2, %v690_v7  ;;  %v2616_v33 = vld [vmem:[%s3683_s10 + $0x1b0] ss:$8 sps:$4 sm:$0xff]   ;;  %v2622_v7 = vld [vmem:[%s3683_s10 + $0x1a0] ss:$8 sps:$4 sm:$0xff]  }
 0x3ea   :  { %924 = vmatprep.mubr.bf16.mxu0 %v2675_v3  ;;  %997 = vmatprep.mubr.bf16.mxu1 %v2675_v3  ;;  %v688_v27 = vsel %vm680_vm1, %v679_v1, %v2502_v31  ;;  %v717_v63 = vld [vmem:[%s3680_s7] sm:$0xf] }
 0x3eb   :  { %1575 = vmatpush1.bf16.msra.mxu0 %v2553_v46  ;;  %1648 = vmatpush1.bf16.msra.mxu1 %v2556_v47  ;;  %v2627_v46 = vld [vmem:[%s3683_s10 + $0x94] ss:$8 sps:$4 sm:$0xff]  }
 0x3ec   :  { %1576 = vmatprep.subr.bf16.mxu0 %v2561_v21  ;;  %1649 = vmatprep.subr.bf16.mxu1 %v2564_v53  ;;  %v2630_v47 = vld [vmem:[%s3683_s10 + $0x194] ss:$8 sps:$4 sm:$0xff]   ;;  %v2633_v21 = vld [vmem:[%s3683_s10 + $0x84] ss:$8 sps:$4 sm:$0xff]  }
 0x3ed   :  { %v2636_v53 = vld [vmem:[%s3683_s10 + $0x184] ss:$8 sps:$4 sm:$0xff]  }
 0x3ef   :  { %1577 = vmatpush1.bf16.msra.mxu0 %v2559_v4  ;;  %1650 = vmatpush1.bf16.msra.mxu1 %v2562_v9  ;;  %v2637_v4 = vld [vmem:[%s3687_s14 + $0x78] sm:$0xff]   ;;  %v719_v9 = vlaneseq }
 0x3f0   :  { %1578 = vmatprep.subr.bf16.mxu0 %v2567_v49  ;;  %1651 = vmatprep.subr.bf16.mxu1 %v2570_v10 }
 0x3f1   :  { %2220 = vmatmul.mubr.msk.bf16.gmra.mxu0 %vm859_vm2, %v691_v16  ;;  %2224 = vmatmul.mubr.msk.bf16.gmra.mxu1 %vm859_vm2, %v691_v16  ;;  %v720_v58 = vshrl.u32 %v719_v9, 7 }
 0x3f2   :  { %934 = vmatprep.mubr.bf16.mxu0 %v2675_v3  ;;  %1007 = vmatprep.mubr.bf16.mxu1 %v2675_v3  ;;  %v687_v3 = vsel %vm680_vm1, %v678_v29, %v2501_v25 }
 0x3f3   :  { %1579 = vmatpush1.bf16.msra.mxu0 %v2565_v61  ;;  %1652 = vmatpush1.bf16.msra.mxu1 %v2568_v22  ;;  %v692_v40 = vpack.c.bf16 %v688_v27, %v687_v3  ;;  %v3356_v59 = vsub.s32 0, %v720_v58  ;;  %v729_v49 = vsub.s32 2, %v720_v58  ;;  %v3361_v10 = vsub.s32 1, %v720_v58 }
 0x3f4   :  { %1580 = vmatprep.subr.bf16.mxu0 %v2573_v0  ;;  %1653 = vmatprep.subr.bf16.mxu1 %v2576_v30  ;;  %v733_v15 = vsub.s32 3, %v720_v58  ;;  %v1050_v0 = vld [vmem:[%s3681_s8] sm:$0xf] }
 0x3f5   :  { %v3364_v5 = vrot.slane %v717_v63, %v3356_v59  ;;  %v3366_v8 = vrot.slane %v717_v63, %v729_v49  ;;  %v3369_v22 = vrot.slane %v717_v63, %v3361_v10  ;;  %v3382_v3 = vrot.slane %v1050_v0, %v3356_v59 }
 0x3f6   :  { %v3371_v31 = vrot.slane %v717_v63, %v733_v15 }
 0x3f7   :  { %1581 = vmatpush1.bf16.msra.mxu0 %v2571_v48  ;;  %1654 = vmatpush1.bf16.msra.mxu1 %v2574_v13  ;;  %v1104_v48 = vld [vmem:[%s3682_s9] sm:$0xf] }
 0x3f8   :  { %1582 = vmatprep.subr.bf16.mxu0 %v2579_v45  ;;  %1655 = vmatprep.subr.bf16.mxu1 %v2582_v60 }
 0x3f9   :  { %2221 = vmatmul.mubr.msk.bf16.gmra.mxu0 %vm859_vm2, %v692_v40  ;;  %2225 = vmatmul.mubr.msk.bf16.gmra.mxu1 %vm859_vm2, %v692_v40 }
 0x3fb   :  { %1583 = vmatpush1.bf16.msra.mxu0 %v2577_v14  ;;  %1656 = vmatpush1.bf16.msra.mxu1 %v2580_v12  ;;  %v3386_v14 = vrot.slane %v1050_v0, %v729_v49 }
 0x3fc   :  { %1584 = vmatprep.subr.bf16.mxu0 %v2585_v32  ;;  %1657 = vmatprep.subr.bf16.mxu1 %v2588_v34 }
 0x3ff   :  { %1585 = vmatpush1.bf16.msra.mxu0 %v2583_v26  ;;  %1658 = vmatpush1.bf16.msra.mxu1 %v2586_v19  ;;  %v3391_v19 = vrot.slane %v1104_v48, %v3356_v59 }
 0x400   :  { %1586 = vmatprep.subr.bf16.mxu0 %v2591_v35  ;;  %1659 = vmatprep.subr.bf16.mxu1 %v2594_v36  ;;  %v3394_v36 = vrot.slane %v1050_v0, %v3361_v10 }
 0x403   :  { %1587 = vmatpush2.bf16.msra.mxu0 %v2589_v11  ;;  %1660 = vmatpush2.bf16.msra.mxu1 %v2592_v23  ;;  %v3396_v11 = vrot.slane %v1050_v0, %v733_v15 }
 0x404   :  { %1588 = vmatprep.subr.bf16.mxu0 %v2597_v50  ;;  %1661 = vmatprep.subr.bf16.mxu1 %v2600_v17 }
 0x407   :  { %1589 = vmatpush2.bf16.msra.mxu0 %v2595_v41  ;;  %1662 = vmatpush2.bf16.msra.mxu1 %v2598_v20 }
 0x408   :  { %1590 = vmatprep.subr.bf16.mxu0 %v2603_v24  ;;  %1663 = vmatprep.subr.bf16.mxu1 %v2606_v28 }
 0x40b   :  { %1591 = vmatpush2.bf16.msra.mxu0 %v2601_v37  ;;  %1664 = vmatpush2.bf16.msra.mxu1 %v2604_v38 }
 0x40c   :  { %1592 = vmatprep.subr.bf16.mxu0 %v2609_v39  ;;  %1665 = vmatprep.subr.bf16.mxu1 %v2612_v2 }
 0x40f   :  { %1593 = vmatpush2.bf16.msra.mxu0 %v2607_v56  ;;  %1666 = vmatpush2.bf16.msra.mxu1 %v2610_v54 }
 0x410   :  { %1594 = vmatprep.subr.bf16.mxu0 %v2615_v42  ;;  %1667 = vmatprep.subr.bf16.mxu1 %v2618_v43 }
 0x413   :  { %1595 = vmatpush2.bf16.msra.mxu0 %v2613_v18  ;;  %1668 = vmatpush2.bf16.msra.mxu1 %v2616_v33  ;;  %v3404_v33 = vrot.slane %v1104_v48, %v729_v49 }
 0x414   :  { %1596 = vmatprep.subr.bf16.mxu0 %v2621_v44  ;;  %1669 = vmatprep.subr.bf16.mxu1 %v2624_v62 }
 0x417   :  { %1597 = vmatpush2.bf16.msra.mxu0 %v2619_v6  ;;  %1670 = vmatpush2.bf16.msra.mxu1 %v2622_v7  ;;  %v3409_v7 = vrot.slane %v1104_v48, %v3361_v10 }
 0x418   :  { %1598 = vmatprep.subr.bf16.mxu0 %v2627_v46  ;;  %1671 = vmatprep.subr.bf16.mxu1 %v2630_v47  ;;  %v3411_v46 = vrot.slane %v1104_v48, %v733_v15 }
 0x41b   :  { %1599 = vmatpush2.bf16.msra.mxu0 %v2625_v51  ;;  %1672 = vmatpush2.bf16.msra.mxu1 %v2628_v52 }
 0x41c   :  { %1600 = vmatprep.subr.bf16.mxu0 %v2633_v21  ;;  %1673 = vmatprep.subr.bf16.mxu1 %v2636_v53 }
 0x41f   :  { %1601 = vmatpush2.bf16.msra.mxu0 %v2631_v55  ;;  %1674 = vmatpush2.bf16.msra.mxu1 %v2634_v57 }
 0x420   :  { %2342 = vmatprep.subr.bf16.mxu0 %v2637_v4 }
 0x4a1   :  { %v906_v16 = vpop.f32.mrf.mxu0  ;;  %v979_v61 = vpop.f32.mrf.mxu1 }
 0x4a2   :  { %v907_v25 = vadd.f32 %v906_v16, %v3364_v5  ;;  %v980_v29 = vadd.f32 %v979_v61, %v3366_v8 }
 0x4a3   :  { %v908_v30 = vpop.f32.mrf.mxu0  ;;  %v981_v1 = vpop.f32.mrf.mxu1 }
 0x4a4   :  { %v909_v45 = vadd.f32 %v908_v30, %v3369_v22  ;;  %v982_v60 = vadd.f32 %v981_v1, %v3371_v31  ;;  %v1018_v40 = vmax.f32 %v907_v25, 0.0  ;;  %v1020_v35 = vmax.f32 %v980_v29, 0.0 }
 0x4a5   :  { %v910_v13 = vpop.f32.mrf.mxu0  ;;  %v983_v27 = vpop.f32.mrf.mxu1 }
 0x4a6   :  { %v911_v12 = vadd.f32 %v910_v13, %v3364_v5  ;;  %v984_v32 = vadd.f32 %v983_v27, %v3366_v8  ;;  %v1019_v28 = vmax.f32 %v909_v45, 0.0  ;;  %v1021_v37 = vmax.f32 %v982_v60, 0.0 }
 0x4a7   :  { %v912_v34 = vpop.f32.mrf.mxu0  ;;  %v985_v26 = vpop.f32.mrf.mxu1  ;;  %v1072_v2 = vmul.f32 %v3382_v3, %v1018_v40  ;;  %v1074_v53 = vmul.f32 %v3386_v14, %v1020_v35 }
 0x4a8   :  { %v1022_v23 = vmax.f32 %v911_v12, 0.0  ;;  %v1024_v50 = vmax.f32 %v984_v32, 0.0  ;;  %v913_v17 = vadd.f32 %v912_v34, %v3369_v22  ;;  %v986_v41 = vadd.f32 %v985_v26, %v3371_v31 }
 0x4a9   :  { %v916_v20 = vpop.f32.mrf.mxu0  ;;  %v989_v24 = vpop.f32.mrf.mxu1  ;;  %v1073_v55 = vmul.f32 %v3394_v36, %v1019_v28  ;;  %v1075_v57 = vmul.f32 %v3396_v11, %v1021_v37  ;;  %v1126_v9 = vadd.f32 %v3391_v19, %v1072_v2  ;;  %v1128_v60 = vadd.f32 %v3404_v33, %v1074_v53  ;;  %v2638_v37 = vld [vmem:[%s3687_s14 + $0x38] sm:$0xff]  }
 0x4aa   :  { %v917_v38 = vadd.f32 %v916_v20, %v3364_v5  ;;  %v990_v39 = vadd.f32 %v989_v24, %v3366_v8  ;;  %v1076_v56 = vmul.f32 %v3382_v3, %v1022_v23  ;;  %v1023_v54 = vmax.f32 %v913_v17, 0.0 }
 0x4ab   :  { %v1025_v42 = vmax.f32 %v986_v41, 0.0  ;;  %v918_v43 = vpop.f32.mrf.mxu0  ;;  %v991_v18 = vpop.f32.mrf.mxu1  ;;  %v1078_v44 = vmul.f32 %v3386_v14, %v1024_v50  ;;  %v1127_v40 = vadd.f32 %v3409_v7, %v1073_v55  ;;  %v1129_v12 = vadd.f32 %v3411_v46, %v1075_v57 }
 0x4ac   :  { %v1026_v62 = vmax.f32 %v917_v38, 0.0  ;;  %v919_v6 = vadd.f32 %v918_v43, %v3369_v22  ;;  %v1077_v47 = vmul.f32 %v3394_v36, %v1023_v54  ;;  %v1028_v4 = vmax.f32 %v990_v39, 0.0  ;;  %v2639_v43 = vld [vmem:[%s3687_s14 + $0x70] sm:$0xff]  }
 0x4ad   :  { %v1079_v51 = vmul.f32 %v3396_v11, %v1025_v42  ;;  %v920_v52 = vpop.f32.mrf.mxu0  ;;  %v993_v21 = vpop.f32.mrf.mxu1  ;;  %v1130_v58 = vadd.f32 %v3391_v19, %v1076_v56  ;;  %v992_v49 = vadd.f32 %v991_v18, %v3371_v31  ;;  %v1132_v61 = vadd.f32 %v3404_v33, %v1078_v44 }
 0x4ae   :  { %v1027_v63 = vmax.f32 %v919_v6, 0.0  ;;  %v1131_v25 = vadd.f32 %v3409_v7, %v1077_v47  ;;  %v1080_v30 = vmul.f32 %v3382_v3, %v1026_v62  ;;  %v921_v1 = vadd.f32 %v920_v52, %v3364_v5 }
 0x4af   :  { %v922_v15 = vpop.f32.mrf.mxu0  ;;  %v995_v16 = vpop.f32.mrf.mxu1  ;;  %v1133_v0 = vadd.f32 %v3411_v46, %v1079_v51  ;;  %v994_v29 = vadd.f32 %v993_v21, %v3366_v8  ;;  %v1082_v32 = vmul.f32 %v3386_v14, %v1028_v4  ;;  %v1029_v26 = vmax.f32 %v992_v49, 0.0 }
 0x4b0   :  { %v923_v48 = vadd.f32 %v922_v15, %v3369_v22  ;;  %v996_v13 = vadd.f32 %v995_v16, %v3371_v31  ;;  %v1081_v34 = vmul.f32 %v3394_v36, %v1027_v63  ;;  %v1030_v35 = vmax.f32 %v921_v1, 0.0 }
 0x4b1   :  { %v926_v27 = vpop.f32.mrf.mxu0  ;;  %v999_v45 = vpop.f32.mrf.mxu1  ;;  %v1032_v41 = vmax.f32 %v994_v29, 0.0  ;;  %v1159_v24 = vpack.c.bf16 %v1131_v25, %v1127_v40  ;;  %v1161_v28 = vpack.c.bf16 %v1133_v0, %v1129_v12  ;;  %v1158_v38 = vpack.c.bf16 %v1130_v58, %v1126_v9  ;;  %v2640_v58 = vld [vmem:[%s3687_s14 + $0x30] sm:$0xff]   ;;  %v2641_v0 = vld [vmem:[%s3687_s14 + $0x68] sm:$0xff]  }
 0x4b2   :  { %v1031_v23 = vmax.f32 %v923_v48, 0.0  ;;  %v1033_v20 = vmax.f32 %v996_v13, 0.0  ;;  %v1160_v39 = vpack.c.bf16 %v1132_v61, %v1128_v60  ;;  %v3438_v2 = vadd.f32 %v3391_v19, %v1080_v30 }
 0x4b3   :  { %v928_v50 = vpop.f32.mrf.mxu0  ;;  %v1001_v17 = vpop.f32.mrf.mxu1  ;;  %v927_v56 = vadd.f32 %v926_v27, %v3364_v5  ;;  %v1000_v44 = vadd.f32 %v999_v45, %v3366_v8  ;;  %1602 = vmatprep.mubr.bf16.mxu0 %v1159_v24  ;;  %1675 = vmatprep.mubr.bf16.mxu1 %v1161_v28  ;;  %v3448_v6 = vadd.f32 %v3404_v33, %v1082_v32  ;;  %v2642_v28 = vld [vmem:[%s3687_s14 + $0x28] sm:$0xff]  }
 0x4b4   :  { %v1085_v18 = vmul.f32 %v3394_v36, %v1031_v23  ;;  %v929_v62 = vadd.f32 %v928_v50, %v3369_v22  ;;  %v1135_v47 = vadd.f32 %v3409_v7, %v1081_v34  ;;  %v1083_v51 = vmul.f32 %v3396_v11, %v1029_v26  ;;  %1603 = vmatmul.mubr.bf16.vlgmr.msra.gmra.mxu0 %v1158_v38 }
 0x4b5   :  { %v930_v54 = vpop.f32.mrf.mxu0  ;;  %v1003_v42 = vpop.f32.mrf.mxu1  ;;  %v1084_v52 = vmul.f32 %v3382_v3, %v1030_v35  ;;  %v1086_v55 = vmul.f32 %v3386_v14, %v1032_v41  ;;  %v1087_v57 = vmul.f32 %v3396_v11, %v1033_v20  ;;  %v1002_v9 = vadd.f32 %v1001_v17, %v3371_v31  ;;  %1676 = vmatmul.mubr.bf16.vlgmr.msra.gmra.mxu1 %v1160_v39 }
 0x4b6   :  { %v1035_v4 = vmax.f32 %v929_v62, 0.0  ;;  %2343 = vmatpush3.bf16.msra.mxu0 %v2638_v37  ;;  %v931_v63 = vadd.f32 %v930_v54, %v3364_v5  ;;  %v1004_v49 = vadd.f32 %v1003_v42, %v3366_v8  ;;  %v1139_v30 = vadd.f32 %v3409_v7, %v1085_v18  ;;  %v2643_v54 = vld [vmem:[%s3687_s14 + $0x60] sm:$0xff]  }
 0x4b7   :  { %v932_v21 = vpop.f32.mrf.mxu0  ;;  %v1005_v53 = vpop.f32.mrf.mxu1  ;;  %2344 = vmatprep.subr.bf16.mxu0 %v2639_v43  ;;  %v1034_v1 = vmax.f32 %v927_v56, 0.0  ;;  %v1036_v29 = vmax.f32 %v1000_v44, 0.0  ;;  %v1037_v48 = vmax.f32 %v1002_v9, 0.0  ;;  %v1137_v32 = vadd.f32 %v3411_v46, %v1083_v51 }
 0x4b8   :  { %v933_v15 = vadd.f32 %v932_v21, %v3369_v22  ;;  %v1006_v16 = vadd.f32 %v1005_v53, %v3371_v31  ;;  %v1089_v13 = vmul.f32 %v3394_v36, %v1035_v4  ;;  %v1038_v27 = vmax.f32 %v931_v63, 0.0 }
 0x4b9   :  { %v936_v61 = vpop.f32.mrf.mxu0  ;;  %v1009_v25 = vpop.f32.mrf.mxu1  ;;  %v1141_v34 = vadd.f32 %v3411_v46, %v1087_v57  ;;  %v1091_v26 = vmul.f32 %v3396_v11, %v1037_v48  ;;  %v1040_v35 = vmax.f32 %v1004_v49, 0.0  ;;  %v1138_v23 = vadd.f32 %v3391_v19, %v1084_v52 }
 0x4ba   :  { %v1039_v45 = vmax.f32 %v933_v15, 0.0  ;;  %v1041_v60 = vmax.f32 %v1006_v16, 0.0  ;;  %2345 = vmatpush3.bf16.msra.mxu0 %v2640_v58  ;;  %v1140_v50 = vadd.f32 %v3404_v33, %v1086_v55  ;;  %v1088_v37 = vmul.f32 %v3382_v3, %v1034_v1 }
 0x4bb   :  { %v938_v40 = vpop.f32.mrf.mxu0  ;;  %v1011_v12 = vpop.f32.mrf.mxu1  ;;  %2346 = vmatprep.subr.bf16.mxu0 %v2641_v0  ;;  %v1090_v38 = vmul.f32 %v3386_v14, %v1036_v29  ;;  %v937_v39 = vadd.f32 %v936_v61, %v3364_v5  ;;  %v1163_v56 = vpack.c.bf16 %v1139_v30, %v1135_v47  ;;  %v1143_v42 = vadd.f32 %v3409_v7, %v1089_v13 }
 0x4bc   :  { %v1093_v17 = vmul.f32 %v3394_v36, %v1039_v45  ;;  %v1095_v41 = vmul.f32 %v3396_v11, %v1041_v60  ;;  %v1092_v43 = vmul.f32 %v3382_v3, %v1038_v27  ;;  %v1145_v52 = vadd.f32 %v3411_v46, %v1091_v26 }
 0x4bd   :  { %v940_v20 = vpop.f32.mrf.mxu0  ;;  %v1013_v24 = vpop.f32.mrf.mxu1  ;;  %v1094_v21 = vmul.f32 %v3386_v14, %v1040_v35  ;;  %1612 = vmatprep.mubr.bf16.mxu0 %v1163_v56  ;;  %v1165_v47 = vpack.c.bf16 %v1141_v34, %v1137_v32  ;;  %v939_v53 = vadd.f32 %v938_v40, %v3369_v22  ;;  %v1012_v55 = vadd.f32 %v1011_v12, %v3371_v31  ;;  %v2650_v56 = vld [vmem:[%s3687_s14 + $0x8] sm:$0xff]  }
 0x4be   :  { %v1147_v18 = vadd.f32 %v3409_v7, %v1093_v17  ;;  %v1149_v44 = vadd.f32 %v3411_v46, %v1095_v41  ;;  %v1162_v57 = vpack.c.bf16 %v1138_v23, %v3438_v2  ;;  %v1164_v4 = vpack.c.bf16 %v1140_v50, %v3448_v6  ;;  %2347 = vmatpush3.bf16.msra.mxu0 %v2642_v28 }
 0x4bf   :  { %v942_v62 = vpop.f32.mrf.mxu0  ;;  %v1015_v51 = vpop.f32.mrf.mxu1  ;;  %v941_v9 = vadd.f32 %v940_v20, %v3364_v5  ;;  %1685 = vmatprep.mubr.bf16.mxu1 %v1165_v47  ;;  %v1043_v58 = vmax.f32 %v939_v53, 0.0  ;;  %v1014_v63 = vadd.f32 %v1013_v24, %v3366_v8  ;;  %2348 = vmatprep.subr.bf16.mxu0 %v2643_v54  ;;  %v1010_v16 = vadd.f32 %v1009_v25, %v3366_v8  ;;  %v2651_v54 = vld [vmem:[%s3687_s14 + $0x40] sm:$0xff]  }
 0x4c0   :  { %v943_v49 = vadd.f32 %v942_v62, %v3369_v22  ;;  %v1016_v15 = vadd.f32 %v1015_v51, %v3371_v31  ;;  %v1045_v61 = vmax.f32 %v1012_v55, 0.0  ;;  %1613 = vmatmul.mubr.bf16.gmra.mxu0 %v1162_v57  ;;  %1686 = vmatmul.mubr.bf16.gmra.mxu1 %v1164_v4  ;;  %v1167_v2 = vpack.c.bf16 %v1147_v18, %v1143_v42  ;;  %v2652_v42 = vld [vmem:[%s3687_s14] sm:$0xff]  }
 0x4c1   :  { %v1169_v0 = vpack.c.bf16 %v1149_v44, %v1145_v52  ;;  %v1146_v6 = vadd.f32 %v3391_v19, %v1092_v43  ;;  %v1097_v5 = vmul.f32 %v3394_v36, %v1043_v58  ;;  %v1148_v29 = vadd.f32 %v3404_v33, %v1094_v21  ;;  %v1238_v43 = vld [vmem:[%s3684_s11] sm:$0x3] }
 0x4c2   :  { %v1047_v30 = vmax.f32 %v943_v49, 0.0  ;;  %v1049_v1 = vmax.f32 %v1016_v15, 0.0  ;;  %v1099_v22 = vmul.f32 %v3396_v11, %v1045_v61  ;;  %v1046_v48 = vmax.f32 %v941_v9, 0.0  ;;  %1622 = vmatprep.mubr.bf16.mxu0 %v1167_v2  ;;  %v1732_v4 = vld [vmem:[%s3685_s12] sm:$0x3] }
 0x4c3   :  { %v1048_v31 = vmax.f32 %v1014_v63, 0.0  ;;  %1695 = vmatprep.mubr.bf16.mxu1 %v1169_v0  ;;  %v1142_v13 = vadd.f32 %v3391_v19, %v1088_v37  ;;  %v1144_v27 = vadd.f32 %v3404_v33, %v1090_v38  ;;  %v1042_v45 = vmax.f32 %v937_v39, 0.0  ;;  %v2646_v38 = vld [vmem:[%s3687_s14 + $0x18] sm:$0xff]   ;;  %v2649_v39 = vld [vmem:[%s3687_s14 + $0x48] sm:$0xff]  }
 0x4c4   :  { %v1101_v8 = vmul.f32 %v3394_v36, %v1047_v30  ;;  %v1103_v25 = vmul.f32 %v3396_v11, %v1049_v1  ;;  %v1044_v60 = vmax.f32 %v1010_v16, 0.0  ;;  %v1151_v40 = vadd.f32 %v3409_v7, %v1097_v5  ;;  %v1760_v30 = vld [vmem:[%s3686_s13] sm:$0x3] }
 0x4c5   :  { %v1153_v12 = vadd.f32 %v3411_v46, %v1099_v22  ;;  %v1100_v26 = vmul.f32 %v3382_v3, %v1046_v48  ;;  %v1102_v36 = vmul.f32 %v3386_v14, %v1048_v31  ;;  %v1166_v35 = vpack.c.bf16 %v1146_v6, %v1142_v13 }
 0x4c6   :  { %v1155_v32 = vadd.f32 %v3409_v7, %v1101_v8  ;;  %v1157_v34 = vadd.f32 %v3411_v46, %v1103_v25  ;;  %v1168_v11 = vpack.c.bf16 %v1148_v29, %v1144_v27  ;;  %v1096_v17 = vmul.f32 %v3382_v3, %v1042_v45  ;;  %v2644_v3 = vld [vmem:[%s3687_s14 + $0x20] sm:$0xff]  }
 0x4c7   :  { %v1098_v41 = vmul.f32 %v3386_v14, %v1044_v60  ;;  %v1154_v7 = vadd.f32 %v3391_v19, %v1100_v26  ;;  %v1156_v46 = vadd.f32 %v3404_v33, %v1102_v36  ;;  %2349 = vmatpush3.bf16.msra.mxu0 %v2644_v3  ;;  %v2645_v14 = vld [vmem:[%s3687_s14 + $0x58] sm:$0xff]   ;;  %v3550_v18 = vrot.slane %v1238_v43, %v3356_v59 }
 0x4c8   :  { %v1171_v23 = vpack.c.bf16 %v1155_v32, %v1151_v40  ;;  %v1173_v50 = vpack.c.bf16 %v1157_v34, %v1153_v12  ;;  %1623 = vmatmul.mubr.bf16.gmra.mxu0 %v1166_v35  ;;  %1696 = vmatmul.mubr.bf16.gmra.mxu1 %v1168_v11  ;;  %v1150_v20 = vadd.f32 %v3391_v19, %v1096_v17  ;;  %v2647_v19 = vld [vmem:[%s3687_s14 + $0x50] sm:$0xff]  }
 0x4c9   :  { %v1152_v24 = vadd.f32 %v3404_v33, %v1098_v41  ;;  %2350 = vmatprep.subr.bf16.mxu0 %v2645_v14  ;;  %v2648_v33 = vld [vmem:[%s3687_s14 + $0x10] sm:$0xff]   ;;  %v3553_v44 = vrot.slane %v1238_v43, %v3361_v10  ;;  %v3562_v16 = vrot.slane %v1732_v4, %v3361_v10  ;;  %v3566_v6 = vrot.slane %v1732_v4, %v3356_v59 }
 0x4ca   :  { %1632 = vmatprep.mubr.bf16.mxu0 %v1171_v23  ;;  %1705 = vmatprep.mubr.bf16.mxu1 %v1173_v50  ;;  %v1170_v28 = vpack.c.bf16 %v1154_v7, %v1150_v20  ;;  %v3573_v48 = vrot.slane %v1760_v30, %v3361_v10  ;;  %v3578_v13 = vrot.slane %v1760_v30, %v3356_v59 }
 0x4cb   :  { %v1172_v37 = vpack.c.bf16 %v1156_v46, %v1152_v24  ;;  %2351 = vmatpush3.bf16.msra.mxu0 %v2646_v38 }
 0x4cc   :  { %2352 = vmatprep.subr.bf16.mxu0 %v2647_v19 }
 0x4cf   :  { %2353 = vmatpush3.bf16.msra.mxu0 %v2648_v33 }
 0x4d0   :  { %1633 = vmatmul.mubr.bf16.gmra.mxu0 %v1170_v28  ;;  %1706 = vmatmul.mubr.bf16.gmra.mxu1 %v1172_v37 }
 0x4d1   :  { %2354 = vmatprep.subr.bf16.mxu0 %v2649_v39 }
 0x4d3   :  { %2355 = vmatpush3.bf16.msra.mxu0 %v2650_v56 }
 0x4d4   :  { %2356 = vmatprep.subr.bf16.mxu0 %v2651_v54 }
 0x4d7   :  { %2357 = vmatpush3.bf16.msra.mxu0 %v2652_v42 }
 0x574   :  { %v1604_v62 = vpop.f32.mrf.mxu0 }
 0x575   :  { %v1605_v51 = vadd.f32 %v1604_v62, %v3550_v18  ;;  %v1677_v52 = vpop.f32.mrf.mxu1 }
 0x576   :  { %v1606_v21 = vpop.f32.mrf.mxu0 }
 0x577   :  { %v1607_v47 = vadd.f32 %v1606_v21, %v3553_v44  ;;  %v1679_v53 = vpop.f32.mrf.mxu1  ;;  %v1678_v55 = vadd.f32 %v1677_v52, %v1605_v51 }
 0x578   :  { %v1608_v57 = vpop.f32.mrf.mxu0 }
 0x579   :  { %v1680_v9 = vadd.f32 %v1679_v53, %v1607_v47  ;;  %v1609_v58 = vadd.f32 %v1608_v57, %v3550_v18  ;;  %v1681_v63 = vpop.f32.mrf.mxu1  ;;  %v1716_v0 = vmax.f32 %v1678_v55, 0.0 }
 0x57a   :  { %v1610_v49 = vpop.f32.mrf.mxu0 }
 0x57b   :  { %v1717_v15 = vmax.f32 %v1680_v9, 0.0  ;;  %v1682_v61 = vadd.f32 %v1681_v63, %v1609_v58  ;;  %v1611_v2 = vadd.f32 %v1610_v49, %v3553_v44  ;;  %v1683_v5 = vpop.f32.mrf.mxu1  ;;  %v1744_v25 = vmul.f32 %v3566_v6, %v1716_v0 }
 0x57d   :  { %v1718_v1 = vmax.f32 %v1682_v61, 0.0  ;;  %v1684_v29 = vadd.f32 %v1683_v5, %v1611_v2  ;;  %v1745_v22 = vmul.f32 %v3562_v16, %v1717_v15  ;;  %v1772_v35 = vadd.f32 %v3578_v13, %v1744_v25 }
 0x57f   :  { %v1746_v31 = vmul.f32 %v3566_v6, %v1718_v1  ;;  %v1719_v8 = vmax.f32 %v1684_v29, 0.0  ;;  %v1773_v10 = vadd.f32 %v3573_v48, %v1745_v22 }
 0x580   :  { %v1614_v27 = vpop.f32.mrf.mxu0  ;;  %v1687_v45 = vpop.f32.mrf.mxu1 }
 0x581   :  { %v1747_v60 = vmul.f32 %v3562_v16, %v1719_v8  ;;  %v1615_v40 = vadd.f32 %v1614_v27, %v3550_v18  ;;  %v1774_v12 = vadd.f32 %v3578_v13, %v1746_v31 }
 0x582   :  { %v1616_v32 = vpop.f32.mrf.mxu0  ;;  %v1689_v34 = vpop.f32.mrf.mxu1 }
 0x583   :  { %v1775_v26 = vadd.f32 %v3573_v48, %v1747_v60  ;;  %v1617_v36 = vadd.f32 %v1616_v32, %v3553_v44  ;;  %v1688_v23 = vadd.f32 %v1687_v45, %v1615_v40  ;;  %v1788_v7 = vpack.c.bf16 %v1774_v12, %v1772_v35 }
 0x584   :  { %v1618_v59 = vpop.f32.mrf.mxu0  ;;  %v1691_v11 = vpop.f32.mrf.mxu1 }
 0x585   :  { %v1690_v50 = vadd.f32 %v1689_v34, %v1617_v36  ;;  %v1619_v17 = vadd.f32 %v1618_v59, %v3550_v18  ;;  %v1789_v41 = vpack.c.bf16 %v1775_v26, %v1773_v10  ;;  %v1720_v38 = vmax.f32 %v1688_v23, 0.0 }
 0x586   :  { %v1620_v46 = vpop.f32.mrf.mxu0  ;;  %v1693_v20 = vpop.f32.mrf.mxu1 }
 0x587   :  { %v1692_v24 = vadd.f32 %v1691_v11, %v1619_v17  ;;  %v1621_v28 = vadd.f32 %v1620_v46, %v3553_v44  ;;  %1963 = vmatprep.mubr.bf16.mxu0 %v1789_v41  ;;  %v1721_v37 = vmax.f32 %v1690_v50, 0.0  ;;  %v1748_v53 = vmul.f32 %v3566_v6, %v1720_v38 }
 0x588   :  { %v1624_v3 = vpop.f32.mrf.mxu0  ;;  %v1697_v14 = vpop.f32.mrf.mxu1  ;;  %1964 = vmatmul.mubr.bf16.vlgmr.msra.gmra.mxu0 %v1788_v7 }
 0x589   :  { %v1722_v19 = vmax.f32 %v1692_v24, 0.0  ;;  %v1694_v33 = vadd.f32 %v1693_v20, %v1621_v28  ;;  %v1625_v39 = vadd.f32 %v1624_v3, %v3550_v18  ;;  %v1749_v51 = vmul.f32 %v3562_v16, %v1721_v37 }
 0x58a   :  { %v1626_v56 = vpop.f32.mrf.mxu0  ;;  %v1699_v54 = vpop.f32.mrf.mxu1  ;;  %v1776_v29 = vadd.f32 %v3578_v13, %v1748_v53  ;;  %v2290_v53 = vld [vmem:[%s3688_s15] ss:$0 sm:$0xff] }
 0x58b   :  { %v1750_v42 = vmul.f32 %v3566_v6, %v1722_v19  ;;  %v1723_v43 = vmax.f32 %v1694_v33, 0.0  ;;  %v1627_v62 = vadd.f32 %v1626_v56, %v3553_v44  ;;  %v1698_v52 = vadd.f32 %v1697_v14, %v1625_v39 }
 0x58c   :  { %v1628_v21 = vpop.f32.mrf.mxu0  ;;  %v1701_v47 = vpop.f32.mrf.mxu1  ;;  %v1777_v0 = vadd.f32 %v3573_v48, %v1749_v51 }
 0x58d   :  { %v1751_v55 = vmul.f32 %v3562_v16, %v1723_v43  ;;  %v1700_v57 = vadd.f32 %v1699_v54, %v1627_v62  ;;  %v1629_v4 = vadd.f32 %v1628_v21, %v3550_v18  ;;  %v1778_v9 = vadd.f32 %v3578_v13, %v1750_v42 }
 0x58e   :  { %v1630_v58 = vpop.f32.mrf.mxu0  ;;  %v1703_v63 = vpop.f32.mrf.mxu1  ;;  %v1724_v5 = vmax.f32 %v1698_v52, 0.0 }
 0x58f   :  { %v1779_v49 = vadd.f32 %v3573_v48, %v1751_v55  ;;  %v1725_v15 = vmax.f32 %v1700_v57, 0.0  ;;  %v1702_v61 = vadd.f32 %v1701_v47, %v1629_v4  ;;  %v1631_v2 = vadd.f32 %v1630_v58, %v3553_v44  ;;  %v2653_v47 = vld [vmem:[%s3691_s18 + $0x18] sm:$0xff]  }
 0x590   :  { %v1634_v30 = vpop.f32.mrf.mxu0  ;;  %v1707_v1 = vpop.f32.mrf.mxu1  ;;  %v1790_v32 = vpack.c.bf16 %v1778_v9, %v1776_v29  ;;  %v1752_v34 = vmul.f32 %v3566_v6, %v1724_v5  ;;  %2438 = vmatprep.subr.bf16.mxu1 %v2653_v47  ;;  %v2308_v5 = vld [vmem:[%s3690_s17] ss:$0 sm:$0xff] }
 0x591   :  { %v1726_v22 = vmax.f32 %v1702_v61, 0.0  ;;  %v1704_v31 = vadd.f32 %v1703_v63, %v1631_v2  ;;  %v1635_v8 = vadd.f32 %v1634_v30, %v3550_v18  ;;  %v1753_v25 = vmul.f32 %v3562_v16, %v1725_v15  ;;  %2439 = vmatpush3.bf16.msra.mxu1 %v2653_v47  ;;  %v2307_v15 = vld [vmem:[%s3689_s16] ss:$0 sm:$0xff] }
 0x592   :  { %v1636_v27 = vpop.f32.mrf.mxu0  ;;  %v1709_v45 = vpop.f32.mrf.mxu1  ;;  %v1791_v60 = vpack.c.bf16 %v1779_v49, %v1777_v0  ;;  %v1780_v24 = vadd.f32 %v3578_v13, %v1752_v34 }
 0x593   :  { %v1754_v40 = vmul.f32 %v3566_v6, %v1726_v22  ;;  %v1727_v12 = vmax.f32 %v1704_v31, 0.0  ;;  %v1637_v10 = vadd.f32 %v1636_v27, %v3553_v44  ;;  %v1708_v59 = vadd.f32 %v1707_v1, %v1635_v8 }
 0x594   :  { %1971 = vmatprep.mubr.bf16.mxu0 %v1791_v60  ;;  %v1638_v26 = vpop.f32.mrf.mxu0  ;;  %v1711_v36 = vpop.f32.mrf.mxu1  ;;  %v1781_v23 = vadd.f32 %v3573_v48, %v1753_v25 }
 0x595   :  { %v1755_v35 = vmul.f32 %v3562_v16, %v1727_v12  ;;  %v1639_v11 = vadd.f32 %v1638_v26, %v3550_v18  ;;  %1972 = vmatmul.mubr.bf16.gmra.mxu0 %v1790_v32  ;;  %v1710_v50 = vadd.f32 %v1709_v45, %v1637_v10  ;;  %v1782_v41 = vadd.f32 %v3578_v13, %v1754_v40 }
 0x596   :  { %v1640_v17 = vpop.f32.mrf.mxu0  ;;  %v1713_v37 = vpop.f32.mrf.mxu1  ;;  %v1728_v3 = vmax.f32 %v1708_v59, 0.0 }
 0x597   :  { %v1783_v7 = vadd.f32 %v3573_v48, %v1755_v35  ;;  %v1712_v46 = vadd.f32 %v1711_v36, %v1639_v11  ;;  %v1641_v20 = vadd.f32 %v1640_v17, %v3553_v44  ;;  %v1729_v28 = vmax.f32 %v1710_v50, 0.0 }
 0x598   :  { %v1792_v56 = vpack.c.bf16 %v1782_v41, %v1780_v24  ;;  %v1756_v54 = vmul.f32 %v3566_v6, %v1728_v3 }
 0x599   :  { %v1730_v14 = vmax.f32 %v1712_v46, 0.0  ;;  %v1714_v38 = vadd.f32 %v1713_v37, %v1641_v20  ;;  %v1793_v18 = vpack.c.bf16 %v1783_v7, %v1781_v23  ;;  %v1757_v19 = vmul.f32 %v3562_v16, %v1729_v28 }
 0x59a   :  { %v1784_v51 = vadd.f32 %v3578_v13, %v1756_v54 }
 0x59b   :  { %v1758_v33 = vmul.f32 %v3566_v6, %v1730_v14  ;;  %v1731_v39 = vmax.f32 %v1714_v38, 0.0  ;;  %1979 = vmatprep.mubr.bf16.mxu0 %v1793_v18  ;;  %v1785_v44 = vadd.f32 %v3573_v48, %v1757_v19  ;;  %v2655_v6 = vld [vmem:[%s3691_s18 + $0x8] sm:$0xff]  }
 0x59d   :  { %v1759_v42 = vmul.f32 %v3562_v16, %v1731_v39  ;;  %1980 = vmatmul.mubr.bf16.gmra.mxu0 %v1792_v56  ;;  %v1786_v43 = vadd.f32 %v3578_v13, %v1758_v33  ;;  %v2654_v16 = vld [vmem:[%s3691_s18 + $0x10] sm:$0xff]  }
 0x59e   :  { %2440 = vmatprep.subr.bf16.mxu1 %v2654_v16 }
 0x59f   :  { %v1787_v62 = vadd.f32 %v3573_v48, %v1759_v42  ;;  %v1794_v21 = vpack.c.bf16 %v1786_v43, %v1784_v51  ;;  %2441 = vmatpush3.bf16.msra.mxu1 %v2654_v16  ;;  %v2656_v48 = vld [vmem:[%s3691_s18] sm:$0xff]  }
 0x5a0   :  { %2442 = vmatprep.subr.bf16.mxu1 %v2655_v6 }
 0x5a1   :  { %v1795_v52 = vpack.c.bf16 %v1787_v62, %v1785_v44 }
 0x5a3   :  { %1987 = vmatprep.mubr.bf16.mxu0 %v1795_v52  ;;  %2443 = vmatpush3.bf16.msra.mxu1 %v2655_v6 }
 0x5a4   :  { %2444 = vmatprep.subr.bf16.mxu1 %v2656_v48 }
 0x5a5   :  { %1988 = vmatmul.mubr.bf16.gmra.mxu0 %v1794_v21 }
 0x5a7   :  { %2445 = vmatpush3.bf16.msra.mxu1 %v2656_v48  ;;  %v2309_v48 = vld [vmem:[%s3692_s19] ss:$0 sm:$0xff] }
 0x648   :  { %v2358_v13 = vpop.f32.mrf.mxu0 }
 0x64a   :  { %v2359_v55 = vpop.f32.mrf.mxu0 }
 0x64b   :  { %v2360_v57 = vadd.f32 %v2359_v55, %v2358_v13 }
 0x64c   :  { %v2361_v4 = vpop.f32.mrf.mxu0 }
 0x64d   :  { %v1966_v9 = vadd.f32 %v2360_v57, %v2290_v53 }
 0x64e   :  { %v2362_v58 = vpop.f32.mrf.mxu0 }
 0x64f   :  { %v1996_v63 = vmax.f32 %v1966_v9, 0.0  ;;  %v2363_v49 = vadd.f32 %v2362_v58, %v2361_v4 }
 0x651   :  { %v1969_v61 = vadd.f32 %v2363_v49, %v2290_v53  ;;  %v2011_v2 = vmul.f32 %v2307_v15, %v1996_v63 }
 0x653   :  { %v1997_v0 = vmax.f32 %v1969_v61, 0.0  ;;  %v2026_v29 = vadd.f32 %v2308_v5, %v2011_v2 }
 0x655   :  { %v2012_v30 = vmul.f32 %v2307_v15, %v1997_v0  ;;  %v2364_v1 = vpop.f32.mrf.mxu0 }
 0x657   :  { %v2027_v22 = vadd.f32 %v2308_v5, %v2012_v30  ;;  %v2365_v31 = vpop.f32.mrf.mxu0 }
 0x658   :  { %v2366_v8 = vadd.f32 %v2365_v31, %v2364_v1 }
 0x659   :  { %v2367_v25 = vpop.f32.mrf.mxu0  ;;  %v2034_v27 = vpack.c.bf16 %v2027_v22, %v2026_v29 }
 0x65a   :  { %v1974_v45 = vadd.f32 %v2366_v8, %v2290_v53 }
 0x65b   :  { %v2368_v60 = vpop.f32.mrf.mxu0  ;;  %2446 = vmatprep.mubr.msk.bf16.mxu1 %vm680_vm1, %v2034_v27 }
 0x65c   :  { %v1998_v40 = vmax.f32 %v1974_v45, 0.0  ;;  %v2369_v12 = vadd.f32 %v2368_v60, %v2367_v25 }
 0x65d   :  { %v2370_v32 = vpop.f32.mrf.mxu0 }
 0x65e   :  { %v1977_v34 = vadd.f32 %v2369_v12, %v2290_v53  ;;  %v2013_v26 = vmul.f32 %v2307_v15, %v1998_v40 }
 0x65f   :  { %v2371_v10 = vpop.f32.mrf.mxu0 }
 0x660   :  { %v1999_v36 = vmax.f32 %v1977_v34, 0.0  ;;  %v2372_v35 = vadd.f32 %v2371_v10, %v2370_v32  ;;  %v2028_v17 = vadd.f32 %v2308_v5, %v2013_v26 }
 0x661   :  { %v2373_v59 = vpop.f32.mrf.mxu0 }
 0x662   :  { %v2014_v11 = vmul.f32 %v2307_v15, %v1999_v36  ;;  %v1982_v23 = vadd.f32 %v2372_v35, %v2290_v53 }
 0x663   :  { %v2374_v50 = vpop.f32.mrf.mxu0 }
 0x664   :  { %v2029_v41 = vadd.f32 %v2308_v5, %v2014_v11  ;;  %v2000_v7 = vmax.f32 %v1982_v23, 0.0  ;;  %v2375_v46 = vadd.f32 %v2374_v50, %v2373_v59 }
 0x665   :  { %v2376_v20 = vpop.f32.mrf.mxu0 }
 0x666   :  { %v2035_v24 = vpack.c.bf16 %v2029_v41, %v2028_v17  ;;  %v1985_v28 = vadd.f32 %v2375_v46, %v2290_v53  ;;  %v2015_v3 = vmul.f32 %v2307_v15, %v2000_v7 }
 0x667   :  { %v2377_v37 = vpop.f32.mrf.mxu0 }
 0x668   :  { %v2001_v14 = vmax.f32 %v1985_v28, 0.0  ;;  %v2378_v38 = vadd.f32 %v2377_v37, %v2376_v20  ;;  %2447 = vmatmul.mubr.msk.bf16.vlgmr.msra.gmra.mxu1 %vm680_vm1, %v2035_v24  ;;  %v2030_v56 = vadd.f32 %v2308_v5, %v2015_v3 }
 0x669   :  { %v2379_v18 = vpop.f32.mrf.mxu0 }
 0x66a   :  { %v2016_v19 = vmul.f32 %v2307_v15, %v2001_v14  ;;  %v1990_v33 = vadd.f32 %v2378_v38, %v2290_v53 }
 0x66b   :  { %v2380_v39 = vpop.f32.mrf.mxu0 }
 0x66c   :  { %v2031_v54 = vadd.f32 %v2308_v5, %v2016_v19  ;;  %v2002_v42 = vmax.f32 %v1990_v33, 0.0  ;;  %v2381_v44 = vadd.f32 %v2380_v39, %v2379_v18 }
 0x66e   :  { %v1993_v43 = vadd.f32 %v2381_v44, %v2290_v53  ;;  %v2036_v62 = vpack.c.bf16 %v2031_v54, %v2030_v56  ;;  %v2017_v51 = vmul.f32 %v2307_v15, %v2002_v42 }
 0x670   :  { %v2003_v52 = vmax.f32 %v1993_v43, 0.0  ;;  %2450 = vmatprep.mubr.msk.bf16.mxu1 %vm680_vm1, %v2036_v62  ;;  %v2032_v47 = vadd.f32 %v2308_v5, %v2017_v51 }
 0x672   :  { %v2018_v21 = vmul.f32 %v2307_v15, %v2003_v52 }
 0x674   :  { %v2033_v16 = vadd.f32 %v2308_v5, %v2018_v21 }
 0x676   :  { %v2037_v6 = vpack.c.bf16 %v2033_v16, %v2032_v47 }
 0x678   :  { %2451 = vmatmul.mubr.msk.bf16.gmra.mxu1 %vm680_vm1, %v2037_v6 }
 0x728   :  { %v2448_v13 = vpop.f32.mrf.mxu1 }
 0x729   :  { %v2132_v55 = vadd.f32 %v2448_v13, %v2309_v48 }
 0x72a   :  { %v2123_v57 = vpop.f32.mrf.mxu1 }
 0x72b   :  { %2156 = vst [vmem:[%s3693_s20 + $0x10] sm:$0xff] %v2132_v55  ;;  %v2124_v53 = vadd.f32 %v2309_v48, %v2123_v57 }
 0x72c   :  { %v2449_v4 = vpop.f32.mrf.mxu1 }
 0x72d   :  { %2154 = vst [vmem:[%s3693_s20] sm:$0xff] %v2124_v53  ;;  %v2135_v9 = vadd.f32 %v2449_v4, %v2309_v48 }
 0x72e   :  { %v2126_v58 = vpop.f32.mrf.mxu1 }
 0x72f   :  { %2157 = vst [vmem:[%s3693_s20 + $0x18] sm:$0xff] %v2135_v9  ;;  %v2127_v63 = vadd.f32 %v2309_v48, %v2126_v58 }
 0x731   :  { %2155 = vst [vmem:[%s3693_s20 + $0x8] sm:$0xff] %v2127_v63 }
 0x738   :  { %v2452_v49 = vpop.f32.mrf.mxu1 }
 0x739   :  { %v2148_v15 = vadd.f32 %v2452_v49, %v2309_v48 }
 0x73a   :  { %v2139_v61 = vpop.f32.mrf.mxu1 }
 0x73b   :  { %2160 = vst [vmem:[%s3693_s20 + $0x30] sm:$0xff] %v2148_v15  ;;  %v2140_v2 = vadd.f32 %v2309_v48, %v2139_v61 }
 0x73c   :  { %v2453_v0 = vpop.f32.mrf.mxu1 }
 0x73d   :  { %2158 = vst [vmem:[%s3693_s20 + $0x20] sm:$0xff] %v2140_v2  ;;  %v2151_v5 = vadd.f32 %v2453_v0, %v2309_v48 }
 0x73e   :  { %v2142_v30 = vpop.f32.mrf.mxu1 }
 0x73f   :  { %2161 = vst [vmem:[%s3693_s20 + $0x38] sm:$0xff] %v2151_v5  ;;  %v2143_v1 = vadd.f32 %v2309_v48, %v2142_v30 }
 0x741   :  { %2159 = vst [vmem:[%s3693_s20 + $0x28] sm:$0xff] %v2143_v1 }
 0x742   :  { %2166 = vsyncpa [#allocation3], 1 }

// kernel: sparse_deep_gcn.14
= control target key start
LH: loop header
LB: loop body
LE: loop exit
PB: predicated region body
PF: predicated region fallthrough
CT: control target
= control target key end

     0   :  { %v4680_v0 = vmov 0   ;;  %s4681_s13 = smov 96   ;;  %vm70_vm0 = vcmask 261120   ;;  %v224_v20 = vlaneseq  ;;  %v4682_v35 = vmov -1e+30   ;;  %s7791_s3 = inlined_call_operand.vmem [shape: f32[64,1], index: 3, kind: input, shape index: {}]   ;;  %s7792_s4 = inlined_call_operand.vmem [shape: bf16[32,64], index: 4, kind: input, shape index: {}]   ;;  %s7793_s0 = inlined_call_operand.vmem [shape: f32[64,32], index: 0, kind: input, shape index: {}, may-alias: {0,1}]   ;;  %s7794_s1 = inlined_call_operand.vmem [shape: f32[64,32], index: 1, kind: input, shape index: {}, may-alias: {0,1}]   ;;  %s7795_s2 = inlined_call_operand.vmem [shape: f32[64,64], index: 2, kind: input, shape index: {}]   ;;  %s7796_s5 = inlined_call_operand.vmem [shape: f32[1,32], index: 5, kind: input, shape index: {}]   ;;  %s7797_s6 = inlined_call_operand.vmem [shape: f32[1,32], index: 6, kind: input, shape index: {}]   ;;  %s7798_s7 = inlined_call_operand.vmem [shape: f32[1,32], index: 7, kind: input, shape index: {}]   ;;  %s7799_s8 = inlined_call_operand.vmem [shape: f32[64,32], index: 8, kind: output, shape index: {}]  }
   0x1   :  { %4659 = vset.pattern.permute.xlu1 %v4680_v0  ;;  %v160_v1 = vld [vmem:[%s7791_s3] sm:$0xff]  ;;  %4660 = vset.pattern.permute.xlu0 %v4680_v0  ;;  %v161_v3 = vld [vmem:[%s7791_s3 + $0x8] sm:$0xff]  ;;  %v163_v6 = vld [vmem:[%s7791_s3 + $0x18] sm:$0xff]  ;;  %vm4386_vm9 = vcmask 1041409   ;;  %vm4388_vm10 = vcmask 1042434   ;;  %vm4390_vm11 = vcmask 1043459  }
   0x2   :  { %170 = vperm.xlu1 %4659, %v160_v1   ;;  %v4661_v2 = vld [vmem:[%s7792_s4] sm:$0xff]   ;;  %v4662_v4 = vld [vmem:[%s7792_s4 + $0x8] sm:$0xff]   ;;  %v162_v9 = vld [vmem:[%s7791_s3 + $0x10] sm:$0xff]  ;;  %v225_v22 = vshrl.u32 %v224_v20, 7  ;;  %vm4392_vm12 = vcmask 1044484   ;;  %vm4394_vm13 = vcmask 1045509  }
   0x3   :  { %64 = vrot.lane.b32.xlu0 %v4661_v2, %s4681_s13  ;;  %4644 = vmatprep.subr.bf16.mxu1 %v4662_v4  ;;  %v42_v5 = vld [vmem:[%s7793_s0] sm:$0xff]  ;;  %v43_v7 = vld [vmem:[%s7793_s0 + $0x8] sm:$0xff]  ;;  %v166_v12 = vld [vmem:[%s7791_s3 + $0x30] sm:$0xff]  ;;  %vm4396_vm14 = vcmask 1046534   ;;  %vm4398_vm15 = vcmask 1047559  }
   0x4   :  { %4645 = vmatpush3.bf16.msra.mxu1 %v4662_v4  ;;  %v50_v8 = vpack.c.bf16 %v43_v7, %v42_v5  ;;  %v164_v10 = vld [vmem:[%s7791_s3 + $0x20] sm:$0xff]  ;;  %v165_v11 = vld [vmem:[%s7791_s3 + $0x28] sm:$0xff]  ;;  %v167_v13 = vld [vmem:[%s7791_s3 + $0x38] sm:$0xff]  ;;  %v4782_v25 = vsub.s32 0, %v225_v22  ;;  %v4790_v28 = vsub.s32 4, %v225_v22  ;;  %v4792_v29 = vsub.s32 5, %v225_v22 }
   0x5   :  { %4646 = vmatprep.subr.bf16.mxu1 %v4661_v2  ;;  %v30_v14 = vld [vmem:[%s7794_s1] sm:$0xff]  ;;  %v31_v15 = vld [vmem:[%s7794_s1 + $0x8] sm:$0xff]  ;;  %v32_v17 = vld [vmem:[%s7794_s1 + $0x10] sm:$0xff]  ;;  %v4794_v30 = vsub.s32 6, %v225_v22  ;;  %v4796_v31 = vsub.s32 7, %v225_v22  ;;  %v4830_v46 = vsub.s32 1, %v225_v22 }
   0x6   :  { %175 = vperm.xlu1 %4659, %v161_v3   ;;  %4636 = vmatprep.mubr.msk.bf16.mxu0 %vm70_vm0, %v50_v8  ;;  %v148_v16 = vpack.c.bf16 %v31_v15, %v30_v14  ;;  %v33_v18 = vld [vmem:[%s7794_s1 + $0x18] sm:$0xff]  ;;  %v152_v24 = vld [vmem:[%s7795_s2] sm:$0xff]  ;;  %v44_v26 = vld [vmem:[%s7793_s0 + $0x10] sm:$0xff]  ;;  %v4832_v47 = vsub.s32 2, %v225_v22  ;;  %v4834_v48 = vsub.s32 3, %v225_v22 }
   0x7   :  { %66 = vrot.lane.b32.xlu0 %v4662_v4, %s4681_s13  ;;  %v149_v19 = vpack.c.bf16 %v33_v18, %v32_v17  ;;  %v45_v27 = vld [vmem:[%s7793_s0 + $0x18] sm:$0xff]  ;;  %v46_v33 = vld [vmem:[%s7793_s0 + $0x20] sm:$0xff]  ;;  %v47_v34 = vld [vmem:[%s7793_s0 + $0x28] sm:$0xff] }
   0x8   :  { %4647 = vmatpush3.bf16.msra.mxu1 %v4661_v2  ;;  %4648 = vmatprep.mubr.msk.bf16.mxu1 %vm70_vm0, %v148_v16  ;;  %v153_v37 = vld [vmem:[%s7795_s2 + $0x8] sm:$0xff]  ;;  %v51_v38 = vpack.c.bf16 %v45_v27, %v44_v26  ;;  %v52_v40 = vpack.c.bf16 %v47_v34, %v46_v33  ;;  %v155_v50 = vld [vmem:[%s7795_s2 + $0x18] sm:$0xff]  ;;  %v48_v55 = vld [vmem:[%s7793_s0 + $0x30] sm:$0xff] }
   0x9   :  { %v49_v56 = vld [vmem:[%s7793_s0 + $0x38] sm:$0xff]  ;;  %v156_v63 = vld [vmem:[%s7795_s2 + $0x20] sm:$0xff]  ;;  %v154_v2 = vld [vmem:[%s7795_s2 + $0x10] sm:$0xff] }
   0xa   :  { %185 = vperm.xlu1 %4659, %v163_v6   ;;  %v53_v0 = vpack.c.bf16 %v49_v56, %v48_v55  ;;  %v158_v14 = vld [vmem:[%s7795_s2 + $0x30] sm:$0xff]  ;;  %v159_v56 = vld [vmem:[%s7795_s2 + $0x38] sm:$0xff] }
   0xb   :  { %180 = vperm.xlu0 %4660, %v162_v9   ;;  %4649 = vmatmul.mubr.msk.bf16.vlgmr.msra.gmra.mxu1 %vm70_vm0, %v149_v19 }
   0xe   :  { %190 = vperm.xlu1 %4659, %v164_v10  }
   0xf   :  { %195 = vperm.xlu0 %4660, %v165_v11  }
  0x12   :  { %200 = vperm.xlu1 %4659, %v166_v12  }
  0x13   :  { %205 = vperm.xlu0 %4660, %v167_v13  }
  0x75   :  { %v65_v21 = vpop.permute.xlu0 %64 }
  0x79   :  { %v67_v23 = vpop.permute.xlu0 %66 }
  0x7a   :  { %4632 = vmatprep.subr.bf16.mxu0 %v67_v23 }
  0x7b   :  { %4633 = vmatpush3.bf16.msra.mxu0 %v67_v23 }
  0x7c   :  { %4634 = vmatprep.subr.bf16.mxu0 %v65_v21 }
  0x7d   :  { %v171_v32 = vpop.permute.xlu1 %170 }
  0x7e   :  { %vm208_vm1 = vcmp.le.f32.partialorder %v152_v24, %v171_v32 }
  0x7f   :  { %v4805_v36 = vsel %vm208_vm1, 0.0, %v4682_v35  ;;  %4635 = vmatpush3.bf16.msra.mxu0 %v65_v21 }
  0x80   :  { %v4812_v39 = vrot.slane %v4805_v36, %v4782_v25  ;;  %v4816_v41 = vrot.slane %v4805_v36, %v4790_v28  ;;  %v4820_v42 = vrot.slane %v4805_v36, %v4792_v29  ;;  %v4824_v43 = vrot.slane %v4805_v36, %v4794_v30 }
  0x81   :  { %v4828_v44 = vrot.slane %v4805_v36, %v4796_v31  ;;  %v176_v45 = vpop.permute.xlu1 %175  ;;  %v4911_v12 = vrot.slane %v4805_v36, %v4830_v46 }
  0x82   :  { %vm209_vm2 = vcmp.le.f32.partialorder %v153_v37, %v176_v45  ;;  %233 = vbcast.lane.b32.xlu0 %v4812_v39, 264  ;;  %229 = vbcast.lane.b32.xlu1 %v4812_v39, 256 }
  0x83   :  { %v217_v49 = vsel %vm209_vm2, 0.0, %v4682_v35  ;;  %4637 = vmatmul.mubr.msk.bf16.vlgmr.msra.gmra.mxu0 %vm70_vm0, %v51_v38 }
  0x84   :  { %v4844_v51 = vrot.slane %v217_v49, %v4782_v25  ;;  %v4847_v52 = vrot.slane %v217_v49, %v4830_v46  ;;  %v4850_v53 = vrot.slane %v217_v49, %v4832_v47  ;;  %v4853_v54 = vrot.slane %v217_v49, %v4834_v48  ;;  %4640 = vmatprep.mubr.msk.bf16.mxu0 %vm70_vm0, %v52_v40 }
  0x85   :  { %v4863_v57 = vrot.slane %v217_v49, %v4790_v28  ;;  %v4866_v58 = vrot.slane %v217_v49, %v4792_v29  ;;  %v4869_v59 = vrot.slane %v217_v49, %v4794_v30  ;;  %v4872_v60 = vrot.slane %v217_v49, %v4796_v31  ;;  %v186_v61 = vpop.permute.xlu1 %185 }
  0x86   :  { %vm211_vm3 = vcmp.le.f32.partialorder %v155_v50, %v186_v61  ;;  %241 = vbcast.lane.b32.xlu0 %v4812_v39, 280  ;;  %237 = vbcast.lane.b32.xlu1 %v4812_v39, 272  ;;  %v181_v1 = vpop.permute.xlu0 %180  ;;  %v157_v50 = vld [vmem:[%s7795_s2 + $0x28] sm:$0xff] }
  0x87   :  { %v219_v62 = vsel %vm211_vm3, 0.0, %v4682_v35  ;;  %vm210_vm5 = vcmp.le.f32.partialorder %v154_v2, %v181_v1 }
  0x88   :  { %v4884_v3 = vrot.slane %v219_v62, %v4782_v25  ;;  %v4887_v4 = vrot.slane %v219_v62, %v4830_v46  ;;  %v4890_v5 = vrot.slane %v219_v62, %v4832_v47  ;;  %v4893_v6 = vrot.slane %v219_v62, %v4834_v48 }
  0x89   :  { %v4896_v7 = vrot.slane %v219_v62, %v4790_v28  ;;  %v4899_v8 = vrot.slane %v219_v62, %v4792_v29  ;;  %v4902_v9 = vrot.slane %v219_v62, %v4794_v30  ;;  %v4905_v10 = vrot.slane %v219_v62, %v4796_v31  ;;  %v191_v11 = vpop.permute.xlu1 %190 }
  0x8a   :  { %7848 = vst [vmem:[#allocation2_spill] sm:$0xff] %v4884_v3  ;;  %7849 = vst [vmem:[#allocation3_spill] sm:$0xff] %v4887_v4  ;;  %vm212_vm4 = vcmp.le.f32.partialorder %v156_v63, %v191_v11  ;;  %249 = vbcast.lane.b32.xlu0 %v4812_v39, 296  ;;  %245 = vbcast.lane.b32.xlu1 %v4812_v39, 288  ;;  %v218_v15 = vsel %vm210_vm5, 0.0, %v4682_v35  ;;  %v196_v16 = vpop.permute.xlu0 %195 }
  0x8b   :  { %7850 = vst [vmem:[#allocation4_spill] sm:$0xff] %v4890_v5  ;;  %7851 = vst [vmem:[#allocation5_spill] sm:$0xff] %v4893_v6  ;;  %v220_v13 = vsel %vm212_vm4, 0.0, %v4682_v35  ;;  %4641 = vmatmul.mubr.msk.bf16.gmra.mxu0 %vm70_vm0, %v53_v0  ;;  %v4946_v27 = vrot.slane %v218_v15, %v4782_v25  ;;  %v4949_v32 = vrot.slane %v218_v15, %v4830_v46 }
  0x8c   :  { %7852 = vst [vmem:[#allocation6_spill] sm:$0xff] %v4896_v7  ;;  %7853 = vst [vmem:[#allocation7_spill] sm:$0xff] %v4899_v8  ;;  %v4920_v17 = vrot.slane %v220_v13, %v4782_v25  ;;  %v4923_v18 = vrot.slane %v220_v13, %v4830_v46  ;;  %v4926_v19 = vrot.slane %v220_v13, %v4832_v47 }
  0x8d   :  { %7854 = vst [vmem:[#allocation8_spill] sm:$0xff] %v4902_v9  ;;  %7855 = vst [vmem:[#allocation9_spill] sm:$0xff] %v4905_v10  ;;  %v4929_v20 = vrot.slane %v220_v13, %v4834_v48  ;;  %v4932_v21 = vrot.slane %v220_v13, %v4790_v28  ;;  %v4935_v22 = vrot.slane %v220_v13, %v4792_v29  ;;  %v201_v26 = vpop.permute.xlu1 %200 }
  0x8e   :  { %7856 = vst [vmem:[#allocation10_spill] sm:$0xff] %v4920_v17  ;;  %7857 = vst [vmem:[#allocation11_spill] sm:$0xff] %v4923_v18  ;;  %v4938_v23 = vrot.slane %v220_v13, %v4794_v30  ;;  %v4941_v24 = vrot.slane %v220_v13, %v4796_v31  ;;  %vm214_vm6 = vcmp.le.f32.partialorder %v158_v14, %v201_v26  ;;  %257 = vbcast.lane.b32.xlu0 %v4812_v39, 312  ;;  %v206_v55 = vpop.permute.xlu0 %205 }
  0x8f   :  { %7858 = vst [vmem:[#allocation12_spill] sm:$0xff] %v4926_v19  ;;  %7859 = vst [vmem:[#allocation13_spill] sm:$0xff] %v4929_v20  ;;  %253 = vbcast.lane.b32.xlu1 %v4812_v39, 304  ;;  %v222_v33 = vsel %vm214_vm6, 0.0, %v4682_v35  ;;  %v4953_v34 = vrot.slane %v218_v15, %v4832_v47  ;;  %v4956_v37 = vrot.slane %v218_v15, %v4834_v48 }
  0x90   :  { %7860 = vst [vmem:[#allocation14_spill] sm:$0xff] %v4932_v21  ;;  %7861 = vst [vmem:[#allocation15_spill] sm:$0xff] %v4935_v22  ;;  %v4959_v38 = vrot.slane %v218_v15, %v4790_v28  ;;  %v4962_v40 = vrot.slane %v222_v33, %v4782_v25  ;;  %v4965_v39 = vrot.slane %v222_v33, %v4830_v46 }
  0x91   :  { %7862 = vst [vmem:[#allocation16_spill] sm:$0xff] %v4938_v23  ;;  %7863 = vst [vmem:[#allocation17_spill] sm:$0xff] %v4941_v24  ;;  %v4968_v45 = vrot.slane %v222_v33, %v4832_v47  ;;  %v4971_v49 = vrot.slane %v222_v33, %v4834_v48  ;;  %v4980_v61 = vrot.slane %v222_v33, %v4790_v28 }
  0x92   :  { %7864 = vst [vmem:[#allocation18_spill] sm:$0xff] %v4946_v27  ;;  %7865 = vst [vmem:[#allocation19_spill] sm:$0xff] %v4949_v32  ;;  %v4983_v62 = vrot.slane %v222_v33, %v4792_v29  ;;  %v4986_v63 = vrot.slane %v222_v33, %v4794_v30  ;;  %v4989_v0 = vrot.slane %v222_v33, %v4796_v31  ;;  %268 = vbcast.lane.b32.xlu0 %v4911_v12, 264 }
  0x93   :  { %7866 = vst [vmem:[#allocation20_spill] sm:$0xff] %v4953_v34  ;;  %7867 = vst [vmem:[#allocation21_spill] sm:$0xff] %v4956_v37  ;;  %264 = vbcast.lane.b32.xlu1 %v4911_v12, 256  ;;  %v4994_v1 = vrot.slane %v218_v15, %v4792_v29  ;;  %v4997_v2 = vrot.slane %v218_v15, %v4794_v30  ;;  %v5000_v11 = vrot.slane %v218_v15, %v4796_v31 }
  0x94   :  { %7868 = vst [vmem:[#allocation22_spill] sm:$0xff] %v4959_v38  ;;  %7869 = vst [vmem:[#allocation23_spill] sm:$0xff] %v4962_v40  ;;  %vm213_vm7 = vcmp.le.f32.partialorder %v157_v50, %v196_v16  ;;  %vm215_vm8 = vcmp.le.f32.partialorder %v159_v56, %v206_v55 }
  0x95   :  { %7870 = vst [vmem:[#allocation24_spill] sm:$0xff] %v4965_v39  ;;  %7871 = vst [vmem:[#allocation25_spill] sm:$0xff] %v4968_v45  ;;  %v221_v13 = vsel %vm213_vm7, 0.0, %v4682_v35  ;;  %v223_v14 = vsel %vm215_vm8, 0.0, %v4682_v35 }
  0x96   :  { %7872 = vst [vmem:[#allocation26_spill] sm:$0xff] %v4971_v49  ;;  %7873 = vst [vmem:[#allocation27_spill] sm:$0xff] %v4980_v61  ;;  %v5005_v26 = vrot.slane %v221_v13, %v4782_v25  ;;  %v5008_v33 = vrot.slane %v221_v13, %v4830_v46  ;;  %276 = vbcast.lane.b32.xlu0 %v4911_v12, 280  ;;  %v5019_v15 = vrot.slane %v221_v13, %v4790_v28 }
  0x97   :  { %7874 = vst [vmem:[#allocation28_spill] sm:$0xff] %v4983_v62  ;;  %7875 = vst [vmem:[#allocation29_spill] sm:$0xff] %v4986_v63  ;;  %v5014_v63 = vrot.slane %v221_v13, %v4834_v48  ;;  %272 = vbcast.lane.b32.xlu1 %v4911_v12, 272  ;;  %v5022_v35 = vrot.slane %v221_v13, %v4792_v29  ;;  %v5025_v16 = vrot.slane %v221_v13, %v4794_v30 }
  0x98   :  { %7876 = vst [vmem:[#allocation30_spill] sm:$0xff] %v4989_v0  ;;  %7877 = vst [vmem:[#allocation31_spill] sm:$0xff] %v4994_v1  ;;  %v5011_v0 = vrot.slane %v221_v13, %v4832_v47  ;;  %v5028_v50 = vrot.slane %v221_v13, %v4796_v31  ;;  %v5031_v55 = vrot.slane %v223_v14, %v4782_v25 }
  0x99   :  { %7878 = vst [vmem:[#allocation32_spill] sm:$0xff] %v4997_v2  ;;  %7879 = vst [vmem:[#allocation33_spill] sm:$0xff] %v5000_v11  ;;  %v5034_v56 = vrot.slane %v223_v14, %v4830_v46  ;;  %v5037_v62 = vrot.slane %v223_v14, %v4832_v47  ;;  %v5040_v61 = vrot.slane %v223_v14, %v4834_v48 }
  0x9a   :  { %7880 = vst [vmem:[#allocation34_spill] sm:$0xff] %v5005_v26  ;;  %7881 = vst [vmem:[#allocation35_spill] sm:$0xff] %v5008_v33  ;;  %v5043_v49 = vrot.slane %v223_v14, %v4790_v28  ;;  %v5046_v45 = vrot.slane %v223_v14, %v4792_v29  ;;  %v5049_v13 = vrot.slane %v223_v14, %v4794_v30  ;;  %284 = vbcast.lane.b32.xlu0 %v4911_v12, 296 }
  0x9b   :  { %7882 = vst [vmem:[#allocation36_spill] sm:$0xff] %v5011_v0  ;;  %7883 = vst [vmem:[#allocation37_spill] sm:$0xff] %v5014_v63  ;;  %v5052_v25 = vrot.slane %v223_v14, %v4796_v31  ;;  %280 = vbcast.lane.b32.xlu1 %v4911_v12, 288  ;;  %v297_v28 = vrot.slane %v4805_v36, %v4832_v47  ;;  %v332_v29 = vrot.slane %v4805_v36, %v4834_v48 }
  0x9c   :  { %7884 = vst [vmem:[#allocation38_spill] sm:$0xff] %v5019_v15  ;;  %7885 = vst [vmem:[#allocation39_spill] sm:$0xff] %v5022_v35 }
  0x9d   :  { %7886 = vst [vmem:[#allocation40_spill] sm:$0xff] %v5025_v16  ;;  %7887 = vst [vmem:[#allocation41_spill] sm:$0xff] %v5028_v50 }
  0x9e   :  { %7888 = vst [vmem:[#allocation42_spill] sm:$0xff] %v5031_v55  ;;  %7889 = vst [vmem:[#allocation43_spill] sm:$0xff] %v5034_v56  ;;  %292 = vbcast.lane.b32.xlu0 %v4911_v12, 312 }
  0x9f   :  { %7890 = vst [vmem:[#allocation44_spill] sm:$0xff] %v5037_v62  ;;  %7891 = vst [vmem:[#allocation45_spill] sm:$0xff] %v5040_v61  ;;  %288 = vbcast.lane.b32.xlu1 %v4911_v12, 304 }
  0xa0   :  { %7892 = vst [vmem:[#allocation46_spill] sm:$0xff] %v5043_v49  ;;  %7893 = vst [vmem:[#allocation47_spill] sm:$0xff] %v5046_v45 }
  0xa1   :  { %7894 = vst [vmem:[#allocation48_spill] sm:$0xff] %v5049_v13  ;;  %7895 = vst [vmem:[#allocation49_spill] sm:$0xff] %v5052_v25 }
  0xa2   :  { %303 = vbcast.lane.b32.xlu0 %v297_v28, 264 }
  0xa3   :  { %299 = vbcast.lane.b32.xlu1 %v297_v28, 256 }
  0xa6   :  { %311 = vbcast.lane.b32.xlu0 %v297_v28, 280 }
  0xa7   :  { %307 = vbcast.lane.b32.xlu1 %v297_v28, 272 }
  0xaa   :  { %319 = vbcast.lane.b32.xlu0 %v297_v28, 296 }
  0xab   :  { %315 = vbcast.lane.b32.xlu1 %v297_v28, 288 }
  0xae   :  { %327 = vbcast.lane.b32.xlu0 %v297_v28, 312 }
  0xaf   :  { %323 = vbcast.lane.b32.xlu1 %v297_v28, 304 }
  0xb2   :  { %338 = vbcast.lane.b32.xlu0 %v332_v29, 264 }
  0xb3   :  { %334 = vbcast.lane.b32.xlu1 %v332_v29, 256 }
  0xb6   :  { %346 = vbcast.lane.b32.xlu0 %v332_v29, 280 }
  0xb7   :  { %342 = vbcast.lane.b32.xlu1 %v332_v29, 272 }
  0xba   :  { %354 = vbcast.lane.b32.xlu0 %v332_v29, 296 }
  0xbb   :  { %350 = vbcast.lane.b32.xlu1 %v332_v29, 288 }
  0xbe   :  { %362 = vbcast.lane.b32.xlu0 %v332_v29, 312 }
  0xbf   :  { %358 = vbcast.lane.b32.xlu1 %v332_v29, 304 }
  0xc2   :  { %373 = vbcast.lane.b32.xlu0 %v4816_v41, 264 }
  0xc3   :  { %369 = vbcast.lane.b32.xlu1 %v4816_v41, 256 }
  0xc6   :  { %381 = vbcast.lane.b32.xlu0 %v4816_v41, 280 }
  0xc7   :  { %377 = vbcast.lane.b32.xlu1 %v4816_v41, 272 }
  0xca   :  { %389 = vbcast.lane.b32.xlu0 %v4816_v41, 296 }
  0xcb   :  { %385 = vbcast.lane.b32.xlu1 %v4816_v41, 288 }
  0xce   :  { %397 = vbcast.lane.b32.xlu0 %v4816_v41, 312 }
  0xcf   :  { %393 = vbcast.lane.b32.xlu1 %v4816_v41, 304 }
  0xd2   :  { %408 = vbcast.lane.b32.xlu0 %v4820_v42, 264 }
  0xd3   :  { %404 = vbcast.lane.b32.xlu1 %v4820_v42, 256 }
  0xd6   :  { %416 = vbcast.lane.b32.xlu0 %v4820_v42, 280 }
  0xd7   :  { %412 = vbcast.lane.b32.xlu1 %v4820_v42, 272 }
  0xda   :  { %424 = vbcast.lane.b32.xlu0 %v4820_v42, 296 }
  0xdb   :  { %420 = vbcast.lane.b32.xlu1 %v4820_v42, 288 }
  0xde   :  { %432 = vbcast.lane.b32.xlu0 %v4820_v42, 312 }
  0xdf   :  { %428 = vbcast.lane.b32.xlu1 %v4820_v42, 304 }
  0xe2   :  { %443 = vbcast.lane.b32.xlu0 %v4824_v43, 264 }
  0xe3   :  { %439 = vbcast.lane.b32.xlu1 %v4824_v43, 256 }
  0xe6   :  { %451 = vbcast.lane.b32.xlu0 %v4824_v43, 280 }
  0xe7   :  { %447 = vbcast.lane.b32.xlu1 %v4824_v43, 272 }
  0xea   :  { %459 = vbcast.lane.b32.xlu0 %v4824_v43, 296 }
  0xeb   :  { %455 = vbcast.lane.b32.xlu1 %v4824_v43, 288 }
  0xee   :  { %467 = vbcast.lane.b32.xlu0 %v4824_v43, 312 }
  0xef   :  { %463 = vbcast.lane.b32.xlu1 %v4824_v43, 304 }
  0xf2   :  { %478 = vbcast.lane.b32.xlu0 %v4828_v44, 264 }
  0xf3   :  { %474 = vbcast.lane.b32.xlu1 %v4828_v44, 256 }
  0xf4   :  { %v5088_v30 = vpop.permute.xlu0 %233  ;;  %v5090_v31 = vpop.permute.xlu1 %229 }
  0xf6   :  { %486 = vbcast.lane.b32.xlu0 %v4828_v44, 280 }
  0xf7   :  { %482 = vbcast.lane.b32.xlu1 %v4828_v44, 272 }
  0xf8   :  { %v5094_v36 = vpop.permute.xlu0 %241  ;;  %v5096_v41 = vpop.permute.xlu1 %237 }
  0xfa   :  { %494 = vbcast.lane.b32.xlu0 %v4828_v44, 296 }
  0xfb   :  { %490 = vbcast.lane.b32.xlu1 %v4828_v44, 288 }
  0xfc   :  { %v5100_v42 = vpop.permute.xlu0 %249  ;;  %v5102_v43 = vpop.permute.xlu1 %245 }
  0xfe   :  { %502 = vbcast.lane.b32.xlu0 %v4828_v44, 312 }
  0xff   :  { %498 = vbcast.lane.b32.xlu1 %v4828_v44, 304 }
 0x100   :  { %v5106_v46 = vpop.permute.xlu0 %257 }
 0x101   :  { %v5108_v47 = vpop.permute.xlu1 %253 }
 0x102   :  { %513 = vbcast.lane.b32.xlu0 %v4844_v51, 264 }
 0x103   :  { %509 = vbcast.lane.b32.xlu1 %v4844_v51, 256 }
 0x104   :  { %v5112_v48 = vpop.permute.xlu0 %268 }
 0x105   :  { %v5114_v12 = vpop.permute.xlu1 %264 }
 0x106   :  { %521 = vbcast.lane.b32.xlu0 %v4844_v51, 280 }
 0x107   :  { %517 = vbcast.lane.b32.xlu1 %v4844_v51, 272 }
 0x108   :  { %v5118_v14 = vpop.permute.xlu0 %276 }
 0x109   :  { %v5120_v28 = vpop.permute.xlu1 %272 }
 0x10a   :  { %529 = vbcast.lane.b32.xlu0 %v4844_v51, 296 }
 0x10b   :  { %525 = vbcast.lane.b32.xlu1 %v4844_v51, 288 }
 0x10c   :  { %v5124_v44 = vpop.permute.xlu0 %284 }
 0x10d   :  { %v5126_v29 = vpop.permute.xlu1 %280 }
 0x10e   :  { %537 = vbcast.lane.b32.xlu0 %v4844_v51, 312 }
 0x10f   :  { %533 = vbcast.lane.b32.xlu1 %v4844_v51, 304 }
 0x110   :  { %v5130_v25 = vpop.permute.xlu0 %292 }
 0x111   :  { %v5132_v13 = vpop.permute.xlu1 %288 }
 0x112   :  { %548 = vbcast.lane.b32.xlu0 %v4847_v52, 264 }
 0x113   :  { %544 = vbcast.lane.b32.xlu1 %v4847_v52, 256 }
 0x114   :  { %v5136_v45 = vpop.permute.xlu0 %303 }
 0x115   :  { %v5138_v49 = vpop.permute.xlu1 %299 }
 0x116   :  { %556 = vbcast.lane.b32.xlu0 %v4847_v52, 280 }
 0x117   :  { %552 = vbcast.lane.b32.xlu1 %v4847_v52, 272 }
 0x118   :  { %v5142_v61 = vpop.permute.xlu0 %311 }
 0x119   :  { %v308_v62 = vpop.permute.xlu1 %307 }
 0x11a   :  { %564 = vbcast.lane.b32.xlu0 %v4847_v52, 296 }
 0x11b   :  { %560 = vbcast.lane.b32.xlu1 %v4847_v52, 288 }
 0x11c   :  { %v5146_v51 = vpop.permute.xlu0 %319 }
 0x11d   :  { %v5148_v56 = vpop.permute.xlu1 %315 }
 0x11e   :  { %572 = vbcast.lane.b32.xlu0 %v4847_v52, 312 }
 0x11f   :  { %568 = vbcast.lane.b32.xlu1 %v4847_v52, 304 }
 0x120   :  { %v5152_v55 = vpop.permute.xlu0 %327 }
 0x121   :  { %v5154_v39 = vpop.permute.xlu1 %323 }
 0x122   :  { %583 = vbcast.lane.b32.xlu0 %v4850_v53, 264 }
 0x123   :  { %579 = vbcast.lane.b32.xlu1 %v4850_v53, 256 }
 0x124   :  { %v5158_v40 = vpop.permute.xlu0 %338 }
 0x125   :  { %v335_v50 = vpop.permute.xlu1 %334 }
 0x126   :  { %591 = vbcast.lane.b32.xlu0 %v4850_v53, 280 }
 0x127   :  { %587 = vbcast.lane.b32.xlu1 %v4850_v53, 272 }
 0x128   :  { %v5162_v16 = vpop.permute.xlu0 %346 }
 0x129   :  { %v343_v35 = vpop.permute.xlu1 %342 }
 0x12a   :  { %599 = vbcast.lane.b32.xlu0 %v4850_v53, 296 }
 0x12b   :  { %595 = vbcast.lane.b32.xlu1 %v4850_v53, 288 }
 0x12c   :  { %v5166_v52 = vpop.permute.xlu0 %354 }
 0x12d   :  { %v5168_v15 = vpop.permute.xlu1 %350 }
 0x12e   :  { %607 = vbcast.lane.b32.xlu0 %v4850_v53, 312 }
 0x12f   :  { %603 = vbcast.lane.b32.xlu1 %v4850_v53, 304 }
 0x130   :  { %v5172_v63 = vpop.permute.xlu0 %362 }
 0x131   :  { %v5174_v0 = vpop.permute.xlu1 %358 }
 0x132   :  { %618 = vbcast.lane.b32.xlu0 %v4853_v54, 264 }
 0x133   :  { %614 = vbcast.lane.b32.xlu1 %v4853_v54, 256 }
 0x134   :  { %v5178_v33 = vpop.permute.xlu0 %373 }
 0x135   :  { %v370_v26 = vpop.permute.xlu1 %369 }
 0x136   :  { %626 = vbcast.lane.b32.xlu0 %v4853_v54, 280 }
 0x137   :  { %622 = vbcast.lane.b32.xlu1 %v4853_v54, 272 }
 0x138   :  { %v382_v24 = vpop.permute.xlu0 %381 }
 0x139   :  { %v378_v23 = vpop.permute.xlu1 %377 }
 0x13a   :  { %634 = vbcast.lane.b32.xlu0 %v4853_v54, 296 }
 0x13b   :  { %630 = vbcast.lane.b32.xlu1 %v4853_v54, 288 }
 0x13c   :  { %v5184_v53 = vpop.permute.xlu0 %389 }
 0x13d   :  { %v5186_v22 = vpop.permute.xlu1 %385 }
 0x13e   :  { %642 = vbcast.lane.b32.xlu0 %v4853_v54, 312 }
 0x13f   :  { %638 = vbcast.lane.b32.xlu1 %v4853_v54, 304 }
 0x140   :  { %v5190_v21 = vpop.permute.xlu0 %397 }
 0x141   :  { %v5192_v20 = vpop.permute.xlu1 %393 }
 0x142   :  { %653 = vbcast.lane.b32.xlu0 %v4863_v57, 264 }
 0x143   :  { %649 = vbcast.lane.b32.xlu1 %v4863_v57, 256  ;;  %v5196_v19 = vpop.f32.mrf.mxu0 }
 0x144   :  { %v5198_v18 = vpop.permute.xlu0 %408  ;;  %v2466_v6 = vadd.f32 %v5196_v19, %v5096_v41  ;;  %v2474_v1 = vadd.f32 %v5196_v19, %v5120_v28  ;;  %v5225_v41 = vadd.f32 %v5196_v19, %v308_v62  ;;  %v5228_v38 = vadd.f32 %v5196_v19, %v343_v35 }
 0x145   :  { %v405_v17 = vpop.permute.xlu1 %404  ;;  %v5200_v10 = vpop.f32.mrf.mxu0 }
 0x146   :  { %661 = vbcast.lane.b32.xlu0 %v4863_v57, 280  ;;  %v2464_v5 = vadd.f32 %v5090_v31, %v5200_v10  ;;  %v5231_v31 = vadd.f32 %v5196_v19, %v378_v23  ;;  %v5239_v34 = vadd.f32 %v5138_v49, %v5200_v10  ;;  %v2979_v62 = vsel %vm70_vm0, %v2466_v6, -inf }
 0x147   :  { %657 = vbcast.lane.b32.xlu1 %v4863_v57, 272  ;;  %v5204_v54 = vpop.f32.mrf.mxu0  ;;  %v5248_v35 = vadd.f32 %v335_v50, %v5200_v10 }
 0x148   :  { %v417_v9 = vpop.permute.xlu0 %416  ;;  %v2467_v23 = vadd.f32 %v5204_v54, %v5094_v36  ;;  %v2976_v49 = vsel %vm70_vm0, %v2464_v5, -inf  ;;  %v5260_v6 = vadd.f32 %v5204_v54, %v5142_v61  ;;  %v5279_v61 = vadd.f32 %v5204_v54, %v5162_v16 }
 0x149   :  { %v413_v8 = vpop.permute.xlu1 %412  ;;  %v5206_v7 = vpop.f32.mrf.mxu0  ;;  %v5266_v50 = vadd.f32 %v5204_v54, %v417_v9 }
 0x14a   :  { %669 = vbcast.lane.b32.xlu0 %v4863_v57, 296  ;;  %v2465_v4 = vadd.f32 %v5088_v30, %v5206_v7  ;;  %v2472_v30 = vadd.f32 %v5114_v12, %v5200_v10  ;;  %v5251_v12 = vadd.f32 %v370_v26, %v5200_v10  ;;  %v5269_v26 = vadd.f32 %v5196_v19, %v413_v8 }
 0x14b   :  { %665 = vbcast.lane.b32.xlu1 %v4863_v57, 288  ;;  %v5216_v3 = vpop.f32.mrf.mxu0  ;;  %7898 = vst [vmem:[#allocation52_spill] sm:$0xff] %v5266_v50  ;;  %v2473_v9 = vadd.f32 %v5112_v48, %v5206_v7  ;;  %v2481_v8 = vadd.f32 %v5136_v45, %v5206_v7  ;;  %v5300_v48 = vadd.f32 %v5178_v33, %v5206_v7  ;;  %v2981_v45 = vsel %vm70_vm0, %v2467_v23, -inf }
 0x14c   :  { %v5218_v11 = vpop.permute.xlu0 %424  ;;  %v2977_v28 = vsel %vm70_vm0, %v2465_v4, -inf  ;;  %v2475_v4 = vadd.f32 %v5204_v54, %v5118_v14  ;;  %v5319_v23 = vadd.f32 %v5216_v3, %v5192_v20 }
 0x14d   :  { %7896 = vst [vmem:[#allocation50_spill] sm:$0xff] %v5218_v11  ;;  %v5220_v2 = vpop.permute.xlu1 %420  ;;  %v5233_v37 = vpop.f32.mrf.mxu0  ;;  %v2978_v36 = vmax.f32 %v2976_v49, %v2977_v28  ;;  %v5288_v28 = vadd.f32 %v5204_v54, %v382_v24  ;;  %v2470_v24 = vadd.f32 %v5216_v3, %v5108_v47 }
 0x14e   :  { %7897 = vst [vmem:[#allocation51_spill] sm:$0xff] %v5220_v2  ;;  %677 = vbcast.lane.b32.xlu0 %v4863_v57, 312  ;;  %v2468_v14 = vadd.f32 %v5102_v43, %v5233_v37  ;;  %v5296_v43 = vadd.f32 %v5158_v40, %v5206_v7  ;;  %v5315_v40 = vadd.f32 %v5216_v3, %v5174_v0  ;;  %7901 = vst [vmem:[#allocation55_spill] sm:$0xff] %v5319_v23 }
 0x14f   :  { %673 = vbcast.lane.b32.xlu1 %v4863_v57, 304  ;;  %v5254_v32 = vpop.f32.mrf.mxu0  ;;  %v5263_v57 = vadd.f32 %v405_v17, %v5200_v10  ;;  %v2980_v49 = vmax.f32 %v2978_v36, %v2979_v62  ;;  %v5307_v62 = vadd.f32 %v5216_v3, %v5132_v13  ;;  %v2997_v13 = vsel %vm70_vm0, %v2472_v30, -inf }
 0x150   :  { %v5271_v5 = vpop.permute.xlu0 %432  ;;  %v2983_v47 = vsel %vm70_vm0, %v2468_v14, -inf  ;;  %v2998_v0 = vsel %vm70_vm0, %v2473_v9, -inf  ;;  %v2476_v20 = vadd.f32 %v5126_v29, %v5233_v37  ;;  %v3000_v14 = vsel %vm70_vm0, %v2474_v1, -inf }
 0x151   :  { %7899 = vst [vmem:[#allocation53_spill] sm:$0xff] %v5271_v5  ;;  %v5273_v27 = vpop.permute.xlu1 %428  ;;  %v5281_v17 = vpop.f32.mrf.mxu0  ;;  %v2982_v5 = vmax.f32 %v2980_v49, %v2981_v45  ;;  %v2999_v45 = vmax.f32 %v2997_v13, %v2998_v0  ;;  %v2471_v30 = vadd.f32 %v5254_v32, %v5106_v46  ;;  %v2484_v9 = vadd.f32 %v5148_v56, %v5233_v37 }
 0x152   :  { %7900 = vst [vmem:[#allocation54_spill] sm:$0xff] %v5273_v27  ;;  %688 = vbcast.lane.b32.xlu0 %v4866_v58, 264  ;;  %v2469_v16 = vadd.f32 %v5100_v42, %v5281_v17  ;;  %v5311_v42 = vadd.f32 %v5216_v3, %v5154_v39  ;;  %v3002_v46 = vsel %vm70_vm0, %v2475_v4, -inf  ;;  %v3019_v0 = vsel %vm70_vm0, %v2481_v8, -inf }
 0x153   :  { %684 = vbcast.lane.b32.xlu1 %v4866_v58, 256  ;;  %v2984_v49 = vmax.f32 %v2982_v5, %v2983_v47  ;;  %v3001_v13 = vmax.f32 %v2999_v45, %v3000_v14 }
 0x154   :  { %v444_v36 = vpop.permute.xlu0 %443  ;;  %v2985_v50 = vsel %vm70_vm0, %v2469_v16, -inf  ;;  %v2987_v16 = vsel %vm70_vm0, %v2470_v24, -inf }
 0x155   :  { %v440_v33 = vpop.permute.xlu1 %439  ;;  %v2513_v27 = vadd.f32 %v444_v36, %v5206_v7  ;;  %v2477_v36 = vadd.f32 %v5124_v44, %v5281_v17  ;;  %v2986_v47 = vmax.f32 %v2984_v49, %v2985_v50  ;;  %v3018_v44 = vsel %vm70_vm0, %v5239_v34, -inf }
 0x156   :  { %v2512_v39 = vadd.f32 %v440_v33, %v5200_v10  ;;  %696 = vbcast.lane.b32.xlu0 %v4866_v58, 280  ;;  %v3003_v56 = vmax.f32 %v3001_v13, %v3002_v46  ;;  %v3004_v50 = vsel %vm70_vm0, %v2476_v20, -inf  ;;  %v3020_v24 = vmax.f32 %v3018_v44, %v3019_v0 }
 0x157   :  { %692 = vbcast.lane.b32.xlu1 %v4866_v58, 272  ;;  %v3103_v33 = vsel %vm70_vm0, %v2513_v27, -inf  ;;  %v2485_v27 = vadd.f32 %v5146_v51, %v5281_v17  ;;  %v3006_v4 = vsel %vm70_vm0, %v2477_v36, -inf  ;;  %v3021_v34 = vsel %vm70_vm0, %v5225_v41, -inf }
 0x158   :  { %v3102_v23 = vsel %vm70_vm0, %v2512_v39, -inf  ;;  %v452_v29 = vpop.permute.xlu0 %451  ;;  %v3005_v11 = vmax.f32 %v3003_v56, %v3004_v50  ;;  %v3022_v2 = vmax.f32 %v3020_v24, %v3021_v34  ;;  %v2479_v20 = vadd.f32 %v5254_v32, %v5130_v25 }
 0x159   :  { %v448_v5 = vpop.permute.xlu1 %447  ;;  %v3104_v39 = vmax.f32 %v3102_v23, %v3103_v33  ;;  %v2515_v8 = vadd.f32 %v5204_v54, %v452_v29  ;;  %v5360_v23 = vadd.f32 %v5198_v18, %v5206_v7  ;;  %v3023_v36 = vsel %vm70_vm0, %v5260_v6, -inf }
 0x15a   :  { %v2514_v1 = vadd.f32 %v5196_v19, %v448_v5  ;;  %704 = vbcast.lane.b32.xlu0 %v4866_v58, 296  ;;  %v2988_v5 = vmax.f32 %v2986_v47, %v2987_v16  ;;  %v3007_v16 = vmax.f32 %v3005_v11, %v3006_v4  ;;  %v3024_v33 = vmax.f32 %v3022_v2, %v3023_v36 }
 0x15b   :  { %700 = vbcast.lane.b32.xlu1 %v4866_v58, 288  ;;  %v2989_v29 = vsel %vm70_vm0, %v2471_v30, -inf  ;;  %v3025_v47 = vsel %vm70_vm0, %v2484_v9, -inf  ;;  %v3027_v25 = vsel %vm70_vm0, %v2485_v27, -inf  ;;  %v3040_v18 = vsel %vm70_vm0, %v5296_v43, -inf }
 0x15c   :  { %v3105_v49 = vsel %vm70_vm0, %v2514_v1, -inf  ;;  %v460_v45 = vpop.permute.xlu0 %459  ;;  %v3107_v13 = vsel %vm70_vm0, %v2515_v8, -inf  ;;  %v2990_v46 = vmax.f32 %v2988_v5, %v2989_v29  ;;  %v3026_v44 = vmax.f32 %v3024_v33, %v3025_v47 }
 0x15d   :  { %v456_v14 = vpop.permute.xlu1 %455  ;;  %v3106_v51 = vmax.f32 %v3104_v39, %v3105_v49  ;;  %v2492_v2 = vadd.f32 %v5168_v15, %v5233_v37  ;;  %v3008_v30 = vsel %vm70_vm0, %v5307_v62, -inf  ;;  %v3042_v56 = vsel %vm70_vm0, %v5228_v38, -inf }
 0x15e   :  { %v2516_v41 = vadd.f32 %v456_v14, %v5233_v37  ;;  %712 = vbcast.lane.b32.xlu0 %v4866_v58, 312  ;;  %v3009_v43 = vmax.f32 %v3007_v16, %v3008_v30  ;;  %v3028_v27 = vmax.f32 %v3026_v44, %v3027_v25  ;;  %v2493_v15 = vadd.f32 %v5166_v52, %v5281_v17 }
 0x15f   :  { %708 = vbcast.lane.b32.xlu1 %v4866_v58, 304  ;;  %v3039_v58 = vsel %vm70_vm0, %v5248_v35, -inf  ;;  %v3108_v11 = vmax.f32 %v3106_v51, %v3107_v13  ;;  %v2487_v35 = vadd.f32 %v5254_v32, %v5152_v55  ;;  %v3010_v62 = vsel %vm70_vm0, %v2479_v20, -inf }
 0x160   :  { %v468_v6 = vpop.permute.xlu0 %467  ;;  %v3041_v9 = vmax.f32 %v3039_v58, %v3040_v18  ;;  %v3109_v0 = vsel %vm70_vm0, %v2516_v41, -inf  ;;  %v2517_v24 = vadd.f32 %v460_v45, %v5281_v17  ;;  %v2991_v4 = vrot.slane %v2990_v46, 4 }
 0x161   :  { %v464_v1 = vpop.permute.xlu1 %463  ;;  %v3029_v34 = vsel %vm70_vm0, %v5311_v42, -inf  ;;  %v3044_v38 = vsel %vm70_vm0, %v5279_v61, -inf  ;;  %v3110_v8 = vmax.f32 %v3108_v11, %v3109_v0  ;;  %v3011_v45 = vmax.f32 %v3009_v43, %v3010_v62 }
 0x162   :  { %723 = vbcast.lane.b32.xlu0 %v4869_v59, 264  ;;  %v3043_v50 = vmax.f32 %v3041_v9, %v3042_v56  ;;  %v2518_v5 = vadd.f32 %v5216_v3, %v464_v1  ;;  %v3030_v51 = vmax.f32 %v3028_v27, %v3029_v34  ;;  %v3046_v20 = vsel %vm70_vm0, %v2492_v2, -inf }
 0x163   :  { %719 = vbcast.lane.b32.xlu1 %v4869_v59, 256  ;;  %v3048_v41 = vsel %vm70_vm0, %v2493_v15, -inf  ;;  %v3111_v16 = vsel %vm70_vm0, %v2517_v24, -inf  ;;  %v2495_v47 = vadd.f32 %v5254_v32, %v5172_v63  ;;  %v2500_v25 = vadd.f32 %v5186_v22, %v5233_v37 }
 0x164   :  { %v479_v39 = vpop.permute.xlu0 %478  ;;  %v3045_v52 = vmax.f32 %v3043_v50, %v3044_v38  ;;  %v2992_v18 = vmax.f32 %v2990_v46, %v2991_v4  ;;  %v2519_v13 = vadd.f32 %v5254_v32, %v468_v6  ;;  %v3112_v11 = vmax.f32 %v3110_v8, %v3111_v16 }
 0x165   :  { %v475_v49 = vpop.permute.xlu1 %474  ;;  %v2521_v55 = vadd.f32 %v479_v39, %v5206_v7  ;;  %v3012_v30 = vrot.slane %v3011_v45, 4  ;;  %v3031_v63 = vsel %vm70_vm0, %v2487_v35, -inf  ;;  %v3113_v9 = vsel %vm70_vm0, %v2518_v5, -inf }
 0x166   :  { %v2520_v14 = vadd.f32 %v475_v49, %v5200_v10  ;;  %731 = vbcast.lane.b32.xlu0 %v4869_v59, 280  ;;  %v3047_v36 = vmax.f32 %v3045_v52, %v3046_v20  ;;  %v3032_v46 = vmax.f32 %v3030_v51, %v3031_v63  ;;  %v3050_v6 = vsel %vm70_vm0, %v5315_v40, -inf }
 0x167   :  { %727 = vbcast.lane.b32.xlu1 %v4869_v59, 272  ;;  %v3124_v42 = vsel %vm70_vm0, %v2521_v55, -inf  ;;  %v2501_v56 = vadd.f32 %v5184_v53, %v5281_v17  ;;  %v2993_v15 = vrot.slane %v2992_v18, 2  ;;  %v3115_v50 = vsel %vm70_vm0, %v2519_v13, -inf }
 0x168   :  { %v3123_v61 = vsel %vm70_vm0, %v2520_v14, -inf  ;;  %v487_v33 = vpop.permute.xlu0 %486  ;;  %v3049_v58 = vmax.f32 %v3047_v36, %v3048_v41  ;;  %v3114_v49 = vmax.f32 %v3112_v11, %v3113_v9  ;;  %v3013_v40 = vmax.f32 %v3011_v45, %v3012_v30 }
 0x169   :  { %v483_v29 = vpop.permute.xlu1 %482  ;;  %v2523_v1 = vadd.f32 %v5204_v54, %v487_v33  ;;  %v3125_v2 = vmax.f32 %v3123_v61, %v3124_v42  ;;  %v3061_v53 = vsel %vm70_vm0, %v5300_v48, -inf  ;;  %v3033_v38 = vrot.slane %v3032_v46, 4 }
 0x16a   :  { %v2522_v44 = vadd.f32 %v5196_v19, %v483_v29  ;;  %739 = vbcast.lane.b32.xlu0 %v4869_v59, 296  ;;  %v3051_v62 = vmax.f32 %v3049_v58, %v3050_v6  ;;  %v3052_v8 = vsel %vm70_vm0, %v2495_v47, -inf  ;;  %v3060_v55 = vsel %vm70_vm0, %v5251_v12, -inf  ;;  %v7902_v6 = vld [vmem:[#allocation51_spill] sm:$0xff] }
 0x16b   :  { %735 = vbcast.lane.b32.xlu1 %v4869_v59, 288  ;;  %v3128_v35 = vsel %vm70_vm0, %v2523_v1, -inf  ;;  %v5432_v51 = vmax.f32 %v2992_v18, %v2993_v15  ;;  %v3062_v42 = vmax.f32 %v3060_v55, %v3061_v53  ;;  %v3063_v61 = vsel %vm70_vm0, %v5231_v31, -inf }
 0x16c   :  { %v3126_v22 = vsel %vm70_vm0, %v2522_v44, -inf  ;;  %v495_v43 = vpop.permute.xlu0 %494  ;;  %v3053_v20 = vmax.f32 %v3051_v62, %v3052_v8  ;;  %v3116_v36 = vmax.f32 %v3114_v49, %v3115_v50  ;;  %v3014_v33 = vrot.slane %v3013_v40, 2 }
 0x16d   :  { %v3127_v0 = vmax.f32 %v3125_v2, %v3126_v22  ;;  %v491_v27 = vpop.permute.xlu1 %490  ;;  %v2525_v24 = vadd.f32 %v495_v43, %v5281_v17  ;;  %v3064_v12 = vmax.f32 %v3062_v42, %v3063_v61  ;;  %v3034_v29 = vmax.f32 %v3032_v46, %v3033_v38 }
 0x16e   :  { %v2524_v39 = vadd.f32 %v491_v27, %v5233_v37  ;;  %747 = vbcast.lane.b32.xlu0 %v4869_v59, 312  ;;  %v3065_v47 = vsel %vm70_vm0, %v5288_v28, -inf  ;;  %v3054_v31 = vrot.slane %v3053_v20, 4  ;;  %v3067_v58 = vsel %vm70_vm0, %v2500_v25, -inf }
 0x16f   :  { %v3129_v4 = vmax.f32 %v3127_v0, %v3128_v35  ;;  %743 = vbcast.lane.b32.xlu1 %v4869_v59, 304  ;;  %v3132_v59 = vsel %vm70_vm0, %v2525_v24, -inf  ;;  %v3066_v44 = vmax.f32 %v3064_v12, %v3065_v47  ;;  %v3069_v2 = vsel %vm70_vm0, %v2501_v56, -inf  ;;  %v7904_v35 = vld [vmem:[#allocation52_spill] sm:$0xff] }
 0x170   :  { %v3130_v34 = vsel %vm70_vm0, %v2524_v39, -inf  ;;  %v503_v52 = vpop.permute.xlu0 %502  ;;  %v3081_v30 = vsel %vm70_vm0, %v5263_v57, -inf  ;;  %v3082_v63 = vsel %vm70_vm0, %v5360_v23, -inf  ;;  %v3084_v28 = vsel %vm70_vm0, %v5269_v26, -inf  ;;  %v7903_v57 = vld [vmem:[#allocation50_spill] sm:$0xff] }
 0x171   :  { %v3131_v14 = vmax.f32 %v3129_v4, %v3130_v34  ;;  %v499_v5 = vpop.permute.xlu1 %498  ;;  %v2527_v45 = vadd.f32 %v5254_v32, %v503_v52  ;;  %v3068_v22 = vmax.f32 %v3066_v44, %v3067_v58  ;;  %v3083_v25 = vmax.f32 %v3081_v30, %v3082_v63  ;;  %v7905_v39 = vld [vmem:[#allocation54_spill] sm:$0xff]  ;;  %v7906_v4 = vld [vmem:[#allocation55_spill] sm:$0xff] }
 0x172   :  { %v2526_v48 = vadd.f32 %v5216_v3, %v499_v5  ;;  %758 = vbcast.lane.b32.xlu0 %v4872_v60, 264  ;;  %v2503_v46 = vadd.f32 %v5254_v32, %v5190_v21  ;;  %v2508_v0 = vadd.f32 %v7902_v6, %v5233_v37  ;;  %v2509_v43 = vadd.f32 %v7903_v57, %v5281_v17 }
 0x173   :  { %v3133_v41 = vmax.f32 %v3131_v14, %v3132_v59  ;;  %754 = vbcast.lane.b32.xlu1 %v4872_v60, 256  ;;  %v3136_v11 = vsel %vm70_vm0, %v2527_v45, -inf  ;;  %v3035_v23 = vrot.slane %v3034_v29, 2  ;;  %v3015_v56 = vmax.f32 %v3013_v40, %v3014_v33 }
 0x174   :  { %v3134_v16 = vsel %vm70_vm0, %v2526_v48, -inf  ;;  %v5444_v13 = vpop.permute.xlu0 %513  ;;  %v3055_v15 = vmax.f32 %v3053_v20, %v3054_v31  ;;  %v3070_v62 = vmax.f32 %v3068_v22, %v3069_v2  ;;  %v3085_v50 = vmax.f32 %v3083_v25, %v3084_v28 }
 0x175   :  { %v3135_v18 = vmax.f32 %v3133_v41, %v3134_v16  ;;  %v5446_v1 = vpop.permute.xlu1 %509  ;;  %v3086_v24 = vsel %vm70_vm0, %v7904_v35, -inf  ;;  %v2510_v21 = vadd.f32 %v5216_v3, %v7905_v39  ;;  %v3117_v49 = vrot.slane %v3116_v36, 4  ;;  %v7907_v41 = vld [vmem:[#allocation53_spill] sm:$0xff] }
 0x176   :  { %766 = vbcast.lane.b32.xlu0 %v4872_v60, 280  ;;  %v3071_v53 = vsel %vm70_vm0, %v7906_v4, -inf  ;;  %v2995_v40 = vrot.slane %v5432_v51, 1  ;;  %v3087_v8 = vmax.f32 %v3085_v50, %v3086_v24  ;;  %v3036_v55 = vmax.f32 %v3034_v29, %v3035_v23 }
 0x177   :  { %v3137_v9 = vmax.f32 %v3135_v18, %v3136_v11  ;;  %762 = vbcast.lane.b32.xlu1 %v4872_v60, 272  ;;  %v3072_v38 = vmax.f32 %v3070_v62, %v3071_v53  ;;  %v3073_v14 = vsel %vm70_vm0, %v2503_v46, -inf  ;;  %v3088_v52 = vsel %vm70_vm0, %v2508_v0, -inf }
 0x178   :  { %v5465_v27 = vpop.permute.xlu0 %521  ;;  %v3090_v5 = vsel %vm70_vm0, %v2509_v43, -inf  ;;  %v3016_v59 = vrot.slane %v3015_v56, 1  ;;  %v3056_v45 = vrot.slane %v3055_v15, 2  ;;  %v3089_v61 = vmax.f32 %v3087_v8, %v3088_v52  ;;  %v5513_v8 = vpop.f32.mrf.mxu1 }
 0x179   :  { %v5467_v26 = vpop.permute.xlu1 %517  ;;  %v3138_v34 = vrot.slane %v3137_v9, 4  ;;  %v3074_v48 = vmax.f32 %v3072_v38, %v3073_v14  ;;  %v2511_v12 = vadd.f32 %v5254_v32, %v7907_v41  ;;  %v3118_v16 = vmax.f32 %v3116_v36, %v3117_v49 }
 0x17a   :  { %774 = vbcast.lane.b32.xlu0 %v4872_v60, 296  ;;  %v3091_v47 = vmax.f32 %v3089_v61, %v3090_v5  ;;  %v3092_v18 = vsel %vm70_vm0, %v2510_v21, -inf  ;;  %v2996_v31 = vmax.f32 %v5432_v51, %v2995_v40  ;;  %v3037_v44 = vrot.slane %v3036_v55, 1  ;;  %v4503_v41 = vpop.f32.mrf.mxu1 }
 0x17b   :  { %770 = vbcast.lane.b32.xlu1 %v4872_v60, 288  ;;  %v3139_v33 = vmax.f32 %v3137_v9, %v3138_v34  ;;  %v3075_v29 = vrot.slane %v3074_v48, 4  ;;  %v3017_v2 = vmax.f32 %v3015_v56, %v3016_v59  ;;  %v3057_v30 = vmax.f32 %v3055_v15, %v3056_v45 }
 0x17c   :  { %v5481_v20 = vpop.permute.xlu0 %529  ;;  %v3093_v36 = vmax.f32 %v3091_v47, %v3092_v18  ;;  %v3094_v28 = vsel %vm70_vm0, %v2511_v12, -inf  ;;  %v3119_v9 = vrot.slane %v3118_v16, 2  ;;  %v3038_v46 = vmax.f32 %v3036_v55, %v3037_v44  ;;  %v5532_v18 = vld [vmem:[%s7796_s5] ss:$0 sm:$0xff] }
 0x17d   :  { %v5483_v42 = vpop.permute.xlu1 %525  ;;  %v3076_v63 = vmax.f32 %v3074_v48, %v3075_v29  ;;  %v3140_v51 = vrot.slane %v3139_v33, 2  ;;  %v3058_v57 = vrot.slane %v3057_v30, 1  ;;  %v4387_v56 = vsel %vm4386_vm9, %v3017_v2, %v2996_v31  ;;  %v7909_v31 = vld [vmem:[#allocation19_spill] sm:$0xff] }
 0x17e   :  { %782 = vbcast.lane.b32.xlu0 %v4872_v60, 312  ;;  %v3095_v25 = vmax.f32 %v3093_v36, %v3094_v28  ;;  %v3120_v15 = vmax.f32 %v3118_v16, %v3119_v9  ;;  %v4389_v24 = vsel %vm4388_vm10, %v3038_v46, %v4387_v56  ;;  %v5544_v36 = vld [vmem:[%s7797_s6] ss:$0 sm:$0xff] }
 0x17f   :  { %778 = vbcast.lane.b32.xlu1 %v4872_v60, 304  ;;  %v7908_v60 = vld [vmem:[#allocation18_spill] sm:$0xff]  ;;  %v3077_v22 = vrot.slane %v3076_v63, 2  ;;  %v3141_v50 = vmax.f32 %v3139_v33, %v3140_v51  ;;  %v3059_v39 = vmax.f32 %v3057_v30, %v3058_v57 }
 0x180   :  { %v5491_v58 = vpop.permute.xlu0 %537  ;;  %v3096_v23 = vrot.slane %v3095_v25, 4  ;;  %v3121_v53 = vrot.slane %v3120_v15, 1  ;;  %v5551_v9 = vld [vmem:[%s7798_s7] ss:$0 sm:$0xff] }
 0x181   :  { %v5493_v11 = vpop.permute.xlu1 %533  ;;  %v3078_v43 = vmax.f32 %v3076_v63, %v3077_v22  ;;  %v3142_v40 = vrot.slane %v3141_v50, 1  ;;  %v4391_v38 = vsel %vm4390_vm11, %v3059_v39, %v4389_v24 }
 0x182   :  { %793 = vbcast.lane.b32.xlu0 %v7908_v60, 264  ;;  %v3097_v62 = vmax.f32 %v3095_v25, %v3096_v23  ;;  %v3122_v59 = vmax.f32 %v3120_v15, %v3121_v53 }
 0x183   :  { %789 = vbcast.lane.b32.xlu1 %v7908_v60, 256  ;;  %v3079_v35 = vrot.slane %v3078_v43, 1  ;;  %v3143_v61 = vmax.f32 %v3141_v50, %v3142_v40 }
 0x184   :  { %v5498_v6 = vpop.permute.xlu0 %548  ;;  %v3098_v21 = vrot.slane %v3097_v62, 2 }
 0x185   :  { %v5500_v0 = vpop.permute.xlu1 %544  ;;  %v3080_v55 = vmax.f32 %v3078_v43, %v3079_v35  ;;  %v4663_v43 = vld [vmem:[%s7794_s1] sm:$0xff] }
 0x186   :  { %801 = vbcast.lane.b32.xlu0 %v7908_v60, 280  ;;  %v3099_v34 = vmax.f32 %v3097_v62, %v3098_v21  ;;  %v7910_v62 = vld [vmem:[#allocation20_spill] sm:$0xff] }
 0x187   :  { %797 = vbcast.lane.b32.xlu1 %v7908_v60, 272  ;;  %v4393_v45 = vsel %vm4392_vm12, %v3080_v55, %v4391_v38  ;;  %v7911_v38 = vld [vmem:[#allocation21_spill] sm:$0xff] }
 0x188   :  { %v5506_v49 = vpop.permute.xlu0 %556  ;;  %v3100_v14 = vrot.slane %v3099_v34, 1 }
 0x189   :  { %v5508_v4 = vpop.permute.xlu1 %552 }
 0x18a   :  { %809 = vbcast.lane.b32.xlu0 %v7908_v60, 296  ;;  %v3101_v48 = vmax.f32 %v3099_v34, %v3100_v14 }
 0x18b   :  { %805 = vbcast.lane.b32.xlu1 %v7908_v60, 288 }
 0x18c   :  { %v5515_v52 = vpop.permute.xlu0 %564  ;;  %v4395_v12 = vsel %vm4394_vm13, %v3101_v48, %v4393_v45  ;;  %v2528_v45 = vadd.f32 %v5446_v1, %v5200_v10  ;;  %v2530_v48 = vadd.f32 %v5196_v19, %v5467_v26 }
 0x18d   :  { %v5517_v5 = vpop.permute.xlu1 %560  ;;  %v4397_v29 = vsel %vm4396_vm14, %v3122_v59, %v4395_v12  ;;  %v2529_v59 = vadd.f32 %v5444_v13, %v5206_v7 }
 0x18e   :  { %817 = vbcast.lane.b32.xlu0 %v7908_v60, 312  ;;  %v4399_v47 = vsel %vm4398_vm15, %v3143_v61, %v4397_v29  ;;  %v2537_v61 = vadd.f32 %v5498_v6, %v5206_v7  ;;  %v3144_v1 = vsel %vm70_vm0, %v2528_v45, -inf  ;;  %v3147_v26 = vsel %vm70_vm0, %v2530_v48, -inf }
 0x18f   :  { %813 = vbcast.lane.b32.xlu1 %v7908_v60, 304  ;;  %v4504_v44 = vadd.f32 %v4503_v41, %v4399_v47  ;;  %v2536_v41 = vadd.f32 %v5500_v0, %v5200_v10  ;;  %v3145_v13 = vsel %vm70_vm0, %v2529_v59, -inf  ;;  %v2538_v47 = vadd.f32 %v5196_v19, %v5508_v4 }
 0x190   :  { %v5523_v16 = vpop.permute.xlu0 %572  ;;  %v3166_v6 = vsel %vm70_vm0, %v2537_v61, -inf  ;;  %v2540_v48 = vadd.f32 %v5517_v5, %v5233_v37 }
 0x191   :  { %v5525_v33 = vpop.permute.xlu1 %568  ;;  %v4541_v63 = vadd.f32 %v5532_v18, %v4504_v44  ;;  %v3165_v0 = vsel %vm70_vm0, %v2536_v41, -inf  ;;  %v3168_v4 = vsel %vm70_vm0, %v2538_v47, -inf  ;;  %v7912_v41 = vld [vmem:[#allocation22_spill] sm:$0xff] }
 0x192   :  { %828 = vbcast.lane.b32.xlu0 %v7909_v31, 264 }
 0x193   :  { %824 = vbcast.lane.b32.xlu1 %v7909_v31, 256  ;;  %v4549_v28 = vmax.f32 %v4541_v63, 0.0 }
 0x194   :  { %v5536_v2 = vpop.permute.xlu0 %583 }
 0x195   :  { %v5538_v30 = vpop.permute.xlu1 %579  ;;  %v4564_v25 = vmul.f32 %v5544_v36, %v4549_v28  ;;  %v2531_v28 = vadd.f32 %v5204_v54, %v5465_v27  ;;  %v2545_v61 = vadd.f32 %v5536_v2, %v5206_v7  ;;  %v2541_v2 = vadd.f32 %v5515_v52, %v5281_v17 }
 0x196   :  { %836 = vbcast.lane.b32.xlu0 %v7909_v31, 280 }
 0x197   :  { %832 = vbcast.lane.b32.xlu1 %v7909_v31, 272  ;;  %v4579_v51 = vadd.f32 %v5551_v9, %v4564_v25  ;;  %v3149_v27 = vsel %vm70_vm0, %v2531_v28, -inf }
 0x198   :  { %v5553_v60 = vpop.permute.xlu0 %591 }
 0x199   :  { %v5555_v22 = vpop.permute.xlu1 %587  ;;  %v4587_v23 = vadd.f32 %v4663_v43, %v4579_v51  ;;  %v3167_v51 = vmax.f32 %v3165_v0, %v3166_v6  ;;  %v2532_v43 = vadd.f32 %v5483_v42, %v5233_v37  ;;  %v2533_v42 = vadd.f32 %v5481_v20, %v5281_v17 }
 0x19a   :  { %844 = vbcast.lane.b32.xlu0 %v7909_v31, 296  ;;  %v2546_v5 = vadd.f32 %v5196_v19, %v5555_v22  ;;  %v3172_v20 = vsel %vm70_vm0, %v2540_v48, -inf  ;;  %v3187_v6 = vsel %vm70_vm0, %v2545_v61, -inf }
 0x19b   :  { %840 = vbcast.lane.b32.xlu1 %v7909_v31, 288  ;;  %4595 = vst.msk [vmem:[%s7799_s8] sm:$0xff] %vm70_vm0, %v4587_v23  ;;  %v2539_v23 = vadd.f32 %v5204_v54, %v5506_v49 }
 0x19c   :  { %v5561_v46 = vpop.permute.xlu0 %599  ;;  %v3189_v52 = vsel %vm70_vm0, %v2546_v5, -inf }
 0x19d   :  { %v5563_v57 = vpop.permute.xlu1 %595 }
 0x19e   :  { %852 = vbcast.lane.b32.xlu0 %v7909_v31, 312 }
 0x19f   :  { %848 = vbcast.lane.b32.xlu1 %v7909_v31, 304  ;;  %v3146_v31 = vmax.f32 %v3144_v1, %v3145_v13  ;;  %v3151_v13 = vsel %vm70_vm0, %v2532_v43, -inf  ;;  %v3170_v1 = vsel %vm70_vm0, %v2539_v23, -inf  ;;  %v3174_v23 = vsel %vm70_vm0, %v2541_v2, -inf }
 0x1a0   :  { %v5574_v56 = vpop.permute.xlu0 %607 }
 0x1a1   :  { %v5576_v15 = vpop.permute.xlu1 %603  ;;  %v3148_v25 = vmax.f32 %v3146_v31, %v3147_v26  ;;  %v3153_v31 = vsel %vm70_vm0, %v2533_v42, -inf }
 0x1a2   :  { %863 = vbcast.lane.b32.xlu0 %v7910_v62, 264 }
 0x1a3   :  { %859 = vbcast.lane.b32.xlu1 %v7910_v62, 256  ;;  %v3150_v49 = vmax.f32 %v3148_v25, %v3149_v27 }
 0x1a4   :  { %v5580_v50 = vpop.permute.xlu0 %618 }
 0x1a5   :  { %v5582_v35 = vpop.permute.xlu1 %614  ;;  %v3152_v28 = vmax.f32 %v3150_v49, %v3151_v13  ;;  %v2553_v22 = vadd.f32 %v5580_v50, %v5206_v7 }
 0x1a6   :  { %871 = vbcast.lane.b32.xlu0 %v7910_v62, 280  ;;  %v2552_v25 = vadd.f32 %v5582_v35, %v5200_v10 }
 0x1a7   :  { %867 = vbcast.lane.b32.xlu1 %v7910_v62, 272  ;;  %v3208_v49 = vsel %vm70_vm0, %v2553_v22, -inf  ;;  %v3154_v5 = vmax.f32 %v3152_v28, %v3153_v31 }
 0x1a8   :  { %v5586_v24 = vpop.permute.xlu0 %626 }
 0x1a9   :  { %v5588_v39 = vpop.permute.xlu1 %622 }
 0x1aa   :  { %879 = vbcast.lane.b32.xlu0 %v7910_v62, 296  ;;  %v2554_v61 = vadd.f32 %v5196_v19, %v5588_v39  ;;  %v3207_v39 = vsel %vm70_vm0, %v2552_v25, -inf  ;;  %v2555_v25 = vadd.f32 %v5204_v54, %v5586_v24 }
 0x1ab   :  { %875 = vbcast.lane.b32.xlu1 %v7910_v62, 288  ;;  %v3209_v28 = vmax.f32 %v3207_v39, %v3208_v49 }
 0x1ac   :  { %v5592_v21 = vpop.permute.xlu0 %634 }
 0x1ad   :  { %v5594_v53 = vpop.permute.xlu1 %630 }
 0x1ae   :  { %887 = vbcast.lane.b32.xlu0 %v7910_v62, 312 }
 0x1af   :  { %883 = vbcast.lane.b32.xlu1 %v7910_v62, 304  ;;  %v3169_v62 = vmax.f32 %v3167_v51, %v3168_v4  ;;  %v5667_v4 = vadd.f32 %v5254_v32, %v5491_v58  ;;  %v2534_v58 = vadd.f32 %v5216_v3, %v5493_v11  ;;  %v2547_v11 = vadd.f32 %v5204_v54, %v5553_v60 }
 0x1b0   :  { %v5598_v34 = vpop.permute.xlu0 %642  ;;  %v2548_v60 = vadd.f32 %v5563_v57, %v5233_v37 }
 0x1b1   :  { %v5600_v40 = vpop.permute.xlu1 %638  ;;  %v3171_v47 = vmax.f32 %v3169_v62, %v3170_v1  ;;  %v3191_v31 = vsel %vm70_vm0, %v2547_v11, -inf  ;;  %v2549_v11 = vadd.f32 %v5561_v46, %v5281_v17 }
 0x1b2   :  { %898 = vbcast.lane.b32.xlu0 %v7911_v38, 264 }
 0x1b3   :  { %894 = vbcast.lane.b32.xlu1 %v7911_v38, 256  ;;  %v3173_v62 = vmax.f32 %v3171_v47, %v3172_v20 }
 0x1b4   :  { %v654_v55 = vpop.permute.xlu0 %653 }
 0x1b5   :  { %v650_v14 = vpop.permute.xlu1 %649  ;;  %v2561_v51 = vadd.f32 %v654_v55, %v5206_v7  ;;  %v3175_v2 = vmax.f32 %v3173_v62, %v3174_v23  ;;  %v2556_v23 = vadd.f32 %v5594_v53, %v5233_v37 }
 0x1b6   :  { %906 = vbcast.lane.b32.xlu0 %v7911_v38, 280  ;;  %v2560_v43 = vadd.f32 %v650_v14, %v5200_v10  ;;  %v2542_v14 = vadd.f32 %v5216_v3, %v5525_v33  ;;  %v3155_v33 = vsel %vm70_vm0, %v2534_v58, -inf }
 0x1b7   :  { %902 = vbcast.lane.b32.xlu1 %v7911_v38, 272 }
 0x1b8   :  { %v5616_v12 = vpop.permute.xlu0 %661  ;;  %v3228_v13 = vsel %vm70_vm0, %v2560_v43, -inf  ;;  %v3176_v22 = vsel %vm70_vm0, %v2542_v14, -inf  ;;  %v7913_v14 = vld [vmem:[#allocation31_spill] sm:$0xff] }
 0x1b9   :  { %v658_v29 = vpop.permute.xlu1 %657 }
 0x1ba   :  { %914 = vbcast.lane.b32.xlu0 %v7911_v38, 296 }
 0x1bb   :  { %910 = vbcast.lane.b32.xlu1 %v7911_v38, 288 }
 0x1bc   :  { %v5627_v44 = vpop.permute.xlu0 %669 }
 0x1bd   :  { %v5629_v63 = vpop.permute.xlu1 %665 }
 0x1be   :  { %922 = vbcast.lane.b32.xlu0 %v7911_v38, 312  ;;  %v2564_v24 = vadd.f32 %v5629_v63, %v5233_v37 }
 0x1bf   :  { %918 = vbcast.lane.b32.xlu1 %v7911_v38, 304  ;;  %v2544_v38 = vadd.f32 %v5538_v30, %v5200_v10 }
 0x1c0   :  { %v5640_v59 = vpop.permute.xlu0 %677 }
 0x1c1   :  { %v5642_v45 = vpop.permute.xlu1 %673  ;;  %v3186_v0 = vsel %vm70_vm0, %v2544_v38, -inf  ;;  %v2562_v38 = vadd.f32 %v5196_v19, %v658_v29  ;;  %v3229_v29 = vsel %vm70_vm0, %v2561_v51, -inf  ;;  %v2563_v51 = vadd.f32 %v5204_v54, %v5616_v12 }
 0x1c2   :  { %933 = vbcast.lane.b32.xlu0 %v7912_v41, 264  ;;  %v3188_v50 = vmax.f32 %v3186_v0, %v3187_v6 }
 0x1c3   :  { %929 = vbcast.lane.b32.xlu1 %v7912_v41, 256  ;;  %v3231_v20 = vsel %vm70_vm0, %v2562_v38, -inf  ;;  %v5717_v38 = vmax.f32 %v3154_v5, %v3155_v33  ;;  %v3233_v49 = vsel %vm70_vm0, %v2563_v51, -inf  ;;  %v3235_v5 = vsel %vm70_vm0, %v2564_v24, -inf }
 0x1c4   :  { %v689_v30 = vpop.permute.xlu0 %688  ;;  %v3190_v42 = vmax.f32 %v3188_v50, %v3189_v52  ;;  %v3230_v52 = vmax.f32 %v3228_v13, %v3229_v29 }
 0x1c5   :  { %v685_v26 = vpop.permute.xlu1 %684  ;;  %v2569_v35 = vadd.f32 %v689_v30, %v5206_v7 }
 0x1c6   :  { %941 = vbcast.lane.b32.xlu0 %v7912_v41, 280  ;;  %v2568_v55 = vadd.f32 %v685_v26, %v5200_v10  ;;  %v3210_v26 = vsel %vm70_vm0, %v2554_v61, -inf  ;;  %v3192_v57 = vmax.f32 %v3190_v42, %v3191_v31  ;;  %v3232_v62 = vmax.f32 %v3230_v52, %v3231_v20 }
 0x1c7   :  { %937 = vbcast.lane.b32.xlu1 %v7912_v41, 272  ;;  %v3250_v6 = vsel %vm70_vm0, %v2569_v35, -inf  ;;  %v3211_v58 = vmax.f32 %v3209_v28, %v3210_v26  ;;  %v2543_v35 = vadd.f32 %v5254_v32, %v5523_v16  ;;  %v3212_v42 = vsel %vm70_vm0, %v2555_v25, -inf }
 0x1c8   :  { %v697_v27 = vpop.permute.xlu0 %696  ;;  %v3249_v0 = vsel %vm70_vm0, %v2568_v55, -inf  ;;  %v5725_v55 = vmax.f32 %v3175_v2, %v3176_v22  ;;  %v3214_v16 = vsel %vm70_vm0, %v2556_v23, -inf  ;;  %v3234_v29 = vmax.f32 %v3232_v62, %v3233_v49 }
 0x1c9   :  { %v693_v48 = vpop.permute.xlu1 %692  ;;  %v3251_v50 = vmax.f32 %v3249_v0, %v3250_v6  ;;  %v2571_v12 = vadd.f32 %v5204_v54, %v697_v27  ;;  %v3213_v39 = vmax.f32 %v3211_v58, %v3212_v42  ;;  %v2557_v26 = vadd.f32 %v5592_v21, %v5281_v17 }
 0x1ca   :  { %949 = vbcast.lane.b32.xlu0 %v7912_v41, 296  ;;  %v2570_v1 = vadd.f32 %v5196_v19, %v693_v48  ;;  %v2565_v6 = vadd.f32 %v5627_v44, %v5281_v17  ;;  %v3195_v28 = vsel %vm70_vm0, %v2549_v11, -inf  ;;  %v2558_v21 = vadd.f32 %v5216_v3, %v5600_v40 }
 0x1cb   :  { %945 = vbcast.lane.b32.xlu1 %v7912_v41, 288  ;;  %v3254_v33 = vsel %vm70_vm0, %v2571_v12, -inf  ;;  %v3236_v52 = vmax.f32 %v3234_v29, %v3235_v5  ;;  %v2566_v62 = vadd.f32 %v5216_v3, %v5642_v45  ;;  %v3216_v40 = vsel %vm70_vm0, %v2557_v26, -inf }
 0x1cc   :  { %v705_v47 = vpop.permute.xlu0 %704  ;;  %v3252_v43 = vsel %vm70_vm0, %v2570_v1, -inf  ;;  %v3237_v24 = vsel %vm70_vm0, %v2565_v6, -inf }
 0x1cd   :  { %v701_v30 = vpop.permute.xlu1 %700  ;;  %v3253_v53 = vmax.f32 %v3251_v50, %v3252_v43  ;;  %v2573_v43 = vadd.f32 %v705_v47, %v5281_v17  ;;  %v3238_v11 = vmax.f32 %v3236_v52, %v3237_v24  ;;  %v3239_v29 = vsel %vm70_vm0, %v2566_v62, -inf }
 0x1ce   :  { %957 = vbcast.lane.b32.xlu0 %v7912_v41, 312  ;;  %v2572_v63 = vadd.f32 %v701_v30, %v5233_v37  ;;  %v2550_v30 = vadd.f32 %v5216_v3, %v5576_v15  ;;  %v3215_v15 = vmax.f32 %v3213_v39, %v3214_v16 }
 0x1cf   :  { %953 = vbcast.lane.b32.xlu1 %v7912_v41, 304  ;;  %v3193_v41 = vsel %vm70_vm0, %v2548_v60, -inf  ;;  %v3178_v60 = vsel %vm70_vm0, %v2543_v35, -inf  ;;  %v3255_v20 = vmax.f32 %v3253_v53, %v3254_v33  ;;  %v3218_v53 = vsel %vm70_vm0, %v2558_v21, -inf  ;;  %v7914_v21 = vld [vmem:[#allocation32_spill] sm:$0xff] }
 0x1d0   :  { %v5715_v48 = vpop.permute.xlu0 %712  ;;  %v3194_v27 = vmax.f32 %v3192_v57, %v3193_v41  ;;  %v3256_v0 = vsel %vm70_vm0, %v2572_v63, -inf  ;;  %v3197_v23 = vsel %vm70_vm0, %v2550_v30, -inf  ;;  %v3217_v35 = vmax.f32 %v3215_v15, %v3216_v40 }
 0x1d1   :  { %v709_v61 = vpop.permute.xlu1 %708  ;;  %v3257_v50 = vmax.f32 %v3255_v20, %v3256_v0  ;;  %v3258_v63 = vsel %vm70_vm0, %v2573_v43, -inf  ;;  %v2559_v33 = vadd.f32 %v5254_v32, %v5598_v34  ;;  %v3179_v30 = vmax.f32 %v5725_v55, %v3178_v60 }
 0x1d2   :  { %968 = vbcast.lane.b32.xlu0 %v7913_v14, 264  ;;  %v3196_v51 = vmax.f32 %v3194_v27, %v3195_v28  ;;  %v2574_v47 = vadd.f32 %v5216_v3, %v709_v61  ;;  %v2551_v61 = vadd.f32 %v5254_v32, %v5574_v56  ;;  %v3219_v26 = vmax.f32 %v3217_v35, %v3218_v53 }
 0x1d3   :  { %964 = vbcast.lane.b32.xlu1 %v7913_v14, 256  ;;  %v2567_v56 = vadd.f32 %v5254_v32, %v5640_v59  ;;  %v3157_v59 = vsel %vm70_vm0, %v5667_v4, -inf  ;;  %v3180_v40 = vrot.slane %v3179_v30, 4 }
 0x1d4   :  { %v724_v13 = vpop.permute.xlu0 %723  ;;  %v3198_v5 = vmax.f32 %v3196_v51, %v3197_v23  ;;  %v3199_v28 = vsel %vm70_vm0, %v2551_v61, -inf }
 0x1d5   :  { %v720_v1 = vpop.permute.xlu1 %719  ;;  %v2577_v2 = vadd.f32 %v724_v13, %v5206_v7  ;;  %v3259_v13 = vmax.f32 %v3257_v50, %v3258_v63  ;;  %v3241_v43 = vsel %vm70_vm0, %v2567_v56, -inf }
 0x1d6   :  { %v2576_v46 = vadd.f32 %v720_v1, %v5200_v10  ;;  %976 = vbcast.lane.b32.xlu0 %v7913_v14, 280  ;;  %v3200_v52 = vmax.f32 %v3198_v5, %v3199_v28 }
 0x1d7   :  { %972 = vbcast.lane.b32.xlu1 %v7913_v14, 272  ;;  %v3271_v22 = vsel %vm70_vm0, %v2577_v2, -inf  ;;  %v3260_v2 = vsel %vm70_vm0, %v2574_v47, -inf }
 0x1d8   :  { %v3270_v31 = vsel %vm70_vm0, %v2576_v46, -inf  ;;  %v732_v57 = vpop.permute.xlu0 %731  ;;  %v3261_v15 = vmax.f32 %v3259_v13, %v3260_v2 }
 0x1d9   :  { %v728_v25 = vpop.permute.xlu1 %727  ;;  %v2579_v44 = vadd.f32 %v5204_v54, %v732_v57  ;;  %v3272_v41 = vmax.f32 %v3270_v31, %v3271_v22  ;;  %v3240_v22 = vmax.f32 %v3238_v11, %v3239_v29 }
 0x1da   :  { %v2578_v58 = vadd.f32 %v5196_v19, %v728_v25  ;;  %984 = vbcast.lane.b32.xlu0 %v7913_v14, 296  ;;  %v3158_v25 = vmax.f32 %v5717_v38, %v3157_v59  ;;  %v3201_v38 = vrot.slane %v3200_v52, 4 }
 0x1db   :  { %980 = vbcast.lane.b32.xlu1 %v7913_v14, 288  ;;  %v3275_v27 = vsel %vm70_vm0, %v2579_v44, -inf  ;;  %v3242_v62 = vmax.f32 %v3240_v22, %v3241_v43 }
 0x1dc   :  { %v3273_v12 = vsel %vm70_vm0, %v2578_v58, -inf  ;;  %v740_v45 = vpop.permute.xlu0 %739  ;;  %v3159_v11 = vrot.slane %v3158_v25, 4  ;;  %v3202_v13 = vmax.f32 %v3200_v52, %v3201_v38 }
 0x1dd   :  { %v3274_v42 = vmax.f32 %v3272_v41, %v3273_v12  ;;  %v736_v49 = vpop.permute.xlu1 %735  ;;  %v2581_v39 = vadd.f32 %v740_v45, %v5281_v17  ;;  %v3243_v63 = vrot.slane %v3242_v62, 4 }
 0x1de   :  { %v2580_v16 = vadd.f32 %v736_v49, %v5233_v37  ;;  %992 = vbcast.lane.b32.xlu0 %v7913_v14, 312 }
 0x1df   :  { %v3276_v1 = vmax.f32 %v3274_v42, %v3275_v27  ;;  %988 = vbcast.lane.b32.xlu1 %v7913_v14, 304  ;;  %v2575_v14 = vadd.f32 %v5254_v32, %v5715_v48  ;;  %v3279_v31 = vsel %vm70_vm0, %v2581_v39, -inf  ;;  %v3220_v48 = vsel %vm70_vm0, %v2559_v33, -inf }
 0x1e0   :  { %v3277_v46 = vsel %vm70_vm0, %v2580_v16, -inf  ;;  %v748_v6 = vpop.permute.xlu0 %747  ;;  %v3221_v51 = vmax.f32 %v3219_v26, %v3220_v48  ;;  %v3181_v16 = vmax.f32 %v3179_v30, %v3180_v40  ;;  %v3160_v33 = vmax.f32 %v3158_v25, %v3159_v11 }
 0x1e1   :  { %v3278_v20 = vmax.f32 %v3276_v1, %v3277_v46  ;;  %v744_v0 = vpop.permute.xlu1 %743  ;;  %v2583_v55 = vadd.f32 %v5254_v32, %v748_v6  ;;  %v3262_v50 = vsel %vm70_vm0, %v2575_v14, -inf }
 0x1e2   :  { %v2582_v34 = vadd.f32 %v5216_v3, %v744_v0  ;;  %1003 = vbcast.lane.b32.xlu0 %v7914_v21, 264  ;;  %v3263_v24 = vmax.f32 %v3261_v15, %v3262_v50  ;;  %v3222_v42 = vrot.slane %v3221_v51, 4  ;;  %v3182_v22 = vrot.slane %v3181_v16, 2 }
 0x1e3   :  { %v3280_v60 = vmax.f32 %v3278_v20, %v3279_v31  ;;  %999 = vbcast.lane.b32.xlu1 %v7914_v21, 256  ;;  %v3283_v47 = vsel %vm70_vm0, %v2583_v55, -inf  ;;  %v3244_v20 = vmax.f32 %v3242_v62, %v3243_v63  ;;  %v3161_v55 = vrot.slane %v3160_v33, 2 }
 0x1e4   :  { %v3281_v57 = vsel %vm70_vm0, %v2582_v34, -inf  ;;  %v759_v58 = vpop.permute.xlu0 %758  ;;  %v3264_v61 = vrot.slane %v3263_v24, 4  ;;  %v3223_v2 = vmax.f32 %v3221_v51, %v3222_v42  ;;  %v3203_v34 = vrot.slane %v3202_v13, 2 }
 0x1e5   :  { %v3282_v44 = vmax.f32 %v3280_v60, %v3281_v57  ;;  %v755_v23 = vpop.permute.xlu1 %754  ;;  %v2585_v41 = vadd.f32 %v759_v58, %v5206_v7  ;;  %v3245_v57 = vrot.slane %v3244_v20, 2 }
 0x1e6   :  { %v2584_v4 = vadd.f32 %v755_v23, %v5200_v10  ;;  %1011 = vbcast.lane.b32.xlu0 %v7914_v21, 280  ;;  %v3265_v14 = vmax.f32 %v3263_v24, %v3264_v61  ;;  %v3224_v60 = vrot.slane %v3223_v2, 2  ;;  %v3204_v62 = vmax.f32 %v3202_v13, %v3203_v34 }
 0x1e7   :  { %1007 = vbcast.lane.b32.xlu1 %v7914_v21, 272  ;;  %v3284_v12 = vmax.f32 %v3282_v44, %v3283_v47  ;;  %v3292_v35 = vsel %vm70_vm0, %v2585_v41, -inf  ;;  %v3183_v44 = vmax.f32 %v3181_v16, %v3182_v22 }
 0x1e8   :  { %v3291_v53 = vsel %vm70_vm0, %v2584_v4, -inf  ;;  %v767_v45 = vpop.permute.xlu0 %766  ;;  %v3266_v58 = vrot.slane %v3265_v14, 2  ;;  %v3162_v4 = vmax.f32 %v3160_v33, %v3161_v55  ;;  %v3225_v40 = vmax.f32 %v3223_v2, %v3224_v60 }
 0x1e9   :  { %v763_v49 = vpop.permute.xlu1 %762  ;;  %v2587_v27 = vadd.f32 %v5204_v54, %v767_v45  ;;  %v3293_v29 = vmax.f32 %v3291_v53, %v3292_v35  ;;  %v3285_v1 = vrot.slane %v3284_v12, 4  ;;  %v3184_v53 = vrot.slane %v3183_v44, 1 }
 0x1ea   :  { %v2586_v39 = vadd.f32 %v5196_v19, %v763_v49  ;;  %1019 = vbcast.lane.b32.xlu0 %v7914_v21, 296  ;;  %v3267_v11 = vmax.f32 %v3265_v14, %v3266_v58  ;;  %v3205_v45 = vrot.slane %v3204_v62, 1  ;;  %v3163_v63 = vrot.slane %v3162_v4, 1 }
 0x1eb   :  { %1015 = vbcast.lane.b32.xlu1 %v7914_v21, 288  ;;  %v3296_v6 = vsel %vm70_vm0, %v2587_v27, -inf  ;;  %v3286_v28 = vmax.f32 %v3284_v12, %v3285_v1  ;;  %v3246_v12 = vmax.f32 %v3244_v20, %v3245_v57  ;;  %v3226_v27 = vrot.slane %v3225_v40, 1 }
 0x1ec   :  { %v3294_v5 = vsel %vm70_vm0, %v2586_v39, -inf  ;;  %v775_v26 = vpop.permute.xlu0 %774  ;;  %v3185_v13 = vmax.f32 %v3183_v44, %v3184_v53  ;;  %v3206_v33 = vmax.f32 %v3204_v62, %v3205_v45 }
 0x1ed   :  { %v3295_v46 = vmax.f32 %v3293_v29, %v3294_v5  ;;  %v771_v56 = vpop.permute.xlu1 %770  ;;  %v2589_v30 = vadd.f32 %v775_v26, %v5281_v17  ;;  %v3287_v50 = vrot.slane %v3286_v28, 2  ;;  %v3247_v29 = vrot.slane %v3246_v12, 1 }
 0x1ee   :  { %v2588_v0 = vadd.f32 %v771_v56, %v5233_v37  ;;  %1027 = vbcast.lane.b32.xlu0 %v7914_v21, 312  ;;  %v3268_v5 = vrot.slane %v3267_v11, 1  ;;  %v3227_v26 = vmax.f32 %v3225_v40, %v3226_v27 }
 0x1ef   :  { %v3297_v31 = vmax.f32 %v3295_v46, %v3296_v6  ;;  %1023 = vbcast.lane.b32.xlu1 %v7914_v21, 304  ;;  %v3300_v25 = vsel %vm70_vm0, %v2589_v30, -inf  ;;  %v7915_v21 = vld [vmem:[#allocation33_spill] sm:$0xff]  ;;  %v3288_v49 = vmax.f32 %v3286_v28, %v3287_v50  ;;  %v3164_v46 = vmax.f32 %v3162_v4, %v3163_v63 }
 0x1f0   :  { %v3298_v15 = vsel %vm70_vm0, %v2588_v0, -inf  ;;  %v783_v52 = vpop.permute.xlu0 %782  ;;  %v3248_v30 = vmax.f32 %v3246_v12, %v3247_v29  ;;  %v5841_v0 = vpop.f32.mrf.mxu1  ;;  %v3269_v22 = vmax.f32 %v3267_v11, %v3268_v5 }
 0x1f1   :  { %v3299_v59 = vmax.f32 %v3297_v31, %v3298_v15  ;;  %v779_v48 = vpop.permute.xlu1 %778  ;;  %v2591_v51 = vadd.f32 %v5254_v32, %v783_v52  ;;  %v3289_v2 = vrot.slane %v3288_v49, 1  ;;  %v4400_v31 = vsel %vm4386_vm9, %v3185_v13, %v3164_v46 }
 0x1f2   :  { %v2590_v43 = vadd.f32 %v5216_v3, %v779_v48  ;;  %1038 = vbcast.lane.b32.xlu0 %v7915_v21, 264  ;;  %v4401_v28 = vsel %vm4388_vm10, %v3206_v33, %v4400_v31  ;;  %v7916_v48 = vld [vmem:[#allocation2_spill] sm:$0xff] }
 0x1f3   :  { %v3301_v23 = vmax.f32 %v3299_v59, %v3300_v25  ;;  %1034 = vbcast.lane.b32.xlu1 %v7915_v21, 256  ;;  %v3304_v35 = vsel %vm70_vm0, %v2591_v51, -inf  ;;  %v3290_v34 = vmax.f32 %v3288_v49, %v3289_v2  ;;  %v4402_v59 = vsel %vm4390_vm11, %v3227_v26, %v4401_v28  ;;  %v4506_v51 = vpop.f32.mrf.mxu1 }
 0x1f4   :  { %v3302_v41 = vsel %vm70_vm0, %v2590_v43, -inf  ;;  %v5822_v47 = vpop.permute.xlu0 %793  ;;  %v4403_v52 = vsel %vm4392_vm12, %v3248_v30, %v4402_v59 }
 0x1f5   :  { %v3303_v24 = vmax.f32 %v3301_v23, %v3302_v41  ;;  %v5824_v38 = vpop.permute.xlu1 %789  ;;  %v4404_v25 = vsel %vm4394_vm13, %v3269_v22, %v4403_v52 }
 0x1f6   :  { %1046 = vbcast.lane.b32.xlu0 %v7915_v21, 280  ;;  %v4405_v43 = vsel %vm4396_vm14, %v3290_v34, %v4404_v25  ;;  %v2592_v31 = vadd.f32 %v5824_v38, %v5200_v10  ;;  %v7919_v34 = vld [vmem:[#allocation5_spill] sm:$0xff] }
 0x1f7   :  { %v3305_v42 = vmax.f32 %v3303_v24, %v3304_v35  ;;  %1042 = vbcast.lane.b32.xlu1 %v7915_v21, 272 }
 0x1f8   :  { %v5829_v16 = vpop.permute.xlu0 %801 }
 0x1f9   :  { %v3306_v39 = vrot.slane %v3305_v42, 4  ;;  %v5831_v61 = vpop.permute.xlu1 %797 }
 0x1fa   :  { %1054 = vbcast.lane.b32.xlu0 %v7915_v21, 296  ;;  %v2594_v28 = vadd.f32 %v5196_v19, %v5831_v61 }
 0x1fb   :  { %v3307_v1 = vmax.f32 %v3305_v42, %v3306_v39  ;;  %1050 = vbcast.lane.b32.xlu1 %v7915_v21, 288 }
 0x1fc   :  { %v5835_v56 = vpop.permute.xlu0 %809 }
 0x1fd   :  { %v5837_v20 = vpop.permute.xlu1 %805  ;;  %v3308_v6 = vrot.slane %v3307_v1, 2 }
 0x1fe   :  { %1062 = vbcast.lane.b32.xlu0 %v7915_v21, 312 }
 0x1ff   :  { %1058 = vbcast.lane.b32.xlu1 %v7915_v21, 304  ;;  %v3309_v14 = vmax.f32 %v3307_v1, %v3308_v6  ;;  %v7918_v1 = vld [vmem:[#allocation4_spill] sm:$0xff] }
 0x200   :  { %v5845_v15 = vpop.permute.xlu0 %817 }
 0x201   :  { %v5847_v55 = vpop.permute.xlu1 %813  ;;  %v3310_v60 = vrot.slane %v3309_v14, 1 }
 0x202   :  { %1073 = vbcast.lane.b32.xlu0 %v7916_v48, 264 }
 0x203   :  { %1069 = vbcast.lane.b32.xlu1 %v7916_v48, 256  ;;  %v3311_v57 = vmax.f32 %v3309_v14, %v3310_v60  ;;  %v2593_v14 = vadd.f32 %v5822_v47, %v5206_v7  ;;  %v3315_v47 = vsel %vm70_vm0, %v2594_v28, -inf }
 0x204   :  { %v5855_v44 = vpop.permute.xlu0 %828 }
 0x205   :  { %v5857_v58 = vpop.permute.xlu1 %824  ;;  %v4406_v23 = vsel %vm4398_vm15, %v3311_v57, %v4405_v43  ;;  %v3313_v52 = vsel %vm70_vm0, %v2593_v14, -inf  ;;  %v2601_v38 = vadd.f32 %v5855_v44, %v5206_v7  ;;  %v2595_v43 = vadd.f32 %v5204_v54, %v5829_v16 }
 0x206   :  { %v4507_v21 = vadd.f32 %v4506_v51, %v4406_v23  ;;  %1081 = vbcast.lane.b32.xlu0 %v7916_v48, 280  ;;  %v2600_v57 = vadd.f32 %v5857_v58, %v5200_v10  ;;  %v2596_v44 = vadd.f32 %v5837_v20, %v5233_v37 }
 0x207   :  { %1077 = vbcast.lane.b32.xlu1 %v7916_v48, 272  ;;  %v3334_v58 = vsel %vm70_vm0, %v2601_v38, -inf  ;;  %v3317_v16 = vsel %vm70_vm0, %v2595_v43, -inf }
 0x208   :  { %v4542_v62 = vadd.f32 %v5532_v18, %v4507_v21  ;;  %v5863_v50 = vpop.permute.xlu0 %836  ;;  %v4664_v18 = vld [vmem:[%s7794_s1 + $0x8] sm:$0xff]  ;;  %v3319_v20 = vsel %vm70_vm0, %v2596_v44, -inf }
 0x209   :  { %v5865_v41 = vpop.permute.xlu1 %832 }
 0x20a   :  { %v4550_v4 = vmax.f32 %v4542_v62, 0.0  ;;  %1089 = vbcast.lane.b32.xlu0 %v7916_v48, 296  ;;  %v2602_v23 = vadd.f32 %v5196_v19, %v5865_v41  ;;  %v3333_v62 = vsel %vm70_vm0, %v2600_v57, -inf }
 0x20b   :  { %1085 = vbcast.lane.b32.xlu1 %v7916_v48, 288 }
 0x20c   :  { %v4565_v40 = vmul.f32 %v5544_v36, %v4550_v4  ;;  %v5870_v24 = vpop.permute.xlu0 %844  ;;  %v7917_v36 = vld [vmem:[#allocation3_spill] sm:$0xff]  ;;  %v3336_v41 = vsel %vm70_vm0, %v2602_v23, -inf }
 0x20d   :  { %v5872_v12 = vpop.permute.xlu1 %840 }
 0x20e   :  { %v4580_v35 = vadd.f32 %v5551_v9, %v4565_v40  ;;  %1097 = vbcast.lane.b32.xlu0 %v7916_v48, 312  ;;  %v2604_v28 = vadd.f32 %v5872_v12, %v5233_v37  ;;  %v6000_v12 = vadd.f32 %v5254_v32, %v5845_v15 }
 0x20f   :  { %1093 = vbcast.lane.b32.xlu1 %v7916_v48, 304  ;;  %v3312_v48 = vsel %vm70_vm0, %v2592_v31, -inf }
 0x210   :  { %v4588_v53 = vadd.f32 %v4664_v18, %v4580_v35  ;;  %v5880_v11 = vpop.permute.xlu0 %852  ;;  %v3314_v25 = vmax.f32 %v3312_v48, %v3313_v52  ;;  %v3335_v18 = vmax.f32 %v3333_v62, %v3334_v58  ;;  %v3340_v43 = vsel %vm70_vm0, %v2604_v28, -inf }
 0x211   :  { %v5882_v42 = vpop.permute.xlu1 %848 }
 0x212   :  { %4596 = vst.msk [vmem:[%s7799_s8 + $0x8] sm:$0xff] %vm70_vm0, %v4588_v53  ;;  %1108 = vbcast.lane.b32.xlu0 %v7917_v36, 264  ;;  %v3316_v21 = vmax.f32 %v3314_v25, %v3315_v47  ;;  %v2603_v53 = vadd.f32 %v5204_v54, %v5863_v50  ;;  %v7920_v50 = vld [vmem:[#allocation6_spill] sm:$0xff]  ;;  %v2598_v25 = vadd.f32 %v5216_v3, %v5847_v55 }
 0x213   :  { %1104 = vbcast.lane.b32.xlu1 %v7917_v36, 256  ;;  %v2605_v55 = vadd.f32 %v5870_v24, %v5281_v17 }
 0x214   :  { %v5890_v9 = vpop.permute.xlu0 %863  ;;  %v3318_v35 = vmax.f32 %v3316_v21, %v3317_v16 }
 0x215   :  { %v5892_v45 = vpop.permute.xlu1 %859  ;;  %v2609_v52 = vadd.f32 %v5890_v9, %v5206_v7 }
 0x216   :  { %1116 = vbcast.lane.b32.xlu0 %v7917_v36, 280  ;;  %v5988_v48 = vmax.f32 %v3318_v35, %v3319_v20 }
 0x217   :  { %1112 = vbcast.lane.b32.xlu1 %v7917_v36, 272  ;;  %v3355_v23 = vsel %vm70_vm0, %v2609_v52, -inf }
 0x218   :  { %v5896_v49 = vpop.permute.xlu0 %871 }
 0x219   :  { %v5898_v63 = vpop.permute.xlu1 %867 }
 0x21a   :  { %1124 = vbcast.lane.b32.xlu0 %v7917_v36, 296  ;;  %v2610_v47 = vadd.f32 %v5196_v19, %v5898_v63 }
 0x21b   :  { %1120 = vbcast.lane.b32.xlu1 %v7917_v36, 288 }
 0x21c   :  { %v5902_v27 = vpop.permute.xlu0 %879  ;;  %v3357_v58 = vsel %vm70_vm0, %v2610_v47, -inf }
 0x21d   :  { %v5904_v39 = vpop.permute.xlu1 %875 }
 0x21e   :  { %1132 = vbcast.lane.b32.xlu0 %v7917_v36, 312 }
 0x21f   :  { %1128 = vbcast.lane.b32.xlu1 %v7917_v36, 304  ;;  %v2597_v36 = vadd.f32 %v5835_v56, %v5281_v17  ;;  %v3338_v56 = vsel %vm70_vm0, %v2603_v53, -inf  ;;  %v2606_v53 = vadd.f32 %v5216_v3, %v5882_v42  ;;  %v3342_v42 = vsel %vm70_vm0, %v2605_v55, -inf }
 0x220   :  { %v5908_v29 = vpop.permute.xlu0 %887 }
 0x221   :  { %v5910_v13 = vpop.permute.xlu1 %883  ;;  %v5996_v38 = vsel %vm70_vm0, %v2597_v36, -inf }
 0x222   :  { %1143 = vbcast.lane.b32.xlu0 %v7918_v1, 264  ;;  %v3322_v63 = vmax.f32 %v5988_v48, %v5996_v38 }
 0x223   :  { %1139 = vbcast.lane.b32.xlu1 %v7918_v1, 256 }
 0x224   :  { %v5914_v5 = vpop.permute.xlu0 %898 }
 0x225   :  { %v5916_v33 = vpop.permute.xlu1 %894  ;;  %v2617_v44 = vadd.f32 %v5914_v5, %v5206_v7  ;;  %v2611_v5 = vadd.f32 %v5204_v54, %v5896_v49 }
 0x226   :  { %1151 = vbcast.lane.b32.xlu0 %v7918_v1, 280  ;;  %v2616_v15 = vadd.f32 %v5916_v33, %v5200_v10 }
 0x227   :  { %1147 = vbcast.lane.b32.xlu1 %v7918_v1, 272  ;;  %v3376_v49 = vsel %vm70_vm0, %v2617_v44, -inf }
 0x228   :  { %v5920_v2 = vpop.permute.xlu0 %906  ;;  %v3375_v28 = vsel %vm70_vm0, %v2616_v15, -inf }
 0x229   :  { %v5922_v46 = vpop.permute.xlu1 %902  ;;  %v2619_v15 = vadd.f32 %v5204_v54, %v5920_v2  ;;  %v2607_v2 = vadd.f32 %v5254_v32, %v5880_v11 }
 0x22a   :  { %1159 = vbcast.lane.b32.xlu0 %v7918_v1, 296  ;;  %v2618_v33 = vadd.f32 %v5196_v19, %v5922_v46 }
 0x22b   :  { %1155 = vbcast.lane.b32.xlu1 %v7918_v1, 288 }
 0x22c   :  { %v5926_v26 = vpop.permute.xlu0 %914 }
 0x22d   :  { %v5928_v6 = vpop.permute.xlu1 %910 }
 0x22e   :  { %1167 = vbcast.lane.b32.xlu0 %v7918_v1, 312 }
 0x22f   :  { %1163 = vbcast.lane.b32.xlu1 %v7918_v1, 304  ;;  %v3337_v1 = vmax.f32 %v3335_v18, %v3336_v41 }
 0x230   :  { %v5932_v30 = vpop.permute.xlu0 %922 }
 0x231   :  { %v5934_v22 = vpop.permute.xlu1 %918  ;;  %v3339_v9 = vmax.f32 %v3337_v1, %v3338_v56  ;;  %v2612_v1 = vadd.f32 %v5904_v39, %v5233_v37  ;;  %v3359_v39 = vsel %vm70_vm0, %v2611_v5, -inf  ;;  %v3378_v56 = vsel %vm70_vm0, %v2618_v33, -inf }
 0x232   :  { %1178 = vbcast.lane.b32.xlu0 %v7919_v34, 264 }
 0x233   :  { %1174 = vbcast.lane.b32.xlu1 %v7919_v34, 256  ;;  %v3341_v41 = vmax.f32 %v3339_v9, %v3340_v43  ;;  %v3377_v9 = vmax.f32 %v3375_v28, %v3376_v49 }
 0x234   :  { %v934_v60 = vpop.permute.xlu0 %933 }
 0x235   :  { %v930_v59 = vpop.permute.xlu1 %929  ;;  %v2625_v62 = vadd.f32 %v934_v60, %v5206_v7  ;;  %v3343_v48 = vmax.f32 %v3341_v41, %v3342_v42  ;;  %v3379_v55 = vmax.f32 %v3377_v9, %v3378_v56  ;;  %v37_v56 = vld [vmem:[%s7794_s1 + $0x38] sm:$0xff]  ;;  %v2621_v9 = vadd.f32 %v5926_v26, %v5281_v17 }
 0x236   :  { %1186 = vbcast.lane.b32.xlu0 %v7919_v34, 280  ;;  %v2624_v16 = vadd.f32 %v930_v59, %v5200_v10 }
 0x237   :  { %1182 = vbcast.lane.b32.xlu1 %v7919_v34, 272  ;;  %v3397_v46 = vsel %vm70_vm0, %v2625_v62, -inf }
 0x238   :  { %v5953_v61 = vpop.permute.xlu0 %941 }
 0x239   :  { %v938_v51 = vpop.permute.xlu1 %937 }
 0x23a   :  { %1194 = vbcast.lane.b32.xlu0 %v7919_v34, 296  ;;  %v2626_v24 = vadd.f32 %v5196_v19, %v938_v51  ;;  %v3396_v51 = vsel %vm70_vm0, %v2624_v16, -inf  ;;  %v2620_v16 = vadd.f32 %v5928_v6, %v5233_v37  ;;  %v2613_v6 = vadd.f32 %v5902_v27, %v5281_v17 }
 0x23b   :  { %1190 = vbcast.lane.b32.xlu1 %v7919_v34, 288  ;;  %v3398_v44 = vmax.f32 %v3396_v51, %v3397_v46  ;;  %v34_v46 = vld [vmem:[%s7794_s1 + $0x20] sm:$0xff]  ;;  %v36_v51 = vld [vmem:[%s7794_s1 + $0x30] sm:$0xff] }
 0x23c   :  { %v5965_v4 = vpop.permute.xlu0 %949 }
 0x23d   :  { %v5967_v40 = vpop.permute.xlu1 %945 }
 0x23e   :  { %1202 = vbcast.lane.b32.xlu0 %v7919_v34, 312 }
 0x23f   :  { %1198 = vbcast.lane.b32.xlu1 %v7919_v34, 304  ;;  %v2608_v34 = vadd.f32 %v5892_v45, %v5200_v10 }
 0x240   :  { %v5978_v14 = vpop.permute.xlu0 %957 }
 0x241   :  { %v5980_v31 = vpop.permute.xlu1 %953  ;;  %v3354_v21 = vsel %vm70_vm0, %v2608_v34, -inf  ;;  %v3323_v34 = vsel %vm70_vm0, %v2598_v25, -inf  ;;  %v3361_v25 = vsel %vm70_vm0, %v2612_v1, -inf  ;;  %v3382_v1 = vsel %vm70_vm0, %v2620_v16, -inf }
 0x242   :  { %1213 = vbcast.lane.b32.xlu0 %v7920_v50, 264  ;;  %v3356_v35 = vmax.f32 %v3354_v21, %v3355_v23  ;;  %v3344_v23 = vsel %vm70_vm0, %v2606_v53, -inf }
 0x243   :  { %1209 = vbcast.lane.b32.xlu1 %v7920_v50, 256  ;;  %v6066_v53 = vmax.f32 %v3343_v48, %v3344_v23 }
 0x244   :  { %v969_v45 = vpop.permute.xlu0 %968  ;;  %v3358_v59 = vmax.f32 %v3356_v35, %v3357_v58  ;;  %v2627_v58 = vadd.f32 %v5204_v54, %v5953_v61  ;;  %v2628_v35 = vadd.f32 %v5967_v40, %v5233_v37  ;;  %v7921_v40 = vld [vmem:[#allocation7_spill] sm:$0xff] }
 0x245   :  { %v965_v57 = vpop.permute.xlu1 %964  ;;  %v2633_v36 = vadd.f32 %v969_v45, %v5206_v7  ;;  %v3399_v45 = vsel %vm70_vm0, %v2626_v24, -inf }
 0x246   :  { %1221 = vbcast.lane.b32.xlu0 %v7920_v50, 280  ;;  %v2632_v60 = vadd.f32 %v965_v57, %v5200_v10  ;;  %v3360_v21 = vmax.f32 %v3358_v59, %v3359_v39  ;;  %v3400_v41 = vmax.f32 %v3398_v44, %v3399_v45  ;;  %v3401_v11 = vsel %vm70_vm0, %v2627_v58, -inf }
 0x247   :  { %1217 = vbcast.lane.b32.xlu1 %v7920_v50, 272  ;;  %v3418_v57 = vsel %vm70_vm0, %v2633_v36, -inf  ;;  %v3403_v49 = vsel %vm70_vm0, %v2628_v35, -inf  ;;  %v3363_v44 = vsel %vm70_vm0, %v2613_v6, -inf  ;;  %v3384_v6 = vsel %vm70_vm0, %v2621_v9, -inf }
 0x248   :  { %v977_v18 = vpop.permute.xlu0 %976  ;;  %v3417_v43 = vsel %vm70_vm0, %v2632_v60, -inf  ;;  %v6071_v24 = vmax.f32 %v3360_v21, %v3361_v25  ;;  %v3380_v60 = vsel %vm70_vm0, %v2619_v15, -inf  ;;  %v3402_v27 = vmax.f32 %v3400_v41, %v3401_v11 }
 0x249   :  { %v973_v20 = vpop.permute.xlu1 %972  ;;  %v3419_v5 = vmax.f32 %v3417_v43, %v3418_v57  ;;  %v2635_v61 = vadd.f32 %v5204_v54, %v977_v18  ;;  %v3381_v18 = vmax.f32 %v3379_v55, %v3380_v60  ;;  %v151_v57 = vpack.c.bf16 %v37_v56, %v36_v51 }
 0x24a   :  { %1229 = vbcast.lane.b32.xlu0 %v7920_v50, 296  ;;  %v2634_v52 = vadd.f32 %v5196_v19, %v973_v20  ;;  %v6062_v20 = vmax.f32 %v3322_v63, %v3323_v34  ;;  %v2614_v63 = vadd.f32 %v5216_v3, %v5910_v13  ;;  %v35_v13 = vld [vmem:[%s7794_s1 + $0x28] sm:$0xff]  ;;  %v2629_v43 = vadd.f32 %v5965_v4, %v5281_v17 }
 0x24b   :  { %1225 = vbcast.lane.b32.xlu1 %v7920_v50, 288  ;;  %v150_v39 = vpack.c.bf16 %v35_v13, %v34_v46  ;;  %v3383_v26 = vmax.f32 %v3381_v18, %v3382_v1  ;;  %v2622_v15 = vadd.f32 %v5216_v3, %v5934_v22  ;;  %v3404_v55 = vmax.f32 %v3402_v27, %v3403_v49 }
 0x24c   :  { %v6042_v47 = vpop.permute.xlu0 %984  ;;  %v3420_v62 = vsel %vm70_vm0, %v2634_v52, -inf  ;;  %v3422_v52 = vsel %vm70_vm0, %v2635_v61, -inf  ;;  %v3364_v4 = vmax.f32 %v6071_v24, %v3363_v44  ;;  %v3405_v24 = vsel %vm70_vm0, %v2629_v43, -inf  ;;  %v7922_v44 = vld [vmem:[#allocation8_spill] sm:$0xff] }
 0x24d   :  { %v981_v38 = vpop.permute.xlu1 %980  ;;  %v3421_v36 = vmax.f32 %v3419_v5, %v3420_v62  ;;  %4652 = vmatprep.mubr.msk.bf16.mxu1 %vm70_vm0, %v150_v39  ;;  %v2637_v16 = vadd.f32 %v6042_v47, %v5281_v17  ;;  %v3365_v5 = vsel %vm70_vm0, %v2614_v63, -inf  ;;  %v3385_v60 = vmax.f32 %v3383_v26, %v3384_v6 }
 0x24e   :  { %1237 = vbcast.lane.b32.xlu0 %v7920_v50, 312  ;;  %v2636_v59 = vadd.f32 %v981_v38, %v5233_v37  ;;  %v3346_v38 = vsel %vm70_vm0, %v2607_v2, -inf  ;;  %4653 = vmatmul.mubr.msk.bf16.gmra.mxu1 %vm70_vm0, %v151_v57  ;;  %v2630_v2 = vadd.f32 %v5216_v3, %v5980_v31  ;;  %v3386_v63 = vsel %vm70_vm0, %v2622_v15, -inf }
 0x24f   :  { %1233 = vbcast.lane.b32.xlu1 %v7920_v50, 304  ;;  %v3423_v45 = vmax.f32 %v3421_v36, %v3422_v52  ;;  %v3406_v11 = vmax.f32 %v3404_v55, %v3405_v24  ;;  %v3426_v1 = vsel %vm70_vm0, %v2637_v16, -inf  ;;  %v3366_v51 = vmax.f32 %v3364_v4, %v3365_v5 }
 0x250   :  { %v6060_v33 = vpop.permute.xlu0 %992  ;;  %v3424_v23 = vsel %vm70_vm0, %v2636_v59, -inf  ;;  %v2623_v52 = vadd.f32 %v5254_v32, %v5932_v30  ;;  %v3347_v39 = vmax.f32 %v6066_v53, %v3346_v38  ;;  %v3387_v56 = vmax.f32 %v3385_v60, %v3386_v63 }
 0x251   :  { %v989_v50 = vpop.permute.xlu1 %988  ;;  %v3425_v22 = vmax.f32 %v3423_v45, %v3424_v23 }
 0x252   :  { %1248 = vbcast.lane.b32.xlu0 %v7921_v40, 264  ;;  %v2638_v47 = vadd.f32 %v5216_v3, %v989_v50  ;;  %v2615_v50 = vadd.f32 %v5254_v32, %v5908_v29  ;;  %v2631_v29 = vadd.f32 %v5254_v32, %v5978_v14  ;;  %v3325_v14 = vsel %vm70_vm0, %v6000_v12, -inf }
 0x253   :  { %1244 = vbcast.lane.b32.xlu1 %v7921_v40, 256  ;;  %v3427_v46 = vmax.f32 %v3425_v22, %v3426_v1  ;;  %v3326_v55 = vmax.f32 %v6062_v20, %v3325_v14  ;;  %v3348_v22 = vrot.slane %v3347_v39, 4 }
 0x254   :  { %v1004_v28 = vpop.permute.xlu0 %1003 }
 0x255   :  { %v1000_v42 = vpop.permute.xlu1 %999  ;;  %v2641_v34 = vadd.f32 %v1004_v28, %v5206_v7  ;;  %v3327_v60 = vrot.slane %v3326_v55, 4 }
 0x256   :  { %v2640_v48 = vadd.f32 %v1000_v42, %v5200_v10  ;;  %1256 = vbcast.lane.b32.xlu0 %v7921_v40, 280  ;;  %v3407_v42 = vsel %vm70_vm0, %v2630_v2, -inf }
 0x257   :  { %1252 = vbcast.lane.b32.xlu1 %v7921_v40, 272  ;;  %v3439_v21 = vsel %vm70_vm0, %v2641_v34, -inf  ;;  %v3428_v34 = vsel %vm70_vm0, %v2638_v47, -inf  ;;  %v3408_v43 = vmax.f32 %v3406_v11, %v3407_v42 }
 0x258   :  { %v3438_v25 = vsel %vm70_vm0, %v2640_v48, -inf  ;;  %v1012_v58 = vpop.permute.xlu0 %1011 }
 0x259   :  { %v1008_v62 = vpop.permute.xlu1 %1007  ;;  %v2643_v41 = vadd.f32 %v5204_v54, %v1012_v58  ;;  %v3440_v61 = vmax.f32 %v3438_v25, %v3439_v21  ;;  %v3367_v21 = vsel %vm70_vm0, %v2615_v50, -inf  ;;  %v3429_v25 = vmax.f32 %v3427_v46, %v3428_v34 }
 0x25a   :  { %v2642_v35 = vadd.f32 %v5196_v19, %v1008_v62  ;;  %1264 = vbcast.lane.b32.xlu0 %v7921_v40, 296  ;;  %v3368_v26 = vmax.f32 %v3366_v51, %v3367_v21  ;;  %v3409_v62 = vsel %vm70_vm0, %v2631_v29, -inf }
 0x25b   :  { %1260 = vbcast.lane.b32.xlu1 %v7921_v40, 288  ;;  %v3443_v27 = vsel %vm70_vm0, %v2643_v41, -inf }
 0x25c   :  { %v3441_v36 = vsel %vm70_vm0, %v2642_v35, -inf  ;;  %v1020_v31 = vpop.permute.xlu0 %1019  ;;  %v3410_v35 = vmax.f32 %v3408_v43, %v3409_v62  ;;  %v3369_v20 = vrot.slane %v3368_v26, 4 }
 0x25d   :  { %v3442_v59 = vmax.f32 %v3440_v61, %v3441_v36  ;;  %v1016_v18 = vpop.permute.xlu1 %1015  ;;  %v2645_v49 = vadd.f32 %v1020_v31, %v5281_v17 }
 0x25e   :  { %v2644_v28 = vadd.f32 %v1016_v18, %v5233_v37  ;;  %1272 = vbcast.lane.b32.xlu0 %v7921_v40, 312  ;;  %v3411_v31 = vrot.slane %v3410_v35, 4  ;;  %v3370_v50 = vmax.f32 %v3368_v26, %v3369_v20 }
 0x25f   :  { %v3444_v13 = vmax.f32 %v3442_v59, %v3443_v27  ;;  %1268 = vbcast.lane.b32.xlu1 %v7921_v40, 304  ;;  %v2639_v40 = vadd.f32 %v5254_v32, %v6060_v33  ;;  %v3447_v23 = vsel %vm70_vm0, %v2645_v49, -inf  ;;  %v3388_v33 = vsel %vm70_vm0, %v2623_v52, -inf }
 0x260   :  { %v3445_v48 = vsel %vm70_vm0, %v2644_v28, -inf  ;;  %v1028_v45 = vpop.permute.xlu0 %1027  ;;  %v3389_v58 = vmax.f32 %v3387_v56, %v3388_v33  ;;  %v3349_v27 = vmax.f32 %v3347_v39, %v3348_v22  ;;  %v3412_v56 = vmax.f32 %v3410_v35, %v3411_v31 }
 0x261   :  { %v3446_v9 = vmax.f32 %v3444_v13, %v3445_v48  ;;  %v1024_v57 = vpop.permute.xlu1 %1023  ;;  %v2647_v53 = vadd.f32 %v5254_v32, %v1028_v45  ;;  %v3430_v5 = vsel %vm70_vm0, %v2639_v40, -inf  ;;  %v3328_v13 = vmax.f32 %v3326_v55, %v3327_v60 }
 0x262   :  { %v2646_v30 = vadd.f32 %v5216_v3, %v1024_v57  ;;  %1283 = vbcast.lane.b32.xlu0 %v7922_v44, 264  ;;  %v3431_v61 = vmax.f32 %v3429_v25, %v3430_v5  ;;  %v3390_v63 = vrot.slane %v3389_v58, 4  ;;  %v3350_v45 = vrot.slane %v3349_v27, 2 }
 0x263   :  { %v3448_v38 = vmax.f32 %v3446_v9, %v3447_v23  ;;  %1279 = vbcast.lane.b32.xlu1 %v7922_v44, 256  ;;  %v3451_v6 = vsel %vm70_vm0, %v2647_v53, -inf  ;;  %v3371_v40 = vrot.slane %v3370_v50, 2  ;;  %v3329_v21 = vrot.slane %v3328_v13, 2 }
 0x264   :  { %v3449_v15 = vsel %vm70_vm0, %v2646_v30, -inf  ;;  %v1039_v16 = vpop.permute.xlu0 %1038  ;;  %v3432_v49 = vrot.slane %v3431_v61, 4  ;;  %v3391_v51 = vmax.f32 %v3389_v58, %v3390_v63  ;;  %v3413_v26 = vrot.slane %v3412_v56, 2 }
 0x265   :  { %v3450_v4 = vmax.f32 %v3448_v38, %v3449_v15  ;;  %v1035_v41 = vpop.permute.xlu1 %1034  ;;  %v2649_v2 = vadd.f32 %v1039_v16, %v5206_v7  ;;  %v3351_v58 = vmax.f32 %v3349_v27, %v3350_v45  ;;  %v3372_v16 = vmax.f32 %v3370_v50, %v3371_v40 }
 0x266   :  { %v2648_v12 = vadd.f32 %v1035_v41, %v5200_v10  ;;  %1291 = vbcast.lane.b32.xlu0 %v7922_v44, 280  ;;  %v3433_v57 = vmax.f32 %v3431_v61, %v3432_v49  ;;  %v3392_v25 = vrot.slane %v3391_v51, 2  ;;  %v3330_v5 = vmax.f32 %v3328_v13, %v3329_v21 }
 0x267   :  { %1287 = vbcast.lane.b32.xlu1 %v7922_v44, 272  ;;  %v3452_v24 = vmax.f32 %v3450_v4, %v3451_v6  ;;  %v3460_v47 = vsel %vm70_vm0, %v2649_v2, -inf  ;;  %v3414_v6 = vmax.f32 %v3412_v56, %v3413_v26  ;;  %v3373_v60 = vrot.slane %v3372_v16, 1 }
 0x268   :  { %v3459_v36 = vsel %vm70_vm0, %v2648_v12, -inf  ;;  %v1047_v11 = vpop.permute.xlu0 %1046  ;;  %v3434_v62 = vrot.slane %v3433_v57, 2  ;;  %v3393_v2 = vmax.f32 %v3391_v51, %v3392_v25 }
 0x269   :  { %v1043_v59 = vpop.permute.xlu1 %1042  ;;  %v2651_v18 = vadd.f32 %v5204_v54, %v1047_v11  ;;  %v3461_v28 = vmax.f32 %v3459_v36, %v3460_v47  ;;  %v3453_v42 = vrot.slane %v3452_v24, 4  ;;  %v3331_v11 = vrot.slane %v3330_v5, 1 }
 0x26a   :  { %v2650_v1 = vadd.f32 %v5196_v19, %v1043_v59  ;;  %1299 = vbcast.lane.b32.xlu0 %v7922_v44, 296  ;;  %v3435_v47 = vmax.f32 %v3433_v57, %v3434_v62  ;;  %v3394_v59 = vrot.slane %v3393_v2, 1  ;;  %v3415_v27 = vrot.slane %v3414_v6, 1 }
 0x26b   :  { %1295 = vbcast.lane.b32.xlu1 %v7922_v44, 288  ;;  %v3464_v29 = vsel %vm70_vm0, %v2651_v18, -inf  ;;  %v3454_v23 = vmax.f32 %v3452_v24, %v3453_v42  ;;  %v3352_v24 = vrot.slane %v3351_v58, 1  ;;  %v3374_v42 = vmax.f32 %v3372_v16, %v3373_v60 }
 0x26c   :  { %v3462_v46 = vsel %vm70_vm0, %v2650_v1, -inf  ;;  %v1055_v34 = vpop.permute.xlu0 %1054  ;;  %v3332_v13 = vmax.f32 %v3330_v5, %v3331_v11  ;;  %v3395_v51 = vmax.f32 %v3393_v2, %v3394_v59  ;;  %v3416_v56 = vmax.f32 %v3414_v6, %v3415_v27  ;;  %v6246_v2 = vld [vmem:[%s7798_s7] ss:$0 sm:$0xff]  ;;  %v4668_v6 = vld [vmem:[%s7794_s1 + $0x10] sm:$0xff] }
 0x26d   :  { %v3463_v52 = vmax.f32 %v3461_v28, %v3462_v46  ;;  %v1051_v48 = vpop.permute.xlu1 %1050  ;;  %v2653_v39 = vadd.f32 %v1055_v34, %v5281_v17  ;;  %v3455_v41 = vrot.slane %v3454_v23, 2  ;;  %v3353_v49 = vmax.f32 %v3351_v58, %v3352_v24  ;;  %v6224_v58 = vld [vmem:[%s7796_s5] ss:$0 sm:$0xff] }
 0x26e   :  { %v2652_v9 = vadd.f32 %v1051_v48, %v5233_v37  ;;  %1307 = vbcast.lane.b32.xlu0 %v7922_v44, 312  ;;  %v3436_v28 = vrot.slane %v3435_v47, 1 }
 0x26f   :  { %v3465_v43 = vmax.f32 %v3463_v52, %v3464_v29  ;;  %1303 = vbcast.lane.b32.xlu1 %v7922_v44, 304  ;;  %v3468_v33 = vsel %vm70_vm0, %v2653_v39, -inf  ;;  %v7923_v44 = vld [vmem:[#allocation9_spill] sm:$0xff]  ;;  %v3456_v63 = vmax.f32 %v3454_v23, %v3455_v41  ;;  %v4407_v29 = vsel %vm4386_vm9, %v3353_v49, %v3332_v13 }
 0x270   :  { %v3466_v30 = vsel %vm70_vm0, %v2652_v9, -inf  ;;  %v1063_v38 = vpop.permute.xlu0 %1062  ;;  %v3437_v39 = vmax.f32 %v3435_v47, %v3436_v28  ;;  %v4408_v45 = vsel %vm4388_vm10, %v3374_v42, %v4407_v29 }
 0x271   :  { %v3467_v53 = vmax.f32 %v3465_v43, %v3466_v30  ;;  %v1059_v14 = vpop.permute.xlu1 %1058  ;;  %v2655_v15 = vadd.f32 %v5254_v32, %v1063_v38  ;;  %v3457_v46 = vrot.slane %v3456_v63, 1  ;;  %v4409_v43 = vsel %vm4390_vm11, %v3395_v51, %v4408_v45  ;;  %v7924_v38 = vld [vmem:[#allocation10_spill] sm:$0xff] }
 0x272   :  { %v2654_v55 = vadd.f32 %v5216_v3, %v1059_v14  ;;  %1318 = vbcast.lane.b32.xlu0 %v7923_v44, 264  ;;  %v4410_v21 = vsel %vm4392_vm12, %v3416_v56, %v4409_v43 }
 0x273   :  { %v3469_v4 = vmax.f32 %v3467_v53, %v3468_v33  ;;  %1314 = vbcast.lane.b32.xlu1 %v7923_v44, 256  ;;  %v3472_v20 = vsel %vm70_vm0, %v2655_v15, -inf  ;;  %v3458_v57 = vmax.f32 %v3456_v63, %v3457_v46  ;;  %v4411_v25 = vsel %vm4394_vm13, %v3437_v39, %v4410_v21 }
 0x274   :  { %v3470_v35 = vsel %vm70_vm0, %v2654_v55, -inf  ;;  %v6182_v22 = vpop.permute.xlu0 %1073 }
 0x275   :  { %v3471_v12 = vmax.f32 %v3469_v4, %v3470_v35  ;;  %v6184_v61 = vpop.permute.xlu1 %1069  ;;  %v4412_v14 = vsel %vm4396_vm14, %v3458_v57, %v4411_v25  ;;  %v2657_v43 = vadd.f32 %v6182_v22, %v5206_v7 }
 0x276   :  { %1326 = vbcast.lane.b32.xlu0 %v7923_v44, 280 }
 0x277   :  { %v3473_v36 = vmax.f32 %v3471_v12, %v3472_v20  ;;  %1322 = vbcast.lane.b32.xlu1 %v7923_v44, 272  ;;  %v3481_v22 = vsel %vm70_vm0, %v2657_v43, -inf }
 0x278   :  { %v6189_v18 = vpop.permute.xlu0 %1081 }
 0x279   :  { %v3474_v31 = vrot.slane %v3473_v36, 4  ;;  %v6191_v1 = vpop.permute.xlu1 %1077 }
 0x27a   :  { %1334 = vbcast.lane.b32.xlu0 %v7923_v44, 296  ;;  %v2658_v21 = vadd.f32 %v5196_v19, %v6191_v1 }
 0x27b   :  { %v3475_v50 = vmax.f32 %v3473_v36, %v3474_v31  ;;  %1330 = vbcast.lane.b32.xlu1 %v7923_v44, 288  ;;  %v7925_v36 = vld [vmem:[#allocation11_spill] sm:$0xff] }
 0x27c   :  { %v6195_v34 = vpop.permute.xlu0 %1089  ;;  %v3483_v1 = vsel %vm70_vm0, %v2658_v21, -inf }
 0x27d   :  { %v3476_v52 = vrot.slane %v3475_v50, 2  ;;  %v6197_v48 = vpop.permute.xlu1 %1085 }
 0x27e   :  { %1342 = vbcast.lane.b32.xlu0 %v7923_v44, 312 }
 0x27f   :  { %v3477_v9 = vmax.f32 %v3475_v50, %v3476_v52  ;;  %1338 = vbcast.lane.b32.xlu1 %v7923_v44, 304  ;;  %v7926_v50 = vld [vmem:[#allocation12_spill] sm:$0xff] }
 0x280   :  { %v6204_v23 = vpop.permute.xlu0 %1097 }
 0x281   :  { %v3478_v40 = vrot.slane %v3477_v9, 1  ;;  %v6206_v30 = vpop.permute.xlu1 %1093 }
 0x282   :  { %1353 = vbcast.lane.b32.xlu0 %v7924_v38, 264 }
 0x283   :  { %v3479_v53 = vmax.f32 %v3477_v9, %v3478_v40  ;;  %1349 = vbcast.lane.b32.xlu1 %v7924_v38, 256  ;;  %v7927_v9 = vld [vmem:[#allocation13_spill] sm:$0xff]  ;;  %v2656_v40 = vadd.f32 %v6184_v61, %v5200_v10 }
 0x284   :  { %v6214_v33 = vpop.permute.xlu0 %1108 }
 0x285   :  { %v4413_v26 = vsel %vm4398_vm15, %v3479_v53, %v4412_v14  ;;  %v6216_v15 = vpop.permute.xlu1 %1104  ;;  %v2665_v25 = vadd.f32 %v6214_v33, %v5206_v7  ;;  %v3480_v61 = vsel %vm70_vm0, %v2656_v40, -inf }
 0x286   :  { %v4512_v55 = vadd.f32 %v5513_v8, %v4413_v26  ;;  %1361 = vbcast.lane.b32.xlu0 %v7924_v38, 280  ;;  %v6236_v8 = vld [vmem:[%s7797_s6] ss:$0 sm:$0xff]  ;;  %v2664_v53 = vadd.f32 %v6216_v15, %v5200_v10 }
 0x287   :  { %1357 = vbcast.lane.b32.xlu1 %v7924_v38, 272  ;;  %v3502_v33 = vsel %vm70_vm0, %v2665_v25, -inf }
 0x288   :  { %v4543_v62 = vadd.f32 %v6224_v58, %v4512_v55  ;;  %v6227_v4 = vpop.permute.xlu0 %1116  ;;  %v3501_v15 = vsel %vm70_vm0, %v2664_v53, -inf  ;;  %v3482_v55 = vmax.f32 %v3480_v61, %v3481_v22  ;;  %v7928_v53 = vld [vmem:[#allocation14_spill] sm:$0xff] }
 0x289   :  { %v6229_v44 = vpop.permute.xlu1 %1112 }
 0x28a   :  { %v4551_v16 = vmax.f32 %v4543_v62, 0.0  ;;  %1369 = vbcast.lane.b32.xlu0 %v7924_v38, 296  ;;  %v2666_v26 = vadd.f32 %v5196_v19, %v6229_v44 }
 0x28b   :  { %1365 = vbcast.lane.b32.xlu1 %v7924_v38, 288 }
 0x28c   :  { %v4566_v41 = vmul.f32 %v6236_v8, %v4551_v16  ;;  %v6239_v35 = vpop.permute.xlu0 %1124  ;;  %v3504_v44 = vsel %vm70_vm0, %v2666_v26, -inf }
 0x28d   :  { %v6241_v5 = vpop.permute.xlu1 %1120 }
 0x28e   :  { %v4581_v12 = vadd.f32 %v6246_v2, %v4566_v41  ;;  %1377 = vbcast.lane.b32.xlu0 %v7924_v38, 312  ;;  %v2659_v41 = vadd.f32 %v5204_v54, %v6189_v18  ;;  %v2668_v21 = vadd.f32 %v6241_v5, %v5233_v37 }
 0x28f   :  { %1373 = vbcast.lane.b32.xlu1 %v7924_v38, 304 }
 0x290   :  { %v4589_v20 = vadd.f32 %v4668_v6, %v4581_v12  ;;  %v6254_v24 = vpop.permute.xlu0 %1132  ;;  %v3484_v12 = vmax.f32 %v3482_v55, %v3483_v1  ;;  %v3503_v6 = vmax.f32 %v3501_v15, %v3502_v33  ;;  %v3485_v18 = vsel %vm70_vm0, %v2659_v41, -inf }
 0x291   :  { %v6256_v47 = vpop.permute.xlu1 %1128 }
 0x292   :  { %4597 = vst.msk [vmem:[%s7799_s8 + $0x10] sm:$0xff] %vm70_vm0, %v4589_v20  ;;  %1388 = vbcast.lane.b32.xlu0 %v7925_v36, 264  ;;  %v2660_v20 = vadd.f32 %v6197_v48, %v5233_v37  ;;  %v2661_v48 = vadd.f32 %v6195_v34, %v5281_v17  ;;  %v3508_v34 = vsel %vm70_vm0, %v2668_v21, -inf }
 0x293   :  { %1384 = vbcast.lane.b32.xlu1 %v7925_v36, 256 }
 0x294   :  { %v6264_v60 = vpop.permute.xlu0 %1143  ;;  %v3487_v22 = vsel %vm70_vm0, %v2660_v20, -inf  ;;  %v3489_v55 = vsel %vm70_vm0, %v2661_v48, -inf }
 0x295   :  { %v6266_v63 = vpop.permute.xlu1 %1139  ;;  %v2673_v25 = vadd.f32 %v6264_v60, %v5206_v7  ;;  %v2669_v60 = vadd.f32 %v6239_v35, %v5281_v17 }
 0x296   :  { %1396 = vbcast.lane.b32.xlu0 %v7925_v36, 280 }
 0x297   :  { %1392 = vbcast.lane.b32.xlu1 %v7925_v36, 272  ;;  %v3523_v33 = vsel %vm70_vm0, %v2673_v25, -inf }
 0x298   :  { %v6270_v11 = vpop.permute.xlu0 %1151 }
 0x299   :  { %v6272_v59 = vpop.permute.xlu1 %1147 }
 0x29a   :  { %1404 = vbcast.lane.b32.xlu0 %v7925_v36, 296  ;;  %v2674_v5 = vadd.f32 %v5196_v19, %v6272_v59 }
 0x29b   :  { %1400 = vbcast.lane.b32.xlu1 %v7925_v36, 288 }
 0x29c   :  { %v6276_v31 = vpop.permute.xlu0 %1159  ;;  %v3525_v35 = vsel %vm70_vm0, %v2674_v5, -inf }
 0x29d   :  { %v6278_v27 = vpop.permute.xlu1 %1155 }
 0x29e   :  { %1412 = vbcast.lane.b32.xlu0 %v7925_v36, 312 }
 0x29f   :  { %1408 = vbcast.lane.b32.xlu1 %v7925_v36, 304  ;;  %v2667_v36 = vadd.f32 %v5204_v54, %v6227_v4  ;;  %v3486_v4 = vmax.f32 %v3484_v12, %v3485_v18 }
 0x2a0   :  { %v6282_v49 = vpop.permute.xlu0 %1167 }
 0x2a1   :  { %v6284_v28 = vpop.permute.xlu1 %1163  ;;  %v3506_v61 = vsel %vm70_vm0, %v2667_v36, -inf  ;;  %v3488_v41 = vmax.f32 %v3486_v4, %v3487_v22  ;;  %v3510_v36 = vsel %vm70_vm0, %v2669_v60, -inf }
 0x2a2   :  { %1423 = vbcast.lane.b32.xlu0 %v7926_v50, 264 }
 0x2a3   :  { %1419 = vbcast.lane.b32.xlu1 %v7926_v50, 256  ;;  %v3490_v5 = vmax.f32 %v3488_v41, %v3489_v55 }
 0x2a4   :  { %v6288_v42 = vpop.permute.xlu0 %1178 }
 0x2a5   :  { %v6290_v46 = vpop.permute.xlu1 %1174  ;;  %v2681_v59 = vadd.f32 %v6288_v42, %v5206_v7 }
 0x2a6   :  { %1431 = vbcast.lane.b32.xlu0 %v7926_v50, 280  ;;  %v2680_v12 = vadd.f32 %v6290_v46, %v5200_v10 }
 0x2a7   :  { %1427 = vbcast.lane.b32.xlu1 %v7926_v50, 272  ;;  %v3544_v4 = vsel %vm70_vm0, %v2681_v59, -inf }
 0x2a8   :  { %v6294_v13 = vpop.permute.xlu0 %1186 }
 0x2a9   :  { %v6296_v51 = vpop.permute.xlu1 %1182 }
 0x2aa   :  { %1439 = vbcast.lane.b32.xlu0 %v7926_v50, 296  ;;  %v2682_v25 = vadd.f32 %v5196_v19, %v6296_v51  ;;  %v3543_v51 = vsel %vm70_vm0, %v2680_v12, -inf  ;;  %v2683_v12 = vadd.f32 %v5204_v54, %v6294_v13 }
 0x2ab   :  { %1435 = vbcast.lane.b32.xlu1 %v7926_v50, 288  ;;  %v3545_v41 = vmax.f32 %v3543_v51, %v3544_v4 }
 0x2ac   :  { %v6300_v52 = vpop.permute.xlu0 %1194 }
 0x2ad   :  { %v6302_v56 = vpop.permute.xlu1 %1190 }
 0x2ae   :  { %1447 = vbcast.lane.b32.xlu0 %v7926_v50, 312 }
 0x2af   :  { %1443 = vbcast.lane.b32.xlu1 %v7926_v50, 304  ;;  %v3505_v50 = vmax.f32 %v3503_v6, %v3504_v44  ;;  %v6375_v44 = vadd.f32 %v5254_v32, %v6204_v23  ;;  %v2662_v23 = vadd.f32 %v5216_v3, %v6206_v30  ;;  %v2675_v30 = vadd.f32 %v5204_v54, %v6270_v11 }
 0x2b0   :  { %v6306_v29 = vpop.permute.xlu0 %1202  ;;  %v2676_v11 = vadd.f32 %v6278_v27, %v5233_v37 }
 0x2b1   :  { %v6308_v39 = vpop.permute.xlu1 %1198  ;;  %v3507_v26 = vmax.f32 %v3505_v50, %v3506_v61  ;;  %v3527_v55 = vsel %vm70_vm0, %v2675_v30, -inf  ;;  %v2677_v30 = vadd.f32 %v6276_v31, %v5281_v17 }
 0x2b2   :  { %1458 = vbcast.lane.b32.xlu0 %v7927_v9, 264 }
 0x2b3   :  { %1454 = vbcast.lane.b32.xlu1 %v7927_v9, 256  ;;  %v3509_v50 = vmax.f32 %v3507_v26, %v3508_v34 }
 0x2b4   :  { %v1214_v45 = vpop.permute.xlu0 %1213 }
 0x2b5   :  { %v1210_v57 = vpop.permute.xlu1 %1209  ;;  %v2689_v6 = vadd.f32 %v1214_v45, %v5206_v7  ;;  %v3511_v60 = vmax.f32 %v3509_v50, %v3510_v36  ;;  %v2684_v36 = vadd.f32 %v6302_v56, %v5233_v37 }
 0x2b6   :  { %1466 = vbcast.lane.b32.xlu0 %v7927_v9, 280  ;;  %v2688_v20 = vadd.f32 %v1210_v57, %v5200_v10  ;;  %v2670_v57 = vadd.f32 %v5216_v3, %v6256_v47  ;;  %v3491_v47 = vsel %vm70_vm0, %v2662_v23, -inf }
 0x2b7   :  { %1462 = vbcast.lane.b32.xlu1 %v7927_v9, 272 }
 0x2b8   :  { %v6324_v38 = vpop.permute.xlu0 %1221  ;;  %v3564_v22 = vsel %vm70_vm0, %v2688_v20, -inf  ;;  %v3512_v59 = vsel %vm70_vm0, %v2670_v57, -inf  ;;  %v7929_v57 = vld [vmem:[#allocation15_spill] sm:$0xff] }
 0x2b9   :  { %v1218_v14 = vpop.permute.xlu1 %1217 }
 0x2ba   :  { %1474 = vbcast.lane.b32.xlu0 %v7927_v9, 296 }
 0x2bb   :  { %1470 = vbcast.lane.b32.xlu1 %v7927_v9, 288 }
 0x2bc   :  { %v6335_v62 = vpop.permute.xlu0 %1229 }
 0x2bd   :  { %v6337_v16 = vpop.permute.xlu1 %1225 }
 0x2be   :  { %1482 = vbcast.lane.b32.xlu0 %v7927_v9, 312  ;;  %v2692_v13 = vadd.f32 %v6337_v16, %v5233_v37 }
 0x2bf   :  { %1478 = vbcast.lane.b32.xlu1 %v7927_v9, 304  ;;  %v2672_v9 = vadd.f32 %v6266_v63, %v5200_v10 }
 0x2c0   :  { %v6348_v43 = vpop.permute.xlu0 %1237 }
 0x2c1   :  { %v6350_v40 = vpop.permute.xlu1 %1233  ;;  %v3522_v15 = vsel %vm70_vm0, %v2672_v9, -inf  ;;  %v2690_v9 = vadd.f32 %v5196_v19, %v1218_v14  ;;  %v3565_v14 = vsel %vm70_vm0, %v2689_v6, -inf  ;;  %v2691_v6 = vadd.f32 %v5204_v54, %v6324_v38 }
 0x2c2   :  { %1493 = vbcast.lane.b32.xlu0 %v7928_v53, 264  ;;  %v3524_v42 = vmax.f32 %v3522_v15, %v3523_v33 }
 0x2c3   :  { %1489 = vbcast.lane.b32.xlu1 %v7928_v53, 256  ;;  %v3567_v34 = vsel %vm70_vm0, %v2690_v9, -inf  ;;  %v6425_v9 = vmax.f32 %v3490_v5, %v3491_v47  ;;  %v3569_v4 = vsel %vm70_vm0, %v2691_v6, -inf  ;;  %v3571_v5 = vsel %vm70_vm0, %v2692_v13, -inf }
 0x2c4   :  { %v1249_v63 = vpop.permute.xlu0 %1248  ;;  %v3526_v48 = vmax.f32 %v3524_v42, %v3525_v35  ;;  %v3566_v35 = vmax.f32 %v3564_v22, %v3565_v14 }
 0x2c5   :  { %v1245_v1 = vpop.permute.xlu1 %1244  ;;  %v2697_v46 = vadd.f32 %v1249_v63, %v5206_v7 }
 0x2c6   :  { %1501 = vbcast.lane.b32.xlu0 %v7928_v53, 280  ;;  %v2696_v45 = vadd.f32 %v1245_v1, %v5200_v10  ;;  %v3546_v1 = vsel %vm70_vm0, %v2682_v25, -inf  ;;  %v3528_v27 = vmax.f32 %v3526_v48, %v3527_v55  ;;  %v3568_v50 = vmax.f32 %v3566_v35, %v3567_v34 }
 0x2c7   :  { %1497 = vbcast.lane.b32.xlu1 %v7928_v53, 272  ;;  %v3586_v33 = vsel %vm70_vm0, %v2697_v46, -inf  ;;  %v3547_v23 = vmax.f32 %v3545_v41, %v3546_v1  ;;  %v2671_v46 = vadd.f32 %v5254_v32, %v6254_v24  ;;  %v3548_v48 = vsel %vm70_vm0, %v2683_v12, -inf }
 0x2c8   :  { %v1257_v18 = vpop.permute.xlu0 %1256  ;;  %v3585_v15 = vsel %vm70_vm0, %v2696_v45, -inf  ;;  %v6433_v45 = vmax.f32 %v3511_v60, %v3512_v59  ;;  %v3550_v24 = vsel %vm70_vm0, %v2684_v36, -inf  ;;  %v3570_v14 = vmax.f32 %v3568_v50, %v3569_v4 }
 0x2c9   :  { %v1253_v21 = vpop.permute.xlu1 %1252  ;;  %v3587_v42 = vmax.f32 %v3585_v15, %v3586_v33  ;;  %v2699_v38 = vadd.f32 %v5204_v54, %v1257_v18  ;;  %v3549_v51 = vmax.f32 %v3547_v23, %v3548_v48  ;;  %v2685_v1 = vadd.f32 %v6300_v52, %v5281_v17 }
 0x2ca   :  { %1509 = vbcast.lane.b32.xlu0 %v7928_v53, 296  ;;  %v2698_v61 = vadd.f32 %v5196_v19, %v1253_v21  ;;  %v2693_v33 = vadd.f32 %v6335_v62, %v5281_v17  ;;  %v3531_v41 = vsel %vm70_vm0, %v2677_v30, -inf  ;;  %v2686_v52 = vadd.f32 %v5216_v3, %v6308_v39 }
 0x2cb   :  { %1505 = vbcast.lane.b32.xlu1 %v7928_v53, 288  ;;  %v3590_v47 = vsel %vm70_vm0, %v2699_v38, -inf  ;;  %v3572_v35 = vmax.f32 %v3570_v14, %v3571_v5  ;;  %v2694_v50 = vadd.f32 %v5216_v3, %v6350_v40  ;;  %v3552_v39 = vsel %vm70_vm0, %v2685_v1, -inf }
 0x2cc   :  { %v1265_v26 = vpop.permute.xlu0 %1264  ;;  %v3588_v20 = vsel %vm70_vm0, %v2698_v61, -inf  ;;  %v3573_v13 = vsel %vm70_vm0, %v2693_v33, -inf }
 0x2cd   :  { %v1261_v63 = vpop.permute.xlu1 %1260  ;;  %v3589_v56 = vmax.f32 %v3587_v42, %v3588_v20  ;;  %v2701_v20 = vadd.f32 %v1265_v26, %v5281_v17  ;;  %v3574_v30 = vmax.f32 %v3572_v35, %v3573_v13  ;;  %v3575_v14 = vsel %vm70_vm0, %v2694_v50, -inf }
 0x2ce   :  { %1517 = vbcast.lane.b32.xlu0 %v7928_v53, 312  ;;  %v2700_v16 = vadd.f32 %v1261_v63, %v5233_v37  ;;  %v2678_v63 = vadd.f32 %v5216_v3, %v6284_v28  ;;  %v3551_v28 = vmax.f32 %v3549_v51, %v3550_v24 }
 0x2cf   :  { %1513 = vbcast.lane.b32.xlu1 %v7928_v53, 304  ;;  %v3529_v53 = vsel %vm70_vm0, %v2676_v11, -inf  ;;  %v3514_v11 = vsel %vm70_vm0, %v2671_v46, -inf  ;;  %v3591_v34 = vmax.f32 %v3589_v56, %v3590_v47  ;;  %v3554_v56 = vsel %vm70_vm0, %v2686_v52, -inf  ;;  %v7930_v52 = vld [vmem:[#allocation16_spill] sm:$0xff] }
 0x2d0   :  { %v6423_v21 = vpop.permute.xlu0 %1272  ;;  %v3530_v18 = vmax.f32 %v3528_v27, %v3529_v53  ;;  %v3592_v15 = vsel %vm70_vm0, %v2700_v16, -inf  ;;  %v3533_v36 = vsel %vm70_vm0, %v2678_v63, -inf  ;;  %v3553_v46 = vmax.f32 %v3551_v28, %v3552_v39 }
 0x2d1   :  { %v1269_v25 = vpop.permute.xlu1 %1268  ;;  %v3593_v42 = vmax.f32 %v3591_v34, %v3592_v15  ;;  %v3594_v16 = vsel %vm70_vm0, %v2701_v20, -inf  ;;  %v2687_v47 = vadd.f32 %v5254_v32, %v6306_v29  ;;  %v3515_v63 = vmax.f32 %v6433_v45, %v3514_v11 }
 0x2d2   :  { %1528 = vbcast.lane.b32.xlu0 %v7929_v57, 264  ;;  %v3532_v6 = vmax.f32 %v3530_v18, %v3531_v41  ;;  %v2702_v26 = vadd.f32 %v5216_v3, %v1269_v25  ;;  %v2679_v25 = vadd.f32 %v5254_v32, %v6282_v49  ;;  %v3555_v1 = vmax.f32 %v3553_v46, %v3554_v56 }
 0x2d3   :  { %1524 = vbcast.lane.b32.xlu1 %v7929_v57, 256  ;;  %v2695_v49 = vadd.f32 %v5254_v32, %v6348_v43  ;;  %v3493_v43 = vsel %vm70_vm0, %v6375_v44, -inf  ;;  %v3516_v39 = vrot.slane %v3515_v63, 4 }
 0x2d4   :  { %v1284_v22 = vpop.permute.xlu0 %1283  ;;  %v3534_v5 = vmax.f32 %v3532_v6, %v3533_v36  ;;  %v3535_v41 = vsel %vm70_vm0, %v2679_v25, -inf }
 0x2d5   :  { %v1280_v61 = vpop.permute.xlu1 %1279  ;;  %v2705_v60 = vadd.f32 %v1284_v22, %v5206_v7  ;;  %v3595_v22 = vmax.f32 %v3593_v42, %v3594_v16  ;;  %v3577_v20 = vsel %vm70_vm0, %v2695_v49, -inf }
 0x2d6   :  { %v2704_v31 = vadd.f32 %v1280_v61, %v5200_v10  ;;  %1536 = vbcast.lane.b32.xlu0 %v7929_v57, 280  ;;  %v3536_v35 = vmax.f32 %v3534_v5, %v3535_v41 }
 0x2d7   :  { %1532 = vbcast.lane.b32.xlu1 %v7929_v57, 272  ;;  %v3607_v59 = vsel %vm70_vm0, %v2705_v60, -inf  ;;  %v3596_v60 = vsel %vm70_vm0, %v2702_v26, -inf }
 0x2d8   :  { %v3606_v55 = vsel %vm70_vm0, %v2704_v31, -inf  ;;  %v1292_v27 = vpop.permute.xlu0 %1291  ;;  %v3597_v28 = vmax.f32 %v3595_v22, %v3596_v60 }
 0x2d9   :  { %v1288_v12 = vpop.permute.xlu1 %1287  ;;  %v2707_v62 = vadd.f32 %v5204_v54, %v1292_v27  ;;  %v3608_v53 = vmax.f32 %v3606_v55, %v3607_v59  ;;  %v3576_v59 = vmax.f32 %v3574_v30, %v3575_v14 }
 0x2da   :  { %v2706_v23 = vadd.f32 %v5196_v19, %v1288_v12  ;;  %1544 = vbcast.lane.b32.xlu0 %v7929_v57, 296  ;;  %v3494_v12 = vmax.f32 %v6425_v9, %v3493_v43  ;;  %v3537_v9 = vrot.slane %v3536_v35, 4 }
 0x2db   :  { %1540 = vbcast.lane.b32.xlu1 %v7929_v57, 288  ;;  %v3611_v18 = vsel %vm70_vm0, %v2707_v62, -inf  ;;  %v3578_v50 = vmax.f32 %v3576_v59, %v3577_v20 }
 0x2dc   :  { %v3609_v38 = vsel %vm70_vm0, %v2706_v23, -inf  ;;  %v1300_v40 = vpop.permute.xlu0 %1299  ;;  %v3495_v30 = vrot.slane %v3494_v12, 4  ;;  %v3538_v22 = vmax.f32 %v3536_v35, %v3537_v9 }
 0x2dd   :  { %v3610_v48 = vmax.f32 %v3608_v53, %v3609_v38  ;;  %v1296_v4 = vpop.permute.xlu1 %1295  ;;  %v2709_v51 = vadd.f32 %v1300_v40, %v5281_v17  ;;  %v3579_v16 = vrot.slane %v3578_v50, 4 }
 0x2de   :  { %v2708_v24 = vadd.f32 %v1296_v4, %v5233_v37  ;;  %1552 = vbcast.lane.b32.xlu0 %v7929_v57, 312 }
 0x2df   :  { %v3612_v61 = vmax.f32 %v3610_v48, %v3611_v18  ;;  %1548 = vbcast.lane.b32.xlu1 %v7929_v57, 304  ;;  %v2703_v57 = vadd.f32 %v5254_v32, %v6423_v21  ;;  %v3615_v55 = vsel %vm70_vm0, %v2709_v51, -inf  ;;  %v3556_v21 = vsel %vm70_vm0, %v2687_v47, -inf }
 0x2e0   :  { %v3613_v31 = vsel %vm70_vm0, %v2708_v24, -inf  ;;  %v1308_v33 = vpop.permute.xlu0 %1307  ;;  %v3557_v6 = vmax.f32 %v3555_v1, %v3556_v21  ;;  %v3517_v24 = vmax.f32 %v3515_v63, %v3516_v39  ;;  %v3496_v47 = vmax.f32 %v3494_v12, %v3495_v30 }
 0x2e1   :  { %v3614_v34 = vmax.f32 %v3612_v61, %v3613_v31  ;;  %v1304_v15 = vpop.permute.xlu1 %1303  ;;  %v2711_v45 = vadd.f32 %v5254_v32, %v1308_v33  ;;  %v3598_v42 = vsel %vm70_vm0, %v2703_v57, -inf }
 0x2e2   :  { %v2710_v29 = vadd.f32 %v5216_v3, %v1304_v15  ;;  %1563 = vbcast.lane.b32.xlu0 %v7930_v52, 264  ;;  %v3599_v13 = vmax.f32 %v3597_v28, %v3598_v42  ;;  %v3558_v48 = vrot.slane %v3557_v6, 4  ;;  %v3518_v59 = vrot.slane %v3517_v24, 2 }
 0x2e3   :  { %v3616_v11 = vmax.f32 %v3614_v34, %v3615_v55  ;;  %1559 = vbcast.lane.b32.xlu1 %v7930_v52, 256  ;;  %v3619_v26 = vsel %vm70_vm0, %v2711_v45, -inf  ;;  %v3580_v34 = vmax.f32 %v3578_v50, %v3579_v16  ;;  %v3497_v45 = vrot.slane %v3496_v47, 2 }
 0x2e4   :  { %v3617_v27 = vsel %vm70_vm0, %v2710_v29, -inf  ;;  %v1319_v23 = vpop.permute.xlu0 %1318  ;;  %v3600_v25 = vrot.slane %v3599_v13, 4  ;;  %v3559_v60 = vmax.f32 %v3557_v6, %v3558_v48  ;;  %v3539_v29 = vrot.slane %v3538_v22, 2 }
 0x2e5   :  { %v3618_v62 = vmax.f32 %v3616_v11, %v3617_v27  ;;  %v1315_v36 = vpop.permute.xlu1 %1314  ;;  %v2713_v53 = vadd.f32 %v1319_v23, %v5206_v7  ;;  %v3581_v27 = vrot.slane %v3580_v34, 2 }
 0x2e6   :  { %v2712_v44 = vadd.f32 %v1315_v36, %v5200_v10  ;;  %1571 = vbcast.lane.b32.xlu0 %v7930_v52, 280  ;;  %v3601_v57 = vmax.f32 %v3599_v13, %v3600_v25  ;;  %v3560_v11 = vrot.slane %v3559_v60, 2  ;;  %v3540_v50 = vmax.f32 %v3538_v22, %v3539_v29 }
 0x2e7   :  { %1567 = vbcast.lane.b32.xlu1 %v7930_v52, 272  ;;  %v3620_v38 = vmax.f32 %v3618_v62, %v3619_v26  ;;  %v3628_v46 = vsel %vm70_vm0, %v2713_v53, -inf  ;;  %v3519_v62 = vmax.f32 %v3517_v24, %v3518_v59 }
 0x2e8   :  { %v3627_v56 = vsel %vm70_vm0, %v2712_v44, -inf  ;;  %v1327_v40 = vpop.permute.xlu0 %1326  ;;  %v3602_v23 = vrot.slane %v3601_v57, 2  ;;  %v3498_v44 = vmax.f32 %v3496_v47, %v3497_v45  ;;  %v3561_v39 = vmax.f32 %v3559_v60, %v3560_v11 }
 0x2e9   :  { %v1323_v4 = vpop.permute.xlu1 %1322  ;;  %v2715_v18 = vadd.f32 %v5204_v54, %v1327_v40  ;;  %v3629_v14 = vmax.f32 %v3627_v56, %v3628_v46  ;;  %v3621_v61 = vrot.slane %v3620_v38, 4  ;;  %v3520_v56 = vrot.slane %v3519_v62, 1 }
 0x2ea   :  { %v2714_v51 = vadd.f32 %v5196_v19, %v1323_v4  ;;  %1579 = vbcast.lane.b32.xlu0 %v7930_v52, 296  ;;  %v3603_v30 = vmax.f32 %v3601_v57, %v3602_v23  ;;  %v3541_v40 = vrot.slane %v3540_v50, 1  ;;  %v3499_v16 = vrot.slane %v3498_v44, 1 }
 0x2eb   :  { %1575 = vbcast.lane.b32.xlu1 %v7930_v52, 288  ;;  %v3632_v33 = vsel %vm70_vm0, %v2715_v18, -inf  ;;  %v3622_v41 = vmax.f32 %v3620_v38, %v3621_v61  ;;  %v3582_v38 = vmax.f32 %v3580_v34, %v3581_v27  ;;  %v3562_v18 = vrot.slane %v3561_v39, 1  ;;  %v7932_v27 = vld [vmem:[#allocation34_spill] sm:$0xff] }
 0x2ec   :  { %v3630_v5 = vsel %vm70_vm0, %v2714_v51, -inf  ;;  %v1335_v1 = vpop.permute.xlu0 %1334  ;;  %v3521_v22 = vmax.f32 %v3519_v62, %v3520_v56  ;;  %v3604_v61 = vrot.slane %v3603_v30, 1  ;;  %v3542_v47 = vmax.f32 %v3540_v50, %v3541_v40 }
 0x2ed   :  { %v3631_v31 = vmax.f32 %v3629_v14, %v3630_v5  ;;  %v1331_v49 = vpop.permute.xlu1 %1330  ;;  %v2717_v63 = vadd.f32 %v1335_v1, %v5281_v17  ;;  %v3623_v42 = vrot.slane %v3622_v41, 2  ;;  %v3583_v14 = vrot.slane %v3582_v38, 1 }
 0x2ee   :  { %v2716_v15 = vadd.f32 %v1331_v49, %v5233_v37  ;;  %1587 = vbcast.lane.b32.xlu0 %v7930_v52, 312  ;;  %v3563_v1 = vmax.f32 %v3561_v39, %v3562_v18  ;;  %v3605_v59 = vmax.f32 %v3603_v30, %v3604_v61 }
 0x2ef   :  { %v3633_v55 = vmax.f32 %v3631_v31, %v3632_v33  ;;  %1583 = vbcast.lane.b32.xlu1 %v7930_v52, 304  ;;  %v3636_v12 = vsel %vm70_vm0, %v2717_v63, -inf  ;;  %v7931_v52 = vld [vmem:[#allocation17_spill] sm:$0xff]  ;;  %v3624_v4 = vmax.f32 %v3622_v41, %v3623_v42  ;;  %v3500_v31 = vmax.f32 %v3498_v44, %v3499_v16 }
 0x2f0   :  { %v3634_v28 = vsel %vm70_vm0, %v2716_v15, -inf  ;;  %v1343_v35 = vpop.permute.xlu0 %1342  ;;  %v3584_v63 = vmax.f32 %v3582_v38, %v3583_v14 }
 0x2f1   :  { %v3635_v43 = vmax.f32 %v3633_v55, %v3634_v28  ;;  %v1339_v21 = vpop.permute.xlu1 %1338  ;;  %v2719_v6 = vadd.f32 %v5254_v32, %v1343_v35  ;;  %v3625_v60 = vrot.slane %v3624_v4, 1  ;;  %v4414_v15 = vsel %vm4386_vm9, %v3521_v22, %v3500_v31 }
 0x2f2   :  { %v2718_v20 = vadd.f32 %v5216_v3, %v1339_v21  ;;  %1598 = vbcast.lane.b32.xlu0 %v7931_v52, 264  ;;  %v4415_v55 = vsel %vm4388_vm10, %v3542_v47, %v4414_v15 }
 0x2f3   :  { %v3637_v36 = vmax.f32 %v3635_v43, %v3636_v12  ;;  %1594 = vbcast.lane.b32.xlu1 %v7931_v52, 256  ;;  %v3640_v46 = vsel %vm70_vm0, %v2719_v6, -inf  ;;  %v3626_v29 = vmax.f32 %v3624_v4, %v3625_v60  ;;  %v4416_v41 = vsel %vm4390_vm11, %v3563_v1, %v4415_v55 }
 0x2f4   :  { %v3638_v53 = vsel %vm70_vm0, %v2718_v20, -inf  ;;  %v6530_v26 = vpop.permute.xlu0 %1353  ;;  %v4417_v43 = vsel %vm4392_vm12, %v3584_v63, %v4416_v41 }
 0x2f5   :  { %v3639_v13 = vmax.f32 %v3637_v36, %v3638_v53  ;;  %v6532_v9 = vpop.permute.xlu1 %1349  ;;  %v4418_v35 = vsel %vm4394_vm13, %v3605_v59, %v4417_v43  ;;  %v2721_v59 = vadd.f32 %v6530_v26, %v5206_v7 }
 0x2f6   :  { %1606 = vbcast.lane.b32.xlu0 %v7931_v52, 280  ;;  %v4419_v12 = vsel %vm4396_vm14, %v3626_v29, %v4418_v35 }
 0x2f7   :  { %v3641_v48 = vmax.f32 %v3639_v13, %v3640_v46  ;;  %1602 = vbcast.lane.b32.xlu1 %v7931_v52, 272  ;;  %v3649_v26 = vsel %vm70_vm0, %v2721_v59, -inf  ;;  %v7936_v59 = vld [vmem:[#allocation38_spill] sm:$0xff] }
 0x2f8   :  { %v6537_v24 = vpop.permute.xlu0 %1361 }
 0x2f9   :  { %v3642_v51 = vrot.slane %v3641_v48, 4  ;;  %v6539_v25 = vpop.permute.xlu1 %1357 }
 0x2fa   :  { %1614 = vbcast.lane.b32.xlu0 %v7931_v52, 296  ;;  %v2722_v55 = vadd.f32 %v5196_v19, %v6539_v25 }
 0x2fb   :  { %v3643_v5 = vmax.f32 %v3641_v48, %v3642_v51  ;;  %1610 = vbcast.lane.b32.xlu1 %v7931_v52, 288  ;;  %v7934_v51 = vld [vmem:[#allocation36_spill] sm:$0xff] }
 0x2fc   :  { %v6543_v34 = vpop.permute.xlu0 %1369  ;;  %v3651_v25 = vsel %vm70_vm0, %v2722_v55, -inf }
 0x2fd   :  { %v3644_v49 = vrot.slane %v3643_v5, 2  ;;  %v6545_v33 = vpop.permute.xlu1 %1365 }
 0x2fe   :  { %1622 = vbcast.lane.b32.xlu0 %v7931_v52, 312 }
 0x2ff   :  { %v3645_v57 = vmax.f32 %v3643_v5, %v3644_v49  ;;  %1618 = vbcast.lane.b32.xlu1 %v7931_v52, 304  ;;  %v7935_v49 = vld [vmem:[#allocation37_spill] sm:$0xff] }
 0x300   :  { %v6552_v45 = vpop.permute.xlu0 %1377 }
 0x301   :  { %v3646_v28 = vrot.slane %v3645_v57, 1  ;;  %v6554_v11 = vpop.permute.xlu1 %1373 }
 0x302   :  { %1633 = vbcast.lane.b32.xlu0 %v7932_v27, 264 }
 0x303   :  { %v3647_v21 = vmax.f32 %v3645_v57, %v3646_v28  ;;  %1629 = vbcast.lane.b32.xlu1 %v7932_v27, 256  ;;  %v2720_v57 = vadd.f32 %v6532_v9, %v5200_v10 }
 0x304   :  { %v6562_v20 = vpop.permute.xlu0 %1388 }
 0x305   :  { %v4420_v6 = vsel %vm4398_vm15, %v3647_v21, %v4419_v12  ;;  %v6564_v62 = vpop.permute.xlu1 %1384  ;;  %v2729_v29 = vadd.f32 %v6562_v20, %v5206_v7  ;;  %v3648_v9 = vsel %vm70_vm0, %v2720_v57, -inf }
 0x306   :  { %v4515_v23 = vadd.f32 %v5841_v0, %v4420_v6  ;;  %1641 = vbcast.lane.b32.xlu0 %v7932_v27, 280  ;;  %v2728_v41 = vadd.f32 %v6564_v62, %v5200_v10  ;;  %v3650_v12 = vmax.f32 %v3648_v9, %v3649_v26  ;;  %v2723_v62 = vadd.f32 %v5204_v54, %v6537_v24 }
 0x307   :  { %1637 = vbcast.lane.b32.xlu1 %v7932_v27, 272  ;;  %v3670_v21 = vsel %vm70_vm0, %v2729_v29, -inf }
 0x308   :  { %v4544_v36 = vadd.f32 %v6224_v58, %v4515_v23  ;;  %v6570_v52 = vpop.permute.xlu0 %1396  ;;  %v4669_v58 = vld [vmem:[%s7794_s1 + $0x18] sm:$0xff]  ;;  %v3653_v24 = vsel %vm70_vm0, %v2723_v62, -inf }
 0x309   :  { %v1393_v50 = vpop.permute.xlu1 %1392 }
 0x30a   :  { %v4552_v42 = vmax.f32 %v4544_v36, 0.0  ;;  %1649 = vbcast.lane.b32.xlu0 %v7932_v27, 296  ;;  %v2730_v35 = vadd.f32 %v5196_v19, %v1393_v50  ;;  %v3652_v36 = vmax.f32 %v3650_v12, %v3651_v25 }
 0x30b   :  { %1645 = vbcast.lane.b32.xlu1 %v7932_v27, 288 }
 0x30c   :  { %v4567_v53 = vmul.f32 %v6236_v8, %v4552_v42  ;;  %v6575_v44 = vpop.permute.xlu0 %1404  ;;  %v7933_v8 = vld [vmem:[#allocation35_spill] sm:$0xff]  ;;  %v3672_v23 = vsel %vm70_vm0, %v2730_v35, -inf  ;;  %v2724_v42 = vadd.f32 %v6545_v33, %v5233_v37  ;;  %v2725_v33 = vadd.f32 %v6543_v34, %v5281_v17 }
 0x30d   :  { %v6577_v39 = vpop.permute.xlu1 %1400 }
 0x30e   :  { %v4582_v0 = vadd.f32 %v6246_v2, %v4567_v53  ;;  %1657 = vbcast.lane.b32.xlu0 %v7932_v27, 312  ;;  %v2731_v53 = vadd.f32 %v5204_v54, %v6570_v52  ;;  %v3654_v52 = vmax.f32 %v3652_v36, %v3653_v24  ;;  %v3655_v57 = vsel %vm70_vm0, %v2724_v42, -inf }
 0x30f   :  { %1653 = vbcast.lane.b32.xlu1 %v7932_v27, 304  ;;  %v3669_v27 = vsel %vm70_vm0, %v2728_v41, -inf  ;;  %v3657_v35 = vsel %vm70_vm0, %v2725_v33, -inf }
 0x310   :  { %v4590_v13 = vadd.f32 %v4669_v58, %v4582_v0  ;;  %v6585_v38 = vpop.permute.xlu0 %1412  ;;  %v3671_v50 = vmax.f32 %v3669_v27, %v3670_v21  ;;  %v3674_v55 = vsel %vm70_vm0, %v2731_v53, -inf  ;;  %v3656_v25 = vmax.f32 %v3654_v52, %v3655_v57 }
 0x311   :  { %v6587_v46 = vpop.permute.xlu1 %1408  ;;  %v6705_v21 = vadd.f32 %v5254_v32, %v6552_v45  ;;  %v2726_v45 = vadd.f32 %v5216_v3, %v6554_v11 }
 0x312   :  { %4598 = vst.msk [vmem:[%s7799_s8 + $0x18] sm:$0xff] %vm70_vm0, %v4590_v13  ;;  %1668 = vbcast.lane.b32.xlu0 %v7933_v8, 264  ;;  %v3673_v0 = vmax.f32 %v3671_v50, %v3672_v23  ;;  %v3658_v33 = vmax.f32 %v3656_v25, %v3657_v35 }
 0x313   :  { %1664 = vbcast.lane.b32.xlu1 %v7933_v8, 256 }
 0x314   :  { %v6595_v2 = vpop.permute.xlu0 %1423  ;;  %v3675_v29 = vmax.f32 %v3673_v0, %v3674_v55 }
 0x315   :  { %v6597_v56 = vpop.permute.xlu1 %1419 }
 0x316   :  { %1676 = vbcast.lane.b32.xlu0 %v7933_v8, 280 }
 0x317   :  { %1672 = vbcast.lane.b32.xlu1 %v7933_v8, 272 }
 0x318   :  { %v6601_v30 = vpop.permute.xlu0 %1431 }
 0x319   :  { %v6603_v48 = vpop.permute.xlu1 %1427  ;;  %v2739_v11 = vadd.f32 %v5204_v54, %v6601_v30 }
 0x31a   :  { %1684 = vbcast.lane.b32.xlu0 %v7933_v8, 296 }
 0x31b   :  { %1680 = vbcast.lane.b32.xlu1 %v7933_v8, 288 }
 0x31c   :  { %v6607_v40 = vpop.permute.xlu0 %1439 }
 0x31d   :  { %v6609_v4 = vpop.permute.xlu1 %1435 }
 0x31e   :  { %1692 = vbcast.lane.b32.xlu0 %v7933_v8, 312  ;;  %v2740_v30 = vadd.f32 %v6609_v4, %v5233_v37 }
 0x31f   :  { %1688 = vbcast.lane.b32.xlu1 %v7933_v8, 304  ;;  %v2732_v8 = vadd.f32 %v6577_v39, %v5233_v37  ;;  %v2738_v39 = vadd.f32 %v5196_v19, %v6603_v48 }
 0x320   :  { %v6613_v16 = vpop.permute.xlu0 %1447 }
 0x321   :  { %v6615_v18 = vpop.permute.xlu1 %1443  ;;  %v3676_v34 = vsel %vm70_vm0, %v2732_v8, -inf }
 0x322   :  { %1703 = vbcast.lane.b32.xlu0 %v7934_v51, 264  ;;  %v3677_v36 = vmax.f32 %v3675_v29, %v3676_v34  ;;  %v3695_v34 = vsel %vm70_vm0, %v2739_v11, -inf }
 0x323   :  { %1699 = vbcast.lane.b32.xlu1 %v7934_v51, 256 }
 0x324   :  { %v6619_v14 = vpop.permute.xlu0 %1458 }
 0x325   :  { %v6621_v22 = vpop.permute.xlu1 %1454  ;;  %v2745_v48 = vadd.f32 %v6619_v14, %v5206_v7 }
 0x326   :  { %1711 = vbcast.lane.b32.xlu0 %v7934_v51, 280  ;;  %v2744_v27 = vadd.f32 %v6621_v22, %v5200_v10 }
 0x327   :  { %1707 = vbcast.lane.b32.xlu1 %v7934_v51, 272  ;;  %v3712_v8 = vsel %vm70_vm0, %v2745_v48, -inf }
 0x328   :  { %v6625_v61 = vpop.permute.xlu0 %1466 }
 0x329   :  { %v6627_v5 = vpop.permute.xlu1 %1462  ;;  %v2747_v35 = vadd.f32 %v5204_v54, %v6625_v61 }
 0x32a   :  { %1719 = vbcast.lane.b32.xlu0 %v7934_v51, 296  ;;  %v2746_v53 = vadd.f32 %v5196_v19, %v6627_v5  ;;  %v3711_v5 = vsel %vm70_vm0, %v2744_v27, -inf }
 0x32b   :  { %1715 = vbcast.lane.b32.xlu1 %v7934_v51, 288 }
 0x32c   :  { %v6631_v47 = vpop.permute.xlu0 %1474 }
 0x32d   :  { %v6633_v60 = vpop.permute.xlu1 %1470 }
 0x32e   :  { %1727 = vbcast.lane.b32.xlu0 %v7934_v51, 312  ;;  %v2748_v27 = vadd.f32 %v6633_v60, %v5233_v37 }
 0x32f   :  { %1723 = vbcast.lane.b32.xlu1 %v7934_v51, 304  ;;  %v2737_v51 = vadd.f32 %v6595_v2, %v5206_v7  ;;  %v2733_v2 = vadd.f32 %v6575_v44, %v5281_v17  ;;  %v3693_v44 = vsel %vm70_vm0, %v2738_v39, -inf  ;;  %v3714_v39 = vsel %vm70_vm0, %v2746_v53, -inf  ;;  %v7937_v53 = vld [vmem:[#allocation39_spill] sm:$0xff] }
 0x330   :  { %v6637_v31 = vpop.permute.xlu0 %1482 }
 0x331   :  { %v6639_v1 = vpop.permute.xlu1 %1478  ;;  %v3691_v26 = vsel %vm70_vm0, %v2737_v51, -inf  ;;  %v3678_v23 = vsel %vm70_vm0, %v2733_v2, -inf }
 0x332   :  { %1738 = vbcast.lane.b32.xlu0 %v7935_v49, 264  ;;  %v3679_v52 = vmax.f32 %v3677_v36, %v3678_v23 }
 0x333   :  { %1734 = vbcast.lane.b32.xlu1 %v7935_v49, 256 }
 0x334   :  { %v1494_v63 = vpop.permute.xlu0 %1493 }
 0x335   :  { %v1490_v15 = vpop.permute.xlu1 %1489  ;;  %v2753_v12 = vadd.f32 %v1494_v63, %v5206_v7 }
 0x336   :  { %1746 = vbcast.lane.b32.xlu0 %v7935_v49, 280  ;;  %v2752_v62 = vadd.f32 %v1490_v15, %v5200_v10  ;;  %v2734_v15 = vadd.f32 %v5216_v3, %v6587_v46  ;;  %v3659_v46 = vsel %vm70_vm0, %v2726_v45, -inf }
 0x337   :  { %1742 = vbcast.lane.b32.xlu1 %v7935_v49, 272  ;;  %v6755_v36 = vmax.f32 %v3658_v33, %v3659_v46  ;;  %v2742_v33 = vadd.f32 %v5216_v3, %v6615_v18  ;;  %v2749_v46 = vadd.f32 %v6631_v47, %v5281_v17  ;;  %v2750_v47 = vadd.f32 %v5216_v3, %v6639_v1 }
 0x338   :  { %v6655_v28 = vpop.permute.xlu0 %1501  ;;  %v3732_v51 = vsel %vm70_vm0, %v2752_v62, -inf }
 0x339   :  { %v1498_v43 = vpop.permute.xlu1 %1497  ;;  %v2755_v25 = vadd.f32 %v5204_v54, %v6655_v28  ;;  %v3720_v1 = vsel %vm70_vm0, %v2749_v46, -inf }
 0x33a   :  { %1754 = vbcast.lane.b32.xlu0 %v7935_v49, 296  ;;  %v2754_v0 = vadd.f32 %v5196_v19, %v1498_v43  ;;  %v3733_v43 = vsel %vm70_vm0, %v2753_v12, -inf }
 0x33b   :  { %1750 = vbcast.lane.b32.xlu1 %v7935_v49, 288 }
 0x33c   :  { %v6665_v6 = vpop.permute.xlu0 %1509  ;;  %v3735_v2 = vsel %vm70_vm0, %v2754_v0, -inf  ;;  %v2741_v0 = vadd.f32 %v6607_v40, %v5281_v17 }
 0x33d   :  { %v6667_v20 = vpop.permute.xlu1 %1505 }
 0x33e   :  { %1762 = vbcast.lane.b32.xlu0 %v7935_v49, 312  ;;  %v2756_v61 = vadd.f32 %v6667_v20, %v5233_v37 }
 0x33f   :  { %1758 = vbcast.lane.b32.xlu1 %v7935_v49, 304  ;;  %v2736_v49 = vadd.f32 %v6597_v56, %v5200_v10 }
 0x340   :  { %v6678_v58 = vpop.permute.xlu0 %1517 }
 0x341   :  { %v6680_v13 = vpop.permute.xlu1 %1513  ;;  %v3690_v9 = vsel %vm70_vm0, %v2736_v49, -inf }
 0x342   :  { %1773 = vbcast.lane.b32.xlu0 %v7936_v59, 264  ;;  %v3692_v14 = vmax.f32 %v3690_v9, %v3691_v26  ;;  %v3713_v26 = vmax.f32 %v3711_v5, %v3712_v8  ;;  %v3734_v9 = vmax.f32 %v3732_v51, %v3733_v43  ;;  %v3739_v5 = vsel %vm70_vm0, %v2756_v61, -inf }
 0x343   :  { %1769 = vbcast.lane.b32.xlu1 %v7936_v59, 256 }
 0x344   :  { %v1529_v56 = vpop.permute.xlu0 %1528  ;;  %v3694_v24 = vmax.f32 %v3692_v14, %v3693_v44  ;;  %v3715_v44 = vmax.f32 %v3713_v26, %v3714_v39  ;;  %v3736_v12 = vmax.f32 %v3734_v9, %v3735_v2  ;;  %v2735_v14 = vadd.f32 %v5254_v32, %v6585_v38 }
 0x345   :  { %v1525_v41 = vpop.permute.xlu1 %1524  ;;  %v2761_v22 = vadd.f32 %v1529_v56, %v5206_v7  ;;  %v3718_v38 = vsel %vm70_vm0, %v2748_v27, -inf }
 0x346   :  { %1781 = vbcast.lane.b32.xlu0 %v7936_v59, 280  ;;  %v2760_v63 = vadd.f32 %v1525_v41, %v5200_v10  ;;  %v3680_v41 = vsel %vm70_vm0, %v2734_v15, -inf  ;;  %v3696_v4 = vmax.f32 %v3694_v24, %v3695_v34 }
 0x347   :  { %1777 = vbcast.lane.b32.xlu1 %v7936_v59, 272  ;;  %v3754_v29 = vsel %vm70_vm0, %v2761_v22, -inf  ;;  %v3716_v22 = vsel %vm70_vm0, %v2747_v35, -inf  ;;  %v3701_v35 = vsel %vm70_vm0, %v2742_v33, -inf }
 0x348   :  { %v1537_v50 = vpop.permute.xlu0 %1536  ;;  %v3753_v56 = vsel %vm70_vm0, %v2760_v63, -inf  ;;  %v3737_v63 = vsel %vm70_vm0, %v2755_v25, -inf  ;;  %v3717_v15 = vmax.f32 %v3715_v44, %v3716_v22  ;;  %v2758_v25 = vadd.f32 %v5216_v3, %v6680_v13 }
 0x349   :  { %v1533_v42 = vpop.permute.xlu1 %1532  ;;  %v3755_v62 = vmax.f32 %v3753_v56, %v3754_v29  ;;  %v2763_v28 = vadd.f32 %v5204_v54, %v1537_v50  ;;  %v3738_v11 = vmax.f32 %v3736_v12, %v3737_v63  ;;  %v3699_v29 = vsel %vm70_vm0, %v2741_v0, -inf }
 0x34a   :  { %1789 = vbcast.lane.b32.xlu0 %v7936_v59, 296  ;;  %v2762_v49 = vadd.f32 %v5196_v19, %v1533_v42  ;;  %v6763_v42 = vmax.f32 %v3679_v52, %v3680_v41  ;;  %v3719_v18 = vmax.f32 %v3717_v15, %v3718_v38 }
 0x34b   :  { %1785 = vbcast.lane.b32.xlu1 %v7936_v59, 288  ;;  %v3758_v43 = vsel %vm70_vm0, %v2763_v28, -inf  ;;  %v3740_v56 = vmax.f32 %v3738_v11, %v3739_v5  ;;  %v2751_v11 = vadd.f32 %v5254_v32, %v6637_v31 }
 0x34c   :  { %v1545_v57 = vpop.permute.xlu0 %1544  ;;  %v3756_v48 = vsel %vm70_vm0, %v2762_v49, -inf  ;;  %v3682_v49 = vsel %vm70_vm0, %v2735_v14, -inf }
 0x34d   :  { %v1541_v55 = vpop.permute.xlu1 %1540  ;;  %v3757_v60 = vmax.f32 %v3755_v62, %v3756_v48  ;;  %v2765_v9 = vadd.f32 %v1545_v57, %v5281_v17  ;;  %v3721_v62 = vmax.f32 %v3719_v18, %v3720_v1  ;;  %v3683_v5 = vmax.f32 %v6763_v42, %v3682_v49 }
 0x34e   :  { %1797 = vbcast.lane.b32.xlu0 %v7936_v59, 312  ;;  %v2764_v20 = vadd.f32 %v1541_v55, %v5233_v37 }
 0x34f   :  { %1793 = vbcast.lane.b32.xlu1 %v7936_v59, 304  ;;  %v3697_v59 = vsel %vm70_vm0, %v2740_v30, -inf  ;;  %v3759_v52 = vmax.f32 %v3757_v60, %v3758_v43  ;;  %v2757_v30 = vadd.f32 %v6665_v6, %v5281_v17  ;;  %v3762_v60 = vsel %vm70_vm0, %v2765_v9, -inf }
 0x350   :  { %v6753_v45 = vpop.permute.xlu0 %1552  ;;  %v3698_v50 = vmax.f32 %v3696_v4, %v3697_v59  ;;  %v3760_v55 = vsel %vm70_vm0, %v2764_v20, -inf  ;;  %v3722_v59 = vsel %vm70_vm0, %v2750_v47, -inf  ;;  %v3743_v20 = vsel %vm70_vm0, %v2758_v25, -inf }
 0x351   :  { %v1549_v23 = vpop.permute.xlu1 %1548  ;;  %v3761_v48 = vmax.f32 %v3759_v52, %v3760_v55  ;;  %v3741_v27 = vsel %vm70_vm0, %v2757_v30, -inf  ;;  %v3723_v43 = vmax.f32 %v3721_v62, %v3722_v59 }
 0x352   :  { %1808 = vbcast.lane.b32.xlu0 %v7937_v53, 264  ;;  %v3700_v26 = vmax.f32 %v3698_v50, %v3699_v29  ;;  %v2766_v57 = vadd.f32 %v5216_v3, %v1549_v23  ;;  %v3742_v61 = vmax.f32 %v3740_v56, %v3741_v27  ;;  %v2743_v23 = vadd.f32 %v5254_v32, %v6613_v16 }
 0x353   :  { %1804 = vbcast.lane.b32.xlu1 %v7937_v53, 256  ;;  %v3763_v50 = vmax.f32 %v3761_v48, %v3762_v60  ;;  %v2759_v16 = vadd.f32 %v5254_v32, %v6678_v58  ;;  %v3661_v58 = vsel %vm70_vm0, %v6705_v21, -inf }
 0x354   :  { %v1564_v24 = vpop.permute.xlu0 %1563  ;;  %v3702_v38 = vmax.f32 %v3700_v26, %v3701_v35  ;;  %v3744_v46 = vmax.f32 %v3742_v61, %v3743_v20  ;;  %v3703_v30 = vsel %vm70_vm0, %v2743_v23, -inf  ;;  %v3662_v18 = vmax.f32 %v6755_v36, %v3661_v58 }
 0x355   :  { %v1560_v8 = vpop.permute.xlu1 %1559  ;;  %v2769_v51 = vadd.f32 %v1564_v24, %v5206_v7  ;;  %v3764_v24 = vsel %vm70_vm0, %v2766_v57, -inf  ;;  %v3745_v56 = vsel %vm70_vm0, %v2759_v16, -inf  ;;  %v3684_v35 = vrot.slane %v3683_v5, 4 }
 0x356   :  { %v2768_v40 = vadd.f32 %v1560_v8, %v5200_v10  ;;  %1816 = vbcast.lane.b32.xlu0 %v7937_v53, 280  ;;  %v3765_v55 = vmax.f32 %v3763_v50, %v3764_v24  ;;  %v3746_v9 = vmax.f32 %v3744_v46, %v3745_v56  ;;  %v3663_v57 = vrot.slane %v3662_v18, 4 }
 0x357   :  { %1812 = vbcast.lane.b32.xlu1 %v7937_v53, 272  ;;  %v3775_v39 = vsel %vm70_vm0, %v2769_v51, -inf }
 0x358   :  { %v3774_v2 = vsel %vm70_vm0, %v2768_v40, -inf  ;;  %v1572_v41 = vpop.permute.xlu0 %1571  ;;  %v3747_v61 = vrot.slane %v3746_v9, 4  ;;  %v3664_v20 = vmax.f32 %v3662_v18, %v3663_v57 }
 0x359   :  { %v1568_v34 = vpop.permute.xlu1 %1567  ;;  %v2771_v6 = vadd.f32 %v5204_v54, %v1572_v41  ;;  %v3776_v44 = vmax.f32 %v3774_v2, %v3775_v39  ;;  %v7938_v39 = vld [vmem:[#allocation40_spill] sm:$0xff]  ;;  %v3704_v2 = vmax.f32 %v3702_v38, %v3703_v30 }
 0x35a   :  { %v2770_v4 = vadd.f32 %v5196_v19, %v1568_v34  ;;  %1824 = vbcast.lane.b32.xlu0 %v7937_v53, 296  ;;  %v3748_v24 = vmax.f32 %v3746_v9, %v3747_v61 }
 0x35b   :  { %1820 = vbcast.lane.b32.xlu1 %v7937_v53, 288  ;;  %v3779_v0 = vsel %vm70_vm0, %v2771_v6, -inf  ;;  %v3705_v36 = vrot.slane %v3704_v2, 4 }
 0x35c   :  { %v3777_v12 = vsel %vm70_vm0, %v2770_v4, -inf  ;;  %v1580_v13 = vpop.permute.xlu0 %1579 }
 0x35d   :  { %v3778_v28 = vmax.f32 %v3776_v44, %v3777_v12  ;;  %v1576_v14 = vpop.permute.xlu1 %1575  ;;  %v2773_v22 = vadd.f32 %v1580_v13, %v5281_v17 }
 0x35e   :  { %v2772_v63 = vadd.f32 %v1576_v14, %v5233_v37  ;;  %1832 = vbcast.lane.b32.xlu0 %v7937_v53, 312  ;;  %v3685_v14 = vmax.f32 %v3683_v5, %v3684_v35 }
 0x35f   :  { %v3780_v15 = vmax.f32 %v3778_v28, %v3779_v0  ;;  %1828 = vbcast.lane.b32.xlu1 %v7937_v53, 304  ;;  %v2767_v53 = vadd.f32 %v5254_v32, %v6753_v45  ;;  %v3783_v52 = vsel %vm70_vm0, %v2773_v22, -inf  ;;  %v3724_v45 = vsel %vm70_vm0, %v2751_v11, -inf }
 0x360   :  { %v3781_v8 = vsel %vm70_vm0, %v2772_v63, -inf  ;;  %v1588_v40 = vpop.permute.xlu0 %1587  ;;  %v3725_v47 = vmax.f32 %v3723_v43, %v3724_v45  ;;  %v3706_v22 = vmax.f32 %v3704_v2, %v3705_v36  ;;  %v3686_v16 = vrot.slane %v3685_v14, 2 }
 0x361   :  { %v3782_v51 = vmax.f32 %v3780_v15, %v3781_v8  ;;  %v1584_v33 = vpop.permute.xlu1 %1583  ;;  %v2775_v42 = vadd.f32 %v5254_v32, %v1588_v40  ;;  %v3766_v6 = vsel %vm70_vm0, %v2767_v53, -inf }
 0x362   :  { %v2774_v31 = vadd.f32 %v5216_v3, %v1584_v33  ;;  %1843 = vbcast.lane.b32.xlu0 %v7938_v39, 264  ;;  %v3767_v25 = vmax.f32 %v3765_v55, %v3766_v6  ;;  %v3726_v12 = vrot.slane %v3725_v47, 4  ;;  %v3707_v33 = vrot.slane %v3706_v22, 2 }
 0x363   :  { %v3784_v49 = vmax.f32 %v3782_v51, %v3783_v52  ;;  %1839 = vbcast.lane.b32.xlu1 %v7938_v39, 256  ;;  %v3787_v48 = vsel %vm70_vm0, %v2775_v42, -inf  ;;  %v3665_v52 = vrot.slane %v3664_v20, 2 }
 0x364   :  { %v3785_v29 = vsel %vm70_vm0, %v2774_v31, -inf  ;;  %v1599_v34 = vpop.permute.xlu0 %1598  ;;  %v3768_v60 = vrot.slane %v3767_v25, 4  ;;  %v3727_v50 = vmax.f32 %v3725_v47, %v3726_v12  ;;  %v3708_v56 = vmax.f32 %v3706_v22, %v3707_v33 }
 0x365   :  { %v3786_v41 = vmax.f32 %v3784_v49, %v3785_v29  ;;  %v1595_v26 = vpop.permute.xlu1 %1594  ;;  %v2777_v4 = vadd.f32 %v1599_v34, %v5206_v7  ;;  %v3749_v49 = vrot.slane %v3748_v24, 2  ;;  %v3687_v29 = vmax.f32 %v3685_v14, %v3686_v16 }
 0x366   :  { %v2776_v21 = vadd.f32 %v1595_v26, %v5200_v10  ;;  %1851 = vbcast.lane.b32.xlu0 %v7938_v39, 280  ;;  %v3769_v51 = vmax.f32 %v3767_v25, %v3768_v60  ;;  %v3728_v31 = vrot.slane %v3727_v50, 2  ;;  %v3666_v26 = vmax.f32 %v3664_v20, %v3665_v52  ;;  %v7940_v52 = vld [vmem:[#allocation23_spill] sm:$0xff] }
 0x367   :  { %1847 = vbcast.lane.b32.xlu1 %v7938_v39, 272  ;;  %v3788_v44 = vmax.f32 %v3786_v41, %v3787_v48  ;;  %v3796_v1 = vsel %vm70_vm0, %v2777_v4, -inf  ;;  %v3750_v35 = vmax.f32 %v3748_v24, %v3749_v49  ;;  %v3688_v48 = vrot.slane %v3687_v29, 1 }
 0x368   :  { %v3795_v27 = vsel %vm70_vm0, %v2776_v21, -inf  ;;  %v1607_v62 = vpop.permute.xlu0 %1606  ;;  %v3770_v18 = vrot.slane %v3769_v51, 2  ;;  %v3729_v9 = vmax.f32 %v3727_v50, %v3728_v31  ;;  %v3667_v57 = vrot.slane %v3666_v26, 1 }
 0x369   :  { %v1603_v59 = vpop.permute.xlu1 %1602  ;;  %v2779_v28 = vadd.f32 %v5204_v54, %v1607_v62  ;;  %v3797_v0 = vmax.f32 %v3795_v27, %v3796_v1  ;;  %v3789_v63 = vrot.slane %v3788_v44, 4  ;;  %v3709_v1 = vrot.slane %v3708_v56, 1 }
 0x36a   :  { %v2778_v13 = vadd.f32 %v5196_v19, %v1603_v59  ;;  %1859 = vbcast.lane.b32.xlu0 %v7938_v39, 296  ;;  %v3771_v36 = vmax.f32 %v3769_v51, %v3770_v18  ;;  %v3730_v12 = vrot.slane %v3729_v9, 1 }
 0x36b   :  { %1855 = vbcast.lane.b32.xlu1 %v7938_v39, 288  ;;  %v3800_v8 = vsel %vm70_vm0, %v2779_v28, -inf  ;;  %v3790_v46 = vmax.f32 %v3788_v44, %v3789_v63  ;;  %v3751_v28 = vrot.slane %v3750_v35, 1  ;;  %v3668_v63 = vmax.f32 %v3666_v26, %v3667_v57 }
 0x36c   :  { %v3798_v23 = vsel %vm70_vm0, %v2778_v13, -inf  ;;  %v1615_v38 = vpop.permute.xlu0 %1614  ;;  %v3689_v13 = vmax.f32 %v3687_v29, %v3688_v48  ;;  %v3772_v60 = vrot.slane %v3771_v36, 1  ;;  %v6903_v29 = vld [vmem:[%s7796_s5] ss:$0 sm:$0xff] }
 0x36d   :  { %v3799_v15 = vmax.f32 %v3797_v0, %v3798_v23  ;;  %v1611_v11 = vpop.permute.xlu1 %1610  ;;  %v2781_v5 = vadd.f32 %v1615_v38, %v5281_v17  ;;  %v3791_v41 = vrot.slane %v3790_v46, 2  ;;  %v3710_v0 = vmax.f32 %v3708_v56, %v3709_v1  ;;  %v7941_v1 = vld [vmem:[#allocation24_spill] sm:$0xff] }
 0x36e   :  { %v2780_v43 = vadd.f32 %v1611_v11, %v5233_v37  ;;  %1867 = vbcast.lane.b32.xlu0 %v7938_v39, 312  ;;  %v3731_v23 = vmax.f32 %v3729_v9, %v3730_v12  ;;  %v3752_v38 = vmax.f32 %v3750_v35, %v3751_v28  ;;  %v6879_v11 = vpop.f32.mrf.mxu1  ;;  %v3773_v24 = vmax.f32 %v3771_v36, %v3772_v60 }
 0x36f   :  { %v3801_v40 = vmax.f32 %v3799_v15, %v3800_v8  ;;  %1863 = vbcast.lane.b32.xlu1 %v7938_v39, 304  ;;  %v3804_v58 = vsel %vm70_vm0, %v2781_v5, -inf  ;;  %v7939_v39 = vld [vmem:[#allocation41_spill] sm:$0xff]  ;;  %v3792_v27 = vmax.f32 %v3790_v46, %v3791_v41  ;;  %v4421_v5 = vsel %vm4386_vm9, %v3689_v13, %v3668_v63  ;;  %v6915_v41 = vld [vmem:[%s7797_s6] ss:$0 sm:$0xff] }
 0x370   :  { %v3802_v53 = vsel %vm70_vm0, %v2780_v43, -inf  ;;  %v1623_v55 = vpop.permute.xlu0 %1622  ;;  %v4422_v16 = vsel %vm4388_vm10, %v3710_v0, %v4421_v5  ;;  %v7942_v0 = vld [vmem:[#allocation25_spill] sm:$0xff] }
 0x371   :  { %v3803_v30 = vmax.f32 %v3801_v40, %v3802_v53  ;;  %v1619_v42 = vpop.permute.xlu1 %1618  ;;  %v2783_v2 = vadd.f32 %v5254_v32, %v1623_v55  ;;  %v3793_v22 = vrot.slane %v3792_v27, 1  ;;  %v4423_v46 = vsel %vm4390_vm11, %v3731_v23, %v4422_v16  ;;  %v4519_v55 = vpop.f32.mrf.mxu1 }
 0x372   :  { %v2782_v45 = vadd.f32 %v5216_v3, %v1619_v42  ;;  %1878 = vbcast.lane.b32.xlu0 %v7939_v39, 264  ;;  %v4424_v53 = vsel %vm4392_vm12, %v3752_v38, %v4423_v46 }
 0x373   :  { %v3805_v47 = vmax.f32 %v3803_v30, %v3804_v58  ;;  %1874 = vbcast.lane.b32.xlu1 %v7939_v39, 256  ;;  %v3808_v25 = vsel %vm70_vm0, %v2783_v2, -inf  ;;  %v3794_v43 = vmax.f32 %v3792_v27, %v3793_v22  ;;  %v4425_v30 = vsel %vm4394_vm13, %v3773_v24, %v4424_v53 }
 0x374   :  { %v3806_v34 = vsel %vm70_vm0, %v2782_v45, -inf  ;;  %v6860_v4 = vpop.permute.xlu0 %1633 }
 0x375   :  { %v3807_v6 = vmax.f32 %v3805_v47, %v3806_v34  ;;  %v6862_v21 = vpop.permute.xlu1 %1629  ;;  %v4426_v42 = vsel %vm4396_vm14, %v3794_v43, %v4425_v30  ;;  %v7943_v43 = vld [vmem:[#allocation26_spill] sm:$0xff]  ;;  %v2785_v46 = vadd.f32 %v6860_v4, %v5206_v7 }
 0x376   :  { %1886 = vbcast.lane.b32.xlu0 %v7939_v39, 280  ;;  %v2784_v53 = vadd.f32 %v6862_v21, %v5200_v10 }
 0x377   :  { %v3809_v44 = vmax.f32 %v3807_v6, %v3808_v25  ;;  %1882 = vbcast.lane.b32.xlu1 %v7939_v39, 272  ;;  %v6925_v6 = vld [vmem:[%s7798_s7] ss:$0 sm:$0xff]  ;;  %v3817_v4 = vsel %vm70_vm0, %v2785_v46, -inf }
 0x378   :  { %v6867_v59 = vpop.permute.xlu0 %1641  ;;  %v4673_v25 = vld [vmem:[%s7794_s1 + $0x20] sm:$0xff]  ;;  %v3816_v21 = vsel %vm70_vm0, %v2784_v53, -inf }
 0x379   :  { %v3810_v62 = vrot.slane %v3809_v44, 4  ;;  %v6869_v61 = vpop.permute.xlu1 %1637 }
 0x37a   :  { %1894 = vbcast.lane.b32.xlu0 %v7939_v39, 296 }
 0x37b   :  { %v3811_v14 = vmax.f32 %v3809_v44, %v3810_v62  ;;  %1890 = vbcast.lane.b32.xlu1 %v7939_v39, 288 }
 0x37c   :  { %v6873_v20 = vpop.permute.xlu0 %1649 }
 0x37d   :  { %v6875_v50 = vpop.permute.xlu1 %1645  ;;  %v3812_v15 = vrot.slane %v3811_v14, 2 }
 0x37e   :  { %1902 = vbcast.lane.b32.xlu0 %v7939_v39, 312 }
 0x37f   :  { %1898 = vbcast.lane.b32.xlu1 %v7939_v39, 304  ;;  %v3813_v8 = vmax.f32 %v3811_v14, %v3812_v15 }
 0x380   :  { %v6883_v51 = vpop.permute.xlu0 %1657 }
 0x381   :  { %v6885_v40 = vpop.permute.xlu1 %1653  ;;  %v3814_v33 = vrot.slane %v3813_v8, 1 }
 0x382   :  { %1913 = vbcast.lane.b32.xlu0 %v7940_v52, 264 }
 0x383   :  { %1909 = vbcast.lane.b32.xlu1 %v7940_v52, 256  ;;  %v3815_v31 = vmax.f32 %v3813_v8, %v3814_v33 }
 0x384   :  { %v6893_v49 = vpop.permute.xlu0 %1668 }
 0x385   :  { %v6895_v58 = vpop.permute.xlu1 %1664  ;;  %v4427_v2 = vsel %vm4398_vm15, %v3815_v31, %v4426_v42  ;;  %v2793_v31 = vadd.f32 %v6893_v49, %v5206_v7 }
 0x386   :  { %v4520_v45 = vadd.f32 %v4519_v55, %v4427_v2  ;;  %1921 = vbcast.lane.b32.xlu0 %v7940_v52, 280  ;;  %v2792_v30 = vadd.f32 %v6895_v58, %v5200_v10 }
 0x387   :  { %1917 = vbcast.lane.b32.xlu1 %v7940_v52, 272  ;;  %v3838_v49 = vsel %vm70_vm0, %v2793_v31, -inf }
 0x388   :  { %v4545_v18 = vadd.f32 %v6903_v29, %v4520_v45  ;;  %v6906_v47 = vpop.permute.xlu0 %1676  ;;  %v3837_v58 = vsel %vm70_vm0, %v2792_v30, -inf  ;;  %v3818_v45 = vmax.f32 %v3816_v21, %v3817_v4  ;;  %v7944_v30 = vld [vmem:[#allocation27_spill] sm:$0xff] }
 0x389   :  { %v6908_v39 = vpop.permute.xlu1 %1672 }
 0x38a   :  { %v4553_v56 = vmax.f32 %v4545_v18, 0.0  ;;  %1929 = vbcast.lane.b32.xlu0 %v7940_v52, 296  ;;  %v2794_v2 = vadd.f32 %v5196_v19, %v6908_v39 }
 0x38b   :  { %1925 = vbcast.lane.b32.xlu1 %v7940_v52, 288 }
 0x38c   :  { %v4568_v34 = vmul.f32 %v6915_v41, %v4553_v56  ;;  %v6918_v26 = vpop.permute.xlu0 %1684  ;;  %v3840_v39 = vsel %vm70_vm0, %v2794_v2, -inf }
 0x38d   :  { %v6920_v9 = vpop.permute.xlu1 %1680 }
 0x38e   :  { %v4583_v35 = vadd.f32 %v6925_v6, %v4568_v34  ;;  %1937 = vbcast.lane.b32.xlu0 %v7940_v52, 312  ;;  %v2787_v34 = vadd.f32 %v5204_v54, %v6867_v59 }
 0x38f   :  { %1933 = vbcast.lane.b32.xlu1 %v7940_v52, 304  ;;  %v2786_v52 = vadd.f32 %v5196_v19, %v6869_v61 }
 0x390   :  { %v4591_v48 = vadd.f32 %v4673_v25, %v4583_v35  ;;  %v6933_v36 = vpop.permute.xlu0 %1692  ;;  %v3839_v25 = vmax.f32 %v3837_v58, %v3838_v49  ;;  %v3821_v59 = vsel %vm70_vm0, %v2787_v34, -inf }
 0x391   :  { %v6935_v44 = vpop.permute.xlu1 %1688  ;;  %v3819_v61 = vsel %vm70_vm0, %v2786_v52, -inf  ;;  %v2796_v52 = vadd.f32 %v6920_v9, %v5233_v37 }
 0x392   :  { %4599 = vst.msk [vmem:[%s7799_s8 + $0x20] sm:$0xff] %vm70_vm0, %v4591_v48  ;;  %1948 = vbcast.lane.b32.xlu0 %v7941_v1, 264  ;;  %v3820_v35 = vmax.f32 %v3818_v45, %v3819_v61  ;;  %v2788_v48 = vadd.f32 %v6875_v50, %v5233_v37  ;;  %v2789_v50 = vadd.f32 %v6873_v20, %v5281_v17 }
 0x393   :  { %1944 = vbcast.lane.b32.xlu1 %v7941_v1, 256  ;;  %v3844_v20 = vsel %vm70_vm0, %v2796_v52, -inf }
 0x394   :  { %v6943_v27 = vpop.permute.xlu0 %1703  ;;  %v3823_v4 = vsel %vm70_vm0, %v2788_v48, -inf  ;;  %v3825_v45 = vsel %vm70_vm0, %v2789_v50, -inf }
 0x395   :  { %v6945_v57 = vpop.permute.xlu1 %1699  ;;  %v2801_v31 = vadd.f32 %v6943_v27, %v5206_v7  ;;  %v2797_v27 = vadd.f32 %v6918_v26, %v5281_v17 }
 0x396   :  { %1956 = vbcast.lane.b32.xlu0 %v7941_v1, 280 }
 0x397   :  { %1952 = vbcast.lane.b32.xlu1 %v7941_v1, 272  ;;  %v3859_v49 = vsel %vm70_vm0, %v2801_v31, -inf }
 0x398   :  { %v6949_v12 = vpop.permute.xlu0 %1711 }
 0x399   :  { %v6951_v62 = vpop.permute.xlu1 %1707 }
 0x39a   :  { %1964 = vbcast.lane.b32.xlu0 %v7941_v1, 296  ;;  %v2802_v9 = vadd.f32 %v5196_v19, %v6951_v62 }
 0x39b   :  { %1960 = vbcast.lane.b32.xlu1 %v7941_v1, 288 }
 0x39c   :  { %v6955_v28 = vpop.permute.xlu0 %1719  ;;  %v3861_v26 = vsel %vm70_vm0, %v2802_v9, -inf }
 0x39d   :  { %v6957_v13 = vpop.permute.xlu1 %1715 }
 0x39e   :  { %1972 = vbcast.lane.b32.xlu0 %v7941_v1, 312 }
 0x39f   :  { %1968 = vbcast.lane.b32.xlu1 %v7941_v1, 304  ;;  %v2795_v1 = vadd.f32 %v5204_v54, %v6906_v47  ;;  %v3822_v47 = vmax.f32 %v3820_v35, %v3821_v59 }
 0x3a0   :  { %v6961_v14 = vpop.permute.xlu0 %1727 }
 0x3a1   :  { %v6963_v60 = vpop.permute.xlu1 %1723  ;;  %v3842_v21 = vsel %vm70_vm0, %v2795_v1, -inf  ;;  %v3824_v34 = vmax.f32 %v3822_v47, %v3823_v4  ;;  %v3846_v1 = vsel %vm70_vm0, %v2797_v27, -inf }
 0x3a2   :  { %1983 = vbcast.lane.b32.xlu0 %v7942_v0, 264 }
 0x3a3   :  { %1979 = vbcast.lane.b32.xlu1 %v7942_v0, 256  ;;  %v3826_v9 = vmax.f32 %v3824_v34, %v3825_v45 }
 0x3a4   :  { %v6967_v22 = vpop.permute.xlu0 %1738 }
 0x3a5   :  { %v6969_v63 = vpop.permute.xlu1 %1734  ;;  %v2809_v62 = vadd.f32 %v6967_v22, %v5206_v7 }
 0x3a6   :  { %1991 = vbcast.lane.b32.xlu0 %v7942_v0, 280  ;;  %v2808_v35 = vadd.f32 %v6969_v63, %v5200_v10 }
 0x3a7   :  { %1987 = vbcast.lane.b32.xlu1 %v7942_v0, 272  ;;  %v3880_v47 = vsel %vm70_vm0, %v2809_v62, -inf }
 0x3a8   :  { %v6973_v23 = vpop.permute.xlu0 %1746 }
 0x3a9   :  { %v6975_v15 = vpop.permute.xlu1 %1742 }
 0x3aa   :  { %1999 = vbcast.lane.b32.xlu0 %v7942_v0, 296  ;;  %v2810_v31 = vadd.f32 %v5196_v19, %v6975_v15  ;;  %v3879_v15 = vsel %vm70_vm0, %v2808_v35, -inf  ;;  %v2811_v35 = vadd.f32 %v5204_v54, %v6973_v23 }
 0x3ab   :  { %1995 = vbcast.lane.b32.xlu1 %v7942_v0, 288  ;;  %v3881_v34 = vmax.f32 %v3879_v15, %v3880_v47 }
 0x3ac   :  { %v6979_v38 = vpop.permute.xlu0 %1754 }
 0x3ad   :  { %v6981_v24 = vpop.permute.xlu1 %1750 }
 0x3ae   :  { %2007 = vbcast.lane.b32.xlu0 %v7942_v0, 312 }
 0x3af   :  { %2003 = vbcast.lane.b32.xlu1 %v7942_v0, 304  ;;  %v3841_v0 = vmax.f32 %v3839_v25, %v3840_v39  ;;  %v7054_v39 = vadd.f32 %v5254_v32, %v6883_v51  ;;  %v2790_v51 = vadd.f32 %v5216_v3, %v6885_v40  ;;  %v2803_v40 = vadd.f32 %v5204_v54, %v6949_v12 }
 0x3b0   :  { %v6985_v8 = vpop.permute.xlu0 %1762  ;;  %v2804_v12 = vadd.f32 %v6957_v13, %v5233_v37 }
 0x3b1   :  { %v6987_v5 = vpop.permute.xlu1 %1758  ;;  %v3843_v2 = vmax.f32 %v3841_v0, %v3842_v21  ;;  %v3863_v45 = vsel %vm70_vm0, %v2803_v40, -inf  ;;  %v2805_v40 = vadd.f32 %v6955_v28, %v5281_v17 }
 0x3b2   :  { %2018 = vbcast.lane.b32.xlu0 %v7943_v43, 264 }
 0x3b3   :  { %2014 = vbcast.lane.b32.xlu1 %v7943_v43, 256  ;;  %v3845_v0 = vmax.f32 %v3843_v2, %v3844_v20 }
 0x3b4   :  { %v1774_v16 = vpop.permute.xlu0 %1773 }
 0x3b5   :  { %v1770_v33 = vpop.permute.xlu1 %1769  ;;  %v2817_v25 = vadd.f32 %v1774_v16, %v5206_v7  ;;  %v3847_v27 = vmax.f32 %v3845_v0, %v3846_v1  ;;  %v2812_v1 = vadd.f32 %v6981_v24, %v5233_v37 }
 0x3b6   :  { %2026 = vbcast.lane.b32.xlu0 %v7943_v43, 280  ;;  %v2816_v48 = vadd.f32 %v1770_v33, %v5200_v10  ;;  %v2798_v33 = vadd.f32 %v5216_v3, %v6935_v44  ;;  %v3827_v44 = vsel %vm70_vm0, %v2790_v51, -inf }
 0x3b7   :  { %2022 = vbcast.lane.b32.xlu1 %v7943_v43, 272 }
 0x3b8   :  { %v7003_v55 = vpop.permute.xlu0 %1781  ;;  %v3900_v4 = vsel %vm70_vm0, %v2816_v48, -inf  ;;  %v3848_v62 = vsel %vm70_vm0, %v2798_v33, -inf  ;;  %v7945_v33 = vld [vmem:[#allocation28_spill] sm:$0xff] }
 0x3b9   :  { %v1778_v42 = vpop.permute.xlu1 %1777 }
 0x3ba   :  { %2034 = vbcast.lane.b32.xlu0 %v7943_v43, 296 }
 0x3bb   :  { %2030 = vbcast.lane.b32.xlu1 %v7943_v43, 288 }
 0x3bc   :  { %v7014_v18 = vpop.permute.xlu0 %1789 }
 0x3bd   :  { %v7016_v56 = vpop.permute.xlu1 %1785 }
 0x3be   :  { %2042 = vbcast.lane.b32.xlu0 %v7943_v43, 312  ;;  %v2820_v23 = vadd.f32 %v7016_v56, %v5233_v37 }
 0x3bf   :  { %2038 = vbcast.lane.b32.xlu1 %v7943_v43, 304  ;;  %v2800_v43 = vadd.f32 %v6945_v57, %v5200_v10 }
 0x3c0   :  { %v7027_v46 = vpop.permute.xlu0 %1797 }
 0x3c1   :  { %v7029_v53 = vpop.permute.xlu1 %1793  ;;  %v3858_v58 = vsel %vm70_vm0, %v2800_v43, -inf  ;;  %v2818_v43 = vadd.f32 %v5196_v19, %v1778_v42  ;;  %v3901_v42 = vsel %vm70_vm0, %v2817_v25, -inf  ;;  %v2819_v25 = vadd.f32 %v5204_v54, %v7003_v55 }
 0x3c2   :  { %2053 = vbcast.lane.b32.xlu0 %v7944_v30, 264  ;;  %v3860_v22 = vmax.f32 %v3858_v58, %v3859_v49 }
 0x3c3   :  { %2049 = vbcast.lane.b32.xlu1 %v7944_v30, 256  ;;  %v3903_v20 = vsel %vm70_vm0, %v2818_v43, -inf  ;;  %v7104_v43 = vmax.f32 %v3826_v9, %v3827_v44  ;;  %v3905_v47 = vsel %vm70_vm0, %v2819_v25, -inf  ;;  %v3907_v9 = vsel %vm70_vm0, %v2820_v23, -inf }
 0x3c4   :  { %v1809_v57 = vpop.permute.xlu0 %1808  ;;  %v3862_v50 = vmax.f32 %v3860_v22, %v3861_v26  ;;  %v3902_v26 = vmax.f32 %v3900_v4, %v3901_v42 }
 0x3c5   :  { %v1805_v61 = vpop.permute.xlu1 %1804  ;;  %v2825_v63 = vadd.f32 %v1809_v57, %v5206_v7 }
 0x3c6   :  { %2061 = vbcast.lane.b32.xlu0 %v7944_v30, 280  ;;  %v2824_v16 = vadd.f32 %v1805_v61, %v5200_v10  ;;  %v3882_v61 = vsel %vm70_vm0, %v2810_v31, -inf  ;;  %v3864_v13 = vmax.f32 %v3862_v50, %v3863_v45  ;;  %v3904_v0 = vmax.f32 %v3902_v26, %v3903_v20 }
 0x3c7   :  { %2057 = vbcast.lane.b32.xlu1 %v7944_v30, 272  ;;  %v3922_v49 = vsel %vm70_vm0, %v2825_v63, -inf  ;;  %v3883_v51 = vmax.f32 %v3881_v34, %v3882_v61  ;;  %v2799_v63 = vadd.f32 %v5254_v32, %v6933_v36  ;;  %v3884_v50 = vsel %vm70_vm0, %v2811_v35, -inf }
 0x3c8   :  { %v1817_v59 = vpop.permute.xlu0 %1816  ;;  %v3921_v58 = vsel %vm70_vm0, %v2824_v16, -inf  ;;  %v7112_v16 = vmax.f32 %v3847_v27, %v3848_v62  ;;  %v3886_v36 = vsel %vm70_vm0, %v2812_v1, -inf  ;;  %v3906_v42 = vmax.f32 %v3904_v0, %v3905_v47 }
 0x3c9   :  { %v1813_v52 = vpop.permute.xlu1 %1812  ;;  %v3923_v22 = vmax.f32 %v3921_v58, %v3922_v49  ;;  %v2827_v55 = vadd.f32 %v5204_v54, %v1817_v59  ;;  %v3885_v15 = vmax.f32 %v3883_v51, %v3884_v50  ;;  %v2813_v61 = vadd.f32 %v6979_v38, %v5281_v17 }
 0x3ca   :  { %2069 = vbcast.lane.b32.xlu0 %v7944_v30, 296  ;;  %v2826_v21 = vadd.f32 %v5196_v19, %v1813_v52  ;;  %v2821_v49 = vadd.f32 %v7014_v18, %v5281_v17  ;;  %v3867_v34 = vsel %vm70_vm0, %v2805_v40, -inf  ;;  %v2814_v38 = vadd.f32 %v5216_v3, %v6987_v5 }
 0x3cb   :  { %2065 = vbcast.lane.b32.xlu1 %v7944_v30, 288  ;;  %v3926_v44 = vsel %vm70_vm0, %v2827_v55, -inf  ;;  %v3908_v26 = vmax.f32 %v3906_v42, %v3907_v9  ;;  %v2822_v0 = vadd.f32 %v5216_v3, %v7029_v53  ;;  %v3888_v5 = vsel %vm70_vm0, %v2813_v61, -inf }
 0x3cc   :  { %v1825_v2 = vpop.permute.xlu0 %1824  ;;  %v3924_v48 = vsel %vm70_vm0, %v2826_v21, -inf  ;;  %v3909_v23 = vsel %vm70_vm0, %v2821_v49, -inf }
 0x3cd   :  { %v1821_v57 = vpop.permute.xlu1 %1820  ;;  %v3925_v24 = vmax.f32 %v3923_v22, %v3924_v48  ;;  %v2829_v48 = vadd.f32 %v1825_v2, %v5281_v17  ;;  %v3910_v40 = vmax.f32 %v3908_v26, %v3909_v23  ;;  %v3911_v42 = vsel %vm70_vm0, %v2822_v0, -inf }
 0x3ce   :  { %2077 = vbcast.lane.b32.xlu0 %v7944_v30, 312  ;;  %v2828_v56 = vadd.f32 %v1821_v57, %v5233_v37  ;;  %v2806_v57 = vadd.f32 %v5216_v3, %v6963_v60  ;;  %v3887_v60 = vmax.f32 %v3885_v15, %v3886_v36 }
 0x3cf   :  { %2073 = vbcast.lane.b32.xlu1 %v7944_v30, 304  ;;  %v3865_v30 = vsel %vm70_vm0, %v2804_v12, -inf  ;;  %v3850_v12 = vsel %vm70_vm0, %v2799_v63, -inf  ;;  %v3927_v20 = vmax.f32 %v3925_v24, %v3926_v44  ;;  %v3890_v24 = vsel %vm70_vm0, %v2814_v38, -inf  ;;  %v7946_v38 = vld [vmem:[#allocation29_spill] sm:$0xff] }
 0x3d0   :  { %v7102_v52 = vpop.permute.xlu0 %1832  ;;  %v3866_v59 = vmax.f32 %v3864_v13, %v3865_v30  ;;  %v3928_v58 = vsel %vm70_vm0, %v2828_v56, -inf  ;;  %v3869_v1 = vsel %vm70_vm0, %v2806_v57, -inf  ;;  %v3889_v63 = vmax.f32 %v3887_v60, %v3888_v5 }
 0x3d1   :  { %v1829_v31 = vpop.permute.xlu1 %1828  ;;  %v3929_v22 = vmax.f32 %v3927_v20, %v3928_v58  ;;  %v3930_v56 = vsel %vm70_vm0, %v2829_v48, -inf  ;;  %v2815_v44 = vadd.f32 %v5254_v32, %v6985_v8  ;;  %v3851_v57 = vmax.f32 %v7112_v16, %v3850_v12 }
 0x3d2   :  { %2088 = vbcast.lane.b32.xlu0 %v7945_v33, 264  ;;  %v3868_v25 = vmax.f32 %v3866_v59, %v3867_v34  ;;  %v2830_v2 = vadd.f32 %v5216_v3, %v1829_v31  ;;  %v2807_v31 = vadd.f32 %v5254_v32, %v6961_v14  ;;  %v3891_v61 = vmax.f32 %v3889_v63, %v3890_v24 }
 0x3d3   :  { %2084 = vbcast.lane.b32.xlu1 %v7945_v33, 256  ;;  %v2823_v14 = vadd.f32 %v5254_v32, %v7027_v46  ;;  %v3829_v46 = vsel %vm70_vm0, %v7054_v39, -inf  ;;  %v3852_v5 = vrot.slane %v3851_v57, 4 }
 0x3d4   :  { %v1844_v4 = vpop.permute.xlu0 %1843  ;;  %v3870_v9 = vmax.f32 %v3868_v25, %v3869_v1  ;;  %v3871_v34 = vsel %vm70_vm0, %v2807_v31, -inf }
 0x3d5   :  { %v1840_v21 = vpop.permute.xlu1 %1839  ;;  %v2833_v27 = vadd.f32 %v1844_v4, %v5206_v7  ;;  %v3931_v4 = vmax.f32 %v3929_v22, %v3930_v56  ;;  %v3913_v48 = vsel %vm70_vm0, %v2823_v14, -inf }
 0x3d6   :  { %v2832_v28 = vadd.f32 %v1840_v21, %v5200_v10  ;;  %2096 = vbcast.lane.b32.xlu0 %v7945_v33, 280  ;;  %v3872_v26 = vmax.f32 %v3870_v9, %v3871_v34 }
 0x3d7   :  { %2092 = vbcast.lane.b32.xlu1 %v7945_v33, 272  ;;  %v3943_v62 = vsel %vm70_vm0, %v2833_v27, -inf  ;;  %v3932_v27 = vsel %vm70_vm0, %v2830_v2, -inf }
 0x3d8   :  { %v3942_v45 = vsel %vm70_vm0, %v2832_v28, -inf  ;;  %v1852_v13 = vpop.permute.xlu0 %1851  ;;  %v3933_v60 = vmax.f32 %v3931_v4, %v3932_v27 }
 0x3d9   :  { %v1848_v35 = vpop.permute.xlu1 %1847  ;;  %v2835_v18 = vadd.f32 %v5204_v54, %v1852_v13  ;;  %v3944_v30 = vmax.f32 %v3942_v45, %v3943_v62  ;;  %v3912_v62 = vmax.f32 %v3910_v40, %v3911_v42 }
 0x3da   :  { %v2834_v51 = vadd.f32 %v5196_v19, %v1848_v35  ;;  %2104 = vbcast.lane.b32.xlu0 %v7945_v33, 296  ;;  %v3830_v35 = vmax.f32 %v7104_v43, %v3829_v46  ;;  %v3873_v43 = vrot.slane %v3872_v26, 4 }
 0x3db   :  { %2100 = vbcast.lane.b32.xlu1 %v7945_v33, 288  ;;  %v3947_v59 = vsel %vm70_vm0, %v2835_v18, -inf  ;;  %v3914_v0 = vmax.f32 %v3912_v62, %v3913_v48 }
 0x3dc   :  { %v3945_v55 = vsel %vm70_vm0, %v2834_v51, -inf  ;;  %v1860_v53 = vpop.permute.xlu0 %1859  ;;  %v3831_v40 = vrot.slane %v3830_v35, 4  ;;  %v3874_v4 = vmax.f32 %v3872_v26, %v3873_v43 }
 0x3dd   :  { %v3946_v50 = vmax.f32 %v3944_v30, %v3945_v55  ;;  %v1856_v47 = vpop.permute.xlu1 %1855  ;;  %v2837_v15 = vadd.f32 %v1860_v53, %v5281_v17  ;;  %v3915_v56 = vrot.slane %v3914_v0, 4 }
 0x3de   :  { %v2836_v36 = vadd.f32 %v1856_v47, %v5233_v37  ;;  %2112 = vbcast.lane.b32.xlu0 %v7945_v33, 312 }
 0x3df   :  { %v3948_v21 = vmax.f32 %v3946_v50, %v3947_v59  ;;  %2108 = vbcast.lane.b32.xlu1 %v7945_v33, 304  ;;  %v2831_v33 = vadd.f32 %v5254_v32, %v7102_v52  ;;  %v3951_v45 = vsel %vm70_vm0, %v2837_v15, -inf  ;;  %v3892_v52 = vsel %vm70_vm0, %v2815_v44, -inf }
 0x3e0   :  { %v3949_v28 = vsel %vm70_vm0, %v2836_v36, -inf  ;;  %v1868_v49 = vpop.permute.xlu0 %1867  ;;  %v3893_v25 = vmax.f32 %v3891_v61, %v3892_v52  ;;  %v3853_v36 = vmax.f32 %v3851_v57, %v3852_v5  ;;  %v3832_v44 = vmax.f32 %v3830_v35, %v3831_v40 }
 0x3e1   :  { %v3950_v20 = vmax.f32 %v3948_v21, %v3949_v28  ;;  %v1864_v58 = vpop.permute.xlu1 %1863  ;;  %v2839_v16 = vadd.f32 %v5254_v32, %v1868_v49  ;;  %v3934_v22 = vsel %vm70_vm0, %v2831_v33, -inf }
 0x3e2   :  { %v2838_v8 = vadd.f32 %v5216_v3, %v1864_v58  ;;  %2123 = vbcast.lane.b32.xlu0 %v7946_v38, 264  ;;  %v3935_v23 = vmax.f32 %v3933_v60, %v3934_v22  ;;  %v3894_v50 = vrot.slane %v3893_v25, 4  ;;  %v3854_v62 = vrot.slane %v3853_v36, 2 }
 0x3e3   :  { %v3952_v12 = vmax.f32 %v3950_v20, %v3951_v45  ;;  %2119 = vbcast.lane.b32.xlu1 %v7946_v38, 256  ;;  %v3955_v2 = vsel %vm70_vm0, %v2839_v16, -inf  ;;  %v3916_v20 = vmax.f32 %v3914_v0, %v3915_v56  ;;  %v3833_v16 = vrot.slane %v3832_v44, 2 }
 0x3e4   :  { %v3953_v13 = vsel %vm70_vm0, %v2838_v8, -inf  ;;  %v1879_v51 = vpop.permute.xlu0 %1878  ;;  %v3936_v31 = vrot.slane %v3935_v23, 4  ;;  %v3895_v27 = vmax.f32 %v3893_v25, %v3894_v50  ;;  %v3875_v8 = vrot.slane %v3874_v4, 2 }
 0x3e5   :  { %v3954_v18 = vmax.f32 %v3952_v12, %v3953_v13  ;;  %v1875_v1 = vpop.permute.xlu1 %1874  ;;  %v2841_v30 = vadd.f32 %v1879_v51, %v5206_v7  ;;  %v3917_v13 = vrot.slane %v3916_v20, 2 }
 0x3e6   :  { %v2840_v39 = vadd.f32 %v1875_v1, %v5200_v10  ;;  %2131 = vbcast.lane.b32.xlu0 %v7946_v38, 280  ;;  %v3937_v33 = vmax.f32 %v3935_v23, %v3936_v31  ;;  %v3896_v12 = vrot.slane %v3895_v27, 2  ;;  %v3876_v0 = vmax.f32 %v3874_v4, %v3875_v8 }
 0x3e7   :  { %2127 = vbcast.lane.b32.xlu1 %v7946_v38, 272  ;;  %v3956_v55 = vmax.f32 %v3954_v18, %v3955_v2  ;;  %v3964_v63 = vsel %vm70_vm0, %v2841_v30, -inf  ;;  %v3855_v18 = vmax.f32 %v3853_v36, %v3854_v62 }
 0x3e8   :  { %v3963_v24 = vsel %vm70_vm0, %v2840_v39, -inf  ;;  %v1887_v53 = vpop.permute.xlu0 %1886  ;;  %v3938_v51 = vrot.slane %v3937_v33, 2  ;;  %v3834_v39 = vmax.f32 %v3832_v44, %v3833_v16  ;;  %v3897_v5 = vmax.f32 %v3895_v27, %v3896_v12 }
 0x3e9   :  { %v1883_v47 = vpop.permute.xlu1 %1882  ;;  %v2843_v59 = vadd.f32 %v5204_v54, %v1887_v53  ;;  %v3965_v42 = vmax.f32 %v3963_v24, %v3964_v63  ;;  %v3957_v21 = vrot.slane %v3956_v55, 4  ;;  %v3856_v24 = vrot.slane %v3855_v18, 1 }
 0x3ea   :  { %v2842_v15 = vadd.f32 %v5196_v19, %v1883_v47  ;;  %2139 = vbcast.lane.b32.xlu0 %v7946_v38, 296  ;;  %v3939_v40 = vmax.f32 %v3937_v33, %v3938_v51  ;;  %v3877_v53 = vrot.slane %v3876_v0, 1  ;;  %v3835_v56 = vrot.slane %v3834_v39, 1 }
 0x3eb   :  { %2135 = vbcast.lane.b32.xlu1 %v7946_v38, 288  ;;  %v3968_v49 = vsel %vm70_vm0, %v2843_v59, -inf  ;;  %v3958_v34 = vmax.f32 %v3956_v55, %v3957_v21  ;;  %v3918_v55 = vmax.f32 %v3916_v20, %v3917_v13  ;;  %v3898_v59 = vrot.slane %v3897_v5, 1 }
 0x3ec   :  { %v3966_v9 = vsel %vm70_vm0, %v2842_v15, -inf  ;;  %v1895_v61 = vpop.permute.xlu0 %1894  ;;  %v3857_v4 = vmax.f32 %v3855_v18, %v3856_v24  ;;  %v3878_v44 = vmax.f32 %v3876_v0, %v3877_v53 }
 0x3ed   :  { %v3967_v28 = vmax.f32 %v3965_v42, %v3966_v9  ;;  %v1891_v14 = vpop.permute.xlu1 %1890  ;;  %v2845_v57 = vadd.f32 %v1895_v61, %v5281_v17  ;;  %v3959_v22 = vrot.slane %v3958_v34, 2  ;;  %v3919_v42 = vrot.slane %v3918_v55, 1 }
 0x3ee   :  { %v2844_v58 = vadd.f32 %v1891_v14, %v5233_v37  ;;  %2147 = vbcast.lane.b32.xlu0 %v7946_v38, 312  ;;  %v3940_v9 = vrot.slane %v3939_v40, 1  ;;  %v3899_v61 = vmax.f32 %v3897_v5, %v3898_v59  ;;  %v7950_v59 = vld [vmem:[#allocation44_spill] sm:$0xff] }
 0x3ef   :  { %v3969_v45 = vmax.f32 %v3967_v28, %v3968_v49  ;;  %2143 = vbcast.lane.b32.xlu1 %v7946_v38, 304  ;;  %v3972_v35 = vsel %vm70_vm0, %v2845_v57, -inf  ;;  %v7947_v38 = vld [vmem:[#allocation30_spill] sm:$0xff]  ;;  %v3960_v47 = vmax.f32 %v3958_v34, %v3959_v22  ;;  %v3836_v28 = vmax.f32 %v3834_v39, %v3835_v56 }
 0x3f0   :  { %v3970_v60 = vsel %vm70_vm0, %v2844_v58, -inf  ;;  %v1903_v26 = vpop.permute.xlu0 %1902  ;;  %v3920_v57 = vmax.f32 %v3918_v55, %v3919_v42  ;;  %v7228_v58 = vpop.f32.mrf.mxu1  ;;  %v3941_v62 = vmax.f32 %v3939_v40, %v3940_v9 }
 0x3f1   :  { %v3971_v46 = vmax.f32 %v3969_v45, %v3970_v60  ;;  %v1899_v52 = vpop.permute.xlu1 %1898  ;;  %v2847_v25 = vadd.f32 %v5254_v32, %v1903_v26  ;;  %v3961_v27 = vrot.slane %v3960_v47, 1  ;;  %v4428_v45 = vsel %vm4386_vm9, %v3857_v4, %v3836_v28  ;;  %v7951_v4 = vld [vmem:[#allocation45_spill] sm:$0xff] }
 0x3f2   :  { %v2846_v48 = vadd.f32 %v5216_v3, %v1899_v52  ;;  %2158 = vbcast.lane.b32.xlu0 %v7947_v38, 264  ;;  %v4429_v34 = vsel %vm4388_vm10, %v3878_v44, %v4428_v45  ;;  %v7948_v52 = vld [vmem:[#allocation42_spill] sm:$0xff] }
 0x3f3   :  { %v3973_v1 = vmax.f32 %v3971_v46, %v3972_v35  ;;  %2154 = vbcast.lane.b32.xlu1 %v7947_v38, 256  ;;  %v3976_v63 = vsel %vm70_vm0, %v2847_v25, -inf  ;;  %v3962_v8 = vmax.f32 %v3960_v47, %v3961_v27  ;;  %v4430_v46 = vsel %vm4390_vm11, %v3899_v61, %v4429_v34  ;;  %v4522_v25 = vpop.f32.mrf.mxu1  ;;  %v7952_v44 = vld [vmem:[#allocation46_spill] sm:$0xff] }
 0x3f4   :  { %v3974_v30 = vsel %vm70_vm0, %v2846_v48, -inf  ;;  %v7209_v2 = vpop.permute.xlu0 %1913  ;;  %v4431_v26 = vsel %vm4392_vm12, %v3920_v57, %v4430_v46  ;;  %v7953_v57 = vld [vmem:[#allocation47_spill] sm:$0xff]  ;;  %v7954_v46 = vld [vmem:[#allocation48_spill] sm:$0xff] }
 0x3f5   :  { %v3975_v23 = vmax.f32 %v3973_v1, %v3974_v30  ;;  %v7211_v43 = vpop.permute.xlu1 %1909  ;;  %v4432_v35 = vsel %vm4394_vm13, %v3941_v62, %v4431_v26  ;;  %v2849_v34 = vadd.f32 %v7209_v2, %v5206_v7 }
 0x3f6   :  { %2166 = vbcast.lane.b32.xlu0 %v7947_v38, 280  ;;  %v4433_v48 = vsel %vm4396_vm14, %v3962_v8, %v4432_v35 }
 0x3f7   :  { %v3977_v50 = vmax.f32 %v3975_v23, %v3976_v63  ;;  %2162 = vbcast.lane.b32.xlu1 %v7947_v38, 272  ;;  %v3985_v35 = vsel %vm70_vm0, %v2849_v34, -inf }
 0x3f8   :  { %v7216_v36 = vpop.permute.xlu0 %1921 }
 0x3f9   :  { %v3978_v15 = vrot.slane %v3977_v50, 4  ;;  %v7218_v31 = vpop.permute.xlu1 %1917 }
 0x3fa   :  { %2174 = vbcast.lane.b32.xlu0 %v7947_v38, 296  ;;  %v2850_v26 = vadd.f32 %v5196_v19, %v7218_v31 }
 0x3fb   :  { %v3979_v21 = vmax.f32 %v3977_v50, %v3978_v15  ;;  %2170 = vbcast.lane.b32.xlu1 %v7947_v38, 288 }
 0x3fc   :  { %v7222_v14 = vpop.permute.xlu0 %1929  ;;  %v3987_v2 = vsel %vm70_vm0, %v2850_v26, -inf }
 0x3fd   :  { %v7224_v20 = vpop.permute.xlu1 %1925  ;;  %v3980_v49 = vrot.slane %v3979_v21, 2 }
 0x3fe   :  { %2182 = vbcast.lane.b32.xlu0 %v7947_v38, 312 }
 0x3ff   :  { %2178 = vbcast.lane.b32.xlu1 %v7947_v38, 304  ;;  %v3981_v33 = vmax.f32 %v3979_v21, %v3980_v49 }
 0x400   :  { %v7232_v60 = vpop.permute.xlu0 %1937 }
 0x401   :  { %v7234_v16 = vpop.permute.xlu1 %1933  ;;  %v3982_v12 = vrot.slane %v3981_v33, 1 }
 0x402   :  { %2193 = vbcast.lane.b32.xlu0 %v7948_v52, 264 }
 0x403   :  { %2189 = vbcast.lane.b32.xlu1 %v7948_v52, 256  ;;  %v3983_v13 = vmax.f32 %v3981_v33, %v3982_v12  ;;  %v2848_v12 = vadd.f32 %v7211_v43, %v5200_v10 }
 0x404   :  { %v7242_v18 = vpop.permute.xlu0 %1948 }
 0x405   :  { %v7244_v51 = vpop.permute.xlu1 %1944  ;;  %v4434_v1 = vsel %vm4398_vm15, %v3983_v13, %v4433_v48  ;;  %v2857_v43 = vadd.f32 %v7242_v18, %v5206_v7  ;;  %v2852_v18 = vadd.f32 %v7224_v20, %v5233_v37 }
 0x406   :  { %v4523_v38 = vadd.f32 %v4522_v25, %v4434_v1  ;;  %2201 = vbcast.lane.b32.xlu0 %v7948_v52, 280  ;;  %v3984_v25 = vsel %vm70_vm0, %v2848_v12, -inf  ;;  %v2856_v48 = vadd.f32 %v7244_v51, %v5200_v10 }
 0x407   :  { %2197 = vbcast.lane.b32.xlu1 %v7948_v52, 272  ;;  %v3986_v1 = vmax.f32 %v3984_v25, %v3985_v35  ;;  %v4006_v51 = vsel %vm70_vm0, %v2857_v43, -inf  ;;  %v3991_v20 = vsel %vm70_vm0, %v2852_v18, -inf }
 0x408   :  { %v4546_v0 = vadd.f32 %v6903_v29, %v4523_v38  ;;  %v7250_v22 = vpop.permute.xlu0 %1956  ;;  %v4674_v29 = vld [vmem:[%s7794_s1 + $0x28] sm:$0xff] }
 0x409   :  { %v7252_v30 = vpop.permute.xlu1 %1952  ;;  %v2859_v35 = vadd.f32 %v5204_v54, %v7250_v22 }
 0x40a   :  { %v4554_v39 = vmax.f32 %v4546_v0, 0.0  ;;  %2209 = vbcast.lane.b32.xlu0 %v7948_v52, 296  ;;  %v2851_v0 = vadd.f32 %v5204_v54, %v7216_v36 }
 0x40b   :  { %2205 = vbcast.lane.b32.xlu1 %v7948_v52, 288  ;;  %v4010_v22 = vsel %vm70_vm0, %v2859_v35, -inf }
 0x40c   :  { %v4569_v5 = vmul.f32 %v6915_v41, %v4554_v39  ;;  %v7257_v23 = vpop.permute.xlu0 %1964  ;;  %v7949_v41 = vld [vmem:[#allocation43_spill] sm:$0xff]  ;;  %v2858_v39 = vadd.f32 %v5196_v19, %v7252_v30  ;;  %v3989_v36 = vsel %vm70_vm0, %v2851_v0, -inf }
 0x40d   :  { %v7259_v55 = vpop.permute.xlu1 %1960 }
 0x40e   :  { %v4584_v63 = vadd.f32 %v6925_v6, %v4569_v5  ;;  %2217 = vbcast.lane.b32.xlu0 %v7948_v52, 312  ;;  %v3988_v5 = vmax.f32 %v3986_v1, %v3987_v2  ;;  %v4008_v30 = vsel %vm70_vm0, %v2858_v39, -inf  ;;  %v2860_v1 = vadd.f32 %v7259_v55, %v5233_v37 }
 0x40f   :  { %2213 = vbcast.lane.b32.xlu1 %v7948_v52, 304  ;;  %v2861_v55 = vadd.f32 %v7257_v23, %v5281_v17 }
 0x410   :  { %v4592_v24 = vadd.f32 %v4674_v29, %v4584_v63  ;;  %v7267_v40 = vpop.permute.xlu0 %1972  ;;  %v7955_v63 = vld [vmem:[#allocation49_spill] sm:$0xff]  ;;  %v4005_v29 = vsel %vm70_vm0, %v2856_v48, -inf  ;;  %v3990_v12 = vmax.f32 %v3988_v5, %v3989_v36  ;;  %v2853_v48 = vadd.f32 %v7222_v14, %v5281_v17 }
 0x411   :  { %v7269_v50 = vpop.permute.xlu1 %1968  ;;  %v4007_v26 = vmax.f32 %v4005_v29, %v4006_v51  ;;  %v2854_v14 = vadd.f32 %v5216_v3, %v7234_v16  ;;  %v4012_v36 = vsel %vm70_vm0, %v2860_v1, -inf }
 0x412   :  { %4600 = vst.msk [vmem:[%s7799_s8 + $0x28] sm:$0xff] %vm70_vm0, %v4592_v24  ;;  %2228 = vbcast.lane.b32.xlu0 %v7949_v41, 264  ;;  %v3992_v5 = vmax.f32 %v3990_v12, %v3991_v20 }
 0x413   :  { %2224 = vbcast.lane.b32.xlu1 %v7949_v41, 256  ;;  %v4009_v25 = vmax.f32 %v4007_v26, %v4008_v30 }
 0x414   :  { %v7277_v6 = vpop.permute.xlu0 %1983 }
 0x415   :  { %v7279_v53 = vpop.permute.xlu1 %1979  ;;  %v2865_v0 = vadd.f32 %v7277_v6, %v5206_v7  ;;  %v4011_v6 = vmax.f32 %v4009_v25, %v4010_v22 }
 0x416   :  { %2236 = vbcast.lane.b32.xlu0 %v7949_v41, 280  ;;  %v2864_v39 = vadd.f32 %v7279_v53, %v5200_v10  ;;  %v3993_v53 = vsel %vm70_vm0, %v2853_v48, -inf  ;;  %v3995_v48 = vsel %vm70_vm0, %v2854_v14, -inf }
 0x417   :  { %2232 = vbcast.lane.b32.xlu1 %v7949_v41, 272  ;;  %v4027_v30 = vsel %vm70_vm0, %v2865_v0, -inf  ;;  %v3994_v26 = vmax.f32 %v3992_v5, %v3993_v53  ;;  %v4013_v1 = vmax.f32 %v4011_v6, %v4012_v36 }
 0x418   :  { %v7283_v47 = vpop.permute.xlu0 %1991  ;;  %v4026_v12 = vsel %vm70_vm0, %v2864_v39, -inf }
 0x419   :  { %v7285_v56 = vpop.permute.xlu1 %1987  ;;  %v4028_v0 = vmax.f32 %v4026_v12, %v4027_v30 }
 0x41a   :  { %2263 = vbcast.lane.b32.xlu0 %v7950_v59, 264  ;;  %v2866_v18 = vadd.f32 %v5196_v19, %v7285_v56  ;;  %v2855_v56 = vadd.f32 %v5254_v32, %v7232_v60  ;;  %v4014_v60 = vsel %vm70_vm0, %v2861_v55, -inf }
 0x41b   :  { %2259 = vbcast.lane.b32.xlu1 %v7950_v59, 256  ;;  %v4015_v53 = vmax.f32 %v4013_v1, %v4014_v60 }
 0x41c   :  { %v7289_v15 = vpop.permute.xlu0 %1999  ;;  %v4029_v23 = vsel %vm70_vm0, %v2866_v18, -inf }
 0x41d   :  { %v7291_v42 = vpop.permute.xlu1 %1995  ;;  %v4030_v14 = vmax.f32 %v4028_v0, %v4029_v23 }
 0x41e   :  { %2298 = vbcast.lane.b32.xlu0 %v7951_v4, 264 }
 0x41f   :  { %2294 = vbcast.lane.b32.xlu1 %v7951_v4, 256 }
 0x420   :  { %v7295_v21 = vpop.permute.xlu0 %2007 }
 0x421   :  { %v7297_v9 = vpop.permute.xlu1 %2003 }
 0x422   :  { %2329 = vbcast.lane.b32.xlu0 %v7952_v44, 256 }
 0x423   :  { %2267 = vbcast.lane.b32.xlu1 %v7950_v59, 272 }
 0x424   :  { %v7301_v27 = vpop.permute.xlu0 %2018 }
 0x425   :  { %v7303_v28 = vpop.permute.xlu1 %2014  ;;  %v2873_v16 = vadd.f32 %v7301_v27, %v5206_v7 }
 0x426   :  { %2302 = vbcast.lane.b32.xlu0 %v7951_v4, 272  ;;  %v2872_v20 = vadd.f32 %v7303_v28, %v5200_v10 }
 0x427   :  { %2333 = vbcast.lane.b32.xlu1 %v7952_v44, 264  ;;  %v4048_v55 = vsel %vm70_vm0, %v2873_v16, -inf }
 0x428   :  { %v7307_v61 = vpop.permute.xlu0 %2026 }
 0x429   :  { %v7309_v49 = vpop.permute.xlu1 %2022 }
 0x42a   :  { %2368 = vbcast.lane.b32.xlu0 %v7953_v57, 264  ;;  %v2874_v5 = vadd.f32 %v5196_v19, %v7309_v49  ;;  %v4047_v49 = vsel %vm70_vm0, %v2872_v20, -inf }
 0x42b   :  { %2364 = vbcast.lane.b32.xlu1 %v7953_v57, 256 }
 0x42c   :  { %v7313_v62 = vpop.permute.xlu0 %2034  ;;  %v4050_v12 = vsel %vm70_vm0, %v2874_v5, -inf }
 0x42d   :  { %v7315_v33 = vpop.permute.xlu1 %2030 }
 0x42e   :  { %2337 = vbcast.lane.b32.xlu0 %v7952_v44, 272 }
 0x42f   :  { %2271 = vbcast.lane.b32.xlu1 %v7950_v59, 280 }
 0x430   :  { %v7319_v45 = vpop.permute.xlu0 %2042 }
 0x431   :  { %v7321_v8 = vpop.permute.xlu1 %2038 }
 0x432   :  { %2403 = vbcast.lane.b32.xlu0 %v7954_v46, 264 }
 0x433   :  { %2399 = vbcast.lane.b32.xlu1 %v7954_v46, 256 }
 0x434   :  { %v2054_v52 = vpop.permute.xlu0 %2053 }
 0x435   :  { %v2050_v13 = vpop.permute.xlu1 %2049  ;;  %v2881_v35 = vadd.f32 %v2054_v52, %v5206_v7  ;;  %v2862_v52 = vadd.f32 %v5216_v3, %v7269_v50  ;;  %v3997_v50 = vsel %vm70_vm0, %v2855_v56, -inf  ;;  %v4049_v56 = vmax.f32 %v4047_v49, %v4048_v55 }
 0x436   :  { %2306 = vbcast.lane.b32.xlu0 %v7951_v4, 280  ;;  %v2880_v25 = vadd.f32 %v2050_v13, %v5200_v10  ;;  %v2867_v13 = vadd.f32 %v5204_v54, %v7283_v47  ;;  %v2868_v47 = vadd.f32 %v7291_v42, %v5233_v37  ;;  %v2869_v49 = vadd.f32 %v7289_v15, %v5281_v17 }
 0x437   :  { %2240 = vbcast.lane.b32.xlu1 %v7949_v41, 288  ;;  %v4051_v0 = vmax.f32 %v4049_v56, %v4050_v12 }
 0x438   :  { %v7340_v31 = vpop.permute.xlu0 %2061  ;;  %v4068_v6 = vsel %vm70_vm0, %v2880_v25, -inf  ;;  %v4031_v25 = vsel %vm70_vm0, %v2867_v13, -inf  ;;  %v4033_v13 = vsel %vm70_vm0, %v2868_v47, -inf }
 0x439   :  { %v2058_v38 = vpop.permute.xlu1 %2057  ;;  %v4032_v42 = vmax.f32 %v4030_v14, %v4031_v25  ;;  %v2883_v60 = vadd.f32 %v5204_v54, %v7340_v31  ;;  %v2863_v14 = vadd.f32 %v5254_v32, %v7267_v40 }
 0x43a   :  { %2434 = vbcast.lane.b32.xlu0 %v7955_v63, 256  ;;  %v2882_v22 = vadd.f32 %v5196_v19, %v2058_v38  ;;  %v4069_v38 = vsel %vm70_vm0, %v2881_v35, -inf  ;;  %v4016_v35 = vsel %vm70_vm0, %v2862_v52, -inf }
 0x43b   :  { %2372 = vbcast.lane.b32.xlu1 %v7953_v57, 272  ;;  %v7445_v55 = vmax.f32 %v4015_v53, %v4016_v35 }
 0x43c   :  { %v7352_v24 = vpop.permute.xlu0 %2069  ;;  %v4071_v16 = vsel %vm70_vm0, %v2882_v22, -inf }
 0x43d   :  { %v7354_v34 = vpop.permute.xlu1 %2065  ;;  %v2885_v25 = vadd.f32 %v7352_v24, %v5281_v17 }
 0x43e   :  { %2275 = vbcast.lane.b32.xlu0 %v7950_v59, 288 }
 0x43f   :  { %2438 = vbcast.lane.b32.xlu1 %v7955_v63, 264 }
 0x440   :  { %v7363_v2 = vpop.permute.xlu0 %2077 }
 0x441   :  { %v7365_v43 = vpop.permute.xlu1 %2073 }
 0x442   :  { %2407 = vbcast.lane.b32.xlu0 %v7954_v46, 272 }
 0x443   :  { %2341 = vbcast.lane.b32.xlu1 %v7952_v44, 280 }
 0x444   :  { %v2089_v51 = vpop.permute.xlu0 %2088 }
 0x445   :  { %v2085_v29 = vpop.permute.xlu1 %2084  ;;  %v2889_v18 = vadd.f32 %v2089_v51, %v5206_v7 }
 0x446   :  { %2310 = vbcast.lane.b32.xlu0 %v7951_v4, 288  ;;  %v2888_v28 = vadd.f32 %v2085_v29, %v5200_v10  ;;  %v3996_v29 = vmax.f32 %v3994_v26, %v3995_v48  ;;  %v4070_v26 = vmax.f32 %v4068_v6, %v4069_v38  ;;  %v2875_v48 = vadd.f32 %v5204_v54, %v7307_v61 }
 0x447   :  { %2244 = vbcast.lane.b32.xlu1 %v7949_v41, 296  ;;  %v4090_v23 = vsel %vm70_vm0, %v2889_v18, -inf  ;;  %v2884_v61 = vadd.f32 %v7354_v34, %v5233_v37  ;;  %v4073_v6 = vsel %vm70_vm0, %v2883_v60, -inf }
 0x448   :  { %v2097_v27 = vpop.permute.xlu0 %2096  ;;  %v4089_v20 = vsel %vm70_vm0, %v2888_v28, -inf  ;;  %v4072_v5 = vmax.f32 %v4070_v26, %v4071_v16  ;;  %v7437_v52 = vmax.f32 %v3996_v29, %v3997_v50  ;;  %v4052_v38 = vsel %vm70_vm0, %v2875_v48, -inf }
 0x449   :  { %v2093_v39 = vpop.permute.xlu1 %2092  ;;  %v4091_v22 = vmax.f32 %v4089_v20, %v4090_v23  ;;  %v2891_v31 = vadd.f32 %v5204_v54, %v2097_v27  ;;  %v4034_v27 = vmax.f32 %v4032_v42, %v4033_v13  ;;  %v4075_v47 = vsel %vm70_vm0, %v2884_v61, -inf }
 0x44a   :  { %2442 = vbcast.lane.b32.xlu0 %v7955_v63, 272  ;;  %v2890_v51 = vadd.f32 %v5196_v19, %v2093_v39  ;;  %v2876_v39 = vadd.f32 %v7315_v33, %v5233_v37  ;;  %v4074_v50 = vmax.f32 %v4072_v5, %v4073_v6  ;;  %v4018_v23 = vsel %vm70_vm0, %v2863_v14, -inf }
 0x44b   :  { %2376 = vbcast.lane.b32.xlu1 %v7953_v57, 280  ;;  %v4094_v12 = vsel %vm70_vm0, %v2891_v31, -inf  ;;  %v2877_v20 = vadd.f32 %v7313_v62, %v5281_v17  ;;  %v4035_v48 = vsel %vm70_vm0, %v2869_v49, -inf  ;;  %v2878_v62 = vadd.f32 %v5216_v3, %v7321_v8 }
 0x44c   :  { %v2105_v36 = vpop.permute.xlu0 %2104  ;;  %v4092_v1 = vsel %vm70_vm0, %v2890_v51, -inf  ;;  %v4053_v51 = vmax.f32 %v4051_v0, %v4052_v38  ;;  %v4054_v40 = vsel %vm70_vm0, %v2876_v39, -inf  ;;  %v4076_v60 = vmax.f32 %v4074_v50, %v4075_v47 }
 0x44d   :  { %v2101_v30 = vpop.permute.xlu1 %2100  ;;  %v4093_v33 = vmax.f32 %v4091_v22, %v4092_v1  ;;  %v4036_v39 = vmax.f32 %v4034_v27, %v4035_v48  ;;  %v2893_v5 = vadd.f32 %v2105_v36, %v5281_v17  ;;  %v2886_v61 = vadd.f32 %v5216_v3, %v7365_v43 }
 0x44e   :  { %2345 = vbcast.lane.b32.xlu0 %v7952_v44, 288  ;;  %v2892_v34 = vadd.f32 %v2101_v30, %v5233_v37  ;;  %v2870_v30 = vadd.f32 %v5216_v3, %v7297_v9  ;;  %v4055_v9 = vmax.f32 %v4053_v51, %v4054_v40  ;;  %v4056_v8 = vsel %vm70_vm0, %v2877_v20, -inf }
 0x44f   :  { %2279 = vbcast.lane.b32.xlu1 %v7950_v59, 296  ;;  %v4095_v35 = vmax.f32 %v4093_v33, %v4094_v12  ;;  %v4077_v33 = vsel %vm70_vm0, %v2885_v25, -inf  ;;  %v4058_v6 = vsel %vm70_vm0, %v2878_v62, -inf  ;;  %v4098_v40 = vsel %vm70_vm0, %v2893_v5, -inf }
 0x450   :  { %v7435_v18 = vpop.permute.xlu0 %2112  ;;  %v4096_v56 = vsel %vm70_vm0, %v2892_v34, -inf  ;;  %v4037_v13 = vsel %vm70_vm0, %v2870_v30, -inf  ;;  %v4057_v38 = vmax.f32 %v4055_v9, %v4056_v8  ;;  %v4078_v34 = vmax.f32 %v4076_v60, %v4077_v33 }
 0x451   :  { %v2109_v28 = vpop.permute.xlu1 %2108  ;;  %v4097_v31 = vmax.f32 %v4095_v35, %v4096_v56  ;;  %v4079_v47 = vsel %vm70_vm0, %v2886_v61, -inf  ;;  %v2879_v30 = vadd.f32 %v5254_v32, %v7319_v45  ;;  %v4019_v25 = vmax.f32 %v7445_v55, %v4018_v23 }
 0x452   :  { %2248 = vbcast.lane.b32.xlu0 %v7949_v41, 304  ;;  %v2894_v36 = vadd.f32 %v5216_v3, %v2109_v28  ;;  %v2871_v28 = vadd.f32 %v5254_v32, %v7295_v21  ;;  %v4059_v56 = vmax.f32 %v4057_v38, %v4058_v6  ;;  %v2887_v21 = vadd.f32 %v5254_v32, %v7363_v2 }
 0x453   :  { %2411 = vbcast.lane.b32.xlu1 %v7954_v46, 280  ;;  %v4099_v12 = vmax.f32 %v4097_v31, %v4098_v40  ;;  %v4080_v9 = vmax.f32 %v4078_v34, %v4079_v47  ;;  %v2895_v62 = vadd.f32 %v5254_v32, %v7435_v18  ;;  %v4020_v18 = vrot.slane %v4019_v25, 4 }
 0x454   :  { %v2124_v29 = vpop.permute.xlu0 %2123  ;;  %v4100_v20 = vsel %vm70_vm0, %v2894_v36, -inf }
 0x455   :  { %v2120_v53 = vpop.permute.xlu1 %2119  ;;  %v2897_v16 = vadd.f32 %v2124_v29, %v5206_v7  ;;  %v4102_v8 = vsel %vm70_vm0, %v2895_v62, -inf }
 0x456   :  { %v2896_v15 = vadd.f32 %v2120_v53, %v5200_v10  ;;  %2380 = vbcast.lane.b32.xlu0 %v7953_v57, 288 }
 0x457   :  { %2314 = vbcast.lane.b32.xlu1 %v7951_v4, 296  ;;  %v4111_v26 = vsel %vm70_vm0, %v2897_v16, -inf }
 0x458   :  { %v4110_v42 = vsel %vm70_vm0, %v2896_v15, -inf  ;;  %v2132_v1 = vpop.permute.xlu0 %2131  ;;  %v4038_v15 = vmax.f32 %v4036_v39, %v4037_v13  ;;  %v4060_v39 = vsel %vm70_vm0, %v2879_v30, -inf }
 0x459   :  { %v2128_v0 = vpop.permute.xlu1 %2127  ;;  %v2899_v24 = vadd.f32 %v5204_v54, %v2132_v1  ;;  %v4112_v14 = vmax.f32 %v4110_v42, %v4111_v26  ;;  %v4039_v1 = vsel %vm70_vm0, %v2871_v28, -inf }
 0x45a   :  { %v2898_v22 = vadd.f32 %v5196_v19, %v2128_v0  ;;  %2283 = vbcast.lane.b32.xlu0 %v7950_v59, 304  ;;  %v4101_v0 = vmax.f32 %v4099_v12, %v4100_v20  ;;  %v4040_v2 = vmax.f32 %v4038_v15, %v4039_v1 }
 0x45b   :  { %2446 = vbcast.lane.b32.xlu1 %v7955_v63, 280  ;;  %v4115_v50 = vsel %vm70_vm0, %v2899_v24, -inf  ;;  %v4061_v24 = vmax.f32 %v4059_v56, %v4060_v39 }
 0x45c   :  { %v4113_v49 = vsel %vm70_vm0, %v2898_v22, -inf  ;;  %v2140_v43 = vpop.permute.xlu0 %2139  ;;  %v4081_v22 = vsel %vm70_vm0, %v2887_v21, -inf  ;;  %v4041_v6 = vrot.slane %v4040_v2, 4 }
 0x45d   :  { %v4114_v27 = vmax.f32 %v4112_v14, %v4113_v49  ;;  %v2136_v51 = vpop.permute.xlu1 %2135  ;;  %v2901_v29 = vadd.f32 %v2140_v43, %v5281_v17  ;;  %v4082_v14 = vmax.f32 %v4080_v9, %v4081_v22  ;;  %v4103_v49 = vmax.f32 %v4101_v0, %v4102_v8 }
 0x45e   :  { %v2900_v53 = vadd.f32 %v2136_v51, %v5233_v37  ;;  %2415 = vbcast.lane.b32.xlu0 %v7954_v46, 288  ;;  %v4021_v51 = vmax.f32 %v4019_v25, %v4020_v18  ;;  %v4062_v40 = vrot.slane %v4061_v24, 4  ;;  %v4042_v30 = vmax.f32 %v4040_v2, %v4041_v6 }
 0x45f   :  { %v4116_v16 = vmax.f32 %v4114_v27, %v4115_v50  ;;  %2349 = vbcast.lane.b32.xlu1 %v7952_v44, 296  ;;  %v4119_v60 = vsel %vm70_vm0, %v2901_v29, -inf }
 0x460   :  { %v4117_v35 = vsel %vm70_vm0, %v2900_v53, -inf  ;;  %v2148_v42 = vpop.permute.xlu0 %2147  ;;  %v4083_v53 = vrot.slane %v4082_v14, 4  ;;  %v4022_v25 = vrot.slane %v4021_v51, 2  ;;  %v4063_v56 = vmax.f32 %v4061_v24, %v4062_v40 }
 0x461   :  { %v4118_v26 = vmax.f32 %v4116_v16, %v4117_v35  ;;  %v2144_v48 = vpop.permute.xlu1 %2143  ;;  %v2903_v55 = vadd.f32 %v5254_v32, %v2148_v42  ;;  %v4104_v16 = vrot.slane %v4103_v49, 4 }
 0x462   :  { %v2902_v45 = vadd.f32 %v5216_v3, %v2144_v48  ;;  %2318 = vbcast.lane.b32.xlu0 %v7951_v4, 304  ;;  %v4084_v48 = vmax.f32 %v4082_v14, %v4083_v53  ;;  %v4064_v2 = vrot.slane %v4063_v56, 2 }
 0x463   :  { %v4120_v23 = vmax.f32 %v4118_v26, %v4119_v60  ;;  %2252 = vbcast.lane.b32.xlu1 %v7949_v41, 312  ;;  %v3999_v41 = vrot.slane %v7437_v52, 4  ;;  %v4123_v38 = vsel %vm70_vm0, %v2903_v55, -inf }
 0x464   :  { %v4121_v5 = vsel %vm70_vm0, %v2902_v45, -inf  ;;  %v2159_v61 = vpop.permute.xlu0 %2158  ;;  %v4105_v45 = vmax.f32 %v4103_v49, %v4104_v16  ;;  %v4085_v24 = vrot.slane %v4084_v48, 2  ;;  %v4065_v49 = vmax.f32 %v4063_v56, %v4064_v2 }
 0x465   :  { %v4122_v13 = vmax.f32 %v4120_v23, %v4121_v5  ;;  %v2155_v31 = vpop.permute.xlu1 %2154  ;;  %v2905_v33 = vadd.f32 %v2159_v61, %v5206_v7  ;;  %v4000_v12 = vmax.f32 %v7437_v52, %v3999_v41  ;;  %v4023_v23 = vmax.f32 %v4021_v51, %v4022_v25 }
 0x466   :  { %v2904_v36 = vadd.f32 %v2155_v31, %v5200_v10  ;;  %2450 = vbcast.lane.b32.xlu0 %v7955_v63, 288 }
 0x467   :  { %2384 = vbcast.lane.b32.xlu1 %v7953_v57, 296  ;;  %v4124_v34 = vmax.f32 %v4122_v13, %v4123_v38  ;;  %v4132_v27 = vsel %vm70_vm0, %v2905_v33, -inf  ;;  %v4001_v60 = vrot.slane %v4000_v12, 2  ;;  %v4024_v41 = vrot.slane %v4023_v23, 1 }
 0x468   :  { %v4131_v43 = vsel %vm70_vm0, %v2904_v36, -inf  ;;  %v2167_v50 = vpop.permute.xlu0 %2166 }
 0x469   :  { %v2163_v29 = vpop.permute.xlu1 %2162  ;;  %v2907_v28 = vadd.f32 %v5204_v54, %v2167_v50  ;;  %v4133_v15 = vmax.f32 %v4131_v43, %v4132_v27  ;;  %v4125_v20 = vrot.slane %v4124_v34, 4  ;;  %v4002_v31 = vmax.f32 %v4000_v12, %v4001_v60 }
 0x46a   :  { %v2906_v47 = vadd.f32 %v5196_v19, %v2163_v29  ;;  %2353 = vbcast.lane.b32.xlu0 %v7952_v44, 304  ;;  %v4086_v27 = vmax.f32 %v4084_v48, %v4085_v24 }
 0x46b   :  { %2287 = vbcast.lane.b32.xlu1 %v7950_v59, 312  ;;  %v4136_v9 = vsel %vm70_vm0, %v2907_v28, -inf  ;;  %v4043_v59 = vrot.slane %v4042_v30, 2  ;;  %v4126_v0 = vmax.f32 %v4124_v34, %v4125_v20  ;;  %v4003_v50 = vrot.slane %v4002_v31, 1 }
 0x46c   :  { %v4134_v35 = vsel %vm70_vm0, %v2906_v47, -inf  ;;  %v2175_v26 = vpop.permute.xlu0 %2174 }
 0x46d   :  { %v4135_v21 = vmax.f32 %v4133_v15, %v4134_v35  ;;  %v2171_v42 = vpop.permute.xlu1 %2170  ;;  %v2909_v52 = vadd.f32 %v2175_v26, %v5281_v17  ;;  %v4044_v8 = vmax.f32 %v4042_v30, %v4043_v59  ;;  %v4127_v33 = vrot.slane %v4126_v0, 2 }
 0x46e   :  { %v2908_v62 = vadd.f32 %v2171_v42, %v5233_v37  ;;  %2322 = vbcast.lane.b32.xlu0 %v7951_v4, 312  ;;  %v4106_v4 = vrot.slane %v4105_v45, 2  ;;  %v4025_v15 = vmax.f32 %v4023_v23, %v4024_v41  ;;  %v4066_v30 = vrot.slane %v4065_v49, 1 }
 0x46f   :  { %v4137_v1 = vmax.f32 %v4135_v21, %v4136_v9  ;;  %2419 = vbcast.lane.b32.xlu1 %v7954_v46, 296  ;;  %v4140_v22 = vsel %vm70_vm0, %v2909_v52, -inf  ;;  %v4045_v28 = vrot.slane %v4044_v8, 1  ;;  %v4128_v47 = vmax.f32 %v4126_v0, %v4127_v33 }
 0x470   :  { %v4138_v55 = vsel %vm70_vm0, %v2908_v62, -inf  ;;  %v2183_v5 = vpop.permute.xlu0 %2182  ;;  %v4107_v29 = vmax.f32 %v4105_v45, %v4106_v4  ;;  %v4087_v21 = vrot.slane %v4086_v27, 1  ;;  %v4004_v48 = vmax.f32 %v4002_v31, %v4003_v50 }
 0x471   :  { %v4139_v39 = vmax.f32 %v4137_v1, %v4138_v55  ;;  %v2179_v18 = vpop.permute.xlu1 %2178  ;;  %v2911_v13 = vadd.f32 %v5254_v32, %v2183_v5  ;;  %v4046_v52 = vmax.f32 %v4044_v8, %v4045_v28  ;;  %v4129_v62 = vrot.slane %v4128_v47, 1 }
 0x472   :  { %v2910_v61 = vadd.f32 %v5216_v3, %v2179_v18  ;;  %2454 = vbcast.lane.b32.xlu0 %v7955_v63, 296  ;;  %v4108_v9 = vrot.slane %v4107_v29, 1  ;;  %v4435_v45 = vsel %vm4386_vm9, %v4025_v15, %v4004_v48  ;;  %v4067_v1 = vmax.f32 %v4065_v49, %v4066_v30  ;;  %v7579_v15 = vld [vmem:[%s7796_s5] ss:$0 sm:$0xff] }
 0x473   :  { %v4141_v14 = vmax.f32 %v4139_v39, %v4140_v22  ;;  %2388 = vbcast.lane.b32.xlu1 %v7953_v57, 304  ;;  %v4144_v43 = vsel %vm70_vm0, %v2911_v13, -inf  ;;  %v4088_v2 = vmax.f32 %v4086_v27, %v4087_v21  ;;  %v4436_v13 = vsel %vm4388_vm10, %v4046_v52, %v4435_v45  ;;  %v7589_v48 = vld [vmem:[%s7797_s6] ss:$0 sm:$0xff] }
 0x474   :  { %v4142_v36 = vsel %vm70_vm0, %v2910_v61, -inf  ;;  %v2194_v6 = vpop.permute.xlu0 %2193  ;;  %v4109_v24 = vmax.f32 %v4107_v29, %v4108_v9  ;;  %v4130_v61 = vmax.f32 %v4128_v47, %v4129_v62  ;;  %v4437_v4 = vsel %vm4390_vm11, %v4067_v1, %v4436_v13  ;;  %v7598_v45 = vld [vmem:[%s7798_s7] ss:$0 sm:$0xff] }
 0x475   :  { %v4143_v38 = vmax.f32 %v4141_v14, %v4142_v36  ;;  %v2190_v34 = vpop.permute.xlu1 %2189  ;;  %v2913_v51 = vadd.f32 %v2194_v6, %v5206_v7  ;;  %v4438_v41 = vsel %vm4392_vm12, %v4088_v2, %v4437_v4  ;;  %v4678_v2 = vld [vmem:[%s7794_s1 + $0x30] sm:$0xff] }
 0x476   :  { %v2912_v40 = vadd.f32 %v2190_v34, %v5200_v10  ;;  %2423 = vbcast.lane.b32.xlu0 %v7954_v46, 304 }
 0x477   :  { %v4145_v53 = vmax.f32 %v4143_v38, %v4144_v43  ;;  %2357 = vbcast.lane.b32.xlu1 %v7952_v44, 312  ;;  %v4153_v12 = vsel %vm70_vm0, %v2913_v51, -inf }
 0x478   :  { %v4152_v16 = vsel %vm70_vm0, %v2912_v40, -inf  ;;  %v2202_v25 = vpop.permute.xlu0 %2201 }
 0x479   :  { %v4146_v20 = vrot.slane %v4145_v53, 4  ;;  %v4154_v35 = vmax.f32 %v4152_v16, %v4153_v12  ;;  %v2198_v56 = vpop.permute.xlu1 %2197  ;;  %v2915_v26 = vadd.f32 %v5204_v54, %v2202_v25 }
 0x47a   :  { %v2914_v42 = vadd.f32 %v5196_v19, %v2198_v56  ;;  %2458 = vbcast.lane.b32.xlu0 %v7955_v63, 304 }
 0x47b   :  { %v4147_v44 = vmax.f32 %v4145_v53, %v4146_v20  ;;  %2392 = vbcast.lane.b32.xlu1 %v7953_v57, 312  ;;  %v4157_v39 = vsel %vm70_vm0, %v2915_v26, -inf }
 0x47c   :  { %v4155_v60 = vsel %vm70_vm0, %v2914_v42, -inf  ;;  %v2210_v55 = vpop.permute.xlu0 %2209 }
 0x47d   :  { %v4148_v59 = vrot.slane %v4147_v44, 2  ;;  %v4156_v0 = vmax.f32 %v4154_v35, %v4155_v60  ;;  %v2206_v23 = vpop.permute.xlu1 %2205  ;;  %v2917_v5 = vadd.f32 %v2210_v55, %v5281_v17 }
 0x47e   :  { %v2916_v18 = vadd.f32 %v2206_v23, %v5233_v37  ;;  %2462 = vbcast.lane.b32.xlu0 %v7955_v63, 312 }
 0x47f   :  { %v4149_v57 = vmax.f32 %v4147_v44, %v4148_v59  ;;  %v4158_v22 = vmax.f32 %v4156_v0, %v4157_v39  ;;  %2427 = vbcast.lane.b32.xlu1 %v7954_v46, 312  ;;  %v4161_v49 = vsel %vm70_vm0, %v2917_v5, -inf  ;;  %v4439_v46 = vsel %vm4394_vm13, %v4109_v24, %v4438_v41 }
 0x480   :  { %v4159_v31 = vsel %vm70_vm0, %v2916_v18, -inf  ;;  %v2218_v33 = vpop.permute.xlu0 %2217  ;;  %v4440_v27 = vsel %vm4396_vm14, %v4130_v61, %v4439_v46 }
 0x481   :  { %v4150_v14 = vrot.slane %v4149_v57, 1  ;;  %v4160_v8 = vmax.f32 %v4158_v22, %v4159_v31  ;;  %v2214_v36 = vpop.permute.xlu1 %2213  ;;  %v2919_v38 = vadd.f32 %v5254_v32, %v2218_v33 }
 0x482   :  { %v2918_v63 = vadd.f32 %v5216_v3, %v2214_v36 }
 0x483   :  { %v4151_v6 = vmax.f32 %v4149_v57, %v4150_v14  ;;  %v4162_v34 = vmax.f32 %v4160_v8, %v4161_v49  ;;  %v4165_v28 = vsel %vm70_vm0, %v2919_v38, -inf }
 0x484   :  { %v4163_v43 = vsel %vm70_vm0, %v2918_v63, -inf  ;;  %v2229_v50 = vpop.permute.xlu0 %2228 }
 0x485   :  { %v4441_v51 = vsel %vm4398_vm15, %v4151_v6, %v4440_v27  ;;  %v4164_v40 = vmax.f32 %v4162_v34, %v4163_v43  ;;  %v2225_v29 = vpop.permute.xlu1 %2224  ;;  %v2921_v47 = vadd.f32 %v2229_v50, %v5206_v7 }
 0x486   :  { %v4528_v53 = vadd.f32 %v6879_v11, %v4441_v51  ;;  %v2920_v12 = vadd.f32 %v2225_v29, %v5200_v10 }
 0x487   :  { %v7574_v16 = vmax.f32 %v4164_v40, %v4165_v28  ;;  %v4174_v20 = vsel %vm70_vm0, %v2921_v47, -inf }
 0x488   :  { %v4547_v30 = vadd.f32 %v7579_v15, %v4528_v53  ;;  %v4173_v35 = vsel %vm70_vm0, %v2920_v12, -inf  ;;  %v2237_v25 = vpop.permute.xlu0 %2236 }
 0x489   :  { %v4175_v11 = vmax.f32 %v4173_v35, %v4174_v20  ;;  %v2233_v56 = vpop.permute.xlu1 %2232  ;;  %v2923_v26 = vadd.f32 %v5204_v54, %v2237_v25 }
 0x48a   :  { %v4555_v21 = vmax.f32 %v4547_v30, 0.0  ;;  %v2922_v42 = vadd.f32 %v5196_v19, %v2233_v56 }
 0x48b   :  { %v7602_v59 = vsel %vm70_vm0, %v2923_v26, -inf }
 0x48c   :  { %v4570_v9 = vmul.f32 %v7589_v48, %v4555_v21  ;;  %v4176_v44 = vsel %vm70_vm0, %v2922_v42, -inf  ;;  %v2264_v62 = vpop.permute.xlu0 %2263 }
 0x48d   :  { %v7593_v52 = vmax.f32 %v4175_v11, %v4176_v44  ;;  %v2260_v60 = vpop.permute.xlu1 %2259  ;;  %v2929_v0 = vadd.f32 %v2264_v62, %v5206_v7 }
 0x48e   :  { %v4585_v1 = vadd.f32 %v7598_v45, %v4570_v9  ;;  %v2928_v55 = vadd.f32 %v2260_v60, %v5200_v10 }
 0x48f   :  { %v4179_v23 = vmax.f32 %v7593_v52, %v7602_v59  ;;  %v4195_v5 = vsel %vm70_vm0, %v2929_v0, -inf }
 0x490   :  { %v4593_v39 = vadd.f32 %v4678_v2, %v4585_v1  ;;  %v4194_v18 = vsel %vm70_vm0, %v2928_v55, -inf  ;;  %v2299_v57 = vpop.permute.xlu0 %2298 }
 0x491   :  { %v4196_v24 = vmax.f32 %v4194_v18, %v4195_v5  ;;  %v2295_v22 = vpop.permute.xlu1 %2294  ;;  %v2937_v13 = vadd.f32 %v2299_v57, %v5206_v7 }
 0x492   :  { %4601 = vst.msk [vmem:[%s7799_s8 + $0x30] sm:$0xff] %vm70_vm0, %v4593_v39  ;;  %v2936_v61 = vadd.f32 %v2295_v22, %v5200_v10 }
 0x493   :  { %v4216_v31 = vsel %vm70_vm0, %v2937_v13, -inf }
 0x494   :  { %v4215_v4 = vsel %vm70_vm0, %v2936_v61, -inf  ;;  %v2330_v8 = vpop.permute.xlu0 %2329  ;;  %v4167_v61 = vrot.slane %v7574_v16, 4 }
 0x495   :  { %v4217_v14 = vmax.f32 %v4215_v4, %v4216_v31  ;;  %v2268_v33 = vpop.permute.xlu1 %2267  ;;  %v2944_v41 = vadd.f32 %v2330_v8, %v5200_v10 }
 0x496   :  { %v2930_v36 = vadd.f32 %v5196_v19, %v2268_v33 }
 0x497   :  { %v4236_v27 = vsel %vm70_vm0, %v2944_v41, -inf }
 0x498   :  { %v4197_v49 = vsel %vm70_vm0, %v2930_v36, -inf  ;;  %v2303_v63 = vpop.permute.xlu0 %2302 }
 0x499   :  { %v7624_v38 = vmax.f32 %v4196_v24, %v4197_v49  ;;  %v2334_v46 = vpop.permute.xlu1 %2333  ;;  %v2938_v6 = vadd.f32 %v5196_v19, %v2303_v63 }
 0x49a   :  { %v2945_v34 = vadd.f32 %v2334_v46, %v5206_v7 }
 0x49b   :  { %v4218_v43 = vsel %vm70_vm0, %v2938_v6, -inf }
 0x49c   :  { %v4237_v51 = vsel %vm70_vm0, %v2945_v34, -inf  ;;  %v7631_v40 = vmax.f32 %v4217_v14, %v4218_v43  ;;  %v2369_v29 = vpop.permute.xlu0 %2368  ;;  %v4168_v14 = vmax.f32 %v7574_v16, %v4167_v61 }
 0x49d   :  { %v4238_v50 = vmax.f32 %v4236_v27, %v4237_v51  ;;  %v2365_v53 = vpop.permute.xlu1 %2364  ;;  %v2953_v28 = vadd.f32 %v2369_v29, %v5206_v7 }
 0x49e   :  { %v2952_v47 = vadd.f32 %v2365_v53, %v5200_v10  ;;  %v4169_v36 = vrot.slane %v4168_v14, 2 }
 0x49f   :  { %v7636_v12 = vsel %vm70_vm0, %v2953_v28, -inf }
 0x4a0   :  { %v7639_v30 = vsel %vm70_vm0, %v2952_v47, -inf  ;;  %v2338_v35 = vpop.permute.xlu0 %2337  ;;  %v4170_v63 = vmax.f32 %v4168_v14, %v4169_v36 }
 0x4a1   :  { %v4259_v20 = vmax.f32 %v7639_v30, %v7636_v12  ;;  %v2272_v11 = vpop.permute.xlu1 %2271  ;;  %v2946_v25 = vadd.f32 %v5196_v19, %v2338_v35 }
 0x4a2   :  { %v2931_v56 = vadd.f32 %v5204_v54, %v2272_v11 }
 0x4a3   :  { %v4239_v21 = vsel %vm70_vm0, %v2946_v25, -inf }
 0x4a4   :  { %v7647_v26 = vsel %vm70_vm0, %v2931_v56, -inf  ;;  %v7649_v42 = vmax.f32 %v4238_v50, %v4239_v21  ;;  %v2404_v44 = vpop.permute.xlu0 %2403  ;;  %v4171_v50 = vrot.slane %v4170_v63, 1 }
 0x4a5   :  { %v4200_v9 = vmax.f32 %v7624_v38, %v7647_v26  ;;  %v2400_v62 = vpop.permute.xlu1 %2399  ;;  %v2961_v27 = vadd.f32 %v2404_v44, %v5206_v7 }
 0x4a6   :  { %v2960_v43 = vadd.f32 %v2400_v62, %v5200_v10 }
 0x4a7   :  { %v4279_v35 = vsel %vm70_vm0, %v2961_v27, -inf }
 0x4a8   :  { %v2307_v60 = vpop.permute.xlu0 %2306  ;;  %v4278_v11 = vsel %vm70_vm0, %v2960_v43, -inf }
 0x4a9   :  { %v2241_v1 = vpop.permute.xlu1 %2240  ;;  %v2939_v16 = vadd.f32 %v5204_v54, %v2307_v60  ;;  %v4280_v14 = vmax.f32 %v4278_v11, %v4279_v35 }
 0x4aa   :  { %v2924_v46 = vadd.f32 %v2241_v1, %v5233_v37  ;;  %v7684_v1 = vmax.f32 %v4170_v63, %v4171_v50 }
 0x4ab   :  { %v4220_v21 = vsel %vm70_vm0, %v2939_v16, -inf }
 0x4ac   :  { %v2435_v0 = vpop.permute.xlu0 %2434  ;;  %v4180_v29 = vsel %vm70_vm0, %v2924_v46, -inf  ;;  %v4221_v52 = vmax.f32 %v7631_v40, %v4220_v21 }
 0x4ad   :  { %v2373_v55 = vpop.permute.xlu1 %2372  ;;  %v4181_v44 = vmax.f32 %v4179_v23, %v4180_v29 }
 0x4ae   :  { %v2954_v25 = vadd.f32 %v5196_v19, %v2373_v55  ;;  %v2968_v55 = vadd.f32 %v2435_v0, %v5200_v10 }
 0x4b0   :  { %v2276_v2 = vpop.permute.xlu0 %2275  ;;  %v4260_v59 = vsel %vm70_vm0, %v2954_v25, -inf  ;;  %v4299_v43 = vsel %vm70_vm0, %v2968_v55, -inf }
 0x4b1   :  { %v2439_v39 = vpop.permute.xlu1 %2438  ;;  %v2932_v62 = vadd.f32 %v2276_v2, %v5233_v37 }
 0x4b2   :  { %v2969_v60 = vadd.f32 %v2439_v39, %v5206_v7 }
 0x4b3   :  { %v4201_v2 = vsel %vm70_vm0, %v2932_v62, -inf }
 0x4b4   :  { %v2408_v5 = vpop.permute.xlu0 %2407  ;;  %v4300_v39 = vsel %vm70_vm0, %v2969_v60, -inf }
 0x4b5   :  { %v2342_v18 = vpop.permute.xlu1 %2341 }
 0x4b8   :  { %v2311_v24 = vpop.permute.xlu0 %2310 }
 0x4b9   :  { %v2245_v57 = vpop.permute.xlu1 %2244 }
 0x4ba   :  { %v2925_v51 = vadd.f32 %v2245_v57, %v5281_v17  ;;  %v2962_v57 = vadd.f32 %v5196_v19, %v2408_v5  ;;  %v2940_v5 = vadd.f32 %v2311_v24, %v5233_v37  ;;  %v7707_v24 = vmax.f32 %v4259_v20, %v4260_v59 }
 0x4bc   :  { %v2443_v22 = vpop.permute.xlu0 %2442  ;;  %v4182_v56 = vsel %vm70_vm0, %v2925_v51, -inf  ;;  %v4281_v0 = vsel %vm70_vm0, %v2962_v57, -inf }
 0x4bd   :  { %v2377_v13 = vpop.permute.xlu1 %2376  ;;  %v4183_v36 = vmax.f32 %v4181_v44, %v4182_v56  ;;  %v7714_v35 = vmax.f32 %v4280_v14, %v4281_v0 }
 0x4be   :  { %v2955_v51 = vadd.f32 %v5204_v54, %v2377_v13  ;;  %v4222_v13 = vsel %vm70_vm0, %v2940_v5, -inf }
 0x4bf   :  { %v4223_v44 = vmax.f32 %v4221_v52, %v4222_v13 }
 0x4c0   :  { %v7654_v31 = vpop.permute.xlu0 %2345  ;;  %v4262_v38 = vsel %vm70_vm0, %v2955_v51, -inf }
 0x4c1   :  { %v2280_v4 = vpop.permute.xlu1 %2279  ;;  %v2948_v26 = vadd.f32 %v7654_v31, %v5233_v37  ;;  %v4263_v31 = vmax.f32 %v7707_v24, %v4262_v38 }
 0x4c2   :  { %v2933_v7 = vadd.f32 %v2280_v4, %v5281_v17 }
 0x4c4   :  { %v2249_v8 = vpop.permute.xlu0 %2248 }
 0x4c5   :  { %v7657_v33 = vpop.permute.xlu1 %2411  ;;  %v2926_v53 = vadd.f32 %v5216_v3, %v2249_v8  ;;  %v2947_v8 = vadd.f32 %v5204_v54, %v2342_v18  ;;  %v2970_v18 = vadd.f32 %v5196_v19, %v2443_v22  ;;  %v4202_v19 = vmax.f32 %v4200_v9, %v4201_v2 }
 0x4c6   :  { %v4203_v22 = vsel %vm70_vm0, %v2933_v7, -inf  ;;  %v2963_v62 = vadd.f32 %v5204_v54, %v7657_v33  ;;  %v4243_v33 = vsel %vm70_vm0, %v2948_v26, -inf }
 0x4c7   :  { %v4184_v61 = vsel %vm70_vm0, %v2926_v53, -inf  ;;  %v4241_v4 = vsel %vm70_vm0, %v2947_v8, -inf  ;;  %v4301_v53 = vmax.f32 %v4299_v43, %v4300_v39  ;;  %v4302_v12 = vsel %vm70_vm0, %v2970_v18, -inf }
 0x4c8   :  { %v7659_v41 = vpop.permute.xlu0 %2380  ;;  %v4185_v10 = vmax.f32 %v4183_v36, %v4184_v61  ;;  %v4242_v25 = vmax.f32 %v7649_v42, %v4241_v4  ;;  %v4204_v9 = vmax.f32 %v4202_v19, %v4203_v22 }
 0x4c9   :  { %v2315_v49 = vpop.permute.xlu1 %2314  ;;  %v4303_v57 = vmax.f32 %v4301_v53, %v4302_v12  ;;  %v2956_v61 = vadd.f32 %v7659_v41, %v5233_v37  ;;  %v4283_v41 = vsel %vm70_vm0, %v2963_v62, -inf }
 0x4ca   :  { %v4244_v22 = vmax.f32 %v4242_v25, %v4243_v33 }
 0x4cb   :  { %v4264_v5 = vsel %vm70_vm0, %v2956_v61, -inf }
 0x4cc   :  { %v2284_v6 = vpop.permute.xlu0 %2283  ;;  %v4265_v12 = vmax.f32 %v4263_v31, %v4264_v5 }
 0x4cd   :  { %v7662_v34 = vpop.permute.xlu1 %2446  ;;  %v2934_v63 = vadd.f32 %v5216_v3, %v2284_v6  ;;  %v2941_v6 = vadd.f32 %v2315_v49, %v5281_v17 }
 0x4ce   :  { %v2971_v2 = vadd.f32 %v5204_v54, %v7662_v34 }
 0x4cf   :  { %v4205_v30 = vsel %vm70_vm0, %v2934_v63, -inf  ;;  %v4224_v42 = vsel %vm70_vm0, %v2941_v6, -inf  ;;  %v4284_v6 = vmax.f32 %v7714_v35, %v4283_v41 }
 0x4d0   :  { %v7670_v28 = vpop.permute.xlu0 %2415  ;;  %v4206_v14 = vmax.f32 %v4204_v9, %v4205_v30  ;;  %v4304_v53 = vsel %vm70_vm0, %v2971_v2, -inf }
 0x4d1   :  { %v7672_v47 = vpop.permute.xlu1 %2349  ;;  %v2964_v63 = vadd.f32 %v7670_v28, %v5233_v37 }
 0x4d2   :  { %v2949_v8 = vadd.f32 %v7672_v47, %v5281_v17 }
 0x4d4   :  { %v2319_v46 = vpop.permute.xlu0 %2318 }
 0x4d5   :  { %v2253_v27 = vpop.permute.xlu1 %2252  ;;  %v2942_v20 = vadd.f32 %v5216_v3, %v2319_v46 }
 0x4d6   :  { %v2927_v23 = vadd.f32 %v5254_v32, %v2253_v27  ;;  %v4225_v27 = vmax.f32 %v4223_v44, %v4224_v42 }
 0x4d7   :  { %v4226_v36 = vsel %vm70_vm0, %v2942_v20, -inf }
 0x4d8   :  { %v4186_v40 = vsel %vm70_vm0, %v2927_v23, -inf  ;;  %v2451_v50 = vpop.permute.xlu0 %2450 }
 0x4d9   :  { %v4187_v16 = vmax.f32 %v4185_v10, %v4186_v40  ;;  %v2385_v29 = vpop.permute.xlu1 %2384  ;;  %v4227_v10 = vmax.f32 %v4225_v27, %v4226_v36  ;;  %v4245_v40 = vsel %vm70_vm0, %v2949_v8, -inf  ;;  %v2972_v43 = vadd.f32 %v2451_v50, %v5233_v37 }
 0x4da   :  { %v2957_v54 = vadd.f32 %v2385_v29, %v5281_v17  ;;  %v4285_v29 = vsel %vm70_vm0, %v2964_v63, -inf  ;;  %v4246_v30 = vmax.f32 %v4244_v22, %v4245_v40 }
 0x4db   :  { %v4188_v11 = vrot.slane %v4187_v16, 4  ;;  %v4306_v20 = vsel %vm70_vm0, %v2972_v43, -inf }
 0x4dc   :  { %v2354_v56 = vpop.permute.xlu0 %2353  ;;  %v4266_v25 = vsel %vm70_vm0, %v2957_v54, -inf }
 0x4dd   :  { %v4189_v49 = vmax.f32 %v4187_v16, %v4188_v11  ;;  %v2288_v21 = vpop.permute.xlu1 %2287  ;;  %v2950_v39 = vadd.f32 %v5216_v3, %v2354_v56  ;;  %v4305_v56 = vmax.f32 %v4303_v57, %v4304_v53  ;;  %v4267_v31 = vmax.f32 %v4265_v12, %v4266_v25 }
 0x4de   :  { %v2935_v60 = vadd.f32 %v5254_v32, %v2288_v21 }
 0x4df   :  { %v4190_v55 = vrot.slane %v4189_v49, 2  ;;  %v4247_v28 = vsel %vm70_vm0, %v2950_v39, -inf }
 0x4e0   :  { %v4207_v46 = vsel %vm70_vm0, %v2935_v60, -inf  ;;  %v2323_v7 = vpop.permute.xlu0 %2322 }
 0x4e1   :  { %v4191_v52 = vmax.f32 %v4189_v49, %v4190_v55  ;;  %v4208_v59 = vmax.f32 %v4206_v14, %v4207_v46  ;;  %v2420_v23 = vpop.permute.xlu1 %2419  ;;  %v2943_v47 = vadd.f32 %v5254_v32, %v2323_v7  ;;  %v4286_v14 = vmax.f32 %v4284_v6, %v4285_v29 }
 0x4e2   :  { %v2965_v26 = vadd.f32 %v2420_v23, %v5281_v17  ;;  %v4307_v55 = vmax.f32 %v4305_v56, %v4306_v20 }
 0x4e3   :  { %v4192_v0 = vrot.slane %v4191_v52, 1  ;;  %v4209_v18 = vrot.slane %v4208_v59, 4  ;;  %v4228_v4 = vsel %vm70_vm0, %v2943_v47, -inf }
 0x4e4   :  { %v4229_v16 = vmax.f32 %v4227_v10, %v4228_v4  ;;  %v2455_v24 = vpop.permute.xlu0 %2454  ;;  %v4287_v57 = vsel %vm70_vm0, %v2965_v26, -inf }
 0x4e5   :  { %v4193_v51 = vmax.f32 %v4191_v52, %v4192_v0  ;;  %v4210_v34 = vmax.f32 %v4208_v59, %v4209_v18  ;;  %v2389_v19 = vpop.permute.xlu1 %2388  ;;  %v2973_v21 = vadd.f32 %v2455_v24, %v5281_v17  ;;  %v4288_v5 = vmax.f32 %v4286_v14, %v4287_v57 }
 0x4e6   :  { %v4230_v50 = vrot.slane %v4229_v16, 4  ;;  %v2958_v11 = vadd.f32 %v5216_v3, %v2389_v19 }
 0x4e7   :  { %v4442_v13 = vsel %vm4386_vm9, %v4193_v51, %v7684_v1  ;;  %v4211_v37 = vrot.slane %v4210_v34, 2  ;;  %v4248_v1 = vmax.f32 %v4246_v30, %v4247_v28  ;;  %v4308_v52 = vsel %vm70_vm0, %v2973_v21, -inf }
 0x4e8   :  { %v4231_v38 = vmax.f32 %v4229_v16, %v4230_v50  ;;  %v2424_v9 = vpop.permute.xlu0 %2423  ;;  %v4268_v60 = vsel %vm70_vm0, %v2958_v11, -inf  ;;  %v4309_v63 = vmax.f32 %v4307_v55, %v4308_v52 }
 0x4e9   :  { %v4212_v35 = vmax.f32 %v4210_v34, %v4211_v37  ;;  %v2358_v49 = vpop.permute.xlu1 %2357  ;;  %v2966_v61 = vadd.f32 %v5216_v3, %v2424_v9  ;;  %v4269_v59 = vmax.f32 %v4267_v31, %v4268_v60 }
 0x4ea   :  { %v2951_v44 = vadd.f32 %v5254_v32, %v2358_v49  ;;  %v4232_v42 = vrot.slane %v4231_v38, 2 }
 0x4eb   :  { %v4213_v62 = vrot.slane %v4212_v35, 1  ;;  %v4289_v39 = vsel %vm70_vm0, %v2966_v61, -inf }
 0x4ec   :  { %v4249_v8 = vsel %vm70_vm0, %v2951_v44, -inf  ;;  %v4233_v46 = vmax.f32 %v4231_v38, %v4232_v42  ;;  %v2459_v27 = vpop.permute.xlu0 %2458 }
 0x4ed   :  { %v4214_v36 = vmax.f32 %v4212_v35, %v4213_v62  ;;  %v4250_v33 = vmax.f32 %v4248_v1, %v4249_v8  ;;  %v2393_v17 = vpop.permute.xlu1 %2392  ;;  %v2974_v7 = vadd.f32 %v5216_v3, %v2459_v27  ;;  %v4290_v3 = vmax.f32 %v4288_v5, %v4289_v39 }
 0x4ee   :  { %v2959_v23 = vadd.f32 %v5254_v32, %v2393_v17  ;;  %v4234_v2 = vrot.slane %v4233_v46, 1 }
 0x4ef   :  { %v4443_v41 = vsel %vm4388_vm10, %v4214_v36, %v4442_v13  ;;  %v4251_v47 = vrot.slane %v4250_v33, 4  ;;  %v4310_v10 = vsel %vm70_vm0, %v2974_v7, -inf }
 0x4f0   :  { %v4270_v0 = vsel %vm70_vm0, %v2959_v23, -inf  ;;  %v4235_v18 = vmax.f32 %v4233_v46, %v4234_v2  ;;  %v2463_v4 = vpop.permute.xlu0 %2462  ;;  %v4311_v19 = vmax.f32 %v4309_v63, %v4310_v10 }
 0x4f1   :  { %v4252_v40 = vmax.f32 %v4250_v33, %v4251_v47  ;;  %v4271_v43 = vmax.f32 %v4269_v59, %v4270_v0  ;;  %v2428_v51 = vpop.permute.xlu1 %2427  ;;  %v2975_v54 = vadd.f32 %v5254_v32, %v2463_v4  ;;  %v4679_v33 = vld [vmem:[%s7794_s1 + $0x38] sm:$0xff] }
 0x4f2   :  { %v2967_v34 = vadd.f32 %v5254_v32, %v2428_v51  ;;  %v4444_v16 = vsel %vm4390_vm11, %v4235_v18, %v4443_v41 }
 0x4f3   :  { %v4253_v24 = vrot.slane %v4252_v40, 2  ;;  %v4272_v22 = vrot.slane %v4271_v43, 4  ;;  %v4312_v6 = vsel %vm70_vm0, %v2975_v54, -inf }
 0x4f4   :  { %v4291_v53 = vsel %vm70_vm0, %v2967_v34, -inf  ;;  %v4313_v37 = vmax.f32 %v4311_v19, %v4312_v6 }
 0x4f5   :  { %v4254_v28 = vmax.f32 %v4252_v40, %v4253_v24  ;;  %v4273_v13 = vmax.f32 %v4271_v43, %v4272_v22  ;;  %v4292_v50 = vmax.f32 %v4290_v3, %v4291_v53 }
 0x4f6   :  { %v4314_v29 = vrot.slane %v4313_v37, 4 }
 0x4f7   :  { %v4255_v11 = vrot.slane %v4254_v28, 1  ;;  %v4274_v12 = vrot.slane %v4273_v13, 2  ;;  %v4293_v30 = vrot.slane %v4292_v50, 4 }
 0x4f8   :  { %v4315_v32 = vmax.f32 %v4313_v37, %v4314_v29 }
 0x4f9   :  { %v4256_v20 = vmax.f32 %v4254_v28, %v4255_v11  ;;  %v4275_v25 = vmax.f32 %v4273_v13, %v4274_v12  ;;  %v4294_v35 = vmax.f32 %v4292_v50, %v4293_v30 }
 0x4fa   :  { %v4316_v9 = vrot.slane %v4315_v32, 2 }
 0x4fb   :  { %v4445_v38 = vsel %vm4392_vm12, %v4256_v20, %v4444_v16  ;;  %v4276_v26 = vrot.slane %v4275_v25, 1  ;;  %v4295_v49 = vrot.slane %v4294_v35, 2 }
 0x4fc   :  { %v4317_v1 = vmax.f32 %v4315_v32, %v4316_v9 }
 0x4fd   :  { %v4277_v56 = vmax.f32 %v4275_v25, %v4276_v26  ;;  %v4296_v21 = vmax.f32 %v4294_v35, %v4295_v49 }
 0x4fe   :  { %v4318_v62 = vrot.slane %v4317_v1, 1 }
 0x4ff   :  { %v4446_v44 = vsel %vm4394_vm13, %v4277_v56, %v4445_v38  ;;  %v4297_v42 = vrot.slane %v4296_v21, 1 }
 0x500   :  { %v4319_v60 = vmax.f32 %v4317_v1, %v4318_v62 }
 0x501   :  { %v4298_v61 = vmax.f32 %v4296_v21, %v4297_v42 }
 0x503   :  { %v4447_v14 = vsel %vm4396_vm14, %v4298_v61, %v4446_v44 }
 0x504   :  { %v4448_v55 = vsel %vm4398_vm15, %v4319_v60, %v4447_v14 }
 0x505   :  { %v4531_v31 = vadd.f32 %v7228_v58, %v4448_v55 }
 0x507   :  { %v4548_v8 = vadd.f32 %v7579_v15, %v4531_v31 }
 0x509   :  { %v4556_v36 = vmax.f32 %v4548_v8, 0.0 }
 0x50b   :  { %v4571_v46 = vmul.f32 %v7589_v48, %v4556_v36 }
 0x50d   :  { %v4586_v57 = vadd.f32 %v7598_v45, %v4571_v46 }
 0x50f   :  { %v4594_v27 = vadd.f32 %v4679_v33, %v4586_v57 }
 0x511   :  { %4602 = vst.msk [vmem:[%s7799_s8 + $0x38] sm:$0xff] %vm70_vm0, %v4594_v27 }

</bundles_post_ra>
